<compile_context>
chip_gen: v6e
topology: v6e:2x2x1
jax: 0.10.0
libtpu: 0.0.40
codegen_flags: <defaults>
</compile_context>

<pallas_src>
import jax
import jax.numpy as jnp
from jax.experimental import pallas as pl
from jax.experimental.pallas import tpu as pltpu


# ---------------------------------------------------------------------------
# Kernel 1: fused (im2col-matmul) conv + BatchNorm(affine) + ReLU
# ---------------------------------------------------------------------------
def _conv_bn_relu_kernel(p_ref, w_ref, scale_ref, shift_ref, o_ref):
    acc = jnp.dot(p_ref[...], w_ref[...], preferred_element_type=jnp.float32)
    y = acc * scale_ref[...] + shift_ref[...]
    o_ref[...] = jnp.maximum(y, 0.0).astype(o_ref.dtype)


def conv_bn_relu(patches, w_flat, scale, shift):
    """patches: (M, K) bf16, w_flat: (K, Cout) bf16, scale/shift: (1, Cout) f32.

    Returns (M, Cout) bf16.  Uses a 1- or 2-step grid (2 steps -> both v7x
    TensorCores get a half-M tile; on v5e/v6e the extra step is negligible).
    """
    M, K = patches.shape
    Cout = w_flat.shape[1]
    if M >= 256 and (M // 2) % 8 == 0:
        tm, grid = M // 2, (2,)
    else:
        tm, grid = M, (1,)
    return pl.pallas_call(
        _conv_bn_relu_kernel,
        out_shape=jax.ShapeDtypeStruct((M, Cout), jnp.bfloat16),
        grid=grid,
        in_specs=[
            pl.BlockSpec((tm, K), lambda i: (i, 0)),
            pl.BlockSpec((K, Cout), lambda i: (0, 0)),
            pl.BlockSpec((1, Cout), lambda i: (0, 0)),
            pl.BlockSpec((1, Cout), lambda i: (0, 0)),
        ],
        out_specs=pl.BlockSpec((tm, Cout), lambda i: (i, 0)),
        compiler_params=pltpu.CompilerParams(
            dimension_semantics=("parallel",)),
    )(patches, w_flat, scale, shift)


# ---------------------------------------------------------------------------
# Kernel 2: fused last conv + BN + ReLU + avg_pool2d(4) + Linear head
# ---------------------------------------------------------------------------
def _conv_head_kernel(p_ref, w_ref, scale_ref, shift_ref, lw_ref, lb_ref, o_ref):
    acc = jnp.dot(p_ref[...], w_ref[...], preferred_element_type=jnp.float32)
    y = jnp.maximum(acc * scale_ref[...] + shift_ref[...], 0.0)     # (M, C) f32
    n = o_ref.shape[0]
    m, c = y.shape
    pooled = jnp.mean(y.reshape(n, m // n, c), axis=1)              # (N, C)
    o_ref[...] = (jnp.dot(pooled, lw_ref[...],
                          preferred_element_type=jnp.float32)
                  + lb_ref[...]).astype(o_ref.dtype)


def conv_bn_relu_pool_linear(patches, w_flat, scale, shift, lin_w, lin_b, n):
    """patches: (N*16, K) bf16; lin_w: (C, 128-padded classes) f32 -> (N, 128)."""
    num_out = lin_w.shape[1]
    return pl.pallas_call(
        _conv_head_kernel,
        out_shape=jax.ShapeDtypeStruct((n, num_out), jnp.float32),
        in_specs=[pl.BlockSpec(memory_space=pltpu.MemorySpace.VMEM)] * 6,
        out_specs=pl.BlockSpec(memory_space=pltpu.MemorySpace.VMEM),
    )(patches, w_flat, scale, shift, lin_w, lin_b)


# ---------------------------------------------------------------------------
# Plain-JAX glue: im2col for 3x3 / pad 1 / stride s convs (NHWC, bf16)
# ---------------------------------------------------------------------------
def im2col_3x3(x, stride):
    N, H, W, C = x.shape
    Ho = (H + 2 - 3) // stride + 1
    Wo = (W + 2 - 3) // stride + 1
    xp = jnp.pad(x, ((0, 0), (1, 1), (1, 1), (0, 0)))
    cols = []
    for kh in range(3):
        for kw in range(3):
            cols.append(xp[:, kh:kh + stride * (Ho - 1) + 1:stride,
                              kw:kw + stride * (Wo - 1) + 1:stride, :])
    p = jnp.stack(cols, axis=3)                   # (N, Ho, Wo, 9, C)
    return p.reshape(N * Ho * Wo, 9 * C), (N, Ho, Wo)


# ---------------------------------------------------------------------------
# Model definition (deterministic synthetic parameters)
# ---------------------------------------------------------------------------
CONV_CFG = [(3, 64, 1), (64, 64, 2), (64, 128, 1),
            (128, 128, 2), (128, 256, 1), (256, 256, 2)]
STRIDES = tuple(s for (_, _, s) in CONV_CFG)
COUTS = tuple(c for (_, c, _) in CONV_CFG)
# Cout<128 layers use the block-diagonal 2-row packing -> 128-lane output.
PACK = tuple(c < 128 for c in COUTS)
LAST = len(CONV_CFG) - 1
NUM_CLASSES = 10
PAD_CLASSES = 128          # lane-dense logits block; sliced back to 10
BN_EPS = 1e-5


def init_params(key):
    conv_params = []
    for li, (cin, cout, _stride) in enumerate(CONV_CFG):
        key, kw, kg, kb, km, kv = jax.random.split(key, 6)
        fan_in = 9 * cin
        w = jax.random.normal(kw, (3, 3, cin, cout), jnp.float32) * (2.0 / fan_in) ** 0.5
        gamma = 1.0 + 0.1 * jax.random.normal(kg, (cout,), jnp.float32)
        beta = 0.1 * jax.random.normal(kb, (cout,), jnp.float32)
        rmean = 0.1 * jax.random.normal(km, (cout,), jnp.float32)
        rvar = 1.0 + jax.random.uniform(kv, (cout,), jnp.float32)
        # eval-mode BatchNorm folded to an affine transform (kept in f32)
        scale = gamma / jnp.sqrt(rvar + BN_EPS)
        shift = beta - rmean * scale
        w_flat = w.reshape(9 * cin, cout)
        scale = scale.reshape(1, cout)
        shift = shift.reshape(1, cout)
        if PACK[li]:
            # block-diagonal weight: two consecutive pixels -> one 128-lane row
            K = 9 * cin
            wb = jnp.zeros((2 * K, 2 * cout), jnp.float32)
            wb = wb.at[:K, :cout].set(w_flat)
            wb = wb.at[K:, cout:].set(w_flat)
            w_flat = wb
            scale = jnp.concatenate([scale, scale], axis=1)
            shift = jnp.concatenate([shift, shift], axis=1)
        conv_params.append((w_flat.astype(jnp.bfloat16), scale, shift))
    key, kl, kb2 = jax.random.split(key, 3)
    lin_w = jax.random.normal(kl, (256, NUM_CLASSES), jnp.float32) * (1.0 / 256.0) ** 0.5
    lin_b = 0.1 * jax.random.normal(kb2, (1, NUM_CLASSES), jnp.float32)
    lin_w_pad = jnp.zeros((256, PAD_CLASSES), jnp.float32).at[:, :NUM_CLASSES].set(lin_w)
    lin_b_pad = jnp.zeros((1, PAD_CLASSES), jnp.float32).at[:, :NUM_CLASSES].set(lin_b)
    return conv_params, lin_w_pad, lin_b_pad


@jax.jit
def simplenet7_forward(x_nchw, conv_params, lin_w_pad, lin_b_pad):
    x = jnp.transpose(x_nchw, (0, 2, 3, 1)).astype(jnp.bfloat16)   # NCHW -> NHWC bf16
    for li in range(LAST):
        w_flat, scale, shift = conv_params[li]
        patches, (n, ho, wo) = im2col_3x3(x, STRIDES[li])
        M = patches.shape[0]
        if PACK[li]:
            patches = patches.reshape(M // 2, -1)      # free row-major reshape
        y = conv_bn_relu(patches, w_flat, scale, shift)
        if PACK[li]:
            y = y.reshape(M, COUTS[li])                # free row-major reshape
        x = y.reshape(n, ho, wo, COUTS[li])
    # last conv + BN + ReLU + avg_pool2d(4) + flatten + linear, one kernel
    w_flat, scale, shift = conv_params[LAST]
    patches, (n, _ho, _wo) = im2col_3x3(x, STRIDES[LAST])
    logits = conv_bn_relu_pool_linear(patches, w_flat, scale, shift,
                                      lin_w_pad, lin_b_pad, n)
    return logits[:, :NUM_CLASSES]


if __name__ == "__main__":
    key = jax.random.PRNGKey(0)
    kx, kp = jax.random.split(key)
    # CIFAR-sized input: spatial 32 so three stride-2 convs give 4x4 before
    # avg_pool2d(4); batch kept small.
    x = jax.random.normal(kx, (2, 3, 32, 32), jnp.float32)     # NCHW like PyTorch
    conv_params, lin_w_pad, lin_b_pad = init_params(kp)

    out = simplenet7_forward(x, conv_params, lin_w_pad, lin_b_pad)
    out = jax.block_until_ready(out)
    assert out.shape == (2, NUM_CLASSES)
    assert bool(jnp.all(jnp.isfinite(out)))
    print("KERNEL_OK")
</pallas_src>

<mosaic_0001>
module attributes {stable_mosaic.version = 11 : i64} {
  func.func @_conv_bn_relu_kernel(%arg0: i32, %arg1: memref<512x54xbf16, #tpu.memory_space<vmem>>, %arg2: memref<54x128xbf16, #tpu.memory_space<vmem>>, %arg3: memref<1x128xf32, #tpu.memory_space<vmem>>, %arg4: memref<1x128xf32, #tpu.memory_space<vmem>>, %arg5: memref<512x128xbf16, #tpu.memory_space<vmem>>) attributes {dimension_semantics = [#tpu.dimension_semantics<parallel>], iteration_bounds = array<i64: 2>, scalar_prefetch = 0 : i64, scratch_operands = 0 : i64, tpu.core_type = #tpu.core_type<tc>, window_params = [{transform_indices = @transform_0, window_bounds = array<i64: 512, 54>}, {pipeline_mode = #tpu.pipeline_mode<synchronous>, transform_indices = @transform_1, window_bounds = array<i64: 54, 128>}, {pipeline_mode = #tpu.pipeline_mode<synchronous>, transform_indices = @transform_2, window_bounds = array<i64: 1, 128>}, {pipeline_mode = #tpu.pipeline_mode<synchronous>, transform_indices = @transform_3, window_bounds = array<i64: 1, 128>}, {transform_indices = @transform_4, window_bounds = array<i64: 512, 128>}]} {
    %c0 = arith.constant 0 : index
    %c0_0 = arith.constant 0 : index
    %0 = vector.load %arg1[%c0, %c0_0] : memref<512x54xbf16, #tpu.memory_space<vmem>>, vector<512x54xbf16>
    %c0_1 = arith.constant 0 : index
    %c0_2 = arith.constant 0 : index
    %1 = vector.load %arg2[%c0_1, %c0_2] : memref<54x128xbf16, #tpu.memory_space<vmem>>, vector<54x128xbf16>
    %cst = arith.constant dense<0.000000e+00> : vector<512x128xf32>
    %2 = tpu.matmul %0, %1, %cst {dimension_numbers = #tpu.dot_dimension_numbers<[1], [0], [0], [1], [0, 0, 1, 1], [], []>} : vector<512x54xbf16>, vector<54x128xbf16>, vector<512x128xf32> -> vector<512x128xf32>
    %c0_3 = arith.constant 0 : index
    %c0_4 = arith.constant 0 : index
    %3 = vector.load %arg3[%c0_3, %c0_4] : memref<1x128xf32, #tpu.memory_space<vmem>>, vector<1x128xf32>
    %4 = vector.broadcast %3 : vector<1x128xf32> to vector<512x128xf32>
    %5 = arith.mulf %2, %4 : vector<512x128xf32>
    %c0_5 = arith.constant 0 : index
    %c0_6 = arith.constant 0 : index
    %6 = vector.load %arg4[%c0_5, %c0_6] : memref<1x128xf32, #tpu.memory_space<vmem>>, vector<1x128xf32>
    %7 = vector.broadcast %6 : vector<1x128xf32> to vector<512x128xf32>
    %8 = arith.addf %5, %7 : vector<512x128xf32>
    %cst_7 = arith.constant 0.000000e+00 : f32
    %9 = vector.broadcast %cst_7 : f32 to vector<512x128xf32>
    %10 = arith.maximumf %8, %9 : vector<512x128xf32>
    %11 = arith.truncf %10 : vector<512x128xf32> to vector<512x128xbf16>
    %c0_8 = arith.constant 0 : index
    %c0_9 = arith.constant 0 : index
    %12 = vector.load %arg5[%c0_8, %c0_9] : memref<512x128xbf16, #tpu.memory_space<vmem>>, vector<512x128xbf16>
    tpu.vector_store %arg5[%c0_8, %c0_9], %11 {strides = array<i32>} : memref<512x128xbf16, #tpu.memory_space<vmem>>, vector<512x128xbf16>,
    return
  }
  func.func @transform_0(%arg0: i32) -> (i32, i32) {
    %c0_i32 = arith.constant 0 : i32
    %c0_i32_0 = arith.constant 0 : i32
    return %arg0, %c0_i32 : i32, i32
  }
  func.func @transform_1(%arg0: i32) -> (i32, i32) {
    %c0_i32 = arith.constant 0 : i32
    %c0_i32_0 = arith.constant 0 : i32
    %c0_i32_1 = arith.constant 0 : i32
    return %c0_i32, %c0_i32_0 : i32, i32
  }
  func.func @transform_2(%arg0: i32) -> (i32, i32) {
    %c0_i32 = arith.constant 0 : i32
    %c0_i32_0 = arith.constant 0 : i32
    %c0_i32_1 = arith.constant 0 : i32
    return %c0_i32, %c0_i32_0 : i32, i32
  }
  func.func @transform_3(%arg0: i32) -> (i32, i32) {
    %c0_i32 = arith.constant 0 : i32
    %c0_i32_0 = arith.constant 0 : i32
    %c0_i32_1 = arith.constant 0 : i32
    return %c0_i32, %c0_i32_0 : i32, i32
  }
  func.func @transform_4(%arg0: i32) -> (i32, i32) {
    %c0_i32 = arith.constant 0 : i32
    %c0_i32_0 = arith.constant 0 : i32
    return %arg0, %c0_i32 : i32, i32
  }
}

module attributes {stable_mosaic.version = 11 : i64} {
  func.func @_conv_bn_relu_kernel(%arg0: i32, %arg1: memref<128x1152xbf16, #tpu.memory_space<vmem>>, %arg2: memref<1152x128xbf16, #tpu.memory_space<vmem>>, %arg3: memref<1x128xf32, #tpu.memory_space<vmem>>, %arg4: memref<1x128xf32, #tpu.memory_space<vmem>>, %arg5: memref<128x128xbf16, #tpu.memory_space<vmem>>) attributes {dimension_semantics = [#tpu.dimension_semantics<parallel>], iteration_bounds = array<i64: 2>, scalar_prefetch = 0 : i64, scratch_operands = 0 : i64, tpu.core_type = #tpu.core_type<tc>, window_params = [{transform_indices = @transform_0, window_bounds = array<i64: 128, 1152>}, {pipeline_mode = #tpu.pipeline_mode<synchronous>, transform_indices = @transform_1, window_bounds = array<i64: 1152, 128>}, {pipeline_mode = #tpu.pipeline_mode<synchronous>, transform_indices = @transform_2, window_bounds = array<i64: 1, 128>}, {pipeline_mode = #tpu.pipeline_mode<synchronous>, transform_indices = @transform_3, window_bounds = array<i64: 1, 128>}, {transform_indices = @transform_4, window_bounds = array<i64: 128, 128>}]} {
    %c0 = arith.constant 0 : index
    %c0_0 = arith.constant 0 : index
    %0 = vector.load %arg1[%c0, %c0_0] : memref<128x1152xbf16, #tpu.memory_space<vmem>>, vector<128x1152xbf16>
    %c0_1 = arith.constant 0 : index
    %c0_2 = arith.constant 0 : index
    %1 = vector.load %arg2[%c0_1, %c0_2] : memref<1152x128xbf16, #tpu.memory_space<vmem>>, vector<1152x128xbf16>
    %cst = arith.constant dense<0.000000e+00> : vector<128x128xf32>
    %2 = tpu.matmul %0, %1, %cst {dimension_numbers = #tpu.dot_dimension_numbers<[1], [0], [0], [1], [0, 0, 1, 1], [], []>} : vector<128x1152xbf16>, vector<1152x128xbf16>, vector<128x128xf32> -> vector<128x128xf32>
    %c0_3 = arith.constant 0 : index
    %c0_4 = arith.constant 0 : index
    %3 = vector.load %arg3[%c0_3, %c0_4] : memref<1x128xf32, #tpu.memory_space<vmem>>, vector<1x128xf32>
    %4 = vector.broadcast %3 : vector<1x128xf32> to vector<128x128xf32>
    %5 = arith.mulf %2, %4 : vector<128x128xf32>
    %c0_5 = arith.constant 0 : index
    %c0_6 = arith.constant 0 : index
    %6 = vector.load %arg4[%c0_5, %c0_6] : memref<1x128xf32, #tpu.memory_space<vmem>>, vector<1x128xf32>
    %7 = vector.broadcast %6 : vector<1x128xf32> to vector<128x128xf32>
    %8 = arith.addf %5, %7 : vector<128x128xf32>
    %cst_7 = arith.constant 0.000000e+00 : f32
    %9 = vector.broadcast %cst_7 : f32 to vector<128x128xf32>
    %10 = arith.maximumf %8, %9 : vector<128x128xf32>
    %11 = arith.truncf %10 : vector<128x128xf32> to vector<128x128xbf16>
    %c0_8 = arith.constant 0 : index
    %c0_9 = arith.constant 0 : index
    %12 = vector.load %arg5[%c0_8, %c0_9] : memref<128x128xbf16, #tpu.memory_space<vmem>>, vector<128x128xbf16>
    tpu.vector_store %arg5[%c0_8, %c0_9], %11 {strides = array<i32>} : memref<128x128xbf16, #tpu.memory_space<vmem>>, vector<128x128xbf16>,
    return
  }
  func.func @transform_0(%arg0: i32) -> (i32, i32) {
    %c0_i32 = arith.constant 0 : i32
    %c0_i32_0 = arith.constant 0 : i32
    return %arg0, %c0_i32 : i32, i32
  }
  func.func @transform_1(%arg0: i32) -> (i32, i32) {
    %c0_i32 = arith.constant 0 : i32
    %c0_i32_0 = arith.constant 0 : i32
    %c0_i32_1 = arith.constant 0 : i32
    return %c0_i32, %c0_i32_0 : i32, i32
  }
  func.func @transform_2(%arg0: i32) -> (i32, i32) {
    %c0_i32 = arith.constant 0 : i32
    %c0_i32_0 = arith.constant 0 : i32
    %c0_i32_1 = arith.constant 0 : i32
    return %c0_i32, %c0_i32_0 : i32, i32
  }
  func.func @transform_3(%arg0: i32) -> (i32, i32) {
    %c0_i32 = arith.constant 0 : i32
    %c0_i32_0 = arith.constant 0 : i32
    %c0_i32_1 = arith.constant 0 : i32
    return %c0_i32, %c0_i32_0 : i32, i32
  }
  func.func @transform_4(%arg0: i32) -> (i32, i32) {
    %c0_i32 = arith.constant 0 : i32
    %c0_i32_0 = arith.constant 0 : i32
    return %arg0, %c0_i32 : i32, i32
  }
}

module attributes {stable_mosaic.version = 11 : i64} {
  func.func @_conv_bn_relu_kernel(%arg0: i32, %arg1: memref<256x576xbf16, #tpu.memory_space<vmem>>, %arg2: memref<576x128xbf16, #tpu.memory_space<vmem>>, %arg3: memref<1x128xf32, #tpu.memory_space<vmem>>, %arg4: memref<1x128xf32, #tpu.memory_space<vmem>>, %arg5: memref<256x128xbf16, #tpu.memory_space<vmem>>) attributes {dimension_semantics = [#tpu.dimension_semantics<parallel>], iteration_bounds = array<i64: 2>, scalar_prefetch = 0 : i64, scratch_operands = 0 : i64, tpu.core_type = #tpu.core_type<tc>, window_params = [{transform_indices = @transform_0, window_bounds = array<i64: 256, 576>}, {pipeline_mode = #tpu.pipeline_mode<synchronous>, transform_indices = @transform_1, window_bounds = array<i64: 576, 128>}, {pipeline_mode = #tpu.pipeline_mode<synchronous>, transform_indices = @transform_2, window_bounds = array<i64: 1, 128>}, {pipeline_mode = #tpu.pipeline_mode<synchronous>, transform_indices = @transform_3, window_bounds = array<i64: 1, 128>}, {transform_indices = @transform_4, window_bounds = array<i64: 256, 128>}]} {
    %c0 = arith.constant 0 : index
    %c0_0 = arith.constant 0 : index
    %0 = vector.load %arg1[%c0, %c0_0] : memref<256x576xbf16, #tpu.memory_space<vmem>>, vector<256x576xbf16>
    %c0_1 = arith.constant 0 : index
    %c0_2 = arith.constant 0 : index
    %1 = vector.load %arg2[%c0_1, %c0_2] : memref<576x128xbf16, #tpu.memory_space<vmem>>, vector<576x128xbf16>
    %cst = arith.constant dense<0.000000e+00> : vector<256x128xf32>
    %2 = tpu.matmul %0, %1, %cst {dimension_numbers = #tpu.dot_dimension_numbers<[1], [0], [0], [1], [0, 0, 1, 1], [], []>} : vector<256x576xbf16>, vector<576x128xbf16>, vector<256x128xf32> -> vector<256x128xf32>
    %c0_3 = arith.constant 0 : index
    %c0_4 = arith.constant 0 : index
    %3 = vector.load %arg3[%c0_3, %c0_4] : memref<1x128xf32, #tpu.memory_space<vmem>>, vector<1x128xf32>
    %4 = vector.broadcast %3 : vector<1x128xf32> to vector<256x128xf32>
    %5 = arith.mulf %2, %4 : vector<256x128xf32>
    %c0_5 = arith.constant 0 : index
    %c0_6 = arith.constant 0 : index
    %6 = vector.load %arg4[%c0_5, %c0_6] : memref<1x128xf32, #tpu.memory_space<vmem>>, vector<1x128xf32>
    %7 = vector.broadcast %6 : vector<1x128xf32> to vector<256x128xf32>
    %8 = arith.addf %5, %7 : vector<256x128xf32>
    %cst_7 = arith.constant 0.000000e+00 : f32
    %9 = vector.broadcast %cst_7 : f32 to vector<256x128xf32>
    %10 = arith.maximumf %8, %9 : vector<256x128xf32>
    %11 = arith.truncf %10 : vector<256x128xf32> to vector<256x128xbf16>
    %c0_8 = arith.constant 0 : index
    %c0_9 = arith.constant 0 : index
    %12 = vector.load %arg5[%c0_8, %c0_9] : memref<256x128xbf16, #tpu.memory_space<vmem>>, vector<256x128xbf16>
    tpu.vector_store %arg5[%c0_8, %c0_9], %11 {strides = array<i32>} : memref<256x128xbf16, #tpu.memory_space<vmem>>, vector<256x128xbf16>,
    return
  }
  func.func @transform_0(%arg0: i32) -> (i32, i32) {
    %c0_i32 = arith.constant 0 : i32
    %c0_i32_0 = arith.constant 0 : i32
    return %arg0, %c0_i32 : i32, i32
  }
  func.func @transform_1(%arg0: i32) -> (i32, i32) {
    %c0_i32 = arith.constant 0 : i32
    %c0_i32_0 = arith.constant 0 : i32
    %c0_i32_1 = arith.constant 0 : i32
    return %c0_i32, %c0_i32_0 : i32, i32
  }
  func.func @transform_2(%arg0: i32) -> (i32, i32) {
    %c0_i32 = arith.constant 0 : i32
    %c0_i32_0 = arith.constant 0 : i32
    %c0_i32_1 = arith.constant 0 : i32
    return %c0_i32, %c0_i32_0 : i32, i32
  }
  func.func @transform_3(%arg0: i32) -> (i32, i32) {
    %c0_i32 = arith.constant 0 : i32
    %c0_i32_0 = arith.constant 0 : i32
    %c0_i32_1 = arith.constant 0 : i32
    return %c0_i32, %c0_i32_0 : i32, i32
  }
  func.func @transform_4(%arg0: i32) -> (i32, i32) {
    %c0_i32 = arith.constant 0 : i32
    %c0_i32_0 = arith.constant 0 : i32
    return %arg0, %c0_i32 : i32, i32
  }
}

module attributes {stable_mosaic.version = 11 : i64} {
  func.func @_conv_bn_relu_kernel(%arg0: i32, %arg1: memref<128x1152xbf16, #tpu.memory_space<vmem>>, %arg2: memref<1152x128xbf16, #tpu.memory_space<vmem>>, %arg3: memref<1x128xf32, #tpu.memory_space<vmem>>, %arg4: memref<1x128xf32, #tpu.memory_space<vmem>>, %arg5: memref<128x128xbf16, #tpu.memory_space<vmem>>) attributes {dimension_semantics = [#tpu.dimension_semantics<parallel>], iteration_bounds = array<i64: 1>, scalar_prefetch = 0 : i64, scratch_operands = 0 : i64, tpu.core_type = #tpu.core_type<tc>, window_params = [{transform_indices = @transform_0, window_bounds = array<i64: 128, 1152>}, {pipeline_mode = #tpu.pipeline_mode<synchronous>, transform_indices = @transform_1, window_bounds = array<i64: 1152, 128>}, {pipeline_mode = #tpu.pipeline_mode<synchronous>, transform_indices = @transform_2, window_bounds = array<i64: 1, 128>}, {pipeline_mode = #tpu.pipeline_mode<synchronous>, transform_indices = @transform_3, window_bounds = array<i64: 1, 128>}, {transform_indices = @transform_4, window_bounds = array<i64: 128, 128>}]} {
    %c0 = arith.constant 0 : index
    %c0_0 = arith.constant 0 : index
    %0 = vector.load %arg1[%c0, %c0_0] : memref<128x1152xbf16, #tpu.memory_space<vmem>>, vector<128x1152xbf16>
    %c0_1 = arith.constant 0 : index
    %c0_2 = arith.constant 0 : index
    %1 = vector.load %arg2[%c0_1, %c0_2] : memref<1152x128xbf16, #tpu.memory_space<vmem>>, vector<1152x128xbf16>
    %cst = arith.constant dense<0.000000e+00> : vector<128x128xf32>
    %2 = tpu.matmul %0, %1, %cst {dimension_numbers = #tpu.dot_dimension_numbers<[1], [0], [0], [1], [0, 0, 1, 1], [], []>} : vector<128x1152xbf16>, vector<1152x128xbf16>, vector<128x128xf32> -> vector<128x128xf32>
    %c0_3 = arith.constant 0 : index
    %c0_4 = arith.constant 0 : index
    %3 = vector.load %arg3[%c0_3, %c0_4] : memref<1x128xf32, #tpu.memory_space<vmem>>, vector<1x128xf32>
    %4 = vector.broadcast %3 : vector<1x128xf32> to vector<128x128xf32>
    %5 = arith.mulf %2, %4 : vector<128x128xf32>
    %c0_5 = arith.constant 0 : index
    %c0_6 = arith.constant 0 : index
    %6 = vector.load %arg4[%c0_5, %c0_6] : memref<1x128xf32, #tpu.memory_space<vmem>>, vector<1x128xf32>
    %7 = vector.broadcast %6 : vector<1x128xf32> to vector<128x128xf32>
    %8 = arith.addf %5, %7 : vector<128x128xf32>
    %cst_7 = arith.constant 0.000000e+00 : f32
    %9 = vector.broadcast %cst_7 : f32 to vector<128x128xf32>
    %10 = arith.maximumf %8, %9 : vector<128x128xf32>
    %11 = arith.truncf %10 : vector<128x128xf32> to vector<128x128xbf16>
    %c0_8 = arith.constant 0 : index
    %c0_9 = arith.constant 0 : index
    %12 = vector.load %arg5[%c0_8, %c0_9] : memref<128x128xbf16, #tpu.memory_space<vmem>>, vector<128x128xbf16>
    tpu.vector_store %arg5[%c0_8, %c0_9], %11 {strides = array<i32>} : memref<128x128xbf16, #tpu.memory_space<vmem>>, vector<128x128xbf16>,
    return
  }
  func.func @transform_0(%arg0: i32) -> (i32, i32) {
    %c0_i32 = arith.constant 0 : i32
    %c0_i32_0 = arith.constant 0 : i32
    return %arg0, %c0_i32 : i32, i32
  }
  func.func @transform_1(%arg0: i32) -> (i32, i32) {
    %c0_i32 = arith.constant 0 : i32
    %c0_i32_0 = arith.constant 0 : i32
    %c0_i32_1 = arith.constant 0 : i32
    return %c0_i32, %c0_i32_0 : i32, i32
  }
  func.func @transform_2(%arg0: i32) -> (i32, i32) {
    %c0_i32 = arith.constant 0 : i32
    %c0_i32_0 = arith.constant 0 : i32
    %c0_i32_1 = arith.constant 0 : i32
    return %c0_i32, %c0_i32_0 : i32, i32
  }
  func.func @transform_3(%arg0: i32) -> (i32, i32) {
    %c0_i32 = arith.constant 0 : i32
    %c0_i32_0 = arith.constant 0 : i32
    %c0_i32_1 = arith.constant 0 : i32
    return %c0_i32, %c0_i32_0 : i32, i32
  }
  func.func @transform_4(%arg0: i32) -> (i32, i32) {
    %c0_i32 = arith.constant 0 : i32
    %c0_i32_0 = arith.constant 0 : i32
    return %arg0, %c0_i32 : i32, i32
  }
}

module attributes {stable_mosaic.version = 11 : i64} {
  func.func @_conv_bn_relu_kernel(%arg0: i32, %arg1: memref<128x1152xbf16, #tpu.memory_space<vmem>>, %arg2: memref<1152x256xbf16, #tpu.memory_space<vmem>>, %arg3: memref<1x256xf32, #tpu.memory_space<vmem>>, %arg4: memref<1x256xf32, #tpu.memory_space<vmem>>, %arg5: memref<128x256xbf16, #tpu.memory_space<vmem>>) attributes {dimension_semantics = [#tpu.dimension_semantics<parallel>], iteration_bounds = array<i64: 1>, scalar_prefetch = 0 : i64, scratch_operands = 0 : i64, tpu.core_type = #tpu.core_type<tc>, window_params = [{transform_indices = @transform_0, window_bounds = array<i64: 128, 1152>}, {pipeline_mode = #tpu.pipeline_mode<synchronous>, transform_indices = @transform_1, window_bounds = array<i64: 1152, 256>}, {pipeline_mode = #tpu.pipeline_mode<synchronous>, transform_indices = @transform_2, window_bounds = array<i64: 1, 256>}, {pipeline_mode = #tpu.pipeline_mode<synchronous>, transform_indices = @transform_3, window_bounds = array<i64: 1, 256>}, {transform_indices = @transform_4, window_bounds = array<i64: 128, 256>}]} {
    %c0 = arith.constant 0 : index
    %c0_0 = arith.constant 0 : index
    %0 = vector.load %arg1[%c0, %c0_0] : memref<128x1152xbf16, #tpu.memory_space<vmem>>, vector<128x1152xbf16>
    %c0_1 = arith.constant 0 : index
    %c0_2 = arith.constant 0 : index
    %1 = vector.load %arg2[%c0_1, %c0_2] : memref<1152x256xbf16, #tpu.memory_space<vmem>>, vector<1152x256xbf16>
    %cst = arith.constant dense<0.000000e+00> : vector<128x256xf32>
    %2 = tpu.matmul %0, %1, %cst {dimension_numbers = #tpu.dot_dimension_numbers<[1], [0], [0], [1], [0, 0, 1, 1], [], []>} : vector<128x1152xbf16>, vector<1152x256xbf16>, vector<128x256xf32> -> vector<128x256xf32>
    %c0_3 = arith.constant 0 : index
    %c0_4 = arith.constant 0 : index
    %3 = vector.load %arg3[%c0_3, %c0_4] : memref<1x256xf32, #tpu.memory_space<vmem>>, vector<1x256xf32>
    %4 = vector.broadcast %3 : vector<1x256xf32> to vector<128x256xf32>
    %5 = arith.mulf %2, %4 : vector<128x256xf32>
    %c0_5 = arith.constant 0 : index
    %c0_6 = arith.constant 0 : index
    %6 = vector.load %arg4[%c0_5, %c0_6] : memref<1x256xf32, #tpu.memory_space<vmem>>, vector<1x256xf32>
    %7 = vector.broadcast %6 : vector<1x256xf32> to vector<128x256xf32>
    %8 = arith.addf %5, %7 : vector<128x256xf32>
    %cst_7 = arith.constant 0.000000e+00 : f32
    %9 = vector.broadcast %cst_7 : f32 to vector<128x256xf32>
    %10 = arith.maximumf %8, %9 : vector<128x256xf32>
    %11 = arith.truncf %10 : vector<128x256xf32> to vector<128x256xbf16>
    %c0_8 = arith.constant 0 : index
    %c0_9 = arith.constant 0 : index
    %12 = vector.load %arg5[%c0_8, %c0_9] : memref<128x256xbf16, #tpu.memory_space<vmem>>, vector<128x256xbf16>
    tpu.vector_store %arg5[%c0_8, %c0_9], %11 {strides = array<i32>} : memref<128x256xbf16, #tpu.memory_space<vmem>>, vector<128x256xbf16>,
    return
  }
  func.func @transform_0(%arg0: i32) -> (i32, i32) {
    %c0_i32 = arith.constant 0 : i32
    %c0_i32_0 = arith.constant 0 : i32
    return %arg0, %c0_i32 : i32, i32
  }
  func.func @transform_1(%arg0: i32) -> (i32, i32) {
    %c0_i32 = arith.constant 0 : i32
    %c0_i32_0 = arith.constant 0 : i32
    %c0_i32_1 = arith.constant 0 : i32
    return %c0_i32, %c0_i32_0 : i32, i32
  }
  func.func @transform_2(%arg0: i32) -> (i32, i32) {
    %c0_i32 = arith.constant 0 : i32
    %c0_i32_0 = arith.constant 0 : i32
    %c0_i32_1 = arith.constant 0 : i32
    return %c0_i32, %c0_i32_0 : i32, i32
  }
  func.func @transform_3(%arg0: i32) -> (i32, i32) {
    %c0_i32 = arith.constant 0 : i32
    %c0_i32_0 = arith.constant 0 : i32
    %c0_i32_1 = arith.constant 0 : i32
    return %c0_i32, %c0_i32_0 : i32, i32
  }
  func.func @transform_4(%arg0: i32) -> (i32, i32) {
    %c0_i32 = arith.constant 0 : i32
    %c0_i32_0 = arith.constant 0 : i32
    return %arg0, %c0_i32 : i32, i32
  }
}

module attributes {stable_mosaic.version = 11 : i64} {
  func.func @_conv_head_kernel(%arg0: memref<32x2304xbf16, #tpu.memory_space<vmem>>, %arg1: memref<2304x256xbf16, #tpu.memory_space<vmem>>, %arg2: memref<1x256xf32, #tpu.memory_space<vmem>>, %arg3: memref<1x256xf32, #tpu.memory_space<vmem>>, %arg4: memref<256x128xf32, #tpu.memory_space<vmem>>, %arg5: memref<1x128xf32, #tpu.memory_space<vmem>>, %arg6: memref<2x128xf32, #tpu.memory_space<vmem>>) attributes {dimension_semantics = [], scalar_prefetch = 0 : i64, scratch_operands = 0 : i64, tpu.core_type = #tpu.core_type<tc>} {
    %c0 = arith.constant 0 : index
    %c0_0 = arith.constant 0 : index
    %0 = vector.load %arg0[%c0, %c0_0] : memref<32x2304xbf16, #tpu.memory_space<vmem>>, vector<32x2304xbf16>
    %c0_1 = arith.constant 0 : index
    %c0_2 = arith.constant 0 : index
    %1 = vector.load %arg1[%c0_1, %c0_2] : memref<2304x256xbf16, #tpu.memory_space<vmem>>, vector<2304x256xbf16>
    %cst = arith.constant dense<0.000000e+00> : vector<32x256xf32>
    %2 = tpu.matmul %0, %1, %cst {dimension_numbers = #tpu.dot_dimension_numbers<[1], [0], [0], [1], [0, 0, 1, 1], [], []>} : vector<32x2304xbf16>, vector<2304x256xbf16>, vector<32x256xf32> -> vector<32x256xf32>
    %c0_3 = arith.constant 0 : index
    %c0_4 = arith.constant 0 : index
    %3 = vector.load %arg2[%c0_3, %c0_4] : memref<1x256xf32, #tpu.memory_space<vmem>>, vector<1x256xf32>
    %4 = vector.broadcast %3 : vector<1x256xf32> to vector<32x256xf32>
    %5 = arith.mulf %2, %4 : vector<32x256xf32>
    %c0_5 = arith.constant 0 : index
    %c0_6 = arith.constant 0 : index
    %6 = vector.load %arg3[%c0_5, %c0_6] : memref<1x256xf32, #tpu.memory_space<vmem>>, vector<1x256xf32>
    %7 = vector.broadcast %6 : vector<1x256xf32> to vector<32x256xf32>
    %8 = arith.addf %5, %7 : vector<32x256xf32>
    %cst_7 = arith.constant 0.000000e+00 : f32
    %9 = vector.broadcast %cst_7 : f32 to vector<32x256xf32>
    %10 = arith.maximumf %8, %9 : vector<32x256xf32>
    %11 = vector.shape_cast %10 : vector<32x256xf32> to vector<2x16x256xf32>
    %cst_8 = arith.constant dense<0.000000e+00> : vector<2x256xf32>
    %12 = vector.multi_reduction <add>, %11, %cst_8 [1] : vector<2x16x256xf32> to vector<2x256xf32>
    %cst_9 = arith.constant 1.600000e+01 : f32
    %13 = vector.broadcast %cst_9 : f32 to vector<2x256xf32>
    %14 = arith.divf %12, %13 : vector<2x256xf32>
    %c0_10 = arith.constant 0 : index
    %c0_11 = arith.constant 0 : index
    %15 = vector.load %arg4[%c0_10, %c0_11] : memref<256x128xf32, #tpu.memory_space<vmem>>, vector<256x128xf32>
    %cst_12 = arith.constant dense<0.000000e+00> : vector<2x128xf32>
    %16 = tpu.matmul %14, %15, %cst_12 {dimension_numbers = #tpu.dot_dimension_numbers<[1], [0], [0], [1], [0, 0, 1, 1], [], []>} : vector<2x256xf32>, vector<256x128xf32>, vector<2x128xf32> -> vector<2x128xf32>
    %c0_13 = arith.constant 0 : index
    %c0_14 = arith.constant 0 : index
    %17 = vector.load %arg5[%c0_13, %c0_14] : memref<1x128xf32, #tpu.memory_space<vmem>>, vector<1x128xf32>
    %18 = vector.broadcast %17 : vector<1x128xf32> to vector<2x128xf32>
    %19 = arith.addf %16, %18 : vector<2x128xf32>
    %c0_15 = arith.constant 0 : index
    %c0_16 = arith.constant 0 : index
    %20 = vector.load %arg6[%c0_15, %c0_16] : memref<2x128xf32, #tpu.memory_space<vmem>>, vector<2x128xf32>
    tpu.vector_store %arg6[%c0_15, %c0_16], %19 {strides = array<i32>} : memref<2x128xf32, #tpu.memory_space<vmem>>, vector<2x128xf32>,
    return
  }
}

</mosaic_0001>

<bundles_post_ra>
// kernel: simplenet7_forward.6
= control target key start
LH: loop header
LB: loop body
LE: loop exit
PB: predicated region body
PF: predicated region fallthrough
CT: control target
= control target key end

     0   :  { %s2021_s15 = smov 0   ;;  %s2295_s0 = inlined_call_operand.vmem [shape: bf16[1024,54], index: 0, kind: input, shape index: {}]   ;;  %s2296_s1 = inlined_call_operand.vmem [shape: bf16[54,128], index: 1, kind: input, shape index: {}]   ;;  %s2297_s2 = inlined_call_operand.vmem [shape: f32[1,128], index: 2, kind: input, shape index: {}]   ;;  %s2298_s3 = inlined_call_operand.vmem [shape: f32[1,128], index: 3, kind: input, shape index: {}]   ;;  %s2299_s4 = inlined_call_operand.vmem [shape: bf16[1024,128], index: 4, kind: output, shape index: {}]  }
   0x1 LB: > { %s1426_s16 = sadd.s32 4294967295, %s1994_s15   ;;  %p1430_p0 = scmp.ge.s32.totalorder %s1994_s15, 1  ;;  %s1994_s15 = sphi %s2021_s15, %s14_s15  }
   0x2   : > { %p163_p1 = scmp.lt.s32.totalorder %s1994_s15, 3 }
   0x4   : > { %p164_p2 = pnand %p1430_p0, %p163_p1 }
   0x5   : > { %s1431_s21 = sshll.u32 (!%p164_p2), %s1426_s16, 6 }
   0x6   : > { %167 = sbr.rel (%p164_p2) target bundleno = 292 (0x124), region = 36  ;;  %p190_p3 = scmp.lt.s32.totalorder (!%p164_p2), %s1431_s21, 127 }
   0xb   : > { %v1952_v0 = vld [vmem:[%s2296_s1 + $0x18] ss:$0 sps:$4 sm:$0x77]   ;;  %vm551_vm0 = vcmask 1042432   ;;  %v1953_v1 = vld [vmem:[%s2296_s1 + $0x10] sm:$0xff]   ;;  %v1954_v3 = vld [vmem:[%s2296_s1 + $0x8] sm:$0xff]  }
   0xc   : > { %1942 = vmatprep.subr.msk.bf16.mxu0 %vm551_vm0, %v1952_v0  ;;  %1943 = vmatprep.subr.msk.bf16.mxu1 %vm551_vm0, %v1952_v0  ;;  %v553_v2 = vsel %vm551_vm0, %v1952_v0, 0  ;;  %s2301_s21 = smov (!%p190_p3, %s1431_s21), 127  ;;  %v1955_v4 = vld [vmem:[%s2296_s1] sm:$0xff]   ;;  %vm454_vm1 = vcmask 441344  }
   0xd   : > { %1863 = vmatpush3.bf16.msra.mxu0 %v553_v2  ;;  %1938 = vmatpush3.bf16.msra.mxu1 %v553_v2  ;;  %s1432_s24 = sshll.u32 %s2301_s21, 2  ;;  %v2118_v37 = vld [vmem:[%s2297_s2] ss:$0 sm:$0xff] }
   0xe   : > { %1864 = vmatprep.subr.bf16.mxu0 %v1953_v1  ;;  %1935 = vmatprep.subr.bf16.mxu1 %v1953_v1  ;;  %s2049_s29 = scalar_lea.vmem %s2295_s0, %s1432_s24  ;;  %v2125_v42 = vld [vmem:[%s2298_s3] ss:$0 sm:$0xff]  ;;  %s2148_s10 = scalar_lea.vmem %s2299_s4, %s1432_s24 }
   0xf   : > { %v1956_v5 = vld [vmem:[%s2049_s29] sm:$0xff]   ;;  %v1958_v7 = vld [vmem:[%s2049_s29 + $0x8] sm:$0xff]   ;;  %v1960_v9 = vld [vmem:[%s2049_s29 + $0x10] sm:$0xff]  }
  0x10   : > { %v1957_v6 = vld [vmem:[%s2049_s29 + $0x80] sm:$0xff]   ;;  %1870 = vmatprep.mubr.msk.bf16.mxu0 %vm454_vm1, %v1956_v5  ;;  %v1959_v8 = vld [vmem:[%s2049_s29 + $0x88] sm:$0xff]   ;;  %v1961_v10 = vld [vmem:[%s2049_s29 + $0x90] sm:$0xff]  }
  0x11   : > { %1865 = vmatpush3.bf16.msra.mxu0 %v1953_v1  ;;  %1939 = vmatpush3.bf16.msra.mxu1 %v1953_v1  ;;  %v1962_v11 = vld [vmem:[%s2049_s29 + $0x18] sm:$0xff]   ;;  %v1964_v13 = vld [vmem:[%s2049_s29 + $0x20] sm:$0xff]   ;;  %v1966_v15 = vld [vmem:[%s2049_s29 + $0x28] sm:$0xff]  }
  0x12   : > { %1866 = vmatprep.subr.bf16.mxu0 %v1954_v3  ;;  %1936 = vmatprep.subr.bf16.mxu1 %v1954_v3  ;;  %v1963_v12 = vld [vmem:[%s2049_s29 + $0x98] sm:$0xff]   ;;  %v1965_v14 = vld [vmem:[%s2049_s29 + $0xa0] sm:$0xff]   ;;  %v1967_v16 = vld [vmem:[%s2049_s29 + $0xa8] sm:$0xff]  }
  0x13   : > { %1902 = vmatprep.mubr.msk.bf16.mxu1 %vm454_vm1, %v1957_v6  ;;  %v1968_v17 = vld [vmem:[%s2049_s29 + $0x30] sm:$0xff]   ;;  %v1970_v19 = vld [vmem:[%s2049_s29 + $0x38] sm:$0xff]   ;;  %v1972_v21 = vld [vmem:[%s2049_s29 + $0x40] sm:$0xff]  }
  0x14   : > { %v1969_v18 = vld [vmem:[%s2049_s29 + $0xb0] sm:$0xff]   ;;  %v1971_v20 = vld [vmem:[%s2049_s29 + $0xb8] sm:$0xff]   ;;  %v1973_v22 = vld [vmem:[%s2049_s29 + $0xc0] sm:$0xff]  }
  0x15   : > { %1867 = vmatpush3.bf16.msra.mxu0 %v1954_v3  ;;  %1940 = vmatpush3.bf16.msra.mxu1 %v1954_v3  ;;  %v1974_v23 = vld [vmem:[%s2049_s29 + $0x48] sm:$0xff]   ;;  %v1976_v25 = vld [vmem:[%s2049_s29 + $0x50] sm:$0xff]   ;;  %v1978_v27 = vld [vmem:[%s2049_s29 + $0x58] sm:$0xff]  }
  0x16   : > { %1868 = vmatprep.subr.bf16.mxu0 %v1955_v4  ;;  %1937 = vmatprep.subr.bf16.mxu1 %v1955_v4  ;;  %v1975_v24 = vld [vmem:[%s2049_s29 + $0xc8] sm:$0xff]   ;;  %v1977_v26 = vld [vmem:[%s2049_s29 + $0xd0] sm:$0xff]   ;;  %v1979_v28 = vld [vmem:[%s2049_s29 + $0xd8] sm:$0xff]  }
  0x17   : > { %v1980_v29 = vld [vmem:[%s2049_s29 + $0x60] sm:$0xff]   ;;  %v1982_v31 = vld [vmem:[%s2049_s29 + $0x68] sm:$0xff]   ;;  %v1984_v33 = vld [vmem:[%s2049_s29 + $0x70] sm:$0xff]  }
  0x18   : > { %v1981_v30 = vld [vmem:[%s2049_s29 + $0xe0] sm:$0xff]   ;;  %v1983_v32 = vld [vmem:[%s2049_s29 + $0xe8] sm:$0xff]   ;;  %v1985_v34 = vld [vmem:[%s2049_s29 + $0xf0] sm:$0xff]  }
  0x19   : > { %1869 = vmatpush3.bf16.msra.mxu0 %v1955_v4  ;;  %1941 = vmatpush3.bf16.msra.mxu1 %v1955_v4  ;;  %v1986_v35 = vld [vmem:[%s2049_s29 + $0x78] sm:$0xff]  }
  0x1a   : > { %v1987_v36 = vld [vmem:[%s2049_s29 + $0xf8] sm:$0xff]  }
  0x1c   : > { %1871 = vmatmul.mubr.msk.bf16.vlgmr.msra.gmra.mxu0 %vm454_vm1, %v1958_v7  ;;  %1903 = vmatmul.mubr.msk.bf16.vlgmr.msra.gmra.mxu1 %vm454_vm1, %v1959_v8 }
  0x1d   : > { %1874 = vmatprep.mubr.msk.bf16.mxu0 %vm454_vm1, %v1960_v9  ;;  %1906 = vmatprep.mubr.msk.bf16.mxu1 %vm454_vm1, %v1961_v10 }
  0x24   : > { %1875 = vmatmul.mubr.msk.bf16.gmra.mxu0 %vm454_vm1, %v1962_v11  ;;  %1907 = vmatmul.mubr.msk.bf16.gmra.mxu1 %vm454_vm1, %v1963_v12 }
  0x25   : > { %1878 = vmatprep.mubr.msk.bf16.mxu0 %vm454_vm1, %v1964_v13  ;;  %1910 = vmatprep.mubr.msk.bf16.mxu1 %vm454_vm1, %v1965_v14 }
  0x2c   : > { %1879 = vmatmul.mubr.msk.bf16.gmra.mxu0 %vm454_vm1, %v1966_v15  ;;  %1911 = vmatmul.mubr.msk.bf16.gmra.mxu1 %vm454_vm1, %v1967_v16 }
  0x2d   : > { %1882 = vmatprep.mubr.msk.bf16.mxu0 %vm454_vm1, %v1968_v17  ;;  %1914 = vmatprep.mubr.msk.bf16.mxu1 %vm454_vm1, %v1969_v18 }
  0x34   : > { %1883 = vmatmul.mubr.msk.bf16.gmra.mxu0 %vm454_vm1, %v1970_v19  ;;  %1915 = vmatmul.mubr.msk.bf16.gmra.mxu1 %vm454_vm1, %v1971_v20 }
  0x35   : > { %1886 = vmatprep.mubr.msk.bf16.mxu0 %vm454_vm1, %v1972_v21  ;;  %1918 = vmatprep.mubr.msk.bf16.mxu1 %vm454_vm1, %v1973_v22 }
  0x3c   : > { %1887 = vmatmul.mubr.msk.bf16.gmra.mxu0 %vm454_vm1, %v1974_v23  ;;  %1919 = vmatmul.mubr.msk.bf16.gmra.mxu1 %vm454_vm1, %v1975_v24 }
  0x3d   : > { %1890 = vmatprep.mubr.msk.bf16.mxu0 %vm454_vm1, %v1976_v25  ;;  %1922 = vmatprep.mubr.msk.bf16.mxu1 %vm454_vm1, %v1977_v26 }
  0x44   : > { %1891 = vmatmul.mubr.msk.bf16.gmra.mxu0 %vm454_vm1, %v1978_v27  ;;  %1923 = vmatmul.mubr.msk.bf16.gmra.mxu1 %vm454_vm1, %v1979_v28 }
  0x45   : > { %1894 = vmatprep.mubr.msk.bf16.mxu0 %vm454_vm1, %v1980_v29  ;;  %1926 = vmatprep.mubr.msk.bf16.mxu1 %vm454_vm1, %v1981_v30 }
  0x4c   : > { %1895 = vmatmul.mubr.msk.bf16.gmra.mxu0 %vm454_vm1, %v1982_v31  ;;  %1927 = vmatmul.mubr.msk.bf16.gmra.mxu1 %vm454_vm1, %v1983_v32 }
  0x4d   : > { %1898 = vmatprep.mubr.msk.bf16.mxu0 %vm454_vm1, %v1984_v33  ;;  %1930 = vmatprep.mubr.msk.bf16.mxu1 %vm454_vm1, %v1985_v34 }
  0x54   : > { %1899 = vmatmul.mubr.msk.bf16.gmra.mxu0 %vm454_vm1, %v1986_v35  ;;  %1931 = vmatmul.mubr.msk.bf16.gmra.mxu1 %vm454_vm1, %v1987_v36 }
  0xdc   : > { %v1872_v38 = vpop.f32.mrf.mxu0  ;;  %v1904_v39 = vpop.f32.mrf.mxu1 }
  0xdd   : > { %v853_v40 = vmul.f32 %v1872_v38, %v2118_v37  ;;  %v885_v41 = vmul.f32 %v1904_v39, %v2118_v37 }
  0xde   : > { %v589_v43 = vpop.f32.mrf.mxu0  ;;  %v717_v44 = vpop.f32.mrf.mxu1 }
  0xdf   : > { %v851_v45 = vmul.f32 %v2118_v37, %v589_v43  ;;  %v883_v46 = vmul.f32 %v2118_v37, %v717_v44  ;;  %v924_v49 = vadd.f32 %v2125_v42, %v853_v40  ;;  %v956_v50 = vadd.f32 %v2125_v42, %v885_v41 }
  0xe0   : > { %v1873_v47 = vpop.f32.mrf.mxu0  ;;  %v1905_v48 = vpop.f32.mrf.mxu1 }
  0xe1   : > { %v854_v51 = vmul.f32 %v1873_v47, %v2118_v37  ;;  %v886_v52 = vmul.f32 %v1905_v48, %v2118_v37  ;;  %v922_v55 = vadd.f32 %v2125_v42, %v851_v45  ;;  %v954_v56 = vadd.f32 %v2125_v42, %v883_v46 }
  0xe2   : > { %v592_v53 = vpop.f32.mrf.mxu0  ;;  %v720_v54 = vpop.f32.mrf.mxu1  ;;  %v988_v63 = vmax.f32 %v924_v49, 0.0  ;;  %v1020_v0 = vmax.f32 %v956_v50, 0.0 }
  0xe3   : > { %v852_v57 = vmul.f32 %v2118_v37, %v592_v53  ;;  %v884_v58 = vmul.f32 %v2118_v37, %v720_v54  ;;  %v925_v59 = vadd.f32 %v2125_v42, %v854_v51  ;;  %v957_v60 = vadd.f32 %v2125_v42, %v886_v52 }
  0xe4   : > { %v1876_v61 = vpop.f32.mrf.mxu0  ;;  %v1908_v62 = vpop.f32.mrf.mxu1  ;;  %v986_v9 = vmax.f32 %v922_v55, 0.0  ;;  %v1018_v10 = vmax.f32 %v954_v56, 0.0 }
  0xe5   : > { %v923_v1 = vadd.f32 %v2125_v42, %v852_v57  ;;  %v955_v2 = vadd.f32 %v2125_v42, %v884_v58  ;;  %v989_v3 = vmax.f32 %v925_v59, 0.0  ;;  %v1021_v4 = vmax.f32 %v957_v60, 0.0 }
  0xe6   : > { %v857_v5 = vmul.f32 %v1876_v61, %v2118_v37  ;;  %v889_v6 = vmul.f32 %v1908_v62, %v2118_v37  ;;  %v605_v7 = vpop.f32.mrf.mxu0  ;;  %v733_v8 = vpop.f32.mrf.mxu1 }
  0xe7   : > { %v987_v11 = vmax.f32 %v923_v1, 0.0  ;;  %v1019_v12 = vmax.f32 %v955_v2, 0.0  ;;  %v1643_v13 = vpack.c.bf16 %v989_v3, %v988_v63  ;;  %v1723_v14 = vpack.c.bf16 %v1021_v4, %v1020_v0 }
  0xe8   : > { %v855_v15 = vmul.f32 %v2118_v37, %v605_v7  ;;  %v887_v16 = vmul.f32 %v2118_v37, %v733_v8  ;;  %v1877_v17 = vpop.f32.mrf.mxu0  ;;  %v1909_v18 = vpop.f32.mrf.mxu1  ;;  %v928_v21 = vadd.f32 %v2125_v42, %v857_v5  ;;  %v960_v22 = vadd.f32 %v2125_v42, %v889_v6 }
  0xe9   : > { %v1638_v19 = vpack.c.bf16 %v987_v11, %v986_v9  ;;  %v1718_v20 = vpack.c.bf16 %v1019_v12, %v1018_v10  ;;  %1795 = vst [vmem:[%s2148_s10 + $0x8] sm:$0xff] %v1643_v13   ;;  %1811 = vst [vmem:[%s2148_s10 + $0x88] sm:$0xff] %v1723_v14   ;;  %v858_v23 = vmul.f32 %v1877_v17, %v2118_v37 }
  0xea   : > { %v890_v24 = vmul.f32 %v1909_v18, %v2118_v37  ;;  %v608_v25 = vpop.f32.mrf.mxu0  ;;  %v736_v26 = vpop.f32.mrf.mxu1  ;;  %v926_v27 = vadd.f32 %v2125_v42, %v855_v15  ;;  %v958_v28 = vadd.f32 %v2125_v42, %v887_v16  ;;  %v992_v40 = vmax.f32 %v928_v21, 0.0 }
  0xeb   : > { %1639 = vst [vmem:[%s2148_s10] sm:$0xff] %v1638_v19   ;;  %1810 = vst [vmem:[%s2148_s10 + $0x80] sm:$0xff] %v1718_v20   ;;  %v856_v29 = vmul.f32 %v2118_v37, %v608_v25  ;;  %v888_v30 = vmul.f32 %v2118_v37, %v736_v26  ;;  %v929_v31 = vadd.f32 %v2125_v42, %v858_v23  ;;  %v1024_v41 = vmax.f32 %v960_v22, 0.0 }
  0xec   : > { %v961_v32 = vadd.f32 %v2125_v42, %v890_v24  ;;  %v1880_v33 = vpop.f32.mrf.mxu0  ;;  %v1912_v34 = vpop.f32.mrf.mxu1  ;;  %v990_v47 = vmax.f32 %v926_v27, 0.0  ;;  %v1022_v48 = vmax.f32 %v958_v28, 0.0 }
  0xed   : > { %v927_v35 = vadd.f32 %v2125_v42, %v856_v29  ;;  %v959_v36 = vadd.f32 %v2125_v42, %v888_v30  ;;  %v861_v38 = vmul.f32 %v1880_v33, %v2118_v37  ;;  %v893_v39 = vmul.f32 %v1912_v34, %v2118_v37 }
  0xee   : > { %v993_v43 = vmax.f32 %v929_v31, 0.0  ;;  %v1025_v44 = vmax.f32 %v961_v32, 0.0  ;;  %v621_v45 = vpop.f32.mrf.mxu0  ;;  %v749_v46 = vpop.f32.mrf.mxu1 }
  0xef   : > { %v991_v49 = vmax.f32 %v927_v35, 0.0  ;;  %v1023_v50 = vmax.f32 %v959_v36, 0.0  ;;  %v859_v53 = vmul.f32 %v2118_v37, %v621_v45  ;;  %v891_v54 = vmul.f32 %v2118_v37, %v749_v46 }
  0xf0   : > { %v1653_v51 = vpack.c.bf16 %v993_v43, %v992_v40  ;;  %v1733_v52 = vpack.c.bf16 %v1025_v44, %v1024_v41  ;;  %v1881_v55 = vpop.f32.mrf.mxu0  ;;  %v1913_v56 = vpop.f32.mrf.mxu1  ;;  %v932_v59 = vadd.f32 %v2125_v42, %v861_v38  ;;  %v964_v60 = vadd.f32 %v2125_v42, %v893_v39 }
  0xf1   : > { %v1648_v57 = vpack.c.bf16 %v991_v49, %v990_v47  ;;  %v1728_v58 = vpack.c.bf16 %v1023_v50, %v1022_v48  ;;  %v862_v61 = vmul.f32 %v1881_v55, %v2118_v37  ;;  %v894_v62 = vmul.f32 %v1913_v56, %v2118_v37 }
  0xf2   : > { %1797 = vst [vmem:[%s2148_s10 + $0x18] sm:$0xff] %v1653_v51   ;;  %1813 = vst [vmem:[%s2148_s10 + $0x98] sm:$0xff] %v1733_v52   ;;  %v624_v63 = vpop.f32.mrf.mxu0  ;;  %v752_v0 = vpop.f32.mrf.mxu1  ;;  %v930_v1 = vadd.f32 %v2125_v42, %v859_v53  ;;  %v962_v2 = vadd.f32 %v2125_v42, %v891_v54  ;;  %v996_v9 = vmax.f32 %v932_v59, 0.0  ;;  %v1028_v10 = vmax.f32 %v964_v60, 0.0 }
  0xf3   : > { %1796 = vst [vmem:[%s2148_s10 + $0x10] sm:$0xff] %v1648_v57   ;;  %1812 = vst [vmem:[%s2148_s10 + $0x90] sm:$0xff] %v1728_v58   ;;  %v860_v3 = vmul.f32 %v2118_v37, %v624_v63  ;;  %v892_v4 = vmul.f32 %v2118_v37, %v752_v0  ;;  %v933_v5 = vadd.f32 %v2125_v42, %v862_v61 }
  0xf4   : > { %v965_v6 = vadd.f32 %v2125_v42, %v894_v62  ;;  %v1884_v7 = vpop.f32.mrf.mxu0  ;;  %v1916_v8 = vpop.f32.mrf.mxu1  ;;  %v994_v19 = vmax.f32 %v930_v1, 0.0  ;;  %v1026_v20 = vmax.f32 %v962_v2, 0.0 }
  0xf5   : > { %v931_v11 = vadd.f32 %v2125_v42, %v860_v3  ;;  %v963_v12 = vadd.f32 %v2125_v42, %v892_v4  ;;  %v997_v13 = vmax.f32 %v933_v5, 0.0  ;;  %v865_v15 = vmul.f32 %v1884_v7, %v2118_v37 }
  0xf6   : > { %v1029_v14 = vmax.f32 %v965_v6, 0.0  ;;  %v897_v16 = vmul.f32 %v1916_v8, %v2118_v37  ;;  %v637_v17 = vpop.f32.mrf.mxu0  ;;  %v765_v18 = vpop.f32.mrf.mxu1 }
  0xf7   : > { %v995_v21 = vmax.f32 %v931_v11, 0.0  ;;  %v1027_v22 = vmax.f32 %v963_v12, 0.0  ;;  %v1663_v23 = vpack.c.bf16 %v997_v13, %v996_v9  ;;  %v863_v25 = vmul.f32 %v2118_v37, %v637_v17 }
  0xf8   : > { %v1743_v24 = vpack.c.bf16 %v1029_v14, %v1028_v10  ;;  %v895_v26 = vmul.f32 %v2118_v37, %v765_v18  ;;  %v1885_v27 = vpop.f32.mrf.mxu0  ;;  %v1917_v28 = vpop.f32.mrf.mxu1  ;;  %v936_v31 = vadd.f32 %v2125_v42, %v865_v15  ;;  %v968_v32 = vadd.f32 %v2125_v42, %v897_v16 }
  0xf9   : > { %v1658_v29 = vpack.c.bf16 %v995_v21, %v994_v19  ;;  %v1738_v30 = vpack.c.bf16 %v1027_v22, %v1026_v20  ;;  %1799 = vst [vmem:[%s2148_s10 + $0x28] sm:$0xff] %v1663_v23   ;;  %v866_v33 = vmul.f32 %v1885_v27, %v2118_v37  ;;  %v898_v34 = vmul.f32 %v1917_v28, %v2118_v37 }
  0xfa   : > { %1815 = vst [vmem:[%s2148_s10 + $0xa8] sm:$0xff] %v1743_v24   ;;  %v640_v35 = vpop.f32.mrf.mxu0  ;;  %v768_v36 = vpop.f32.mrf.mxu1  ;;  %v934_v38 = vadd.f32 %v2125_v42, %v863_v25  ;;  %v966_v39 = vadd.f32 %v2125_v42, %v895_v26  ;;  %v1000_v51 = vmax.f32 %v936_v31, 0.0  ;;  %v1032_v52 = vmax.f32 %v968_v32, 0.0 }
  0xfb   : > { %1798 = vst [vmem:[%s2148_s10 + $0x20] sm:$0xff] %v1658_v29   ;;  %1814 = vst [vmem:[%s2148_s10 + $0xa0] sm:$0xff] %v1738_v30   ;;  %v864_v40 = vmul.f32 %v2118_v37, %v640_v35  ;;  %v896_v41 = vmul.f32 %v2118_v37, %v768_v36  ;;  %v937_v43 = vadd.f32 %v2125_v42, %v866_v33 }
  0xfc   : > { %v969_v44 = vadd.f32 %v2125_v42, %v898_v34  ;;  %v1888_v45 = vpop.f32.mrf.mxu0  ;;  %v1920_v46 = vpop.f32.mrf.mxu1  ;;  %v998_v57 = vmax.f32 %v934_v38, 0.0  ;;  %v1030_v58 = vmax.f32 %v966_v39, 0.0 }
  0xfd   : > { %v935_v47 = vadd.f32 %v2125_v42, %v864_v40  ;;  %v967_v48 = vadd.f32 %v2125_v42, %v896_v41  ;;  %v869_v49 = vmul.f32 %v1888_v45, %v2118_v37  ;;  %v901_v50 = vmul.f32 %v1920_v46, %v2118_v37 }
  0xfe   : > { %v1001_v53 = vmax.f32 %v937_v43, 0.0  ;;  %v1033_v54 = vmax.f32 %v969_v44, 0.0  ;;  %v653_v55 = vpop.f32.mrf.mxu0  ;;  %v781_v56 = vpop.f32.mrf.mxu1 }
  0xff   : > { %v999_v59 = vmax.f32 %v935_v47, 0.0  ;;  %v1031_v60 = vmax.f32 %v967_v48, 0.0  ;;  %v867_v63 = vmul.f32 %v2118_v37, %v653_v55  ;;  %v899_v0 = vmul.f32 %v2118_v37, %v781_v56 }
 0x100   : > { %v1673_v61 = vpack.c.bf16 %v1001_v53, %v1000_v51  ;;  %v1753_v62 = vpack.c.bf16 %v1033_v54, %v1032_v52  ;;  %v1889_v1 = vpop.f32.mrf.mxu0  ;;  %v1921_v2 = vpop.f32.mrf.mxu1  ;;  %v940_v5 = vadd.f32 %v2125_v42, %v869_v49  ;;  %v972_v6 = vadd.f32 %v2125_v42, %v901_v50 }
 0x101   : > { %v1668_v3 = vpack.c.bf16 %v999_v59, %v998_v57  ;;  %v1748_v4 = vpack.c.bf16 %v1031_v60, %v1030_v58  ;;  %v870_v7 = vmul.f32 %v1889_v1, %v2118_v37  ;;  %v902_v8 = vmul.f32 %v1921_v2, %v2118_v37 }
 0x102   : > { %1801 = vst [vmem:[%s2148_s10 + $0x38] sm:$0xff] %v1673_v61   ;;  %1817 = vst [vmem:[%s2148_s10 + $0xb8] sm:$0xff] %v1753_v62   ;;  %v656_v9 = vpop.f32.mrf.mxu0  ;;  %v784_v10 = vpop.f32.mrf.mxu1  ;;  %v938_v11 = vadd.f32 %v2125_v42, %v867_v63  ;;  %v970_v12 = vadd.f32 %v2125_v42, %v899_v0  ;;  %v1004_v19 = vmax.f32 %v940_v5, 0.0  ;;  %v1036_v20 = vmax.f32 %v972_v6, 0.0 }
 0x103   : > { %1800 = vst [vmem:[%s2148_s10 + $0x30] sm:$0xff] %v1668_v3   ;;  %1816 = vst [vmem:[%s2148_s10 + $0xb0] sm:$0xff] %v1748_v4   ;;  %v868_v13 = vmul.f32 %v2118_v37, %v656_v9  ;;  %v900_v14 = vmul.f32 %v2118_v37, %v784_v10  ;;  %v941_v15 = vadd.f32 %v2125_v42, %v870_v7 }
 0x104   : > { %v973_v16 = vadd.f32 %v2125_v42, %v902_v8  ;;  %v1892_v17 = vpop.f32.mrf.mxu0  ;;  %v1924_v18 = vpop.f32.mrf.mxu1  ;;  %v1002_v29 = vmax.f32 %v938_v11, 0.0  ;;  %v1034_v30 = vmax.f32 %v970_v12, 0.0 }
 0x105   : > { %v939_v21 = vadd.f32 %v2125_v42, %v868_v13  ;;  %v971_v22 = vadd.f32 %v2125_v42, %v900_v14  ;;  %v1005_v23 = vmax.f32 %v941_v15, 0.0  ;;  %v873_v25 = vmul.f32 %v1892_v17, %v2118_v37 }
 0x106   : > { %v1037_v24 = vmax.f32 %v973_v16, 0.0  ;;  %v905_v26 = vmul.f32 %v1924_v18, %v2118_v37  ;;  %v669_v27 = vpop.f32.mrf.mxu0  ;;  %v797_v28 = vpop.f32.mrf.mxu1 }
 0x107   : > { %v1003_v31 = vmax.f32 %v939_v21, 0.0  ;;  %v1035_v32 = vmax.f32 %v971_v22, 0.0  ;;  %v1683_v33 = vpack.c.bf16 %v1005_v23, %v1004_v19  ;;  %v871_v35 = vmul.f32 %v2118_v37, %v669_v27 }
 0x108   : > { %v1763_v34 = vpack.c.bf16 %v1037_v24, %v1036_v20  ;;  %v903_v36 = vmul.f32 %v2118_v37, %v797_v28  ;;  %v1893_v38 = vpop.f32.mrf.mxu0  ;;  %v1925_v39 = vpop.f32.mrf.mxu1  ;;  %v944_v43 = vadd.f32 %v2125_v42, %v873_v25  ;;  %v976_v44 = vadd.f32 %v2125_v42, %v905_v26 }
 0x109   : > { %v1678_v40 = vpack.c.bf16 %v1003_v31, %v1002_v29  ;;  %v1758_v41 = vpack.c.bf16 %v1035_v32, %v1034_v30  ;;  %1803 = vst [vmem:[%s2148_s10 + $0x48] sm:$0xff] %v1683_v33   ;;  %v874_v45 = vmul.f32 %v1893_v38, %v2118_v37  ;;  %v906_v46 = vmul.f32 %v1925_v39, %v2118_v37 }
 0x10a   : > { %1819 = vst [vmem:[%s2148_s10 + $0xc8] sm:$0xff] %v1763_v34   ;;  %v672_v47 = vpop.f32.mrf.mxu0  ;;  %v800_v48 = vpop.f32.mrf.mxu1  ;;  %v942_v49 = vadd.f32 %v2125_v42, %v871_v35  ;;  %v974_v50 = vadd.f32 %v2125_v42, %v903_v36  ;;  %v1008_v61 = vmax.f32 %v944_v43, 0.0  ;;  %v1040_v62 = vmax.f32 %v976_v44, 0.0 }
 0x10b   : > { %1802 = vst [vmem:[%s2148_s10 + $0x40] sm:$0xff] %v1678_v40   ;;  %1818 = vst [vmem:[%s2148_s10 + $0xc0] sm:$0xff] %v1758_v41   ;;  %v872_v51 = vmul.f32 %v2118_v37, %v672_v47  ;;  %v904_v52 = vmul.f32 %v2118_v37, %v800_v48  ;;  %v945_v53 = vadd.f32 %v2125_v42, %v874_v45 }
 0x10c   : > { %v977_v54 = vadd.f32 %v2125_v42, %v906_v46  ;;  %v1896_v55 = vpop.f32.mrf.mxu0  ;;  %v1928_v56 = vpop.f32.mrf.mxu1  ;;  %v1006_v3 = vmax.f32 %v942_v49, 0.0  ;;  %v1038_v4 = vmax.f32 %v974_v50, 0.0 }
 0x10d   : > { %v943_v57 = vadd.f32 %v2125_v42, %v872_v51  ;;  %v975_v58 = vadd.f32 %v2125_v42, %v904_v52  ;;  %v877_v59 = vmul.f32 %v1896_v55, %v2118_v37  ;;  %v909_v60 = vmul.f32 %v1928_v56, %v2118_v37 }
 0x10e   : > { %v1009_v63 = vmax.f32 %v945_v53, 0.0  ;;  %v1041_v0 = vmax.f32 %v977_v54, 0.0  ;;  %v685_v1 = vpop.f32.mrf.mxu0  ;;  %v813_v2 = vpop.f32.mrf.mxu1 }
 0x10f   : > { %v1007_v5 = vmax.f32 %v943_v57, 0.0  ;;  %v1039_v6 = vmax.f32 %v975_v58, 0.0  ;;  %v875_v9 = vmul.f32 %v2118_v37, %v685_v1  ;;  %v907_v10 = vmul.f32 %v2118_v37, %v813_v2 }
 0x110   : > { %v1693_v7 = vpack.c.bf16 %v1009_v63, %v1008_v61  ;;  %v1773_v8 = vpack.c.bf16 %v1041_v0, %v1040_v62  ;;  %v1897_v11 = vpop.f32.mrf.mxu0  ;;  %v1929_v12 = vpop.f32.mrf.mxu1  ;;  %v948_v15 = vadd.f32 %v2125_v42, %v877_v59  ;;  %v980_v16 = vadd.f32 %v2125_v42, %v909_v60 }
 0x111   : > { %v1688_v13 = vpack.c.bf16 %v1007_v5, %v1006_v3  ;;  %v1768_v14 = vpack.c.bf16 %v1039_v6, %v1038_v4  ;;  %v878_v17 = vmul.f32 %v1897_v11, %v2118_v37  ;;  %v910_v18 = vmul.f32 %v1929_v12, %v2118_v37 }
 0x112   : > { %1805 = vst [vmem:[%s2148_s10 + $0x58] sm:$0xff] %v1693_v7   ;;  %1821 = vst [vmem:[%s2148_s10 + $0xd8] sm:$0xff] %v1773_v8   ;;  %v688_v19 = vpop.f32.mrf.mxu0  ;;  %v816_v20 = vpop.f32.mrf.mxu1  ;;  %v946_v21 = vadd.f32 %v2125_v42, %v875_v9  ;;  %v978_v22 = vadd.f32 %v2125_v42, %v907_v10  ;;  %v1012_v29 = vmax.f32 %v948_v15, 0.0  ;;  %v1044_v30 = vmax.f32 %v980_v16, 0.0 }
 0x113   : > { %1804 = vst [vmem:[%s2148_s10 + $0x50] sm:$0xff] %v1688_v13   ;;  %1820 = vst [vmem:[%s2148_s10 + $0xd0] sm:$0xff] %v1768_v14   ;;  %v876_v23 = vmul.f32 %v2118_v37, %v688_v19  ;;  %v908_v24 = vmul.f32 %v2118_v37, %v816_v20  ;;  %v949_v25 = vadd.f32 %v2125_v42, %v878_v17 }
 0x114   : > { %v981_v26 = vadd.f32 %v2125_v42, %v910_v18  ;;  %v1900_v27 = vpop.f32.mrf.mxu0  ;;  %v1932_v28 = vpop.f32.mrf.mxu1  ;;  %v1010_v40 = vmax.f32 %v946_v21, 0.0  ;;  %v1042_v41 = vmax.f32 %v978_v22, 0.0 }
 0x115   : > { %v947_v31 = vadd.f32 %v2125_v42, %v876_v23  ;;  %v979_v32 = vadd.f32 %v2125_v42, %v908_v24  ;;  %v1013_v33 = vmax.f32 %v949_v25, 0.0  ;;  %v881_v35 = vmul.f32 %v1900_v27, %v2118_v37 }
 0x116   : > { %v1045_v34 = vmax.f32 %v981_v26, 0.0  ;;  %v913_v36 = vmul.f32 %v1932_v28, %v2118_v37  ;;  %v701_v38 = vpop.f32.mrf.mxu0  ;;  %v829_v39 = vpop.f32.mrf.mxu1 }
 0x117   : > { %v1011_v43 = vmax.f32 %v947_v31, 0.0  ;;  %v1043_v44 = vmax.f32 %v979_v32, 0.0  ;;  %v1703_v45 = vpack.c.bf16 %v1013_v33, %v1012_v29  ;;  %v879_v47 = vmul.f32 %v2118_v37, %v701_v38 }
 0x118   : > { %v1783_v46 = vpack.c.bf16 %v1045_v34, %v1044_v30  ;;  %v911_v48 = vmul.f32 %v2118_v37, %v829_v39  ;;  %v1901_v49 = vpop.f32.mrf.mxu0  ;;  %v1933_v50 = vpop.f32.mrf.mxu1  ;;  %v952_v53 = vadd.f32 %v2125_v42, %v881_v35  ;;  %v984_v54 = vadd.f32 %v2125_v42, %v913_v36 }
 0x119   : > { %v1698_v51 = vpack.c.bf16 %v1011_v43, %v1010_v40  ;;  %v1778_v52 = vpack.c.bf16 %v1043_v44, %v1042_v41  ;;  %1807 = vst [vmem:[%s2148_s10 + $0x68] sm:$0xff] %v1703_v45   ;;  %v882_v55 = vmul.f32 %v1901_v49, %v2118_v37  ;;  %v914_v56 = vmul.f32 %v1933_v50, %v2118_v37 }
 0x11a   : > { %1823 = vst [vmem:[%s2148_s10 + $0xe8] sm:$0xff] %v1783_v46   ;;  %v704_v57 = vpop.f32.mrf.mxu0  ;;  %v832_v58 = vpop.f32.mrf.mxu1  ;;  %v950_v59 = vadd.f32 %v2125_v42, %v879_v47  ;;  %v982_v60 = vadd.f32 %v2125_v42, %v911_v48  ;;  %v1016_v3 = vmax.f32 %v952_v53, 0.0  ;;  %v1048_v4 = vmax.f32 %v984_v54, 0.0 }
 0x11b   : > { %1806 = vst [vmem:[%s2148_s10 + $0x60] sm:$0xff] %v1698_v51   ;;  %1822 = vst [vmem:[%s2148_s10 + $0xe0] sm:$0xff] %v1778_v52   ;;  %v880_v61 = vmul.f32 %v2118_v37, %v704_v57  ;;  %v912_v62 = vmul.f32 %v2118_v37, %v832_v58  ;;  %v953_v63 = vadd.f32 %v2125_v42, %v882_v55 }
 0x11c   : > { %v985_v0 = vadd.f32 %v2125_v42, %v914_v56  ;;  %v1014_v7 = vmax.f32 %v950_v59, 0.0  ;;  %v1046_v8 = vmax.f32 %v982_v60, 0.0 }
 0x11d   : > { %v951_v1 = vadd.f32 %v2125_v42, %v880_v61  ;;  %v983_v2 = vadd.f32 %v2125_v42, %v912_v62  ;;  %v1017_v5 = vmax.f32 %v953_v63, 0.0 }
 0x11e   : > { %v1049_v6 = vmax.f32 %v985_v0, 0.0 }
 0x11f   : > { %v1015_v9 = vmax.f32 %v951_v1, 0.0  ;;  %v1047_v37 = vmax.f32 %v983_v2, 0.0  ;;  %v1713_v10 = vpack.c.bf16 %v1017_v5, %v1016_v3 }
 0x120   : > { %v1793_v11 = vpack.c.bf16 %v1049_v6, %v1048_v4 }
 0x121   : > { %v1708_v12 = vpack.c.bf16 %v1015_v9, %v1014_v7  ;;  %v1788_v13 = vpack.c.bf16 %v1047_v37, %v1046_v8  ;;  %1809 = vst [vmem:[%s2148_s10 + $0x78] sm:$0xff] %v1713_v10  }
 0x122   : > { %1825 = vst [vmem:[%s2148_s10 + $0xf8] sm:$0xff] %v1793_v11  }
 0x123   : > { %1808 = vst [vmem:[%s2148_s10 + $0x70] sm:$0xff] %v1708_v12   ;;  %1824 = vst [vmem:[%s2148_s10 + $0xf0] sm:$0xff] %v1788_v13  }
 0x124 PF: > { %s14_s15 = sadd.s32 1, %s1994_s15  }
 0x125   : > { %p11_p4 = scmp.ge.s32.totalorder %s14_s15, 4  }
 0x127   :  { %13 = sbr.rel (!%p11_p4) target bundleno = 1 (0x1), region = 66 }

// kernel: simplenet7_forward.7
= control target key start
LH: loop header
LB: loop body
LE: loop exit
PB: predicated region body
PF: predicated region fallthrough
CT: control target
= control target key end

     0   :  { %s2686_s15 = smov 0   ;;  %s3138_s0 = inlined_call_operand.vmem [shape: bf16[256,1152], index: 0, kind: input, shape index: {}]   ;;  %s3139_s1 = inlined_call_operand.vmem [shape: bf16[1152,128], index: 1, kind: input, shape index: {}]   ;;  %s3140_s2 = inlined_call_operand.vmem [shape: f32[1,128], index: 2, kind: input, shape index: {}]   ;;  %s3141_s3 = inlined_call_operand.vmem [shape: f32[1,128], index: 3, kind: input, shape index: {}]   ;;  %s3142_s4 = inlined_call_operand.vmem [shape: bf16[256,128], index: 4, kind: output, shape index: {}]  }
   0x1 LB: > { %s1912_s16 = sadd.s32 4294967295, %s2659_s15   ;;  %p1916_p0 = scmp.ge.s32.totalorder %s2659_s15, 1  ;;  %s2659_s15 = sphi %s2686_s15, %s14_s15  }
   0x2   : > { %p164_p1 = scmp.lt.s32.totalorder %s2659_s15, 3 }
   0x4   : > { %p165_p2 = pnand %p1916_p0, %p164_p1 }
   0x6   : > { %168 = sbr.rel (%p165_p2) target bundleno = 392 (0x188), region = 36 }
   0xb   : > { %v2477_v0 = vld [vmem:[%s3139_s1 + $0x78] sm:$0xff]   ;;  %v2481_v4 = vld [vmem:[%s3139_s1 + $0x70] sm:$0xff]   ;;  %v2485_v8 = vld [vmem:[%s3139_s1 + $0x68] sm:$0xff]   ;;  %s1917_s23 = sshll.u32 %s1912_s16, 4 }
   0xc   : > { %v2478_v1 = vld [vmem:[%s3139_s1 + $0xf8] sm:$0xff]   ;;  %2148 = vmatprep.subr.bf16.mxu0 %v2477_v0  ;;  %v2482_v5 = vld [vmem:[%s3139_s1 + $0xf0] sm:$0xff]   ;;  %v2486_v9 = vld [vmem:[%s3139_s1 + $0xe8] sm:$0xff]   ;;  %p192_p3 = scmp.lt.s32.totalorder %s1917_s23, 31 }
   0xd   : > { %v2479_v2 = vld [vmem:[%s3139_s1 + $0x38] sm:$0xff]   ;;  %2212 = vmatprep.subr.bf16.mxu1 %v2478_v1  ;;  %v2483_v6 = vld [vmem:[%s3139_s1 + $0x30] sm:$0xff]   ;;  %v2487_v10 = vld [vmem:[%s3139_s1 + $0x28] sm:$0xff]  }
   0xe   : > { %v2480_v3 = vld [vmem:[%s3139_s1 + $0xb8] sm:$0xff]   ;;  %2149 = vmatpush3.bf16.msra.mxu0 %v2479_v2  ;;  %v2484_v7 = vld [vmem:[%s3139_s1 + $0xb0] sm:$0xff]   ;;  %v2488_v11 = vld [vmem:[%s3139_s1 + $0xa8] sm:$0xff]   ;;  %s3172_s23 = smov (!%p192_p3, %s1917_s23), 31 }
   0xf   : > { %2213 = vmatpush3.bf16.msra.mxu1 %v2480_v3  ;;  %2150 = vmatprep.subr.bf16.mxu0 %v2481_v4  ;;  %v2489_v12 = vld [vmem:[%s3139_s1 + $0x60] sm:$0xff]   ;;  %v2493_v16 = vld [vmem:[%s3139_s1 + $0x58] sm:$0xff]   ;;  %v2497_v20 = vld [vmem:[%s3139_s1 + $0x50] sm:$0xff]   ;;  %s2468_s21 = smul.u32 36, %s3172_s23  ;;  %s1920_s28 = sshll.u32 %s3172_s23, 2 }
  0x10   : > { %2214 = vmatprep.subr.bf16.mxu1 %v2482_v5  ;;  %v2490_v13 = vld [vmem:[%s3139_s1 + $0xe0] sm:$0xff]   ;;  %v2494_v17 = vld [vmem:[%s3139_s1 + $0xd8] sm:$0xff]   ;;  %v2498_v21 = vld [vmem:[%s3139_s1 + $0xd0] sm:$0xff]   ;;  %s3106_s30 = scalar_lea.vmem %s3142_s4, %s1920_s28 }
  0x11   : > { %v2491_v14 = vld [vmem:[%s3139_s1 + $0x20] sm:$0xff]   ;;  %v2495_v18 = vld [vmem:[%s3139_s1 + $0x18] sm:$0xff]   ;;  %v2499_v22 = vld [vmem:[%s3139_s1 + $0x10] sm:$0xff]   ;;  %s2792_s6 = scalar_lea.vmem %s3138_s0, %s2468_s21 }
  0x12   : > { %2151 = vmatpush3.bf16.msra.mxu0 %v2483_v6  ;;  %v2492_v15 = vld [vmem:[%s3139_s1 + $0xa0] sm:$0xff]   ;;  %v2496_v19 = vld [vmem:[%s3139_s1 + $0x98] sm:$0xff]   ;;  %v2500_v23 = vld [vmem:[%s3139_s1 + $0x90] sm:$0xff]  }
  0x13   : > { %2215 = vmatpush3.bf16.msra.mxu1 %v2484_v7  ;;  %2152 = vmatprep.subr.bf16.mxu0 %v2485_v8  ;;  %v2501_v24 = vld [vmem:[%s3139_s1 + $0x48] sm:$0xff]   ;;  %v2505_v28 = vld [vmem:[%s3139_s1 + $0x40] sm:$0xff]   ;;  %v2515_v36 = vld [vmem:[%s3139_s1 + $0x178] sm:$0xff]  }
  0x14   : > { %2216 = vmatprep.subr.bf16.mxu1 %v2486_v9  ;;  %v2502_v25 = vld [vmem:[%s3139_s1 + $0xc8] sm:$0xff]   ;;  %v2506_v29 = vld [vmem:[%s3139_s1 + $0xc0] sm:$0xff]   ;;  %v2516_v37 = vld [vmem:[%s3139_s1 + $0x1f8] sm:$0xff]  }
  0x15   : > { %v2503_v26 = vld [vmem:[%s3139_s1 + $0x8] sm:$0xff]   ;;  %v2507_v30 = vld [vmem:[%s3139_s1] sm:$0xff]   ;;  %v2517_v38 = vld [vmem:[%s3139_s1 + $0x138] sm:$0xff]  }
  0x16   : > { %2153 = vmatpush3.bf16.msra.mxu0 %v2487_v10  ;;  %v2504_v27 = vld [vmem:[%s3139_s1 + $0x88] sm:$0xff]   ;;  %v2508_v31 = vld [vmem:[%s3139_s1 + $0x80] sm:$0xff]   ;;  %v2518_v39 = vld [vmem:[%s3139_s1 + $0x1b8] sm:$0xff]  }
  0x17   : > { %2217 = vmatpush3.bf16.msra.mxu1 %v2488_v11  ;;  %2154 = vmatprep.subr.bf16.mxu0 %v2489_v12  ;;  %v2509_v32 = vld [vmem:[%s2792_s6] ss:$36 sps:$4 sm:$0xff]   ;;  %v2512_v34 = vld [vmem:[%s2792_s6 + $0x8] ss:$36 sps:$4 sm:$0xff]   ;;  %v2521_v41 = vld [vmem:[%s2792_s6 + $0x54] ss:$36 sps:$4 sm:$0xff]  }
  0x18   : > { %2218 = vmatprep.subr.bf16.mxu1 %v2490_v13  ;;  %v2511_v33 = vld [vmem:[%s2792_s6 + $0x4] ss:$36 sps:$4 sm:$0xff]   ;;  %v2514_v35 = vld [vmem:[%s2792_s6 + $0xc] ss:$36 sps:$4 sm:$0xff]   ;;  %v2529_v48 = vld [vmem:[%s2792_s6 + $0x94] ss:$36 sps:$4 sm:$0xff]  }
  0x19   : > { %1261 = vmatprep.mubr.bf16.mxu0 %v2511_v33  ;;  %1358 = vmatprep.mubr.bf16.mxu1 %v2514_v35  ;;  %v2519_v40 = vld [vmem:[%s2792_s6 + $0x4c] ss:$36 sps:$4 sm:$0xff]   ;;  %v2531_v49 = vld [vmem:[%s2792_s6 + $0x9c] ss:$36 sps:$4 sm:$0xff]   ;;  %v2541_v57 = vld [vmem:[%s2792_s6 + $0xe4] ss:$36 sps:$4 sm:$0xff]  }
  0x1a   : > { %2155 = vmatpush3.bf16.msra.mxu0 %v2491_v14  ;;  %v2523_v42 = vld [vmem:[%s2792_s6 + $0x48] ss:$36 sps:$4 sm:$0xff]   ;;  %v2524_v43 = vld [vmem:[%s2792_s6 + $0x50] ss:$36 sps:$4 sm:$0xff]   ;;  %v2534_v51 = vld [vmem:[%s2792_s6 + $0x98] ss:$36 sps:$4 sm:$0xff]  }
  0x1b   : > { %2219 = vmatpush3.bf16.msra.mxu1 %v2492_v15  ;;  %2156 = vmatprep.subr.bf16.mxu0 %v2493_v16  ;;  %v2525_v44 = vld [vmem:[%s3139_s1 + $0x170] sm:$0xff]   ;;  %v2535_v52 = vld [vmem:[%s3139_s1 + $0x168] sm:$0xff]   ;;  %v2539_v56 = vld [vmem:[%s2792_s6 + $0xdc] ss:$36 sps:$4 sm:$0xff]  }
  0x1c   : > { %2220 = vmatprep.subr.bf16.mxu1 %v2494_v17  ;;  %v2526_v45 = vld [vmem:[%s3139_s1 + $0x1f0] sm:$0xff]   ;;  %v2536_v53 = vld [vmem:[%s3139_s1 + $0x1e8] sm:$0xff]   ;;  %v2543_v58 = vld [vmem:[%s2792_s6 + $0xd8] ss:$36 sps:$4 sm:$0xff]  }
  0x1d   : > { %v2527_v46 = vld [vmem:[%s3139_s1 + $0x130] sm:$0xff]   ;;  %v2537_v54 = vld [vmem:[%s3139_s1 + $0x128] sm:$0xff]   ;;  %v2544_v59 = vld [vmem:[%s2792_s6 + $0xe0] ss:$36 sps:$4 sm:$0xff]  }
  0x1e   : > { %2157 = vmatpush3.bf16.msra.mxu0 %v2495_v18  ;;  %v2528_v47 = vld [vmem:[%s3139_s1 + $0x1b0] sm:$0xff]   ;;  %v2538_v55 = vld [vmem:[%s3139_s1 + $0x1a8] sm:$0xff]   ;;  %v2545_v60 = vld [vmem:[%s3139_s1 + $0x160] sm:$0xff]  }
  0x1f   : > { %2221 = vmatpush3.bf16.msra.mxu1 %v2496_v19  ;;  %2158 = vmatprep.subr.bf16.mxu0 %v2497_v20  ;;  %v2533_v50 = vld [vmem:[%s2792_s6 + $0x90] ss:$36 sps:$4 sm:$0xff]   ;;  %v2546_v61 = vld [vmem:[%s3139_s1 + $0x1e0] sm:$0xff]   ;;  %v2555_v3 = vld [vmem:[%s3139_s1 + $0x158] sm:$0xff]  }
  0x20   : > { %2222 = vmatprep.subr.bf16.mxu1 %v2498_v21  ;;  %v2547_v62 = vld [vmem:[%s3139_s1 + $0x120] sm:$0xff]   ;;  %v2551_v1 = vld [vmem:[%s2792_s6 + $0x12c] ss:$36 sps:$4 sm:$0xff]   ;;  %v2556_v5 = vld [vmem:[%s3139_s1 + $0x1d8] sm:$0xff]  }
  0x21   : > { %v2548_v63 = vld [vmem:[%s3139_s1 + $0x1a0] sm:$0xff]   ;;  %v2554_v4 = vld [vmem:[%s2792_s6 + $0x128] ss:$36 sps:$4 sm:$0xff]   ;;  %v2557_v6 = vld [vmem:[%s3139_s1 + $0x118] sm:$0xff]  }
  0x22   : > { %2159 = vmatpush3.bf16.msra.mxu0 %v2499_v22  ;;  %v2549_v0 = vld [vmem:[%s2792_s6 + $0x124] ss:$36 sps:$4 sm:$0xff]   ;;  %v2558_v7 = vld [vmem:[%s3139_s1 + $0x198] sm:$0xff]   ;;  %v2559_v8 = vld [vmem:[%s2792_s6 + $0x16c] ss:$36 sps:$4 sm:$0xff]  }
  0x23   : > { %2223 = vmatpush3.bf16.msra.mxu1 %v2500_v23  ;;  %2160 = vmatprep.subr.bf16.mxu0 %v2501_v24  ;;  %v2553_v2 = vld [vmem:[%s2792_s6 + $0x120] ss:$36 sps:$4 sm:$0xff]   ;;  %v2561_v9 = vld [vmem:[%s2792_s6 + $0x174] ss:$36 sps:$4 sm:$0xff]   ;;  %v2563_v12 = vld [vmem:[%s2792_s6 + $0x168] ss:$36 sps:$4 sm:$0xff]  }
  0x24   : > { %2224 = vmatprep.subr.bf16.mxu1 %v2502_v25  ;;  %v2565_v10 = vld [vmem:[%s3139_s1 + $0x150] sm:$0xff]   ;;  %v2571_v17 = vld [vmem:[%s2792_s6 + $0x1bc] ss:$36 sps:$4 sm:$0xff]   ;;  %v2575_v18 = vld [vmem:[%s3139_s1 + $0x148] sm:$0xff]  }
  0x25   : > { %v2566_v11 = vld [vmem:[%s3139_s1 + $0x1d0] sm:$0xff]   ;;  %v2576_v19 = vld [vmem:[%s3139_s1 + $0x1c8] sm:$0xff]   ;;  %v2574_v23 = vld [vmem:[%s2792_s6 + $0x1b8] ss:$36 sps:$4 sm:$0xff]  }
  0x26   : > { %2161 = vmatpush3.bf16.msra.mxu0 %v2503_v26  ;;  %v2567_v13 = vld [vmem:[%s3139_s1 + $0x110] sm:$0xff]   ;;  %v2577_v20 = vld [vmem:[%s3139_s1 + $0x108] sm:$0xff]   ;;  %v2579_v24 = vld [vmem:[%s2792_s6 + $0x1fc] ss:$36 sps:$4 sm:$0xff]  }
  0x27   : > { %2225 = vmatpush3.bf16.msra.mxu1 %v2504_v27  ;;  %2162 = vmatprep.subr.bf16.mxu0 %v2505_v28  ;;  %v2568_v14 = vld [vmem:[%s3139_s1 + $0x190] sm:$0xff]   ;;  %v2578_v21 = vld [vmem:[%s3139_s1 + $0x188] sm:$0xff]   ;;  %v2585_v26 = vld [vmem:[%s3139_s1 + $0x140] sm:$0xff]  }
  0x28   : > { %2226 = vmatprep.subr.bf16.mxu1 %v2506_v29  ;;  %v2564_v15 = vld [vmem:[%s2792_s6 + $0x170] ss:$36 sps:$4 sm:$0xff]   ;;  %v2581_v25 = vld [vmem:[%s2792_s6 + $0x204] ss:$36 sps:$4 sm:$0xff]  }
  0x29   : > { %v2569_v16 = vld [vmem:[%s2792_s6 + $0x1b4] ss:$36 sps:$4 sm:$0xff]   ;;  %v2586_v27 = vld [vmem:[%s3139_s1 + $0x1c0] sm:$0xff]  }
  0x2a   : > { %2163 = vmatpush3.bf16.msra.mxu0 %v2507_v30  ;;  %v2573_v22 = vld [vmem:[%s2792_s6 + $0x1b0] ss:$36 sps:$4 sm:$0xff]   ;;  %v2587_v28 = vld [vmem:[%s3139_s1 + $0x100] sm:$0xff]   ;;  %v2583_v30 = vld [vmem:[%s2792_s6 + $0x1f8] ss:$36 sps:$4 sm:$0xff]  }
  0x2b   : > { %2227 = vmatpush3.bf16.msra.mxu1 %v2508_v31  ;;  %2276 = vmatprep.subr.bf16.mxu0 %v2515_v36  ;;  %v2588_v29 = vld [vmem:[%s3139_s1 + $0x180] sm:$0xff]   ;;  %v2591_v33 = vld [vmem:[%s2792_s6 + $0x14] ss:$36 sps:$4 sm:$0xff]  }
  0x2c   : > { %2340 = vmatprep.subr.bf16.mxu1 %v2516_v37  ;;  %v2584_v31 = vld [vmem:[%s2792_s6 + $0x200] ss:$36 sps:$4 sm:$0xff]   ;;  %v2589_v35 = vld [vmem:[%s2792_s6 + $0x10] ss:$36 sps:$4 sm:$0xff]   ;;  %v2592_v36 = vld [vmem:[%s2792_s6 + $0x18] ss:$36 sps:$4 sm:$0xff]  }
  0x2d   : > { %1262 = vmatmul.mubr.bf16.vlgmr.msra.gmra.mxu0 %v2509_v32  ;;  %v2595_v32 = vld [vmem:[%s3139_s1 + $0x238] sm:$0xff]  }
  0x2e   : > { %1359 = vmatmul.mubr.bf16.vlgmr.msra.gmra.mxu1 %v2512_v34  ;;  %2277 = vmatpush3.bf16.msra.mxu0 %v2517_v38  ;;  %v2594_v34 = vld [vmem:[%s2792_s6 + $0x1c] ss:$36 sps:$4 sm:$0xff]   ;;  %v2598_v38 = vld [vmem:[%s2792_s6 + $0x64] ss:$36 sps:$4 sm:$0xff]  }
  0x2f   : > { %2341 = vmatpush3.bf16.msra.mxu1 %v2518_v39  ;;  %1269 = vmatprep.mubr.bf16.mxu0 %v2519_v40  ;;  %v2596_v37 = vld [vmem:[%s2792_s6 + $0x5c] ss:$36 sps:$4 sm:$0xff]   ;;  %v2602_v39 = vld [vmem:[%s3139_s1 + $0x230] sm:$0xff]   ;;  %v2609_v40 = vld [vmem:[%s3139_s1 + $0x228] sm:$0xff]  }
  0x30   : > { %1366 = vmatprep.mubr.bf16.mxu1 %v2521_v41  ;;  %2278 = vmatprep.subr.bf16.mxu0 %v2525_v44  ;;  %v2600_v41 = vld [vmem:[%s2792_s6 + $0x58] ss:$36 sps:$4 sm:$0xff]   ;;  %v2605_v44 = vld [vmem:[%s2792_s6 + $0xac] ss:$36 sps:$4 sm:$0xff]  }
  0x31   : > { %2342 = vmatprep.subr.bf16.mxu1 %v2526_v45  ;;  %v2616_v45 = vld [vmem:[%s3139_s1 + $0x220] sm:$0xff]  }
  0x32   : > { %2279 = vmatpush3.bf16.msra.mxu0 %v2527_v46  ;;  %v2623_v46 = vld [vmem:[%s3139_s1 + $0x218] sm:$0xff]  }
  0x33   : > { %2343 = vmatpush3.bf16.msra.mxu1 %v2528_v47  ;;  %2280 = vmatprep.subr.bf16.mxu0 %v2535_v52  ;;  %v2607_v47 = vld [vmem:[%s2792_s6 + $0xa0] ss:$36 sps:$4 sm:$0xff]   ;;  %v2614_v52 = vld [vmem:[%s2792_s6 + $0xe8] ss:$36 sps:$4 sm:$0xff]  }
  0x34   : > { %2344 = vmatprep.subr.bf16.mxu1 %v2536_v53  ;;  %v2637_v53 = vld [vmem:[%s3139_s1 + $0x208] sm:$0xff]  }
  0x35   : > { %1270 = vmatmul.mubr.bf16.gmra.mxu0 %v2523_v42  ;;  %v2601_v42 = vld [vmem:[%s2792_s6 + $0x60] ss:$36 sps:$4 sm:$0xff]  }
  0x36   : > { %1367 = vmatmul.mubr.bf16.gmra.mxu1 %v2524_v43  ;;  %1277 = vmatprep.mubr.bf16.mxu0 %v2529_v48  ;;  %v2603_v43 = vld [vmem:[%s2792_s6 + $0xa4] ss:$36 sps:$4 sm:$0xff]  }
  0x37   : > { %1374 = vmatprep.mubr.bf16.mxu1 %v2531_v49  ;;  %2281 = vmatpush3.bf16.msra.mxu0 %v2537_v54  ;;  %v2608_v48 = vld [vmem:[%s2792_s6 + $0xa8] ss:$36 sps:$4 sm:$0xff]   ;;  %v2615_v54 = vld [vmem:[%s2792_s6 + $0xf0] ss:$36 sps:$4 sm:$0xff]  }
  0x38   : > { %2345 = vmatpush3.bf16.msra.mxu1 %v2538_v55  ;;  %2282 = vmatprep.subr.bf16.mxu0 %v2545_v60  ;;  %v2610_v49 = vld [vmem:[%s2792_s6 + $0xec] ss:$36 sps:$4 sm:$0xff]   ;;  %v2617_v55 = vld [vmem:[%s2792_s6 + $0x134] ss:$36 sps:$4 sm:$0xff]   ;;  %v2624_v60 = vld [vmem:[%s2792_s6 + $0x17c] ss:$36 sps:$4 sm:$0xff]  }
  0x39   : > { %2346 = vmatprep.subr.bf16.mxu1 %v2546_v61  ;;  %v2626_v61 = vld [vmem:[%s2792_s6 + $0x184] ss:$36 sps:$4 sm:$0xff]  }
  0x3b   : > { %2283 = vmatpush3.bf16.msra.mxu0 %v2547_v62  ;;  %v2628_v62 = vld [vmem:[%s2792_s6 + $0x178] ss:$36 sps:$4 sm:$0xff]  }
  0x3c   : > { %2347 = vmatpush3.bf16.msra.mxu1 %v2548_v63  ;;  %2284 = vmatprep.subr.bf16.mxu0 %v2555_v3  ;;  %v2629_v63 = vld [vmem:[%s2792_s6 + $0x180] ss:$36 sps:$4 sm:$0xff]   ;;  %v2636_v3 = vld [vmem:[%s2792_s6 + $0x1c8] ss:$36 sps:$4 sm:$0xff]  }
  0x3d   : > { %1278 = vmatmul.mubr.bf16.gmra.mxu0 %v2533_v50  ;;  %2348 = vmatprep.subr.bf16.mxu1 %v2556_v5  ;;  %v2612_v50 = vld [vmem:[%s2792_s6 + $0xf4] ss:$36 sps:$4 sm:$0xff]  }
  0x3e   : > { %1375 = vmatmul.mubr.bf16.gmra.mxu1 %v2534_v51  ;;  %1285 = vmatprep.mubr.bf16.mxu0 %v2539_v56  ;;  %v2630_v51 = vld [vmem:[%s3139_s1 + $0x210] sm:$0xff]   ;;  %v2619_v56 = vld [vmem:[%s2792_s6 + $0x13c] ss:$36 sps:$4 sm:$0xff]  }
  0x3f   : > { %1382 = vmatprep.mubr.bf16.mxu1 %v2541_v57  ;;  %2285 = vmatpush3.bf16.msra.mxu0 %v2557_v6  ;;  %v2644_v57 = vld [vmem:[%s3139_s1 + $0x200] sm:$0xff]   ;;  %v2640_v5 = vld [vmem:[%s2792_s6 + $0x214] ss:$36 sps:$4 sm:$0xff]   ;;  %v2642_v6 = vld [vmem:[%s2792_s6 + $0x208] ss:$36 sps:$4 sm:$0xff]  }
  0x40   : > { %2349 = vmatpush3.bf16.msra.mxu1 %v2558_v7  ;;  %2286 = vmatprep.subr.bf16.mxu0 %v2565_v10  ;;  %v2643_v7 = vld [vmem:[%s2792_s6 + $0x210] ss:$36 sps:$4 sm:$0xff]   ;;  %v2647_v10 = vld [vmem:[%s2792_s6 + $0x68] ss:$36 sps:$4 sm:$0xff]  }
  0x41   : > { %2350 = vmatprep.subr.bf16.mxu1 %v2566_v11  ;;  %v2648_v11 = vld [vmem:[%s2792_s6 + $0x188] ss:$36 sps:$4 sm:$0xff]  }
  0x43   : > { %2287 = vmatpush3.bf16.msra.mxu0 %v2567_v13  ;;  %v2650_v13 = vld [vmem:[%s2792_s6 + $0x1d0] ss:$36 sps:$4 sm:$0xff]  }
  0x44   : > { %2351 = vmatpush3.bf16.msra.mxu1 %v2568_v14  ;;  %2288 = vmatprep.subr.bf16.mxu0 %v2575_v18  ;;  %v2651_v14 = vld [vmem:[%s2792_s6 + $0xf8] ss:$36 sps:$4 sm:$0xff]  }
  0x45   : > { %1286 = vmatmul.mubr.bf16.gmra.mxu0 %v2543_v58  ;;  %2352 = vmatprep.subr.bf16.mxu1 %v2576_v19  ;;  %v2621_v58 = vld [vmem:[%s2792_s6 + $0x130] ss:$36 sps:$4 sm:$0xff]  }
  0x46   : > { %1383 = vmatmul.mubr.bf16.gmra.mxu1 %v2544_v59  ;;  %1293 = vmatprep.mubr.bf16.mxu0 %v2549_v0  ;;  %v2622_v59 = vld [vmem:[%s2792_s6 + $0x138] ss:$36 sps:$4 sm:$0xff]   ;;  %v2631_v0 = vld [vmem:[%s2792_s6 + $0x1c4] ss:$36 sps:$4 sm:$0xff]  }
  0x47   : > { %1390 = vmatprep.mubr.bf16.mxu1 %v2551_v1  ;;  %2289 = vmatpush3.bf16.msra.mxu0 %v2577_v20  ;;  %v2633_v1 = vld [vmem:[%s2792_s6 + $0x1cc] ss:$36 sps:$4 sm:$0xff]  }
  0x48   : > { %2353 = vmatpush3.bf16.msra.mxu1 %v2578_v21  ;;  %2290 = vmatprep.subr.bf16.mxu0 %v2585_v26 }
  0x49   : > { %2354 = vmatprep.subr.bf16.mxu1 %v2586_v27 }
  0x4b   : > { %2291 = vmatpush3.bf16.msra.mxu0 %v2587_v28 }
  0x4c   : > { %2355 = vmatpush3.bf16.msra.mxu1 %v2588_v29  ;;  %2420 = vmatprep.subr.bf16.mxu0 %v2595_v32 }
  0x4d   : > { %1294 = vmatmul.mubr.bf16.gmra.mxu0 %v2553_v2  ;;  %2452 = vmatprep.subr.bf16.mxu1 %v2595_v32  ;;  %v2635_v2 = vld [vmem:[%s2792_s6 + $0x1c0] ss:$36 sps:$4 sm:$0xff]  }
  0x4e   : > { %1391 = vmatmul.mubr.bf16.gmra.mxu1 %v2554_v4  ;;  %1301 = vmatprep.mubr.bf16.mxu0 %v2559_v8  ;;  %v2638_v4 = vld [vmem:[%s2792_s6 + $0x20c] ss:$36 sps:$4 sm:$0xff]   ;;  %v2645_v8 = vld [vmem:[%s2792_s6 + $0x20] ss:$36 sps:$4 sm:$0xff]  }
  0x4f   : > { %1398 = vmatprep.mubr.bf16.mxu1 %v2561_v9  ;;  %v2646_v9 = vld [vmem:[%s2792_s6 + $0x140] ss:$36 sps:$4 sm:$0xff]  }
  0x55   : > { %1302 = vmatmul.mubr.bf16.gmra.mxu0 %v2563_v12  ;;  %v2649_v12 = vld [vmem:[%s2792_s6 + $0xb0] ss:$36 sps:$4 sm:$0xff]  }
  0x56   : > { %1399 = vmatmul.mubr.bf16.gmra.mxu1 %v2564_v15  ;;  %1309 = vmatprep.mubr.bf16.mxu0 %v2569_v16  ;;  %v2652_v15 = vld [vmem:[%s2792_s6 + $0x218] ss:$36 sps:$4 sm:$0xff]  }
  0x57   : > { %1406 = vmatprep.mubr.bf16.mxu1 %v2571_v17 }
  0x5d   : > { %1310 = vmatmul.mubr.bf16.gmra.mxu0 %v2573_v22 }
  0x5e   : > { %1407 = vmatmul.mubr.bf16.gmra.mxu1 %v2574_v23  ;;  %1317 = vmatprep.mubr.bf16.mxu0 %v2579_v24 }
  0x5f   : > { %1414 = vmatprep.mubr.bf16.mxu1 %v2581_v25 }
  0x65   : > { %1318 = vmatmul.mubr.bf16.gmra.mxu0 %v2583_v30 }
  0x66   : > { %1415 = vmatmul.mubr.bf16.gmra.mxu1 %v2584_v31  ;;  %1455 = vmatprep.mubr.bf16.mxu0 %v2591_v33 }
  0x67   : > { %1552 = vmatprep.mubr.bf16.mxu1 %v2594_v34 }
  0x6d   : > { %1456 = vmatmul.mubr.bf16.vlgmr.msra.gmra.mxu0 %v2589_v35 }
  0x6e   : > { %1553 = vmatmul.mubr.bf16.vlgmr.msra.gmra.mxu1 %v2592_v36  ;;  %2421 = vmatpush3.bf16.msra.mxu0 %v2595_v32 }
  0x6f   : > { %2460 = vmatpush3.bf16.msra.mxu1 %v2595_v32  ;;  %1463 = vmatprep.mubr.bf16.mxu0 %v2596_v37 }
  0x70   : > { %1560 = vmatprep.mubr.bf16.mxu1 %v2598_v38  ;;  %2422 = vmatprep.subr.bf16.mxu0 %v2602_v39 }
  0x71   : > { %2453 = vmatprep.subr.bf16.mxu1 %v2602_v39 }
  0x72   : > { %2423 = vmatpush3.bf16.msra.mxu0 %v2602_v39 }
  0x73   : > { %2461 = vmatpush3.bf16.msra.mxu1 %v2602_v39  ;;  %2424 = vmatprep.subr.bf16.mxu0 %v2609_v40 }
  0x74   : > { %2454 = vmatprep.subr.bf16.mxu1 %v2609_v40 }
  0x75   : > { %1464 = vmatmul.mubr.bf16.gmra.mxu0 %v2600_v41 }
  0x76   : > { %1561 = vmatmul.mubr.bf16.gmra.mxu1 %v2601_v42  ;;  %1471 = vmatprep.mubr.bf16.mxu0 %v2603_v43 }
  0x77   : > { %1568 = vmatprep.mubr.bf16.mxu1 %v2605_v44  ;;  %2425 = vmatpush3.bf16.msra.mxu0 %v2609_v40 }
  0x78   : > { %2462 = vmatpush3.bf16.msra.mxu1 %v2609_v40  ;;  %2426 = vmatprep.subr.bf16.mxu0 %v2616_v45 }
  0x79   : > { %2455 = vmatprep.subr.bf16.mxu1 %v2616_v45 }
  0x7b   : > { %2427 = vmatpush3.bf16.msra.mxu0 %v2616_v45 }
  0x7c   : > { %2463 = vmatpush3.bf16.msra.mxu1 %v2616_v45  ;;  %2428 = vmatprep.subr.bf16.mxu0 %v2623_v46 }
  0x7d   : > { %1472 = vmatmul.mubr.bf16.gmra.mxu0 %v2607_v47  ;;  %2456 = vmatprep.subr.bf16.mxu1 %v2623_v46 }
  0x7e   : > { %1569 = vmatmul.mubr.bf16.gmra.mxu1 %v2608_v48  ;;  %1479 = vmatprep.mubr.bf16.mxu0 %v2610_v49 }
  0x7f   : > { %1576 = vmatprep.mubr.bf16.mxu1 %v2612_v50  ;;  %2429 = vmatpush3.bf16.msra.mxu0 %v2623_v46 }
  0x80   : > { %2464 = vmatpush3.bf16.msra.mxu1 %v2623_v46  ;;  %2430 = vmatprep.subr.bf16.mxu0 %v2630_v51 }
  0x81   : > { %2457 = vmatprep.subr.bf16.mxu1 %v2630_v51 }
  0x83   : > { %2431 = vmatpush3.bf16.msra.mxu0 %v2630_v51 }
  0x84   : > { %2465 = vmatpush3.bf16.msra.mxu1 %v2630_v51  ;;  %2432 = vmatprep.subr.bf16.mxu0 %v2637_v53 }
  0x85   : > { %1480 = vmatmul.mubr.bf16.gmra.mxu0 %v2614_v52  ;;  %2458 = vmatprep.subr.bf16.mxu1 %v2637_v53 }
  0x86   : > { %1577 = vmatmul.mubr.bf16.gmra.mxu1 %v2615_v54  ;;  %1487 = vmatprep.mubr.bf16.mxu0 %v2617_v55 }
  0x87   : > { %1584 = vmatprep.mubr.bf16.mxu1 %v2619_v56  ;;  %2433 = vmatpush3.bf16.msra.mxu0 %v2637_v53 }
  0x88   : > { %2466 = vmatpush3.bf16.msra.mxu1 %v2637_v53  ;;  %2434 = vmatprep.subr.bf16.mxu0 %v2644_v57 }
  0x89   : > { %2459 = vmatprep.subr.bf16.mxu1 %v2644_v57 }
  0x8b   : > { %2435 = vmatpush3.bf16.msra.mxu0 %v2644_v57 }
  0x8c   : > { %2467 = vmatpush3.bf16.msra.mxu1 %v2644_v57 }
  0x8d   : > { %1488 = vmatmul.mubr.bf16.gmra.mxu0 %v2621_v58 }
  0x8e   : > { %1585 = vmatmul.mubr.bf16.gmra.mxu1 %v2622_v59  ;;  %1495 = vmatprep.mubr.bf16.mxu0 %v2624_v60 }
  0x8f   : > { %1592 = vmatprep.mubr.bf16.mxu1 %v2626_v61 }
  0x95   : > { %1496 = vmatmul.mubr.bf16.gmra.mxu0 %v2628_v62 }
  0x96   : > { %1593 = vmatmul.mubr.bf16.gmra.mxu1 %v2629_v63  ;;  %1503 = vmatprep.mubr.bf16.mxu0 %v2631_v0 }
  0x97   : > { %1600 = vmatprep.mubr.bf16.mxu1 %v2633_v1 }
  0x9d   : > { %1504 = vmatmul.mubr.bf16.gmra.mxu0 %v2635_v2 }
  0x9e   : > { %1601 = vmatmul.mubr.bf16.gmra.mxu1 %v2636_v3  ;;  %1511 = vmatprep.mubr.bf16.mxu0 %v2638_v4 }
  0x9f   : > { %1608 = vmatprep.mubr.bf16.mxu1 %v2640_v5 }
  0xa5   : > { %1512 = vmatmul.mubr.bf16.gmra.mxu0 %v2642_v6 }
  0xa6   : > { %1609 = vmatmul.mubr.bf16.gmra.mxu1 %v2643_v7  ;;  %2436 = vmatprep.mubr.bf16.mxu0 %v2645_v8 }
  0xa7   : > { %2444 = vmatprep.mubr.bf16.mxu1 %v2646_v9 }
  0xad   : > { %2437 = vmatmul.mubr.bf16.vlgmr.msra.gmra.mxu0 %v2647_v10 }
  0xae   : > { %2445 = vmatmul.mubr.bf16.vlgmr.msra.gmra.mxu1 %v2648_v11  ;;  %2440 = vmatprep.mubr.bf16.mxu0 %v2649_v12 }
  0xaf   : > { %2448 = vmatprep.mubr.bf16.mxu1 %v2650_v13 }
  0xb5   : > { %2441 = vmatmul.mubr.bf16.gmra.mxu0 %v2651_v14 }
  0xb6   : > { %2449 = vmatmul.mubr.bf16.gmra.mxu1 %v2652_v15 }
  0xed   : > { %v2164_v16 = vpop.f32.mrf.mxu0 }
  0xee   : > { %v2228_v17 = vpop.f32.mrf.mxu1 }
  0xef   : > { %v2165_v18 = vpop.f32.mrf.mxu0 }
  0xf0   : > { %v2166_v19 = vadd.f32 %v2165_v18, %v2164_v16  ;;  %v2229_v20 = vpop.f32.mrf.mxu1 }
  0xf1   : > { %v2230_v21 = vadd.f32 %v2229_v20, %v2228_v17  ;;  %v2167_v22 = vpop.f32.mrf.mxu0 }
  0xf2   : > { %v2231_v23 = vpop.f32.mrf.mxu1 }
  0xf3   : > { %v2992_v24 = vadd.f32 %v2230_v21, %v2166_v19  ;;  %v2168_v25 = vpop.f32.mrf.mxu0 }
  0xf4   : > { %v2169_v26 = vadd.f32 %v2168_v25, %v2167_v22  ;;  %v2232_v27 = vpop.f32.mrf.mxu1 }
  0xf5   : > { %v2233_v28 = vadd.f32 %v2232_v27, %v2231_v23  ;;  %v2170_v29 = vpop.f32.mrf.mxu0 }
  0xf6   : > { %v2234_v30 = vpop.f32.mrf.mxu1 }
  0xf7   : > { %v2994_v31 = vadd.f32 %v2233_v28, %v2169_v26  ;;  %v2171_v32 = vpop.f32.mrf.mxu0 }
  0xf8   : > { %v2172_v33 = vadd.f32 %v2171_v32, %v2170_v29  ;;  %v2235_v34 = vpop.f32.mrf.mxu1 }
  0xf9   : > { %v2236_v35 = vadd.f32 %v2235_v34, %v2234_v30  ;;  %v2173_v36 = vpop.f32.mrf.mxu0 }
  0xfa   : > { %v2237_v37 = vpop.f32.mrf.mxu1 }
  0xfb   : > { %v2996_v38 = vadd.f32 %v2236_v35, %v2172_v33  ;;  %v2174_v39 = vpop.f32.mrf.mxu0 }
  0xfc   : > { %v2175_v40 = vadd.f32 %v2174_v39, %v2173_v36  ;;  %v2238_v41 = vpop.f32.mrf.mxu1 }
  0xfd   : > { %v2239_v42 = vadd.f32 %v2238_v41, %v2237_v37  ;;  %v2176_v43 = vpop.f32.mrf.mxu0 }
  0xfe   : > { %v2240_v44 = vpop.f32.mrf.mxu1 }
  0xff   : > { %v2998_v45 = vadd.f32 %v2239_v42, %v2175_v40  ;;  %v2177_v46 = vpop.f32.mrf.mxu0 }
 0x100   : > { %v2178_v47 = vadd.f32 %v2177_v46, %v2176_v43  ;;  %v2241_v48 = vpop.f32.mrf.mxu1 }
 0x101   : > { %v2242_v49 = vadd.f32 %v2241_v48, %v2240_v44  ;;  %v2179_v50 = vpop.f32.mrf.mxu0 }
 0x102   : > { %v2243_v51 = vpop.f32.mrf.mxu1 }
 0x103   : > { %v3000_v52 = vadd.f32 %v2242_v49, %v2178_v47  ;;  %v2180_v53 = vpop.f32.mrf.mxu0 }
 0x104   : > { %v2181_v54 = vadd.f32 %v2180_v53, %v2179_v50  ;;  %v2244_v55 = vpop.f32.mrf.mxu1 }
 0x105   : > { %v2245_v56 = vadd.f32 %v2244_v55, %v2243_v51  ;;  %v2182_v57 = vpop.f32.mrf.mxu0 }
 0x106   : > { %v2246_v58 = vpop.f32.mrf.mxu1 }
 0x107   : > { %v3002_v59 = vadd.f32 %v2245_v56, %v2181_v54  ;;  %v2183_v60 = vpop.f32.mrf.mxu0 }
 0x108   : > { %v2184_v61 = vadd.f32 %v2183_v60, %v2182_v57  ;;  %v2247_v62 = vpop.f32.mrf.mxu1 }
 0x109   : > { %v2248_v63 = vadd.f32 %v2247_v62, %v2246_v58  ;;  %v2185_v0 = vpop.f32.mrf.mxu0 }
 0x10a   : > { %v2249_v1 = vpop.f32.mrf.mxu1 }
 0x10b   : > { %v3004_v2 = vadd.f32 %v2248_v63, %v2184_v61  ;;  %v2186_v3 = vpop.f32.mrf.mxu0 }
 0x10c   : > { %v2187_v4 = vadd.f32 %v2186_v3, %v2185_v0  ;;  %v2250_v5 = vpop.f32.mrf.mxu1 }
 0x10d   : > { %v2251_v6 = vadd.f32 %v2250_v5, %v2249_v1  ;;  %v2188_v7 = vpop.f32.mrf.mxu0 }
 0x10e   : > { %v2252_v8 = vpop.f32.mrf.mxu1 }
 0x10f   : > { %v3006_v9 = vadd.f32 %v2251_v6, %v2187_v4  ;;  %v2189_v10 = vpop.f32.mrf.mxu0 }
 0x110   : > { %v2190_v11 = vadd.f32 %v2189_v10, %v2188_v7  ;;  %v2253_v12 = vpop.f32.mrf.mxu1 }
 0x111   : > { %v2254_v13 = vadd.f32 %v2253_v12, %v2252_v8  ;;  %v2191_v14 = vpop.f32.mrf.mxu0 }
 0x112   : > { %v2255_v15 = vpop.f32.mrf.mxu1 }
 0x113   : > { %v3008_v16 = vadd.f32 %v2254_v13, %v2190_v11  ;;  %v2192_v17 = vpop.f32.mrf.mxu0 }
 0x114   : > { %v2193_v18 = vadd.f32 %v2192_v17, %v2191_v14  ;;  %v2256_v19 = vpop.f32.mrf.mxu1 }
 0x115   : > { %3143 = vst [vmem:[#allocation2_spill] sm:$0xff] %v3008_v16  ;;  %v2257_v20 = vadd.f32 %v2256_v19, %v2255_v15  ;;  %v2194_v21 = vpop.f32.mrf.mxu0 }
 0x116   : > { %v2258_v22 = vpop.f32.mrf.mxu1 }
 0x117   : > { %v3010_v23 = vadd.f32 %v2257_v20, %v2193_v18  ;;  %v2195_v25 = vpop.f32.mrf.mxu0 }
 0x118   : > { %v2196_v26 = vadd.f32 %v2195_v25, %v2194_v21  ;;  %v2259_v27 = vpop.f32.mrf.mxu1 }
 0x119   : > { %3144 = vst [vmem:[#allocation3_spill] sm:$0xff] %v3010_v23  ;;  %v2260_v28 = vadd.f32 %v2259_v27, %v2258_v22  ;;  %v2197_v29 = vpop.f32.mrf.mxu0 }
 0x11a   : > { %v2261_v30 = vpop.f32.mrf.mxu1 }
 0x11b   : > { %v3012_v32 = vadd.f32 %v2260_v28, %v2196_v26  ;;  %v2198_v33 = vpop.f32.mrf.mxu0 }
 0x11c   : > { %v2199_v34 = vadd.f32 %v2198_v33, %v2197_v29  ;;  %v2262_v35 = vpop.f32.mrf.mxu1 }
 0x11d   : > { %v2263_v36 = vadd.f32 %v2262_v35, %v2261_v30  ;;  %v2200_v37 = vpop.f32.mrf.mxu0 }
 0x11e   : > { %v2264_v39 = vpop.f32.mrf.mxu1 }
 0x11f   : > { %v3014_v40 = vadd.f32 %v2263_v36, %v2199_v34  ;;  %v2201_v41 = vpop.f32.mrf.mxu0 }
 0x120   : > { %v2202_v42 = vadd.f32 %v2201_v41, %v2200_v37  ;;  %v2265_v43 = vpop.f32.mrf.mxu1 }
 0x121   : > { %3145 = vst [vmem:[#allocation4_spill] sm:$0xff] %v3014_v40  ;;  %v2266_v44 = vadd.f32 %v2265_v43, %v2264_v39  ;;  %v2203_v46 = vpop.f32.mrf.mxu0 }
 0x122   : > { %v2267_v47 = vpop.f32.mrf.mxu1 }
 0x123   : > { %v3016_v48 = vadd.f32 %v2266_v44, %v2202_v42  ;;  %v2204_v49 = vpop.f32.mrf.mxu0 }
 0x124   : > { %v2205_v50 = vadd.f32 %v2204_v49, %v2203_v46  ;;  %v2268_v51 = vpop.f32.mrf.mxu1 }
 0x125   : > { %3146 = vst [vmem:[#allocation5_spill] sm:$0xff] %v3016_v48  ;;  %v2269_v53 = vadd.f32 %v2268_v51, %v2267_v47  ;;  %v2206_v54 = vpop.f32.mrf.mxu0 }
 0x126   : > { %v2270_v55 = vpop.f32.mrf.mxu1 }
 0x127   : > { %v3018_v56 = vadd.f32 %v2269_v53, %v2205_v50  ;;  %v2207_v57 = vpop.f32.mrf.mxu0 }
 0x128   : > { %v2208_v58 = vadd.f32 %v2207_v57, %v2206_v54  ;;  %v2271_v60 = vpop.f32.mrf.mxu1 }
 0x129   : > { %3147 = vst [vmem:[#allocation6_spill] sm:$0xff] %v3018_v56  ;;  %v2272_v61 = vadd.f32 %v2271_v60, %v2270_v55  ;;  %v2209_v62 = vpop.f32.mrf.mxu0 }
 0x12a   : > { %v2273_v63 = vpop.f32.mrf.mxu1 }
 0x12b   : > { %v3020_v0 = vadd.f32 %v2272_v61, %v2208_v58  ;;  %v2210_v1 = vpop.f32.mrf.mxu0 }
 0x12c   : > { %v2211_v3 = vadd.f32 %v2210_v1, %v2209_v62  ;;  %v2274_v4 = vpop.f32.mrf.mxu1 }
 0x12d   : > { %3148 = vst [vmem:[#allocation7_spill] sm:$0xff] %v3020_v0  ;;  %v2275_v5 = vadd.f32 %v2274_v4, %v2273_v63  ;;  %v2292_v6 = vpop.f32.mrf.mxu0 }
 0x12e   : > { %v2356_v7 = vpop.f32.mrf.mxu1 }
 0x12f   : > { %v3022_v8 = vadd.f32 %v2275_v5, %v2211_v3  ;;  %v2293_v10 = vpop.f32.mrf.mxu0 }
 0x130   : > { %v2294_v11 = vadd.f32 %v2293_v10, %v2292_v6  ;;  %v2357_v12 = vpop.f32.mrf.mxu1 }
 0x131   : > { %3149 = vst [vmem:[#allocation8_spill] sm:$0xff] %v3022_v8  ;;  %v2295_v13 = vpop.f32.mrf.mxu0  ;;  %v2358_v15 = vadd.f32 %v2357_v12, %v2356_v7 }
 0x132   : > { %v1458_v14 = vadd.f32 %v2294_v11, %v2992_v24  ;;  %v2359_v17 = vpop.f32.mrf.mxu1 }
 0x133   : > { %v2296_v18 = vpop.f32.mrf.mxu0 }
 0x134   : > { %v2360_v19 = vpop.f32.mrf.mxu1  ;;  %v3025_v20 = vadd.f32 %v2358_v15, %v1458_v14  ;;  %v2297_v15 = vadd.f32 %v2296_v18, %v2295_v13 }
 0x135   : > { %v2298_v21 = vpop.f32.mrf.mxu0 }
 0x136   : > { %3150 = vst [vmem:[#allocation9_spill] sm:$0xff] %v3025_v20  ;;  %v2362_v22 = vpop.f32.mrf.mxu1 }
 0x137   : > { %v2299_v25 = vpop.f32.mrf.mxu0 }
 0x138   : > { %v2363_v26 = vpop.f32.mrf.mxu1  ;;  %v2300_v8 = vadd.f32 %v2299_v25, %v2298_v21 }
 0x139   : > { %v2301_v27 = vpop.f32.mrf.mxu0  ;;  %v2364_v16 = vadd.f32 %v2363_v26, %v2362_v22 }
 0x13a   : > { %v2365_v28 = vpop.f32.mrf.mxu1  ;;  %v1466_v23 = vadd.f32 %v2300_v8, %v2996_v38 }
 0x13b   : > { %v2302_v29 = vpop.f32.mrf.mxu0 }
 0x13c   : > { %v2366_v30 = vpop.f32.mrf.mxu1  ;;  %v2303_v20 = vadd.f32 %v2302_v29, %v2301_v27 }
 0x13d   : > { %v2304_v33 = vpop.f32.mrf.mxu0 }
 0x13e   : > { %v2368_v34 = vpop.f32.mrf.mxu1  ;;  %v1469_v13 = vadd.f32 %v2303_v20, %v2998_v45 }
 0x13f   : > { %v2305_v35 = vpop.f32.mrf.mxu0 }
 0x140   : > { %v2369_v36 = vpop.f32.mrf.mxu1 }
 0x141   : > { %v2307_v37 = vpop.f32.mrf.mxu0 }
 0x142   : > { %v2371_v24 = vpop.f32.mrf.mxu1 }
 0x143   : > { %v2308_v39 = vpop.f32.mrf.mxu0 }
 0x144   : > { %v2372_v41 = vpop.f32.mrf.mxu1  ;;  %v2309_v48 = vadd.f32 %v2308_v39, %v2307_v37  ;;  %v2367_v37 = vadd.f32 %v2366_v30, %v2365_v28 }
 0x145   : > { %v2310_v42 = vpop.f32.mrf.mxu0  ;;  %v2373_v38 = vadd.f32 %v2372_v41, %v2371_v24  ;;  %v3158_v24 = vld [vmem:[#allocation3_spill] sm:$0xff] }
 0x146   : > { %v2374_v43 = vpop.f32.mrf.mxu1  ;;  %v1477_v27 = vadd.f32 %v2309_v48, %v3002_v59 }
 0x147   : > { %v2311_v44 = vpop.f32.mrf.mxu0 }
 0x148   : > { %v2375_v46 = vpop.f32.mrf.mxu1  ;;  %v3055_v30 = vadd.f32 %v2373_v38, %v1477_v27 }
 0x149   : > { %v2313_v47 = vpop.f32.mrf.mxu0  ;;  %v2376_v8 = vadd.f32 %v2375_v46, %v2374_v43  ;;  %v3159_v46 = vld [vmem:[#allocation4_spill] sm:$0xff] }
 0x14a   : > { %v3027_v49 = vpop.f32.mrf.mxu1 }
 0x14b   : > { %3151 = vst [vmem:[#allocation10_spill] sm:$0xff] %v3027_v49  ;;  %v2314_v50 = vpop.f32.mrf.mxu0  ;;  %v2361_v49 = vadd.f32 %v2360_v19, %v2359_v17 }
 0x14c   : > { %v3029_v51 = vpop.f32.mrf.mxu1 }
 0x14d   : > { %3152 = vst [vmem:[#allocation11_spill] sm:$0xff] %v3029_v51  ;;  %v2316_v53 = vpop.f32.mrf.mxu0  ;;  %v1461_v51 = vadd.f32 %v2297_v15, %v2994_v31 }
 0x14e   : > { %v3031_v54 = vpop.f32.mrf.mxu1 }
 0x14f   : > { %3153 = vst [vmem:[#allocation12_spill] sm:$0xff] %v3031_v54  ;;  %v2317_v55 = vpop.f32.mrf.mxu0  ;;  %v1558_v59 = vadd.f32 %v2361_v49, %v1461_v51 }
 0x150   : > { %v3033_v57 = vpop.f32.mrf.mxu1  ;;  %v2318_v31 = vadd.f32 %v2317_v55, %v2316_v53  ;;  %v3164_v55 = vld [vmem:[#allocation5_spill] sm:$0xff] }
 0x151   : > { %3154 = vst [vmem:[#allocation13_spill] sm:$0xff] %v3033_v57  ;;  %v2319_v58 = vpop.f32.mrf.mxu0  ;;  %v2312_v57 = vadd.f32 %v2311_v44, %v2310_v42  ;;  %v2370_v42 = vadd.f32 %v2369_v36, %v2368_v34  ;;  %v1566_v44 = vadd.f32 %v2367_v37, %v1469_v13  ;;  %v3157_v34 = vld [vmem:[#allocation2_spill] sm:$0xff] }
 0x152   : > { %v3035_v60 = vpop.f32.mrf.mxu1  ;;  %v1490_v36 = vadd.f32 %v2318_v31, %v3157_v34 }
 0x153   : > { %3155 = vst [vmem:[#allocation14_spill] sm:$0xff] %v3035_v60  ;;  %v2320_v61 = vpop.f32.mrf.mxu0  ;;  %v2306_v60 = vadd.f32 %v2305_v35, %v2304_v33  ;;  %v1482_v29 = vadd.f32 %v2312_v57, %v3004_v2  ;;  %v2315_v33 = vadd.f32 %v2314_v50, %v2313_v47 }
 0x154   : > { %v3037_v62 = vpop.f32.mrf.mxu1  ;;  %v2321_v17 = vadd.f32 %v2320_v61, %v2319_v58 }
 0x155   : > { %3156 = vst [vmem:[#allocation15_spill] sm:$0xff] %v3037_v62  ;;  %v2322_v63 = vpop.f32.mrf.mxu0  ;;  %v1474_v25 = vadd.f32 %v2306_v60, %v3000_v52  ;;  %v1563_v52 = vadd.f32 %v2364_v16, %v1466_v23  ;;  %v1485_v2 = vadd.f32 %v2315_v33, %v3006_v9  ;;  %v3051_v47 = vadd.f32 %v2376_v8, %v1482_v29  ;;  %v3160_v16 = vld [vmem:[#allocation10_spill] sm:$0xff]  ;;  %v3161_v23 = vld [vmem:[#allocation11_spill] sm:$0xff] }
 0x156   : > { %v2386_v1 = vpop.f32.mrf.mxu1  ;;  %v1493_v41 = vadd.f32 %v2321_v17, %v3158_v24  ;;  %v2379_v49 = vadd.f32 %v3161_v23, %v3160_v16  ;;  %v3162_v51 = vld [vmem:[#allocation12_spill] sm:$0xff]  ;;  %v3079_v17 = vld [vmem:[%s3141_s3] ss:$0 sm:$0xff] }
 0x157   : > { %v2323_v3 = vpop.f32.mrf.mxu0  ;;  %v3053_v28 = vadd.f32 %v2370_v42, %v1474_v25 }
 0x158   : > { %v2387_v4 = vpop.f32.mrf.mxu1  ;;  %v2324_v18 = vadd.f32 %v2323_v3, %v2322_v63  ;;  %v3163_v9 = vld [vmem:[#allocation13_spill] sm:$0xff]  ;;  %v3072_v25 = vadd.f32 %v2379_v49, %v1485_v2 }
 0x159   : > { %v2325_v5 = vpop.f32.mrf.mxu0  ;;  %v2388_v43 = vadd.f32 %v2387_v4, %v2386_v1  ;;  %v2382_v53 = vadd.f32 %v3163_v9, %v3162_v51  ;;  %v3070_v1 = vld [vmem:[%s3140_s2] ss:$0 sm:$0xff] }
 0x15a   : > { %v2389_v6 = vpop.f32.mrf.mxu1  ;;  %v1498_v20 = vadd.f32 %v2324_v18, %v3012_v32  ;;  %v3165_v61 = vld [vmem:[#allocation14_spill] sm:$0xff] }
 0x15b   : > { %v2326_v7 = vpop.f32.mrf.mxu0  ;;  %v1587_v29 = vadd.f32 %v2382_v53, %v1490_v36 }
 0x15c   : > { %v2390_v10 = vpop.f32.mrf.mxu1  ;;  %v2327_v19 = vadd.f32 %v2326_v7, %v2325_v5  ;;  %v3166_v63 = vld [vmem:[#allocation15_spill] sm:$0xff]  ;;  %v1595_v4 = vadd.f32 %v2388_v43, %v1498_v20  ;;  %v3170_v20 = vld [vmem:[#allocation6_spill] sm:$0xff] }
 0x15d   : > { %v2328_v11 = vpop.f32.mrf.mxu0  ;;  %v2385_v3 = vadd.f32 %v3166_v63, %v3165_v61  ;;  %v2391_v5 = vadd.f32 %v2390_v10, %v2389_v6  ;;  %v3167_v6 = vld [vmem:[#allocation7_spill] sm:$0xff] }
 0x15e   : > { %v2392_v12 = vpop.f32.mrf.mxu1  ;;  %v1501_v32 = vadd.f32 %v2327_v19, %v3159_v46 }
 0x15f   : > { %v2329_v14 = vpop.f32.mrf.mxu0  ;;  %v1590_v37 = vadd.f32 %v2385_v3, %v1493_v41 }
 0x160   : > { %v2393_v56 = vpop.f32.mrf.mxu1  ;;  %v2330_v22 = vadd.f32 %v2329_v14, %v2328_v11  ;;  %v1598_v33 = vadd.f32 %v2391_v5, %v1501_v32 }
 0x161   : > { %v2331_v0 = vpop.f32.mrf.mxu0  ;;  %v2394_v14 = vadd.f32 %v2393_v56, %v2392_v12  ;;  %v3168_v56 = vld [vmem:[#allocation9_spill] sm:$0xff] }
 0x162   : > { %v3039_v62 = vpop.f32.mrf.mxu1  ;;  %v1506_v57 = vadd.f32 %v2330_v22, %v3164_v55 }
 0x163   : > { %v2332_v54 = vpop.f32.mrf.mxu0 }
 0x164   : > { %v3042_v40 = vpop.f32.mrf.mxu1  ;;  %v2333_v15 = vadd.f32 %v2332_v54, %v2331_v0  ;;  %v1603_v12 = vadd.f32 %v2394_v14, %v1506_v57 }
 0x165   : > { %v2334_v21 = vpop.f32.mrf.mxu0  ;;  %v2397_v19 = vadd.f32 %v3042_v40, %v3039_v62 }
 0x166   : > { %v2398_v35 = vpop.f32.mrf.mxu1 }
 0x167   : > { %v2335_v39 = vpop.f32.mrf.mxu0 }
 0x168   : > { %v2399_v45 = vpop.f32.mrf.mxu1  ;;  %v2336_v58 = vadd.f32 %v2335_v39, %v2334_v21  ;;  %v3169_v39 = vld [vmem:[#allocation8_spill] sm:$0xff] }
 0x169   : > { %v2337_v26 = vpop.f32.mrf.mxu0 }
 0x16a   : > { %v2401_v48 = vpop.f32.mrf.mxu1  ;;  %v1514_v10 = vadd.f32 %v2336_v58, %v3167_v6 }
 0x16b   : > { %v2338_v50 = vpop.f32.mrf.mxu0 }
 0x16c   : > { %v2402_v60 = vpop.f32.mrf.mxu1  ;;  %v2339_v7 = vadd.f32 %v2338_v50, %v2337_v26  ;;  %v1509_v26 = vadd.f32 %v2333_v15, %v3170_v20 }
 0x16d   : > { %v2438_v11 = vpop.f32.mrf.mxu0  ;;  %v2403_v24 = vadd.f32 %v2402_v60, %v2401_v48 }
 0x16e   : > { %v1660_v13 = vadd.f32 %v2438_v11, %v1563_v52  ;;  %v2446_v18 = vpop.f32.mrf.mxu1  ;;  %v1517_v42 = vadd.f32 %v2339_v7, %v3169_v39  ;;  %v2400_v52 = vadd.f32 %v2399_v45, %v2398_v35  ;;  %v1606_v39 = vadd.f32 %v2397_v19, %v1509_v26 }
 0x16f   : > { %v1692_v21 = vadd.f32 %v2446_v18, %v1595_v4  ;;  %v1651_v27 = vpop.f32.mrf.mxu0 }
 0x170   : > { %v1723_v31 = vmul.f32 %v3070_v1, %v1660_v13  ;;  %v1652_v0 = vadd.f32 %v1651_v27, %v3168_v56  ;;  %v1683_v54 = vpop.f32.mrf.mxu1  ;;  %v1611_v23 = vadd.f32 %v2400_v52, %v1514_v10  ;;  %v1614_v49 = vadd.f32 %v2403_v24, %v1517_v42 }
 0x171   : > { %v1731_v38 = vmul.f32 %v3070_v1, %v1692_v21  ;;  %v1684_v8 = vadd.f32 %v1683_v54, %v1587_v29  ;;  %v2439_v22 = vpop.f32.mrf.mxu0 }
 0x172   : > { %v1721_v2 = vmul.f32 %v3070_v1, %v1652_v0  ;;  %v1663_v34 = vadd.f32 %v2439_v22, %v1566_v44  ;;  %v2447_v36 = vpop.f32.mrf.mxu1  ;;  %v1746_v41 = vadd.f32 %v3079_v17, %v1723_v31 }
 0x173   : > { %v1729_v43 = vmul.f32 %v3070_v1, %v1684_v8  ;;  %v1695_v40 = vadd.f32 %v2447_v36, %v1598_v33  ;;  %v1654_v62 = vpop.f32.mrf.mxu0  ;;  %v1754_v46 = vadd.f32 %v3079_v17, %v1731_v38 }
 0x174   : > { %v1724_v32 = vmul.f32 %v3070_v1, %v1663_v34  ;;  %v1655_v50 = vadd.f32 %v1654_v62, %v1558_v59  ;;  %v1686_v16 = vpop.f32.mrf.mxu1  ;;  %v1744_v35 = vadd.f32 %v3079_v17, %v1721_v2  ;;  %v1762_v59 = vmax.f32 %v1746_v41, 0.0 }
 0x175   : > { %v1732_v45 = vmul.f32 %v3070_v1, %v1695_v40  ;;  %v1687_v44 = vadd.f32 %v1686_v16, %v1590_v37  ;;  %v2442_v48 = vpop.f32.mrf.mxu0  ;;  %v1752_v51 = vadd.f32 %v3079_v17, %v1729_v43  ;;  %v1770_v3 = vmax.f32 %v1754_v46, 0.0 }
 0x176   : > { %v1747_v9 = vadd.f32 %v3079_v17, %v1724_v32  ;;  %v1722_v53 = vmul.f32 %v3070_v1, %v1655_v50  ;;  %v1676_v55 = vadd.f32 %v2442_v48, %v3051_v47  ;;  %v2450_v57 = vpop.f32.mrf.mxu1  ;;  %v1760_v14 = vmax.f32 %v1744_v35, 0.0 }
 0x177   : > { %v1755_v58 = vadd.f32 %v3079_v17, %v1732_v45  ;;  %v1730_v60 = vmul.f32 %v3070_v1, %v1687_v44  ;;  %v1708_v61 = vadd.f32 %v2450_v57, %v1611_v23  ;;  %v1667_v63 = vpop.f32.mrf.mxu0  ;;  %v1768_v21 = vmax.f32 %v1752_v51, 0.0 }
 0x178   : > { %v1763_v5 = vmax.f32 %v1747_v9, 0.0  ;;  %v1745_v7 = vadd.f32 %v3079_v17, %v1722_v53  ;;  %v1668_v11 = vadd.f32 %v1667_v63, %v3053_v28  ;;  %v1699_v4 = vpop.f32.mrf.mxu1  ;;  %v1727_v33 = vmul.f32 %v3070_v1, %v1676_v55 }
 0x179   : > { %v1771_v47 = vmax.f32 %v1755_v58, 0.0  ;;  %v1753_v15 = vadd.f32 %v3079_v17, %v1730_v60  ;;  %v1700_v13 = vadd.f32 %v1699_v4, %v1603_v12  ;;  %v2443_v18 = vpop.f32.mrf.mxu0  ;;  %v1735_v10 = vmul.f32 %v3070_v1, %v1708_v61 }
 0x17a   : > { %v2109_v27 = vpack.c.bf16 %v1763_v5, %v1762_v59  ;;  %v1761_v29 = vmax.f32 %v1745_v7, 0.0  ;;  %v2451_v28 = vpop.f32.mrf.mxu1  ;;  %v1725_v31 = vmul.f32 %v3070_v1, %v1668_v11  ;;  %v1679_v12 = vadd.f32 %v2443_v18, %v3072_v25 }
 0x17b   : > { %v2129_v37 = vpack.c.bf16 %v1771_v47, %v1770_v3  ;;  %v1769_v6 = vmax.f32 %v1753_v15, 0.0  ;;  %v1670_v56 = vpop.f32.mrf.mxu0  ;;  %v1733_v54 = vmul.f32 %v3070_v1, %v1700_v13  ;;  %v1711_v8 = vadd.f32 %v2451_v28, %v1614_v49 }
 0x17c   : > { %2141 = vst [vmem:[%s3106_s30 + $0x8] sm:$0xff] %v2109_v27   ;;  %v2104_v0 = vpack.c.bf16 %v1761_v29, %v1760_v14  ;;  %v1702_v42 = vpop.f32.mrf.mxu1  ;;  %v1750_v22 = vadd.f32 %v3079_v17, %v1727_v33  ;;  %v1728_v20 = vmul.f32 %v3070_v1, %v1679_v12  ;;  %v1671_v52 = vadd.f32 %v1670_v56, %v3055_v30 }
 0x17d   : > { %2145 = vst [vmem:[%s3106_s30 + $0x28] sm:$0xff] %v2129_v37   ;;  %v2124_v38 = vpack.c.bf16 %v1769_v6, %v1768_v21  ;;  %v1703_v2 = vadd.f32 %v1702_v42, %v1606_v39  ;;  %v1758_v34 = vadd.f32 %v3079_v17, %v1735_v10  ;;  %v1748_v36 = vadd.f32 %v3079_v17, %v1725_v31 }
 0x17e   : > { %2105 = vst [vmem:[%s3106_s30] sm:$0xff] %v2104_v0   ;;  %v1736_v25 = vmul.f32 %v3070_v1, %v1711_v8  ;;  %v1756_v19 = vadd.f32 %v3079_v17, %v1733_v54  ;;  %v1751_v26 = vadd.f32 %v3079_v17, %v1728_v20  ;;  %v1726_v24 = vmul.f32 %v3070_v1, %v1671_v52 }
 0x17f   : > { %2144 = vst [vmem:[%s3106_s30 + $0x20] sm:$0xff] %v2124_v38   ;;  %v1734_v41 = vmul.f32 %v3070_v1, %v1703_v2  ;;  %v1766_v30 = vmax.f32 %v1750_v22, 0.0  ;;  %v1774_v32 = vmax.f32 %v1758_v34, 0.0  ;;  %v1764_v50 = vmax.f32 %v1748_v36, 0.0 }
 0x180   : > { %v1759_v43 = vadd.f32 %v3079_v17, %v1736_v25  ;;  %v1767_v40 = vmax.f32 %v1751_v26, 0.0  ;;  %v1749_v62 = vadd.f32 %v3079_v17, %v1726_v24  ;;  %v1772_v23 = vmax.f32 %v1756_v19, 0.0 }
 0x181   : > { %v1757_v46 = vadd.f32 %v3079_v17, %v1734_v41 }
 0x182   : > { %v1775_v16 = vmax.f32 %v1759_v43, 0.0  ;;  %v2119_v35 = vpack.c.bf16 %v1767_v40, %v1766_v30  ;;  %v1765_v45 = vmax.f32 %v1749_v62, 0.0 }
 0x183   : > { %v1773_v44 = vmax.f32 %v1757_v46, 0.0 }
 0x184   : > { %v2139_v48 = vpack.c.bf16 %v1775_v16, %v1774_v32  ;;  %2143 = vst [vmem:[%s3106_s30 + $0x18] sm:$0xff] %v2119_v35   ;;  %v2114_v1 = vpack.c.bf16 %v1765_v45, %v1764_v50 }
 0x185   : > { %v2134_v49 = vpack.c.bf16 %v1773_v44, %v1772_v23 }
 0x186   : > { %2147 = vst [vmem:[%s3106_s30 + $0x38] sm:$0xff] %v2139_v48   ;;  %2142 = vst [vmem:[%s3106_s30 + $0x10] sm:$0xff] %v2114_v1  }
 0x187   : > { %2146 = vst [vmem:[%s3106_s30 + $0x30] sm:$0xff] %v2134_v49  }
 0x188 PF: > { %s14_s15 = sadd.s32 1, %s2659_s15  }
 0x189   : > { %p11_p4 = scmp.ge.s32.totalorder %s14_s15, 4  }
 0x18b   :  { %13 = sbr.rel (!%p11_p4) target bundleno = 1 (0x1), region = 66 }

// kernel: simplenet7_forward.8
= control target key start
LH: loop header
LB: loop body
LE: loop exit
PB: predicated region body
PF: predicated region fallthrough
CT: control target
= control target key end

     0   :  { %s2641_s15 = smov 0   ;;  %s3179_s0 = inlined_call_operand.vmem [shape: bf16[512,576], index: 0, kind: input, shape index: {}]   ;;  %s3180_s1 = inlined_call_operand.vmem [shape: bf16[576,128], index: 1, kind: input, shape index: {}]   ;;  %s3181_s2 = inlined_call_operand.vmem [shape: f32[1,128], index: 2, kind: input, shape index: {}]   ;;  %s3182_s3 = inlined_call_operand.vmem [shape: f32[1,128], index: 3, kind: input, shape index: {}]   ;;  %s3183_s4 = inlined_call_operand.vmem [shape: bf16[512,128], index: 4, kind: output, shape index: {}]  }
   0x1 LB: > { %s1847_s16 = sadd.s32 4294967295, %s2614_s15   ;;  %p1851_p0 = scmp.ge.s32.totalorder %s2614_s15, 1  ;;  %s2614_s15 = sphi %s2641_s15, %s14_s15  }
   0x2   : > { %p164_p1 = scmp.lt.s32.totalorder %s2614_s15, 3 }
   0x4   : > { %p165_p2 = pnand %p1851_p0, %p164_p1 }
   0x6   : > { %168 = sbr.rel (%p165_p2) target bundleno = 410 (0x19a), region = 36 }
   0xb   : > { %v2460_v0 = vld [vmem:[%s3180_s1 + $0x78] sm:$0xff]   ;;  %s1852_s19 = sshll.u32 %s1847_s16, 5  ;;  %v2462_v2 = vld [vmem:[%s3180_s1 + $0x70] sm:$0xff]   ;;  %v2464_v4 = vld [vmem:[%s3180_s1 + $0x68] sm:$0xff]   ;;  %vm989_vm0 = vcmask 523264  }
   0xc   : > { %v2461_v1 = vld [vmem:[%s3180_s1 + $0x38] sm:$0xff]   ;;  %2151 = vmatprep.subr.bf16.mxu0 %v2460_v0  ;;  %2435 = vmatprep.subr.bf16.mxu1 %v2460_v0  ;;  %p192_p3 = scmp.lt.s32.totalorder %s1852_s19, 63  ;;  %v2463_v3 = vld [vmem:[%s3180_s1 + $0x30] sm:$0xff]   ;;  %v2465_v5 = vld [vmem:[%s3180_s1 + $0x28] sm:$0xff]  }
   0xd   : > { %2152 = vmatpush3.bf16.msra.mxu0 %v2461_v1  ;;  %2443 = vmatpush3.bf16.msra.mxu1 %v2461_v1  ;;  %v2466_v6 = vld [vmem:[%s3180_s1 + $0x60] sm:$0xff]   ;;  %v2468_v8 = vld [vmem:[%s3180_s1 + $0x58] sm:$0xff]   ;;  %v2470_v10 = vld [vmem:[%s3180_s1 + $0x50] sm:$0xff]  }
   0xe   : > { %2153 = vmatprep.subr.bf16.mxu0 %v2462_v2  ;;  %2436 = vmatprep.subr.bf16.mxu1 %v2462_v2  ;;  %s3225_s19 = smov (!%p192_p3, %s1852_s19), 63  ;;  %v2467_v7 = vld [vmem:[%s3180_s1 + $0x20] sm:$0xff]   ;;  %v2469_v9 = vld [vmem:[%s3180_s1 + $0x18] sm:$0xff]   ;;  %v2471_v13 = vld [vmem:[%s3180_s1 + $0x10] sm:$0xff]  }
   0xf   : > { %s2451_s6 = smul.u32 20, %s3225_s19  ;;  %v2472_v14 = vld [vmem:[%s3180_s1 + $0x48] sm:$0xff]   ;;  %v2474_v16 = vld [vmem:[%s3180_s1 + $0x40] sm:$0xff]   ;;  %v2482_v18 = vld [vmem:[%s3180_s1 + $0xf8] sm:$0xff]   ;;  %s1855_s27 = sshll.u32 %s3225_s19, 2 }
  0x10   : > { %v2473_v15 = vld [vmem:[%s3180_s1 + $0x8] sm:$0xff]   ;;  %v2475_v17 = vld [vmem:[%s3180_s1] sm:$0xff]   ;;  %v2485_v19 = vld [vmem:[%s3180_s1 + $0x118] sm:$0xff]   ;;  %s3030_s29 = scalar_lea.vmem %s3183_s4, %s1855_s27 }
  0x11   : > { %2154 = vmatpush3.bf16.msra.mxu0 %v2463_v3  ;;  %2444 = vmatpush3.bf16.msra.mxu1 %v2463_v3  ;;  %s2682_s13 = scalar_lea.vmem %s3179_s0, %s2451_s6  ;;  %v2483_v22 = vld [vmem:[%s3180_s1 + $0xb8] sm:$0xff]   ;;  %v2484_v23 = vld [vmem:[%s3180_s1 + $0xf0] sm:$0xff]   ;;  %v2493_v28 = vld [vmem:[%s3180_s1 + $0xe8] sm:$0xff]  }
  0x12   : > { %2155 = vmatprep.subr.bf16.mxu0 %v2464_v4  ;;  %2437 = vmatprep.subr.bf16.mxu1 %v2464_v4  ;;  %v2478_v11 = vld [vmem:[%s2682_s13 + $0x4] ss:$20 sps:$4 sm:$0xff]   ;;  %v2476_v20 = vld [vmem:[%s2682_s13] ss:$20 sps:$4 sm:$0xff]   ;;  %v2491_v27 = vld [vmem:[%s2682_s13 + $0x28] ss:$20 sps:$4 sm:$0xff]  }
  0x13   : > { %v2481_v12 = vld [vmem:[%s2682_s13 + $0x1e4] ss:$20 sps:$4 sm:$0xff]   ;;  %1070 = vmatprep.mubr.bf16.mxu0 %v2478_v11  ;;  %v2479_v21 = vld [vmem:[%s2682_s13 + $0x1e0] ss:$20 sps:$4 sm:$0xff]   ;;  %v2492_v29 = vld [vmem:[%s2682_s13 + $0x208] ss:$20 sps:$4 sm:$0xff]  }
  0x14   : > { %1166 = vmatprep.mubr.bf16.mxu1 %v2481_v12  ;;  %v2487_v24 = vld [vmem:[%s2682_s13 + $0x2c] ss:$20 sps:$4 sm:$0xff]   ;;  %v2486_v26 = vld [vmem:[%s3180_s1 + $0xb0] sm:$0xff]   ;;  %v2503_v37 = vld [vmem:[%s3180_s1 + $0xd8] sm:$0xff]  }
  0x15   : > { %2156 = vmatpush3.bf16.msra.mxu0 %v2465_v5  ;;  %2445 = vmatpush3.bf16.msra.mxu1 %v2465_v5  ;;  %v2489_v25 = vld [vmem:[%s2682_s13 + $0x20c] ss:$20 sps:$4 sm:$0xff]   ;;  %v2497_v32 = vld [vmem:[%s2682_s13 + $0x54] ss:$20 sps:$4 sm:$0xff]   ;;  %v2501_v36 = vld [vmem:[%s2682_s13 + $0x50] ss:$20 sps:$4 sm:$0xff]  }
  0x16   : > { %2157 = vmatprep.subr.bf16.mxu0 %v2466_v6  ;;  %2438 = vmatprep.subr.bf16.mxu1 %v2466_v6  ;;  %v2494_v30 = vld [vmem:[%s3180_s1 + $0xa8] sm:$0xff]   ;;  %v2495_v31 = vld [vmem:[%s3180_s1 + $0xe0] sm:$0xff]   ;;  %v2516_v35 = vld [vmem:[%s3180_s1 + $0x110] sm:$0xff]  }
  0x17   : > { %v2499_v33 = vld [vmem:[%s2682_s13 + $0x234] ss:$20 sps:$4 sm:$0xff]   ;;  %v2496_v34 = vld [vmem:[%s3180_s1 + $0xa0] sm:$0xff]   ;;  %v2504_v39 = vld [vmem:[%s3180_s1 + $0x98] sm:$0xff]  }
  0x18   : > { %v2502_v38 = vld [vmem:[%s2682_s13 + $0x230] ss:$20 sps:$4 sm:$0xff]   ;;  %v2511_v44 = vld [vmem:[%s2682_s13 + $0x78] ss:$20 sps:$4 sm:$0xff]   ;;  %v2520_v53 = vld [vmem:[%s2682_s13 + $0x8] ss:$20 sps:$4 sm:$0xff]  }
  0x19   : > { %2158 = vmatpush3.bf16.msra.mxu0 %v2467_v7  ;;  %2446 = vmatpush3.bf16.msra.mxu1 %v2467_v7  ;;  %v2505_v40 = vld [vmem:[%s3180_s1 + $0xd0] sm:$0xff]   ;;  %v2512_v45 = vld [vmem:[%s2682_s13 + $0x258] ss:$20 sps:$4 sm:$0xff]   ;;  %v2515_v49 = vld [vmem:[%s3180_s1 + $0xc0] sm:$0xff]  }
  0x1a   : > { %2159 = vmatprep.subr.bf16.mxu0 %v2468_v8  ;;  %2439 = vmatprep.subr.bf16.mxu1 %v2468_v8  ;;  %v2507_v41 = vld [vmem:[%s2682_s13 + $0x7c] ss:$20 sps:$4 sm:$0xff]   ;;  %v2513_v46 = vld [vmem:[%s3180_s1 + $0xc8] sm:$0xff]   ;;  %v2518_v50 = vld [vmem:[%s2682_s13 + $0xa4] ss:$20 sps:$4 sm:$0xff]  }
  0x1b   : > { %v2509_v42 = vld [vmem:[%s2682_s13 + $0x25c] ss:$20 sps:$4 sm:$0xff]   ;;  %v2536_v47 = vld [vmem:[%s3180_s1 + $0x108] sm:$0xff]   ;;  %v2517_v52 = vld [vmem:[%s3180_s1 + $0x80] sm:$0xff]  }
  0x1c   : > { %v2506_v43 = vld [vmem:[%s3180_s1 + $0x90] sm:$0xff]   ;;  %v2514_v48 = vld [vmem:[%s3180_s1 + $0x88] sm:$0xff]   ;;  %v2555_v56 = vld [vmem:[%s3180_s1 + $0x100] sm:$0xff]  }
  0x1d   : > { %2160 = vmatpush3.bf16.msra.mxu0 %v2469_v9  ;;  %2447 = vmatpush3.bf16.msra.mxu1 %v2469_v9  ;;  %v2522_v51 = vld [vmem:[%s2682_s13 + $0xc] ss:$20 sps:$4 sm:$0xff]   ;;  %v2526_v57 = vld [vmem:[%s2682_s13 + $0x34] ss:$20 sps:$4 sm:$0xff]   ;;  %v2529_v59 = vld [vmem:[%s2682_s13 + $0x30] ss:$20 sps:$4 sm:$0xff]  }
  0x1e   : > { %2161 = vmatprep.subr.bf16.mxu0 %v2470_v10  ;;  %2440 = vmatprep.subr.bf16.mxu1 %v2470_v10  ;;  %v2523_v54 = vld [vmem:[%s2682_s13 + $0xa0] ss:$20 sps:$4 sm:$0xff]   ;;  %v2528_v58 = vld [vmem:[%s2682_s13 + $0xc8] ss:$20 sps:$4 sm:$0xff]   ;;  %v2534_v62 = vld [vmem:[%s2682_s13 + $0xf0] ss:$20 sps:$4 sm:$0xff]  }
  0x1f   : > { %v2524_v55 = vld [vmem:[%s2682_s13 + $0xcc] ss:$20 sps:$4 sm:$0xff]   ;;  %v2530_v60 = vld [vmem:[%s2682_s13 + $0xf4] ss:$20 sps:$4 sm:$0xff]   ;;  %v2532_v61 = vld [vmem:[%s2682_s13 + $0x5c] ss:$20 sps:$4 sm:$0xff]  }
  0x20   : > { %v2535_v63 = vld [vmem:[%s2682_s13 + $0x58] ss:$20 sps:$4 sm:$0xff]   ;;  %v2537_v0 = vld [vmem:[%s2682_s13 + $0x11c] ss:$20 sps:$4 sm:$0xff]   ;;  %v2542_v3 = vld [vmem:[%s2682_s13 + $0x80] ss:$20 sps:$4 sm:$0xff]  }
  0x21   : > { %2162 = vmatpush3.bf16.msra.mxu0 %v2471_v13  ;;  %2448 = vmatpush3.bf16.msra.mxu1 %v2471_v13  ;;  %v2539_v1 = vld [vmem:[%s2682_s13 + $0x84] ss:$20 sps:$4 sm:$0xff]   ;;  %v2545_v5 = vld [vmem:[%s2682_s13 + $0xac] ss:$20 sps:$4 sm:$0xff]   ;;  %v2548_v7 = vld [vmem:[%s2682_s13 + $0xa8] ss:$20 sps:$4 sm:$0xff]  }
  0x22   : > { %2163 = vmatprep.subr.bf16.mxu0 %v2472_v14  ;;  %2441 = vmatprep.subr.bf16.mxu1 %v2472_v14  ;;  %v2541_v2 = vld [vmem:[%s2682_s13 + $0x118] ss:$20 sps:$4 sm:$0xff]   ;;  %v2547_v6 = vld [vmem:[%s2682_s13 + $0x140] ss:$20 sps:$4 sm:$0xff]   ;;  %v2553_v10 = vld [vmem:[%s2682_s13 + $0x168] ss:$20 sps:$4 sm:$0xff]  }
  0x23   : > { %v2543_v4 = vld [vmem:[%s2682_s13 + $0x144] ss:$20 sps:$4 sm:$0xff]   ;;  %v2549_v8 = vld [vmem:[%s2682_s13 + $0x16c] ss:$20 sps:$4 sm:$0xff]   ;;  %v2551_v9 = vld [vmem:[%s2682_s13 + $0xd4] ss:$20 sps:$4 sm:$0xff]  }
  0x24   : > { %v2554_v11 = vld [vmem:[%s2682_s13 + $0xd0] ss:$20 sps:$4 sm:$0xff]   ;;  %v2556_v12 = vld [vmem:[%s2682_s13 + $0x194] ss:$20 sps:$4 sm:$0xff]  }
  0x25   : > { %2164 = vmatpush3.bf16.msra.mxu0 %v2473_v15  ;;  %2449 = vmatpush3.bf16.msra.mxu1 %v2473_v15  ;;  %v2558_v13 = vld [vmem:[%s2682_s13 + $0xfc] ss:$20 sps:$4 sm:$0xff]   ;;  %v2561_v15 = vld [vmem:[%s2682_s13 + $0xf8] ss:$20 sps:$4 sm:$0xff]  }
  0x26   : > { %2165 = vmatprep.subr.bf16.mxu0 %v2474_v16  ;;  %2442 = vmatprep.subr.bf16.mxu1 %v2474_v16  ;;  %v2560_v14 = vld [vmem:[%s2682_s13 + $0x190] ss:$20 sps:$4 sm:$0xff]  }
  0x27   : > { %v2562_v16 = vld [vmem:[%s2682_s13 + $0x1bc] ss:$20 sps:$4 sm:$0xff]  }
  0x29   : > { %2166 = vmatpush3.bf16.msra.mxu0 %v2475_v17  ;;  %2450 = vmatpush3.bf16.msra.mxu1 %v2475_v17  ;;  %v2564_v17 = vld [vmem:[%s2682_s13 + $0x124] ss:$20 sps:$4 sm:$0xff]  }
  0x2a   : > { %2263 = vmatprep.subr.bf16.mxu1 %v2482_v18  ;;  %2395 = vmatprep.subr.bf16.mxu0 %v2485_v19  ;;  %v2566_v18 = vld [vmem:[%s2682_s13 + $0x1b8] ss:$20 sps:$4 sm:$0xff]  }
  0x2c   : > { %1071 = vmatmul.mubr.bf16.vlgmr.msra.gmra.mxu0 %v2476_v20  ;;  %1167 = vmatmul.mubr.bf16.vlgmr.msra.gmra.mxu1 %v2479_v21  ;;  %v2568_v20 = vld [vmem:[%s2682_s13 + $0x14c] ss:$20 sps:$4 sm:$0xff]   ;;  %v2570_v21 = vld [vmem:[%s2682_s13 + $0x10] ss:$20 sps:$4 sm:$0xff]  }
  0x2d   : > { %2264 = vmatpush3.bf16.msra.mxu1 %v2483_v22  ;;  %2396 = vmatpush3.bf16.msra.mxu0 %v2485_v19  ;;  %v2567_v19 = vld [vmem:[%s2682_s13 + $0x120] ss:$20 sps:$4 sm:$0xff]   ;;  %v2571_v22 = vld [vmem:[%s2682_s13 + $0x148] ss:$20 sps:$4 sm:$0xff]  }
  0x2e   : > { %2265 = vmatprep.subr.bf16.mxu1 %v2484_v23  ;;  %1078 = vmatprep.mubr.bf16.mxu0 %v2487_v24  ;;  %v2572_v23 = vld [vmem:[%s2682_s13 + $0x38] ss:$20 sps:$4 sm:$0xff]   ;;  %v2573_v24 = vld [vmem:[%s2682_s13 + $0x174] ss:$20 sps:$4 sm:$0xff]  }
  0x2f   : > { %1174 = vmatprep.mubr.bf16.mxu1 %v2489_v25  ;;  %2397 = vmatprep.subr.bf16.mxu0 %v2516_v35  ;;  %v2575_v25 = vld [vmem:[%s2682_s13 + $0x60] ss:$20 sps:$4 sm:$0xff]  }
  0x31   : > { %2266 = vmatpush3.bf16.msra.mxu1 %v2486_v26  ;;  %2398 = vmatpush3.bf16.msra.mxu0 %v2516_v35  ;;  %v2576_v26 = vld [vmem:[%s2682_s13 + $0x170] ss:$20 sps:$4 sm:$0xff]   ;;  %v2587_v35 = vld [vmem:[%s2682_s13 + $0x128] ss:$20 sps:$4 sm:$0xff]  }
  0x32   : > { %2267 = vmatprep.subr.bf16.mxu1 %v2493_v28  ;;  %2399 = vmatprep.subr.bf16.mxu0 %v2536_v47  ;;  %v2578_v28 = vld [vmem:[%s2682_s13 + $0x19c] ss:$20 sps:$4 sm:$0xff]  }
  0x34   : > { %1079 = vmatmul.mubr.bf16.gmra.mxu0 %v2491_v27  ;;  %1175 = vmatmul.mubr.bf16.gmra.mxu1 %v2492_v29  ;;  %v2577_v27 = vld [vmem:[%s2682_s13 + $0x88] ss:$20 sps:$4 sm:$0xff]   ;;  %v2580_v29 = vld [vmem:[%s2682_s13 + $0xb0] ss:$20 sps:$4 sm:$0xff]  }
  0x35   : > { %2268 = vmatpush3.bf16.msra.mxu1 %v2494_v30  ;;  %1086 = vmatprep.mubr.bf16.mxu0 %v2497_v32  ;;  %v2581_v30 = vld [vmem:[%s2682_s13 + $0x198] ss:$20 sps:$4 sm:$0xff]  }
  0x36   : > { %2269 = vmatprep.subr.bf16.mxu1 %v2495_v31  ;;  %1182 = vmatprep.mubr.bf16.mxu1 %v2499_v33  ;;  %v2582_v31 = vld [vmem:[%s2682_s13 + $0xd8] ss:$20 sps:$4 sm:$0xff]   ;;  %v2585_v33 = vld [vmem:[%s2682_s13 + $0x100] ss:$20 sps:$4 sm:$0xff]  }
  0x37   : > { %2400 = vmatpush3.bf16.msra.mxu0 %v2536_v47  ;;  %v2583_v32 = vld [vmem:[%s2682_s13 + $0x1c4] ss:$20 sps:$4 sm:$0xff]  }
  0x38   : > { %2401 = vmatprep.subr.bf16.mxu0 %v2555_v56  ;;  %v2602_v47 = vld [vmem:[%s2682_s13 + $0x218] ss:$20 sps:$4 sm:$0xff]  }
  0x39   : > { %2270 = vmatpush3.bf16.msra.mxu1 %v2496_v34  ;;  %v2586_v34 = vld [vmem:[%s2682_s13 + $0x1c0] ss:$20 sps:$4 sm:$0xff]  }
  0x3a   : > { %2271 = vmatprep.subr.bf16.mxu1 %v2503_v37  ;;  %v2590_v37 = vld [vmem:[%s2682_s13 + $0x150] ss:$20 sps:$4 sm:$0xff]  }
  0x3b   : > { %2402 = vmatpush3.bf16.msra.mxu0 %v2555_v56 }
  0x3c   : > { %1087 = vmatmul.mubr.bf16.gmra.mxu0 %v2501_v36  ;;  %1183 = vmatmul.mubr.bf16.gmra.mxu1 %v2502_v38  ;;  %v2588_v36 = vld [vmem:[%s2682_s13 + $0x1ec] ss:$20 sps:$4 sm:$0xff]   ;;  %v2591_v38 = vld [vmem:[%s2682_s13 + $0x1e8] ss:$20 sps:$4 sm:$0xff]  }
  0x3d   : > { %2272 = vmatpush3.bf16.msra.mxu1 %v2504_v39  ;;  %1094 = vmatprep.mubr.bf16.mxu0 %v2507_v41  ;;  %v2592_v39 = vld [vmem:[%s2682_s13 + $0x178] ss:$20 sps:$4 sm:$0xff]   ;;  %v2595_v41 = vld [vmem:[%s2682_s13 + $0x1a0] ss:$20 sps:$4 sm:$0xff]  }
  0x3e   : > { %2273 = vmatprep.subr.bf16.mxu1 %v2505_v40  ;;  %1190 = vmatprep.mubr.bf16.mxu1 %v2509_v42  ;;  %v2593_v40 = vld [vmem:[%s2682_s13 + $0x214] ss:$20 sps:$4 sm:$0xff]   ;;  %v2596_v42 = vld [vmem:[%s2682_s13 + $0x210] ss:$20 sps:$4 sm:$0xff]  }
  0x41   : > { %2274 = vmatpush3.bf16.msra.mxu1 %v2506_v43  ;;  %v2597_v43 = vld [vmem:[%s2682_s13 + $0x1c8] ss:$20 sps:$4 sm:$0xff]  }
  0x42   : > { %2275 = vmatprep.subr.bf16.mxu1 %v2513_v46  ;;  %v2601_v46 = vld [vmem:[%s2682_s13 + $0x238] ss:$20 sps:$4 sm:$0xff]  }
  0x44   : > { %1095 = vmatmul.mubr.bf16.gmra.mxu0 %v2511_v44  ;;  %1191 = vmatmul.mubr.bf16.gmra.mxu1 %v2512_v45  ;;  %v2598_v44 = vld [vmem:[%s2682_s13 + $0x23c] ss:$20 sps:$4 sm:$0xff]  }
  0x45   : > { %2276 = vmatpush3.bf16.msra.mxu1 %v2514_v48  ;;  %1102 = vmatprep.mubr.bf16.mxu0 %v2518_v50  ;;  %v2600_v45 = vld [vmem:[%s2682_s13 + $0x1f0] ss:$20 sps:$4 sm:$0xff]   ;;  %v2606_v50 = vld [vmem:[%s2682_s13 + $0x260] ss:$20 sps:$4 sm:$0xff]  }
  0x46   : > { %2277 = vmatprep.subr.bf16.mxu1 %v2515_v49  ;;  %1231 = vmatprep.mubr.bf16.mxu1 %v2522_v51  ;;  %v2603_v48 = vld [vmem:[%s2682_s13 + $0x264] ss:$20 sps:$4 sm:$0xff]   ;;  %v2605_v49 = vld [vmem:[%s2682_s13 + $0x240] ss:$20 sps:$4 sm:$0xff]   ;;  %v2607_v51 = vld [vmem:[%s2682_s13 + $0x268] ss:$20 sps:$4 sm:$0xff]  }
  0x49   : > { %2278 = vmatpush3.bf16.msra.mxu1 %v2517_v52 }
  0x4c   : > { %1103 = vmatmul.mubr.bf16.gmra.mxu0 %v2523_v54  ;;  %1232 = vmatmul.mubr.bf16.vlgmr.msra.gmra.mxu1 %v2520_v53 }
  0x4d   : > { %1110 = vmatprep.mubr.bf16.mxu0 %v2524_v55  ;;  %1239 = vmatprep.mubr.bf16.mxu1 %v2526_v57 }
  0x54   : > { %1111 = vmatmul.mubr.bf16.gmra.mxu0 %v2528_v58  ;;  %1240 = vmatmul.mubr.bf16.gmra.mxu1 %v2529_v59 }
  0x55   : > { %1118 = vmatprep.mubr.bf16.mxu0 %v2530_v60  ;;  %1247 = vmatprep.mubr.bf16.mxu1 %v2532_v61 }
  0x5c   : > { %1119 = vmatmul.mubr.bf16.gmra.mxu0 %v2534_v62  ;;  %1248 = vmatmul.mubr.bf16.gmra.mxu1 %v2535_v63 }
  0x5d   : > { %1126 = vmatprep.mubr.bf16.mxu0 %v2537_v0  ;;  %1255 = vmatprep.mubr.bf16.mxu1 %v2539_v1 }
  0x64   : > { %1127 = vmatmul.mubr.bf16.gmra.mxu0 %v2541_v2  ;;  %1256 = vmatmul.mubr.bf16.gmra.mxu1 %v2542_v3 }
  0x65   : > { %1134 = vmatprep.mubr.bf16.mxu0 %v2543_v4  ;;  %1263 = vmatprep.mubr.bf16.mxu1 %v2545_v5 }
  0x6c   : > { %1135 = vmatmul.mubr.bf16.gmra.mxu0 %v2547_v6  ;;  %1264 = vmatmul.mubr.bf16.gmra.mxu1 %v2548_v7 }
  0x6d   : > { %1142 = vmatprep.mubr.bf16.mxu0 %v2549_v8  ;;  %1271 = vmatprep.mubr.bf16.mxu1 %v2551_v9 }
  0x74   : > { %1143 = vmatmul.mubr.bf16.gmra.mxu0 %v2553_v10  ;;  %1272 = vmatmul.mubr.bf16.gmra.mxu1 %v2554_v11 }
  0x75   : > { %1150 = vmatprep.mubr.bf16.mxu0 %v2556_v12  ;;  %1279 = vmatprep.mubr.bf16.mxu1 %v2558_v13 }
  0x7c   : > { %1151 = vmatmul.mubr.bf16.gmra.mxu0 %v2560_v14  ;;  %1280 = vmatmul.mubr.bf16.gmra.mxu1 %v2561_v15 }
  0x7d   : > { %1158 = vmatprep.mubr.bf16.mxu0 %v2562_v16  ;;  %1287 = vmatprep.mubr.bf16.mxu1 %v2564_v17 }
  0x84   : > { %1159 = vmatmul.mubr.bf16.gmra.mxu0 %v2566_v18  ;;  %1288 = vmatmul.mubr.bf16.gmra.mxu1 %v2567_v19 }
  0x85   : > { %1295 = vmatprep.mubr.bf16.mxu1 %v2568_v20  ;;  %2403 = vmatprep.mubr.msk.bf16.mxu0 %vm989_vm0, %v2570_v21 }
  0x8c   : > { %1296 = vmatmul.mubr.bf16.gmra.mxu1 %v2571_v22  ;;  %2404 = vmatmul.mubr.msk.bf16.vlgmr.msra.gmra.mxu0 %vm989_vm0, %v2572_v23 }
  0x8d   : > { %1303 = vmatprep.mubr.bf16.mxu1 %v2573_v24  ;;  %2407 = vmatprep.mubr.msk.bf16.mxu0 %vm989_vm0, %v2575_v25 }
  0x94   : > { %1304 = vmatmul.mubr.bf16.gmra.mxu1 %v2576_v26  ;;  %2408 = vmatmul.mubr.msk.bf16.gmra.mxu0 %vm989_vm0, %v2577_v27 }
  0x95   : > { %1311 = vmatprep.mubr.bf16.mxu1 %v2578_v28  ;;  %2411 = vmatprep.mubr.msk.bf16.mxu0 %vm989_vm0, %v2580_v29 }
  0x9c   : > { %1312 = vmatmul.mubr.bf16.gmra.mxu1 %v2581_v30  ;;  %2412 = vmatmul.mubr.msk.bf16.gmra.mxu0 %vm989_vm0, %v2582_v31 }
  0x9d   : > { %1319 = vmatprep.mubr.bf16.mxu1 %v2583_v32  ;;  %2415 = vmatprep.mubr.msk.bf16.mxu0 %vm989_vm0, %v2585_v33 }
  0xa4   : > { %1320 = vmatmul.mubr.bf16.gmra.mxu1 %v2586_v34  ;;  %2416 = vmatmul.mubr.msk.bf16.gmra.mxu0 %vm989_vm0, %v2587_v35 }
  0xa5   : > { %1327 = vmatprep.mubr.bf16.mxu1 %v2588_v36  ;;  %2419 = vmatprep.mubr.msk.bf16.mxu0 %vm989_vm0, %v2590_v37 }
  0xac   : > { %1328 = vmatmul.mubr.bf16.gmra.mxu1 %v2591_v38  ;;  %2420 = vmatmul.mubr.msk.bf16.gmra.mxu0 %vm989_vm0, %v2592_v39 }
  0xad   : > { %1335 = vmatprep.mubr.bf16.mxu1 %v2593_v40  ;;  %2423 = vmatprep.mubr.msk.bf16.mxu0 %vm989_vm0, %v2595_v41 }
  0xb4   : > { %1336 = vmatmul.mubr.bf16.gmra.mxu1 %v2596_v42  ;;  %2424 = vmatmul.mubr.msk.bf16.gmra.mxu0 %vm989_vm0, %v2597_v43 }
  0xb5   : > { %1343 = vmatprep.mubr.bf16.mxu1 %v2598_v44  ;;  %2427 = vmatprep.mubr.msk.bf16.mxu0 %vm989_vm0, %v2600_v45 }
  0xbc   : > { %1344 = vmatmul.mubr.bf16.gmra.mxu1 %v2601_v46  ;;  %2428 = vmatmul.mubr.msk.bf16.gmra.mxu0 %vm989_vm0, %v2602_v47 }
  0xbd   : > { %1351 = vmatprep.mubr.bf16.mxu1 %v2603_v48  ;;  %2431 = vmatprep.mubr.msk.bf16.mxu0 %vm989_vm0, %v2605_v49 }
  0xc4   : > { %1352 = vmatmul.mubr.bf16.gmra.mxu1 %v2606_v50  ;;  %2432 = vmatmul.mubr.msk.bf16.gmra.mxu0 %vm989_vm0, %v2607_v51 }
  0xec   : > { %v2167_v52 = vpop.f32.mrf.mxu0  ;;  %v2239_v53 = vpop.f32.mrf.mxu1 }
  0xee   : > { %v2168_v54 = vpop.f32.mrf.mxu0  ;;  %v2240_v55 = vpop.f32.mrf.mxu1 }
  0xef   : > { %v2169_v56 = vadd.f32 %v2168_v54, %v2167_v52  ;;  %v2861_v57 = vadd.f32 %v2240_v55, %v2239_v53 }
  0xf0   : > { %v2170_v58 = vpop.f32.mrf.mxu0  ;;  %v2242_v59 = vpop.f32.mrf.mxu1 }
  0xf1   : > { %3184 = vst [vmem:[#allocation2_spill] sm:$0xff] %v2861_v57 }
  0xf2   : > { %v2171_v60 = vpop.f32.mrf.mxu0  ;;  %v2243_v61 = vpop.f32.mrf.mxu1 }
  0xf3   : > { %v2863_v62 = vadd.f32 %v2171_v60, %v2170_v58  ;;  %v2865_v63 = vadd.f32 %v2243_v61, %v2242_v59 }
  0xf4   : > { %v2173_v0 = vpop.f32.mrf.mxu0  ;;  %v2245_v1 = vpop.f32.mrf.mxu1 }
  0xf5   : > { %3185 = vst [vmem:[#allocation3_spill] sm:$0xff] %v2865_v63 }
  0xf6   : > { %v2174_v2 = vpop.f32.mrf.mxu0  ;;  %v2246_v3 = vpop.f32.mrf.mxu1 }
  0xf7   : > { %v2867_v4 = vadd.f32 %v2174_v2, %v2173_v0  ;;  %v2869_v5 = vadd.f32 %v2246_v3, %v2245_v1 }
  0xf8   : > { %v2176_v6 = vpop.f32.mrf.mxu0  ;;  %v2248_v7 = vpop.f32.mrf.mxu1 }
  0xf9   : > { %3186 = vst [vmem:[#allocation4_spill] sm:$0xff] %v2869_v5 }
  0xfa   : > { %v2177_v8 = vpop.f32.mrf.mxu0  ;;  %v2249_v9 = vpop.f32.mrf.mxu1 }
  0xfb   : > { %v2871_v10 = vadd.f32 %v2177_v8, %v2176_v6  ;;  %v2873_v11 = vadd.f32 %v2249_v9, %v2248_v7 }
  0xfc   : > { %v2179_v12 = vpop.f32.mrf.mxu0  ;;  %v2251_v13 = vpop.f32.mrf.mxu1 }
  0xfd   : > { %3187 = vst [vmem:[#allocation5_spill] sm:$0xff] %v2873_v11 }
  0xfe   : > { %v2180_v14 = vpop.f32.mrf.mxu0  ;;  %v2252_v15 = vpop.f32.mrf.mxu1 }
  0xff   : > { %v2875_v16 = vadd.f32 %v2180_v14, %v2179_v12  ;;  %v2877_v17 = vadd.f32 %v2252_v15, %v2251_v13 }
 0x100   : > { %v2182_v18 = vpop.f32.mrf.mxu0  ;;  %v2254_v19 = vpop.f32.mrf.mxu1 }
 0x101   : > { %3188 = vst [vmem:[#allocation6_spill] sm:$0xff] %v2877_v17 }
 0x102   : > { %v2183_v20 = vpop.f32.mrf.mxu0  ;;  %v2255_v21 = vpop.f32.mrf.mxu1 }
 0x103   : > { %v2879_v22 = vadd.f32 %v2183_v20, %v2182_v18  ;;  %v2881_v23 = vadd.f32 %v2255_v21, %v2254_v19 }
 0x104   : > { %v2185_v24 = vpop.f32.mrf.mxu0  ;;  %v2257_v25 = vpop.f32.mrf.mxu1 }
 0x105   : > { %3189 = vst [vmem:[#allocation7_spill] sm:$0xff] %v2881_v23 }
 0x106   : > { %v2186_v26 = vpop.f32.mrf.mxu0  ;;  %v2258_v27 = vpop.f32.mrf.mxu1 }
 0x107   : > { %v2883_v28 = vadd.f32 %v2186_v26, %v2185_v24  ;;  %v2885_v29 = vadd.f32 %v2258_v27, %v2257_v25 }
 0x108   : > { %v2188_v30 = vpop.f32.mrf.mxu0  ;;  %v2260_v31 = vpop.f32.mrf.mxu1 }
 0x109   : > { %3190 = vst [vmem:[#allocation8_spill] sm:$0xff] %v2885_v29 }
 0x10a   : > { %v2189_v32 = vpop.f32.mrf.mxu0  ;;  %v2261_v33 = vpop.f32.mrf.mxu1 }
 0x10b   : > { %v2887_v34 = vadd.f32 %v2189_v32, %v2188_v30  ;;  %v2889_v35 = vadd.f32 %v2261_v33, %v2260_v31 }
 0x10c   : > { %v2191_v36 = vpop.f32.mrf.mxu0  ;;  %v2279_v37 = vpop.f32.mrf.mxu1 }
 0x10d   : > { %3191 = vst [vmem:[#allocation9_spill] sm:$0xff] %v2889_v35 }
 0x10e   : > { %v2192_v38 = vpop.f32.mrf.mxu0  ;;  %v2280_v39 = vpop.f32.mrf.mxu1 }
 0x10f   : > { %v2891_v40 = vadd.f32 %v2192_v38, %v2191_v36  ;;  %v2281_v41 = vadd.f32 %v2280_v39, %v2279_v37 }
 0x110   : > { %v2194_v42 = vpop.f32.mrf.mxu0  ;;  %v2893_v43 = vpop.f32.mrf.mxu1 }
 0x111   : > { %v2895_v44 = vadd.f32 %v2281_v41, %v2169_v56 }
 0x112   : > { %v2195_v45 = vpop.f32.mrf.mxu0  ;;  %v2897_v46 = vpop.f32.mrf.mxu1 }
 0x113   : > { %v2899_v47 = vadd.f32 %v2195_v45, %v2194_v42 }
 0x114   : > { %v2197_v48 = vpop.f32.mrf.mxu0  ;;  %v2285_v49 = vpop.f32.mrf.mxu1 }
 0x116   : > { %v2198_v50 = vpop.f32.mrf.mxu0  ;;  %v2286_v51 = vpop.f32.mrf.mxu1 }
 0x117   : > { %v2901_v52 = vadd.f32 %v2198_v50, %v2197_v48  ;;  %v2287_v17 = vadd.f32 %v2286_v51, %v2285_v49  ;;  %v2284_v51 = vadd.f32 %v2897_v46, %v2893_v43 }
 0x118   : > { %v2200_v53 = vpop.f32.mrf.mxu0  ;;  %v2288_v54 = vpop.f32.mrf.mxu1 }
 0x11a   : > { %v2201_v55 = vpop.f32.mrf.mxu0  ;;  %v2289_v58 = vpop.f32.mrf.mxu1 }
 0x11b   : > { %v2903_v59 = vadd.f32 %v2201_v55, %v2200_v53 }
 0x11c   : > { %v2203_v60 = vpop.f32.mrf.mxu0  ;;  %v2905_v56 = vpop.f32.mrf.mxu1 }
 0x11e   : > { %v2204_v61 = vpop.f32.mrf.mxu0  ;;  %v2907_v0 = vpop.f32.mrf.mxu1 }
 0x11f   : > { %v2909_v1 = vadd.f32 %v2204_v61, %v2203_v60  ;;  %v2293_v43 = vadd.f32 %v2907_v0, %v2905_v56 }
 0x120   : > { %v2206_v2 = vpop.f32.mrf.mxu0  ;;  %v2911_v3 = vpop.f32.mrf.mxu1 }
 0x122   : > { %v2207_v6 = vpop.f32.mrf.mxu0  ;;  %v2913_v7 = vpop.f32.mrf.mxu1 }
 0x123   : > { %v2915_v8 = vadd.f32 %v2207_v6, %v2206_v2  ;;  %v2296_v56 = vadd.f32 %v2913_v7, %v2911_v3 }
 0x124   : > { %v2917_v9 = vpop.f32.mrf.mxu0  ;;  %v2297_v12 = vpop.f32.mrf.mxu1 }
 0x126   : > { %v2919_v13 = vpop.f32.mrf.mxu0  ;;  %v2298_v14 = vpop.f32.mrf.mxu1 }
 0x128   : > { %v2921_v15 = vpop.f32.mrf.mxu0  ;;  %v2300_v18 = vpop.f32.mrf.mxu1 }
 0x12a   : > { %v2923_v19 = vpop.f32.mrf.mxu0  ;;  %v2301_v20 = vpop.f32.mrf.mxu1 }
 0x12c   : > { %v2215_v21 = vpop.f32.mrf.mxu0  ;;  %v2925_v24 = vpop.f32.mrf.mxu1 }
 0x12e   : > { %v2216_v25 = vpop.f32.mrf.mxu0  ;;  %v2927_v26 = vpop.f32.mrf.mxu1 }
 0x12f   : > { %v2929_v27 = vadd.f32 %v2216_v25, %v2215_v21 }
 0x130   : > { %v2931_v30 = vpop.f32.mrf.mxu0  ;;  %v2933_v31 = vpop.f32.mrf.mxu1 }
 0x131   : > { %3192 = vst [vmem:[#allocation10_spill] sm:$0xff] %v2929_v27  ;;  %3193 = vst [vmem:[#allocation11_spill] sm:$0xff] %v2931_v30 }
 0x132   : > { %v2935_v32 = vpop.f32.mrf.mxu0  ;;  %v2937_v33 = vpop.f32.mrf.mxu1 }
 0x133   : > { %3194 = vst [vmem:[#allocation12_spill] sm:$0xff] %v2935_v32 }
 0x134   : > { %v2939_v36 = vpop.f32.mrf.mxu0  ;;  %v2309_v37 = vpop.f32.mrf.mxu1 }
 0x136   : > { %v2941_v38 = vpop.f32.mrf.mxu0  ;;  %v2310_v39 = vpop.f32.mrf.mxu1 }
 0x138   : > { %v2943_v41 = vpop.f32.mrf.mxu0  ;;  %v2945_v42 = vpop.f32.mrf.mxu1 }
 0x13a   : > { %v2947_v45 = vpop.f32.mrf.mxu0  ;;  %v2949_v48 = vpop.f32.mrf.mxu1 }
 0x13c   : > { %v2951_v50 = vpop.f32.mrf.mxu0  ;;  %v2953_v53 = vpop.f32.mrf.mxu1 }
 0x13d   : > { %3195 = vst [vmem:[#allocation13_spill] sm:$0xff] %v2951_v50 }
 0x13e   : > { %v2955_v55 = vpop.f32.mrf.mxu0  ;;  %v2957_v60 = vpop.f32.mrf.mxu1 }
 0x13f   : > { %3196 = vst [vmem:[#allocation14_spill] sm:$0xff] %v2955_v55 }
 0x140   : > { %v2959_v61 = vpop.f32.mrf.mxu0  ;;  %v2961_v2 = vpop.f32.mrf.mxu1 }
 0x141   : > { %3197 = vst [vmem:[#allocation15_spill] sm:$0xff] %v2959_v61  ;;  %v1242_v61 = vadd.f32 %v2287_v17, %v2867_v4 }
 0x142   : > { %v2963_v6 = vpop.f32.mrf.mxu0  ;;  %v2965_v21 = vpop.f32.mrf.mxu1 }
 0x143   : > { %3198 = vst [vmem:[#allocation16_spill] sm:$0xff] %v2963_v6  ;;  %v2290_v6 = vadd.f32 %v2289_v58, %v2288_v54  ;;  %v3001_v58 = vld [vmem:[%s3182_s3] ss:$0 sm:$0xff] }
 0x144   : > { %v2967_v25 = vpop.f32.mrf.mxu0  ;;  %v2969_v35 = vpop.f32.mrf.mxu1 }
 0x145   : > { %3199 = vst [vmem:[#allocation17_spill] sm:$0xff] %v2967_v25  ;;  %v2299_v25 = vadd.f32 %v2298_v14, %v2297_v12  ;;  %v1245_v17 = vadd.f32 %v2290_v6, %v2871_v10  ;;  %v2302_v12 = vadd.f32 %v2301_v20, %v2300_v18  ;;  %v2311_v20 = vadd.f32 %v2310_v39, %v2309_v37 }
 0x146   : > { %v2971_v23 = vpop.f32.mrf.mxu0  ;;  %v2973_v29 = vpop.f32.mrf.mxu1  ;;  %v2305_v37 = vadd.f32 %v2927_v26, %v2925_v24 }
 0x147   : > { %3200 = vst [vmem:[#allocation18_spill] sm:$0xff] %v2971_v23  ;;  %v2989_v23 = vld [vmem:[%s3181_s2] ss:$0 sm:$0xff]  ;;  %v1274_v26 = vadd.f32 %v2311_v20, %v2901_v52 }
 0x148   : > { %v2975_v63 = vpop.f32.mrf.mxu0  ;;  %v2977_v11 = vpop.f32.mrf.mxu1 }
 0x149   : > { %3201 = vst [vmem:[#allocation19_spill] sm:$0xff] %v2975_v63 }
 0x14a   : > { %v2979_v57 = vpop.f32.mrf.mxu0  ;;  %v2981_v5 = vpop.f32.mrf.mxu1 }
 0x14b   : > { %3202 = vst [vmem:[#allocation20_spill] sm:$0xff] %v2979_v57 }
 0x14c   : > { %v2984_v55 = vpop.f32.mrf.mxu1  ;;  %v2405_v50 = vpop.f32.mrf.mxu0 }
 0x14d   : > { %v1403_v49 = vadd.f32 %v2405_v50, %v1242_v61 }
 0x14e   : > { %v2993_v63 = vpop.f32.mrf.mxu1  ;;  %v1394_v57 = vpop.f32.mrf.mxu0 }
 0x14f   : > { %v1530_v54 = vmul.f32 %v2989_v23, %v1403_v49  ;;  %v1395_v4 = vadd.f32 %v1394_v57, %v2895_v44  ;;  %v1237_v57 = vadd.f32 %v2284_v51, %v2863_v62  ;;  %v1258_v49 = vadd.f32 %v2299_v25, %v2883_v28 }
 0x150   : > { %v3003_v27 = vpop.f32.mrf.mxu1  ;;  %v2406_v50 = vpop.f32.mrf.mxu0  ;;  %v1250_v62 = vadd.f32 %v2293_v43, %v2875_v16  ;;  %v1261_v25 = vadd.f32 %v2302_v12, %v2887_v34  ;;  %v1253_v43 = vadd.f32 %v2296_v56, %v2879_v22 }
 0x151   : > { %3203 = vst [vmem:[#allocation21_spill] sm:$0xff] %v3003_v27  ;;  %v1406_v46 = vadd.f32 %v2406_v50, %v1245_v17  ;;  %v1528_v14 = vmul.f32 %v2989_v23, %v1395_v4  ;;  %v1569_v44 = vadd.f32 %v3001_v58, %v1530_v54 }
 0x152   : > { %v3008_v61 = vpop.f32.mrf.mxu1  ;;  %v1397_v10 = vpop.f32.mrf.mxu0 }
 0x153   : > { %v1531_v6 = vmul.f32 %v2989_v23, %v1406_v46  ;;  %v1398_v32 = vadd.f32 %v1397_v10, %v1237_v57  ;;  %v1567_v51 = vadd.f32 %v3001_v58, %v1528_v14  ;;  %v1601_v17 = vmax.f32 %v1569_v44, 0.0 }
 0x154   : > { %v3014_v30 = vpop.f32.mrf.mxu1  ;;  %v2409_v27 = vpop.f32.mrf.mxu0  ;;  %v2314_v46 = vadd.f32 %v2949_v48, %v2945_v42  ;;  %v2308_v48 = vadd.f32 %v2937_v33, %v2933_v31 }
 0x155   : > { %v1570_v0 = vadd.f32 %v3001_v58, %v1531_v6  ;;  %v1419_v18 = vadd.f32 %v2409_v27, %v1258_v49  ;;  %v1529_v54 = vmul.f32 %v2989_v23, %v1398_v32  ;;  %v1599_v12 = vmax.f32 %v1567_v51, 0.0 }
 0x156   : > { %v3023_v4 = vpop.f32.mrf.mxu1  ;;  %v1410_v28 = vpop.f32.mrf.mxu0  ;;  %v2323_v51 = vadd.f32 %v2973_v29, %v2969_v35 }
 0x157   : > { %v1602_v50 = vmax.f32 %v1570_v0, 0.0  ;;  %v1534_v3 = vmul.f32 %v2989_v23, %v1419_v18  ;;  %v1411_v7 = vadd.f32 %v1410_v28, %v1250_v62  ;;  %v1568_v16 = vadd.f32 %v3001_v58, %v1529_v54 }
 0x158   : > { %v3033_v27 = vpop.f32.mrf.mxu1  ;;  %v2410_v32 = vpop.f32.mrf.mxu0  ;;  %v1266_v62 = vadd.f32 %v2305_v37, %v2891_v40  ;;  %v2211_v40 = vadd.f32 %v2919_v13, %v2917_v9  ;;  %v2326_v37 = vadd.f32 %v2981_v5, %v2977_v11 }
 0x159   : > { %v2064_v34 = vpack.c.bf16 %v1602_v50, %v1601_v17  ;;  %v1422_v39 = vadd.f32 %v2410_v32, %v1261_v25  ;;  %v1600_v14 = vmax.f32 %v1568_v16, 0.0  ;;  %v1532_v57 = vmul.f32 %v2989_v23, %v1411_v7 }
 0x15a   : > { %v3041_v10 = vpop.f32.mrf.mxu1  ;;  %v1413_v44 = vpop.f32.mrf.mxu0  ;;  %v1573_v6 = vadd.f32 %v3001_v58, %v1534_v3  ;;  %v1277_v25 = vadd.f32 %v2314_v46, %v2903_v59  ;;  %v2317_v7 = vadd.f32 %v2957_v60, %v2953_v53  ;;  %v1269_v59 = vadd.f32 %v2308_v48, %v2899_v47 }
 0x15b   : > { %2136 = vst [vmem:[%s3030_s29 + $0x8] sm:$0xff] %v2064_v34   ;;  %v1535_v24 = vmul.f32 %v2989_v23, %v1422_v39  ;;  %v2059_v49 = vpack.c.bf16 %v1600_v14, %v1599_v12  ;;  %v1414_v22 = vadd.f32 %v1413_v44, %v1253_v43  ;;  %v1571_v54 = vadd.f32 %v3001_v58, %v1532_v57 }
 0x15c   : > { %v3047_v56 = vpop.f32.mrf.mxu1  ;;  %v2413_v42 = vpop.f32.mrf.mxu0  ;;  %v1605_v17 = vmax.f32 %v1573_v6, 0.0  ;;  %v1290_v60 = vadd.f32 %v2323_v51, %v2211_v40  ;;  %v2214_v47 = vadd.f32 %v2923_v19, %v2921_v15  ;;  %v2320_v57 = vadd.f32 %v2965_v21, %v2961_v2 }
 0x15d   : > { %v1574_v0 = vadd.f32 %v3001_v58, %v1535_v24  ;;  %v1435_v18 = vadd.f32 %v2413_v42, %v1274_v26  ;;  %2060 = vst [vmem:[%s3030_s29] sm:$0xff] %v2059_v49   ;;  %v1533_v52 = vmul.f32 %v2989_v23, %v1414_v22  ;;  %v1603_v34 = vmax.f32 %v1571_v54, 0.0 }
 0x15e   : > { %v3058_v20 = vpop.f32.mrf.mxu1  ;;  %v1426_v28 = vpop.f32.mrf.mxu0  ;;  %v1282_v24 = vadd.f32 %v2317_v7, %v2909_v1  ;;  %v2335_v26 = vadd.f32 %v3023_v4, %v3014_v30  ;;  %v1293_v42 = vadd.f32 %v2326_v37, %v2214_v47  ;;  %v2223_v1 = vadd.f32 %v2941_v38, %v2939_v36  ;;  %v3205_v7 = vld [vmem:[#allocation11_spill] sm:$0xff] }
 0x15f   : > { %v1606_v31 = vmax.f32 %v1574_v0, 0.0  ;;  %v1538_v33 = vmul.f32 %v2989_v23, %v1435_v18  ;;  %v1427_v50 = vadd.f32 %v1426_v28, %v1266_v62  ;;  %v1572_v29 = vadd.f32 %v3001_v58, %v1533_v52 }
 0x160   : > { %v3065_v35 = vpop.f32.mrf.mxu1  ;;  %v2414_v3 = vpop.f32.mrf.mxu0  ;;  %v2329_v62 = vadd.f32 %v2993_v63, %v2984_v55  ;;  %v1285_v52 = vadd.f32 %v2320_v57, %v2915_v8  ;;  %v2338_v28 = vadd.f32 %v3041_v10, %v3033_v27  ;;  %v1306_v63 = vadd.f32 %v2335_v26, %v2223_v1  ;;  %v3204_v8 = vld [vmem:[#allocation21_spill] sm:$0xff] }
 0x161   : > { %v2074_v16 = vpack.c.bf16 %v1606_v31, %v1605_v17  ;;  %v1438_v32 = vadd.f32 %v2414_v3, %v1277_v25  ;;  %v1604_v39 = vmax.f32 %v1572_v29, 0.0  ;;  %v1536_v43 = vmul.f32 %v2989_v23, %v1427_v50  ;;  %v3210_v1 = vld [vmem:[#allocation13_spill] sm:$0xff] }
 0x162   : > { %v3073_v9 = vpop.f32.mrf.mxu1  ;;  %v1429_v13 = vpop.f32.mrf.mxu0  ;;  %v1577_v46 = vadd.f32 %v3001_v58, %v1538_v33  ;;  %v2226_v55 = vadd.f32 %v2947_v45, %v2943_v41  ;;  %v2332_v40 = vadd.f32 %v3008_v61, %v3204_v8  ;;  %v2341_v26 = vadd.f32 %v3058_v20, %v3047_v56  ;;  %v3212_v56 = vld [vmem:[#allocation15_spill] sm:$0xff]  ;;  %v3213_v20 = vld [vmem:[#allocation16_spill] sm:$0xff] }
 0x163   : > { %2138 = vst [vmem:[%s3030_s29 + $0x18] sm:$0xff] %v2074_v16   ;;  %v1539_v53 = vmul.f32 %v2989_v23, %v1438_v32  ;;  %v2069_v12 = vpack.c.bf16 %v1604_v39, %v1603_v34  ;;  %v1430_v14 = vadd.f32 %v1429_v13, %v1269_v59  ;;  %v1575_v49 = vadd.f32 %v3001_v58, %v1536_v43  ;;  %v3206_v16 = vld [vmem:[#allocation12_spill] sm:$0xff]  ;;  %v3207_v34 = vld [vmem:[#allocation10_spill] sm:$0xff] }
 0x164   : > { %v2345_v5 = vpop.f32.mrf.mxu1  ;;  %v2417_v11 = vpop.f32.mrf.mxu0  ;;  %v1609_v48 = vmax.f32 %v1577_v46, 0.0  ;;  %v2220_v32 = vadd.f32 %v3206_v16, %v3205_v7  ;;  %v1298_v39 = vadd.f32 %v2329_v62, %v3207_v34  ;;  %v1309_v46 = vadd.f32 %v2338_v28, %v2226_v55 }
 0x165   : > { %v1578_v44 = vadd.f32 %v3001_v58, %v1539_v53  ;;  %v1451_v6 = vadd.f32 %v2417_v11, %v1290_v60  ;;  %2137 = vst [vmem:[%s3030_s29 + $0x10] sm:$0xff] %v2069_v12   ;;  %v1537_v15 = vmul.f32 %v2989_v23, %v1430_v14  ;;  %v1607_v25 = vmax.f32 %v1575_v49, 0.0  ;;  %v3208_v14 = vld [vmem:[#allocation17_spill] sm:$0xff]  ;;  %v3209_v11 = vld [vmem:[#allocation18_spill] sm:$0xff] }
 0x166   : > { %v2346_v19 = vpop.f32.mrf.mxu1  ;;  %v1442_v22 = vpop.f32.mrf.mxu0  ;;  %v2235_v57 = vadd.f32 %v3209_v11, %v3208_v14  ;;  %v3216_v11 = vld [vmem:[#allocation4_spill] sm:$0xff] }
 0x167   : > { %v1610_v0 = vmax.f32 %v1578_v44, 0.0  ;;  %v1542_v2 = vmul.f32 %v2989_v23, %v1451_v6  ;;  %v1443_v21 = vadd.f32 %v1442_v22, %v1282_v24  ;;  %v1576_v18 = vadd.f32 %v3001_v58, %v1537_v15 }
 0x168   : > { %v2348_v30 = vpop.f32.mrf.mxu1  ;;  %v2418_v4 = vpop.f32.mrf.mxu0  ;;  %v2347_v43 = vadd.f32 %v2346_v19, %v2345_v5  ;;  %v1301_v24 = vadd.f32 %v2332_v40, %v2220_v32 }
 0x169   : > { %v2084_v51 = vpack.c.bf16 %v1610_v0, %v1609_v48  ;;  %v1454_v54 = vadd.f32 %v2418_v4, %v1293_v42  ;;  %v1608_v17 = vmax.f32 %v1576_v18, 0.0  ;;  %v1540_v31 = vmul.f32 %v2989_v23, %v1443_v21  ;;  %v3211_v18 = vld [vmem:[#allocation14_spill] sm:$0xff] }
 0x16a   : > { %v2349_v33 = vpop.f32.mrf.mxu1  ;;  %v1445_v36 = vpop.f32.mrf.mxu0  ;;  %v1581_v38 = vadd.f32 %v3001_v58, %v1542_v2  ;;  %v2229_v4 = vadd.f32 %v3211_v18, %v3210_v1 }
 0x16b   : > { %2140 = vst [vmem:[%s3030_s29 + $0x28] sm:$0xff] %v2084_v51   ;;  %v1543_v50 = vmul.f32 %v2989_v23, %v1454_v54  ;;  %v2079_v27 = vpack.c.bf16 %v1608_v17, %v1607_v25  ;;  %v1446_v10 = vadd.f32 %v1445_v36, %v1285_v52  ;;  %v1579_v13 = vadd.f32 %v3001_v58, %v1540_v31  ;;  %v3214_v54 = vld [vmem:[#allocation19_spill] sm:$0xff]  ;;  %v3215_v52 = vld [vmem:[#allocation20_spill] sm:$0xff] }
 0x16c   : > { %v2351_v29 = vpop.f32.mrf.mxu1  ;;  %v2421_v3 = vpop.f32.mrf.mxu0  ;;  %v1613_v53 = vmax.f32 %v1581_v38, 0.0  ;;  %v2350_v15 = vadd.f32 %v2349_v33, %v2348_v30  ;;  %v1322_v51 = vadd.f32 %v2347_v43, %v2235_v57  ;;  %v2232_v30 = vadd.f32 %v3213_v20, %v3212_v56 }
 0x16d   : > { %v1582_v59 = vadd.f32 %v3001_v58, %v1543_v50  ;;  %v1467_v37 = vadd.f32 %v2421_v3, %v1306_v63  ;;  %2139 = vst [vmem:[%s3030_s29 + $0x20] sm:$0xff] %v2079_v27   ;;  %v1541_v41 = vmul.f32 %v2989_v23, %v1446_v10  ;;  %v1611_v22 = vmax.f32 %v1579_v13, 0.0 }
 0x16e   : > { %v2352_v45 = vpop.f32.mrf.mxu1  ;;  %v1458_v61 = vpop.f32.mrf.mxu0  ;;  %v2238_v28 = vadd.f32 %v3215_v52, %v3214_v54  ;;  %v2344_v36 = vadd.f32 %v3073_v9, %v3065_v35  ;;  %v1314_v63 = vadd.f32 %v2341_v26, %v2229_v4 }
 0x16f   : > { %v1614_v60 = vmax.f32 %v1582_v59, 0.0  ;;  %v1546_v47 = vmul.f32 %v2989_v23, %v1467_v37  ;;  %v1459_v12 = vadd.f32 %v1458_v61, %v1298_v39  ;;  %v1580_v44 = vadd.f32 %v3001_v58, %v1541_v41 }
 0x170   : > { %v2354_v6 = vpop.f32.mrf.mxu1  ;;  %v2422_v5 = vpop.f32.mrf.mxu0  ;;  %v1325_v3 = vadd.f32 %v2350_v15, %v2238_v28  ;;  %v2353_v34 = vadd.f32 %v2352_v45, %v2351_v29  ;;  %v1317_v13 = vadd.f32 %v2344_v36, %v2232_v30 }
 0x171   : > { %v2094_v49 = vpack.c.bf16 %v1614_v60, %v1613_v53  ;;  %v1470_v19 = vadd.f32 %v2422_v5, %v1309_v46  ;;  %v1612_v42 = vmax.f32 %v1580_v44, 0.0  ;;  %v1585_v48 = vadd.f32 %v3001_v58, %v1546_v47 }
 0x172   : > { %v1544_v0 = vmul.f32 %v2989_v23, %v1459_v12  ;;  %v2355_v2 = vpop.f32.mrf.mxu1  ;;  %v1461_v21 = vpop.f32.mrf.mxu0 }
 0x173   : > { %2142 = vst [vmem:[%s3030_s29 + $0x38] sm:$0xff] %v2094_v49   ;;  %v1547_v62 = vmul.f32 %v2989_v23, %v1470_v19  ;;  %v2089_v25 = vpack.c.bf16 %v1612_v42, %v1611_v22  ;;  %v1462_v17 = vadd.f32 %v1461_v21, %v1301_v24  ;;  %v1617_v55 = vmax.f32 %v1585_v48, 0.0  ;;  %v3217_v49 = vld [vmem:[#allocation2_spill] sm:$0xff] }
 0x174   : > { %v2357_v31 = vpop.f32.mrf.mxu1  ;;  %v2425_v33 = vpop.f32.mrf.mxu0  ;;  %v1583_v8 = vadd.f32 %v3001_v58, %v1544_v0  ;;  %v1330_v15 = vadd.f32 %v2353_v34, %v3217_v49  ;;  %v2356_v19 = vadd.f32 %v2355_v2, %v2354_v6 }
 0x175   : > { %v1586_v38 = vadd.f32 %v3001_v58, %v1547_v62  ;;  %v1483_v50 = vadd.f32 %v2425_v33, %v1322_v51  ;;  %2141 = vst [vmem:[%s3030_s29 + $0x30] sm:$0xff] %v2089_v25   ;;  %v1545_v40 = vmul.f32 %v2989_v23, %v1462_v17  ;;  %v3218_v62 = vld [vmem:[#allocation5_spill] sm:$0xff] }
 0x176   : > { %v2358_v27 = vpop.f32.mrf.mxu1  ;;  %v1474_v10 = vpop.f32.mrf.mxu0  ;;  %v1615_v41 = vmax.f32 %v1583_v8, 0.0 }
 0x177   : > { %v1618_v7 = vmax.f32 %v1586_v38, 0.0  ;;  %v1550_v16 = vmul.f32 %v2989_v23, %v1483_v50  ;;  %v2359_v32 = vadd.f32 %v2358_v27, %v2357_v31  ;;  %v1475_v59 = vadd.f32 %v1474_v10, %v1314_v63  ;;  %v3219_v31 = vld [vmem:[#allocation3_spill] sm:$0xff] }
 0x178   : > { %v1584_v35 = vadd.f32 %v3001_v58, %v1545_v40  ;;  %v2360_v9 = vpop.f32.mrf.mxu1  ;;  %v2426_v37 = vpop.f32.mrf.mxu0  ;;  %v1333_v33 = vadd.f32 %v2356_v19, %v3219_v31 }
 0x179   : > { %v2104_v39 = vpack.c.bf16 %v1618_v7, %v1617_v55  ;;  %v1486_v43 = vadd.f32 %v2426_v37, %v1325_v3  ;;  %v1589_v46 = vadd.f32 %v3001_v58, %v1550_v16  ;;  %v1548_v53 = vmul.f32 %v2989_v23, %v1475_v59  ;;  %v3220_v3 = vld [vmem:[#allocation6_spill] sm:$0xff] }
 0x17a   : > { %v1616_v61 = vmax.f32 %v1584_v35, 0.0  ;;  %v2361_v60 = vpop.f32.mrf.mxu1  ;;  %v1477_v47 = vpop.f32.mrf.mxu0  ;;  %v1338_v57 = vadd.f32 %v2359_v32, %v3216_v11 }
 0x17b   : > { %2144 = vst [vmem:[%s3030_s29 + $0x48] sm:$0xff] %v2104_v39   ;;  %v1551_v12 = vmul.f32 %v2989_v23, %v1486_v43  ;;  %v2362_v14 = vadd.f32 %v2361_v60, %v2360_v9  ;;  %v1478_v29 = vadd.f32 %v1477_v47, %v1317_v13  ;;  %v1621_v22 = vmax.f32 %v1589_v46, 0.0  ;;  %v3221_v46 = vld [vmem:[#allocation8_spill] sm:$0xff]  ;;  %v3222_v47 = vld [vmem:[#allocation7_spill] sm:$0xff] }
 0x17c   : > { %v2099_v44 = vpack.c.bf16 %v1616_v61, %v1615_v41  ;;  %v2363_v45 = vpop.f32.mrf.mxu1  ;;  %v2429_v5 = vpop.f32.mrf.mxu0  ;;  %v1587_v42 = vadd.f32 %v3001_v58, %v1548_v53 }
 0x17d   : > { %v1590_v24 = vadd.f32 %v3001_v58, %v1551_v12  ;;  %v1499_v26 = vadd.f32 %v2429_v5, %v1338_v57  ;;  %v1549_v48 = vmul.f32 %v2989_v23, %v1478_v29  ;;  %v1341_v51 = vadd.f32 %v2362_v14, %v3218_v62 }
 0x17e   : > { %2143 = vst [vmem:[%s3030_s29 + $0x40] sm:$0xff] %v2099_v44   ;;  %v2364_v0 = vpop.f32.mrf.mxu1  ;;  %v1490_v21 = vpop.f32.mrf.mxu0  ;;  %v1619_v52 = vmax.f32 %v1587_v42, 0.0 }
 0x17f   : > { %v1622_v1 = vmax.f32 %v1590_v24, 0.0  ;;  %v1554_v18 = vmul.f32 %v2989_v23, %v1499_v26  ;;  %v1491_v4 = vadd.f32 %v1490_v21, %v1330_v15  ;;  %v1588_v56 = vadd.f32 %v3001_v58, %v1549_v48  ;;  %v3223_v15 = vld [vmem:[#allocation9_spill] sm:$0xff] }
 0x180   : > { %v2366_v20 = vpop.f32.mrf.mxu1  ;;  %v2430_v30 = vpop.f32.mrf.mxu0  ;;  %v2365_v2 = vadd.f32 %v2364_v0, %v2363_v45 }
 0x181   : > { %v2114_v6 = vpack.c.bf16 %v1622_v1, %v1621_v22  ;;  %v1502_v54 = vadd.f32 %v2430_v30, %v1341_v51  ;;  %v1620_v28 = vmax.f32 %v1588_v56, 0.0  ;;  %v1552_v25 = vmul.f32 %v2989_v23, %v1491_v4 }
 0x182   : > { %v2367_v17 = vpop.f32.mrf.mxu1  ;;  %v1493_v36 = vpop.f32.mrf.mxu0  ;;  %v1593_v38 = vadd.f32 %v3001_v58, %v1554_v18  ;;  %v1346_v7 = vadd.f32 %v2365_v2, %v3220_v3 }
 0x183   : > { %2146 = vst [vmem:[%s3030_s29 + $0x58] sm:$0xff] %v2114_v6   ;;  %v1555_v50 = vmul.f32 %v2989_v23, %v1502_v54  ;;  %v2109_v63 = vpack.c.bf16 %v1620_v28, %v1619_v52  ;;  %v1494_v55 = vadd.f32 %v1493_v36, %v1333_v33  ;;  %v2368_v10 = vadd.f32 %v2367_v17, %v2366_v20 }
 0x184   : > { %v2369_v8 = vpop.f32.mrf.mxu1  ;;  %v2433_v40 = vpop.f32.mrf.mxu0  ;;  %v1591_v16 = vadd.f32 %v3001_v58, %v1552_v25  ;;  %v1625_v9 = vmax.f32 %v1593_v38, 0.0 }
 0x185   : > { %v1594_v27 = vadd.f32 %v3001_v58, %v1555_v50  ;;  %2145 = vst [vmem:[%s3030_s29 + $0x50] sm:$0xff] %v2109_v63   ;;  %v1553_v32 = vmul.f32 %v2989_v23, %v1494_v55  ;;  %v1349_v12 = vadd.f32 %v2368_v10, %v3222_v47 }
 0x186   : > { %v2370_v59 = vpop.f32.mrf.mxu1  ;;  %v1506_v35 = vpop.f32.mrf.mxu0  ;;  %v1623_v14 = vmax.f32 %v1591_v16, 0.0 }
 0x187   : > { %v1626_v37 = vmax.f32 %v1594_v27, 0.0  ;;  %v2371_v34 = vadd.f32 %v2370_v59, %v2369_v8  ;;  %v1507_v39 = vadd.f32 %v1506_v35, %v1346_v7  ;;  %v1592_v43 = vadd.f32 %v3001_v58, %v1553_v32 }
 0x188   : > { %v2372_v13 = vpop.f32.mrf.mxu1  ;;  %v2434_v41 = vpop.f32.mrf.mxu0 }
 0x189   : > { %v2124_v61 = vpack.c.bf16 %v1626_v37, %v1625_v9  ;;  %v1354_v53 = vadd.f32 %v2371_v34, %v3221_v46  ;;  %v1556_v60 = vmul.f32 %v2989_v23, %v1507_v39  ;;  %v1624_v11 = vmax.f32 %v1592_v43, 0.0 }
 0x18a   : > { %v2373_v57 = vpop.f32.mrf.mxu1  ;;  %v1509_v44 = vpop.f32.mrf.mxu0 }
 0x18b   : > { %2148 = vst [vmem:[%s3030_s29 + $0x68] sm:$0xff] %v2124_v61   ;;  %v1515_v29 = vadd.f32 %v2433_v40, %v1354_v53  ;;  %v2374_v45 = vadd.f32 %v2373_v57, %v2372_v13  ;;  %v1510_v5 = vadd.f32 %v1509_v44, %v1349_v12  ;;  %v2119_v24 = vpack.c.bf16 %v1624_v11, %v1623_v14 }
 0x18c   : > { %v1595_v49 = vadd.f32 %v3001_v58, %v1556_v60 }
 0x18d   : > { %v1558_v26 = vmul.f32 %v2989_v23, %v1515_v29  ;;  %v1357_v19 = vadd.f32 %v2374_v45, %v3223_v15  ;;  %v1557_v22 = vmul.f32 %v2989_v23, %v1510_v5  ;;  %2147 = vst [vmem:[%s3030_s29 + $0x60] sm:$0xff] %v2119_v24  }
 0x18e   : > { %v1627_v21 = vmax.f32 %v1595_v49, 0.0 }
 0x18f   : > { %v1518_v42 = vadd.f32 %v2434_v41, %v1357_v19  ;;  %v1596_v48 = vadd.f32 %v3001_v58, %v1557_v22  ;;  %v1597_v0 = vadd.f32 %v3001_v58, %v1558_v26 }
 0x191   : > { %v1559_v1 = vmul.f32 %v2989_v23, %v1518_v42  ;;  %v1628_v18 = vmax.f32 %v1596_v48, 0.0  ;;  %v1629_v51 = vmax.f32 %v1597_v0, 0.0 }
 0x193   : > { %v1598_v4 = vadd.f32 %v3001_v58, %v1559_v1  ;;  %v2129_v62 = vpack.c.bf16 %v1628_v18, %v1627_v21 }
 0x195   : > { %v1630_v56 = vmax.f32 %v1598_v4, 0.0  ;;  %2149 = vst [vmem:[%s3030_s29 + $0x70] sm:$0xff] %v2129_v62  }
 0x197   : > { %v2134_v20 = vpack.c.bf16 %v1630_v56, %v1629_v51 }
 0x199   : > { %2150 = vst [vmem:[%s3030_s29 + $0x78] sm:$0xff] %v2134_v20  }
 0x19a PF: > { %s14_s15 = sadd.s32 1, %s2614_s15  }
 0x19b   : > { %p11_p4 = scmp.ge.s32.totalorder %s14_s15, 4  }
 0x19d   :  { %13 = sbr.rel (!%p11_p4) target bundleno = 1 (0x1), region = 66 }

// kernel: simplenet7_forward.9
= control target key start
LH: loop header
LB: loop body
LE: loop exit
PB: predicated region body
PF: predicated region fallthrough
CT: control target
= control target key end

     0   :  { %s3007_s1 = inlined_call_operand.vmem [shape: bf16[1152,128], index: 1, kind: input, shape index: {}]   ;;  %s3008_s0 = inlined_call_operand.vmem [shape: bf16[128,1152], index: 0, kind: input, shape index: {}]   ;;  %s3009_s2 = inlined_call_operand.vmem [shape: f32[1,128], index: 2, kind: input, shape index: {}]   ;;  %s3010_s3 = inlined_call_operand.vmem [shape: f32[1,128], index: 3, kind: input, shape index: {}]   ;;  %s3011_s4 = inlined_call_operand.vmem [shape: bf16[128,128], index: 4, kind: output, shape index: {}]  }
   0x1   :  { %v2218_v0 = vld [vmem:[%s3007_s1 + $0x78] sm:$0xff]   ;;  %v2222_v4 = vld [vmem:[%s3007_s1 + $0x70] sm:$0xff]   ;;  %v2226_v8 = vld [vmem:[%s3007_s1 + $0x68] sm:$0xff]  }
   0x2   :  { %v2219_v1 = vld [vmem:[%s3007_s1 + $0xf8] sm:$0xff]   ;;  %1898 = vmatprep.subr.bf16.mxu0 %v2218_v0  ;;  %v2223_v5 = vld [vmem:[%s3007_s1 + $0xf0] sm:$0xff]   ;;  %v2227_v9 = vld [vmem:[%s3007_s1 + $0xe8] sm:$0xff]  }
   0x3   :  { %v2220_v2 = vld [vmem:[%s3007_s1 + $0x38] sm:$0xff]   ;;  %1962 = vmatprep.subr.bf16.mxu1 %v2219_v1  ;;  %v2224_v6 = vld [vmem:[%s3007_s1 + $0x30] sm:$0xff]   ;;  %v2228_v10 = vld [vmem:[%s3007_s1 + $0x28] sm:$0xff]  }
   0x4   :  { %v2221_v3 = vld [vmem:[%s3007_s1 + $0xb8] sm:$0xff]   ;;  %1899 = vmatpush3.bf16.msra.mxu0 %v2220_v2  ;;  %v2225_v7 = vld [vmem:[%s3007_s1 + $0xb0] sm:$0xff]   ;;  %v2229_v11 = vld [vmem:[%s3007_s1 + $0xa8] sm:$0xff]  }
   0x5   :  { %1963 = vmatpush3.bf16.msra.mxu1 %v2221_v3  ;;  %1900 = vmatprep.subr.bf16.mxu0 %v2222_v4  ;;  %v2230_v12 = vld [vmem:[%s3007_s1 + $0x60] sm:$0xff]   ;;  %v2234_v16 = vld [vmem:[%s3007_s1 + $0x58] sm:$0xff]   ;;  %v2238_v20 = vld [vmem:[%s3007_s1 + $0x50] sm:$0xff]  }
   0x6   :  { %1964 = vmatprep.subr.bf16.mxu1 %v2223_v5  ;;  %v2231_v13 = vld [vmem:[%s3007_s1 + $0xe0] sm:$0xff]   ;;  %v2235_v17 = vld [vmem:[%s3007_s1 + $0xd8] sm:$0xff]   ;;  %v2239_v21 = vld [vmem:[%s3007_s1 + $0xd0] sm:$0xff]  }
   0x7   :  { %v2232_v14 = vld [vmem:[%s3007_s1 + $0x20] sm:$0xff]   ;;  %v2236_v18 = vld [vmem:[%s3007_s1 + $0x18] sm:$0xff]   ;;  %v2240_v22 = vld [vmem:[%s3007_s1 + $0x10] sm:$0xff]  }
   0x8   :  { %1901 = vmatpush3.bf16.msra.mxu0 %v2224_v6  ;;  %v2233_v15 = vld [vmem:[%s3007_s1 + $0xa0] sm:$0xff]   ;;  %v2237_v19 = vld [vmem:[%s3007_s1 + $0x98] sm:$0xff]   ;;  %v2241_v23 = vld [vmem:[%s3007_s1 + $0x90] sm:$0xff]  }
   0x9   :  { %1965 = vmatpush3.bf16.msra.mxu1 %v2225_v7  ;;  %1902 = vmatprep.subr.bf16.mxu0 %v2226_v8  ;;  %v2242_v24 = vld [vmem:[%s3007_s1 + $0x48] sm:$0xff]   ;;  %v2246_v28 = vld [vmem:[%s3007_s1 + $0x40] sm:$0xff]   ;;  %v2256_v36 = vld [vmem:[%s3007_s1 + $0x178] sm:$0xff]  }
   0xa   :  { %1966 = vmatprep.subr.bf16.mxu1 %v2227_v9  ;;  %v2243_v25 = vld [vmem:[%s3007_s1 + $0xc8] sm:$0xff]   ;;  %v2247_v29 = vld [vmem:[%s3007_s1 + $0xc0] sm:$0xff]   ;;  %v2257_v37 = vld [vmem:[%s3007_s1 + $0x1f8] sm:$0xff]  }
   0xb   :  { %v2244_v26 = vld [vmem:[%s3007_s1 + $0x8] sm:$0xff]   ;;  %v2248_v30 = vld [vmem:[%s3007_s1] sm:$0xff]   ;;  %v2258_v38 = vld [vmem:[%s3007_s1 + $0x138] sm:$0xff]  }
   0xc   :  { %1903 = vmatpush3.bf16.msra.mxu0 %v2228_v10  ;;  %v2245_v27 = vld [vmem:[%s3007_s1 + $0x88] sm:$0xff]   ;;  %v2249_v31 = vld [vmem:[%s3007_s1 + $0x80] sm:$0xff]   ;;  %v2259_v39 = vld [vmem:[%s3007_s1 + $0x1b8] sm:$0xff]  }
   0xd   :  { %1967 = vmatpush3.bf16.msra.mxu1 %v2229_v11  ;;  %1904 = vmatprep.subr.bf16.mxu0 %v2230_v12  ;;  %v2250_v32 = vld [vmem:[%s3008_s0] ss:$36 sps:$4 sm:$0xff]   ;;  %v2253_v34 = vld [vmem:[%s3008_s0 + $0x8] ss:$36 sps:$4 sm:$0xff]   ;;  %v2262_v41 = vld [vmem:[%s3008_s0 + $0x54] ss:$36 sps:$4 sm:$0xff]  }
   0xe   :  { %1968 = vmatprep.subr.bf16.mxu1 %v2231_v13  ;;  %v2252_v33 = vld [vmem:[%s3008_s0 + $0x4] ss:$36 sps:$4 sm:$0xff]   ;;  %v2255_v35 = vld [vmem:[%s3008_s0 + $0xc] ss:$36 sps:$4 sm:$0xff]   ;;  %v2270_v48 = vld [vmem:[%s3008_s0 + $0x94] ss:$36 sps:$4 sm:$0xff]  }
   0xf   :  { %1074 = vmatprep.mubr.bf16.mxu0 %v2252_v33  ;;  %1171 = vmatprep.mubr.bf16.mxu1 %v2255_v35  ;;  %v2260_v40 = vld [vmem:[%s3008_s0 + $0x4c] ss:$36 sps:$4 sm:$0xff]   ;;  %v2272_v49 = vld [vmem:[%s3008_s0 + $0x9c] ss:$36 sps:$4 sm:$0xff]   ;;  %v2282_v57 = vld [vmem:[%s3008_s0 + $0xe4] ss:$36 sps:$4 sm:$0xff]  }
  0x10   :  { %1905 = vmatpush3.bf16.msra.mxu0 %v2232_v14  ;;  %v2264_v42 = vld [vmem:[%s3008_s0 + $0x48] ss:$36 sps:$4 sm:$0xff]   ;;  %v2265_v43 = vld [vmem:[%s3008_s0 + $0x50] ss:$36 sps:$4 sm:$0xff]   ;;  %v2275_v51 = vld [vmem:[%s3008_s0 + $0x98] ss:$36 sps:$4 sm:$0xff]  }
  0x11   :  { %1969 = vmatpush3.bf16.msra.mxu1 %v2233_v15  ;;  %1906 = vmatprep.subr.bf16.mxu0 %v2234_v16  ;;  %v2266_v44 = vld [vmem:[%s3007_s1 + $0x170] sm:$0xff]   ;;  %v2276_v52 = vld [vmem:[%s3007_s1 + $0x168] sm:$0xff]   ;;  %v2280_v56 = vld [vmem:[%s3008_s0 + $0xdc] ss:$36 sps:$4 sm:$0xff]  }
  0x12   :  { %1970 = vmatprep.subr.bf16.mxu1 %v2235_v17  ;;  %v2267_v45 = vld [vmem:[%s3007_s1 + $0x1f0] sm:$0xff]   ;;  %v2277_v53 = vld [vmem:[%s3007_s1 + $0x1e8] sm:$0xff]   ;;  %v2284_v58 = vld [vmem:[%s3008_s0 + $0xd8] ss:$36 sps:$4 sm:$0xff]  }
  0x13   :  { %v2268_v46 = vld [vmem:[%s3007_s1 + $0x130] sm:$0xff]   ;;  %v2278_v54 = vld [vmem:[%s3007_s1 + $0x128] sm:$0xff]   ;;  %v2285_v59 = vld [vmem:[%s3008_s0 + $0xe0] ss:$36 sps:$4 sm:$0xff]  }
  0x14   :  { %1907 = vmatpush3.bf16.msra.mxu0 %v2236_v18  ;;  %v2269_v47 = vld [vmem:[%s3007_s1 + $0x1b0] sm:$0xff]   ;;  %v2279_v55 = vld [vmem:[%s3007_s1 + $0x1a8] sm:$0xff]   ;;  %v2286_v60 = vld [vmem:[%s3007_s1 + $0x160] sm:$0xff]  }
  0x15   :  { %1971 = vmatpush3.bf16.msra.mxu1 %v2237_v19  ;;  %1908 = vmatprep.subr.bf16.mxu0 %v2238_v20  ;;  %v2274_v50 = vld [vmem:[%s3008_s0 + $0x90] ss:$36 sps:$4 sm:$0xff]   ;;  %v2287_v61 = vld [vmem:[%s3007_s1 + $0x1e0] sm:$0xff]   ;;  %v2296_v3 = vld [vmem:[%s3007_s1 + $0x158] sm:$0xff]  }
  0x16   :  { %1972 = vmatprep.subr.bf16.mxu1 %v2239_v21  ;;  %v2288_v62 = vld [vmem:[%s3007_s1 + $0x120] sm:$0xff]   ;;  %v2292_v1 = vld [vmem:[%s3008_s0 + $0x12c] ss:$36 sps:$4 sm:$0xff]   ;;  %v2297_v5 = vld [vmem:[%s3007_s1 + $0x1d8] sm:$0xff]  }
  0x17   :  { %v2289_v63 = vld [vmem:[%s3007_s1 + $0x1a0] sm:$0xff]   ;;  %v2295_v4 = vld [vmem:[%s3008_s0 + $0x128] ss:$36 sps:$4 sm:$0xff]   ;;  %v2298_v6 = vld [vmem:[%s3007_s1 + $0x118] sm:$0xff]  }
  0x18   :  { %1909 = vmatpush3.bf16.msra.mxu0 %v2240_v22  ;;  %v2290_v0 = vld [vmem:[%s3008_s0 + $0x124] ss:$36 sps:$4 sm:$0xff]   ;;  %v2299_v7 = vld [vmem:[%s3007_s1 + $0x198] sm:$0xff]   ;;  %v2300_v8 = vld [vmem:[%s3008_s0 + $0x16c] ss:$36 sps:$4 sm:$0xff]  }
  0x19   :  { %1973 = vmatpush3.bf16.msra.mxu1 %v2241_v23  ;;  %1910 = vmatprep.subr.bf16.mxu0 %v2242_v24  ;;  %v2294_v2 = vld [vmem:[%s3008_s0 + $0x120] ss:$36 sps:$4 sm:$0xff]   ;;  %v2302_v9 = vld [vmem:[%s3008_s0 + $0x174] ss:$36 sps:$4 sm:$0xff]   ;;  %v2304_v12 = vld [vmem:[%s3008_s0 + $0x168] ss:$36 sps:$4 sm:$0xff]  }
  0x1a   :  { %1974 = vmatprep.subr.bf16.mxu1 %v2243_v25  ;;  %v2306_v10 = vld [vmem:[%s3007_s1 + $0x150] sm:$0xff]   ;;  %v2312_v17 = vld [vmem:[%s3008_s0 + $0x1bc] ss:$36 sps:$4 sm:$0xff]   ;;  %v2316_v18 = vld [vmem:[%s3007_s1 + $0x148] sm:$0xff]  }
  0x1b   :  { %v2307_v11 = vld [vmem:[%s3007_s1 + $0x1d0] sm:$0xff]   ;;  %v2317_v19 = vld [vmem:[%s3007_s1 + $0x1c8] sm:$0xff]   ;;  %v2315_v23 = vld [vmem:[%s3008_s0 + $0x1b8] ss:$36 sps:$4 sm:$0xff]  }
  0x1c   :  { %1911 = vmatpush3.bf16.msra.mxu0 %v2244_v26  ;;  %v2308_v13 = vld [vmem:[%s3007_s1 + $0x110] sm:$0xff]   ;;  %v2318_v20 = vld [vmem:[%s3007_s1 + $0x108] sm:$0xff]   ;;  %v2320_v24 = vld [vmem:[%s3008_s0 + $0x1fc] ss:$36 sps:$4 sm:$0xff]  }
  0x1d   :  { %1975 = vmatpush3.bf16.msra.mxu1 %v2245_v27  ;;  %1912 = vmatprep.subr.bf16.mxu0 %v2246_v28  ;;  %v2309_v14 = vld [vmem:[%s3007_s1 + $0x190] sm:$0xff]   ;;  %v2319_v21 = vld [vmem:[%s3007_s1 + $0x188] sm:$0xff]   ;;  %v2326_v26 = vld [vmem:[%s3007_s1 + $0x140] sm:$0xff]  }
  0x1e   :  { %1976 = vmatprep.subr.bf16.mxu1 %v2247_v29  ;;  %v2305_v15 = vld [vmem:[%s3008_s0 + $0x170] ss:$36 sps:$4 sm:$0xff]   ;;  %v2322_v25 = vld [vmem:[%s3008_s0 + $0x204] ss:$36 sps:$4 sm:$0xff]  }
  0x1f   :  { %v2310_v16 = vld [vmem:[%s3008_s0 + $0x1b4] ss:$36 sps:$4 sm:$0xff]   ;;  %v2327_v27 = vld [vmem:[%s3007_s1 + $0x1c0] sm:$0xff]  }
  0x20   :  { %1913 = vmatpush3.bf16.msra.mxu0 %v2248_v30  ;;  %v2314_v22 = vld [vmem:[%s3008_s0 + $0x1b0] ss:$36 sps:$4 sm:$0xff]   ;;  %v2328_v28 = vld [vmem:[%s3007_s1 + $0x100] sm:$0xff]   ;;  %v2324_v30 = vld [vmem:[%s3008_s0 + $0x1f8] ss:$36 sps:$4 sm:$0xff]  }
  0x21   :  { %1977 = vmatpush3.bf16.msra.mxu1 %v2249_v31  ;;  %2026 = vmatprep.subr.bf16.mxu0 %v2256_v36  ;;  %v2329_v29 = vld [vmem:[%s3007_s1 + $0x180] sm:$0xff]   ;;  %v2332_v33 = vld [vmem:[%s3008_s0 + $0x14] ss:$36 sps:$4 sm:$0xff]  }
  0x22   :  { %2090 = vmatprep.subr.bf16.mxu1 %v2257_v37  ;;  %v2325_v31 = vld [vmem:[%s3008_s0 + $0x200] ss:$36 sps:$4 sm:$0xff]   ;;  %v2330_v35 = vld [vmem:[%s3008_s0 + $0x10] ss:$36 sps:$4 sm:$0xff]   ;;  %v2333_v36 = vld [vmem:[%s3008_s0 + $0x18] ss:$36 sps:$4 sm:$0xff]  }
  0x23   :  { %1075 = vmatmul.mubr.bf16.vlgmr.msra.gmra.mxu0 %v2250_v32  ;;  %v2336_v32 = vld [vmem:[%s3007_s1 + $0x238] sm:$0xff]  }
  0x24   :  { %1172 = vmatmul.mubr.bf16.vlgmr.msra.gmra.mxu1 %v2253_v34  ;;  %2027 = vmatpush3.bf16.msra.mxu0 %v2258_v38  ;;  %v2335_v34 = vld [vmem:[%s3008_s0 + $0x1c] ss:$36 sps:$4 sm:$0xff]   ;;  %v2339_v38 = vld [vmem:[%s3008_s0 + $0x64] ss:$36 sps:$4 sm:$0xff]  }
  0x25   :  { %2091 = vmatpush3.bf16.msra.mxu1 %v2259_v39  ;;  %1082 = vmatprep.mubr.bf16.mxu0 %v2260_v40  ;;  %v2337_v37 = vld [vmem:[%s3008_s0 + $0x5c] ss:$36 sps:$4 sm:$0xff]   ;;  %v2343_v39 = vld [vmem:[%s3007_s1 + $0x230] sm:$0xff]   ;;  %v2350_v40 = vld [vmem:[%s3007_s1 + $0x228] sm:$0xff]  }
  0x26   :  { %1179 = vmatprep.mubr.bf16.mxu1 %v2262_v41  ;;  %2028 = vmatprep.subr.bf16.mxu0 %v2266_v44  ;;  %v2341_v41 = vld [vmem:[%s3008_s0 + $0x58] ss:$36 sps:$4 sm:$0xff]   ;;  %v2346_v44 = vld [vmem:[%s3008_s0 + $0xac] ss:$36 sps:$4 sm:$0xff]  }
  0x27   :  { %2092 = vmatprep.subr.bf16.mxu1 %v2267_v45  ;;  %v2357_v45 = vld [vmem:[%s3007_s1 + $0x220] sm:$0xff]  }
  0x28   :  { %2029 = vmatpush3.bf16.msra.mxu0 %v2268_v46  ;;  %v2364_v46 = vld [vmem:[%s3007_s1 + $0x218] sm:$0xff]  }
  0x29   :  { %2093 = vmatpush3.bf16.msra.mxu1 %v2269_v47  ;;  %2030 = vmatprep.subr.bf16.mxu0 %v2276_v52  ;;  %v2348_v47 = vld [vmem:[%s3008_s0 + $0xa0] ss:$36 sps:$4 sm:$0xff]   ;;  %v2355_v52 = vld [vmem:[%s3008_s0 + $0xe8] ss:$36 sps:$4 sm:$0xff]  }
  0x2a   :  { %2094 = vmatprep.subr.bf16.mxu1 %v2277_v53  ;;  %v2378_v53 = vld [vmem:[%s3007_s1 + $0x208] sm:$0xff]  }
  0x2b   :  { %1083 = vmatmul.mubr.bf16.gmra.mxu0 %v2264_v42  ;;  %v2342_v42 = vld [vmem:[%s3008_s0 + $0x60] ss:$36 sps:$4 sm:$0xff]  }
  0x2c   :  { %1180 = vmatmul.mubr.bf16.gmra.mxu1 %v2265_v43  ;;  %1090 = vmatprep.mubr.bf16.mxu0 %v2270_v48  ;;  %v2344_v43 = vld [vmem:[%s3008_s0 + $0xa4] ss:$36 sps:$4 sm:$0xff]  }
  0x2d   :  { %1187 = vmatprep.mubr.bf16.mxu1 %v2272_v49  ;;  %2031 = vmatpush3.bf16.msra.mxu0 %v2278_v54  ;;  %v2349_v48 = vld [vmem:[%s3008_s0 + $0xa8] ss:$36 sps:$4 sm:$0xff]   ;;  %v2356_v54 = vld [vmem:[%s3008_s0 + $0xf0] ss:$36 sps:$4 sm:$0xff]  }
  0x2e   :  { %2095 = vmatpush3.bf16.msra.mxu1 %v2279_v55  ;;  %2032 = vmatprep.subr.bf16.mxu0 %v2286_v60  ;;  %v2351_v49 = vld [vmem:[%s3008_s0 + $0xec] ss:$36 sps:$4 sm:$0xff]   ;;  %v2358_v55 = vld [vmem:[%s3008_s0 + $0x134] ss:$36 sps:$4 sm:$0xff]   ;;  %v2365_v60 = vld [vmem:[%s3008_s0 + $0x17c] ss:$36 sps:$4 sm:$0xff]  }
  0x2f   :  { %2096 = vmatprep.subr.bf16.mxu1 %v2287_v61  ;;  %v2367_v61 = vld [vmem:[%s3008_s0 + $0x184] ss:$36 sps:$4 sm:$0xff]  }
  0x31   :  { %2033 = vmatpush3.bf16.msra.mxu0 %v2288_v62  ;;  %v2369_v62 = vld [vmem:[%s3008_s0 + $0x178] ss:$36 sps:$4 sm:$0xff]  }
  0x32   :  { %2097 = vmatpush3.bf16.msra.mxu1 %v2289_v63  ;;  %2034 = vmatprep.subr.bf16.mxu0 %v2296_v3  ;;  %v2370_v63 = vld [vmem:[%s3008_s0 + $0x180] ss:$36 sps:$4 sm:$0xff]   ;;  %v2377_v3 = vld [vmem:[%s3008_s0 + $0x1c8] ss:$36 sps:$4 sm:$0xff]  }
  0x33   :  { %1091 = vmatmul.mubr.bf16.gmra.mxu0 %v2274_v50  ;;  %2098 = vmatprep.subr.bf16.mxu1 %v2297_v5  ;;  %v2353_v50 = vld [vmem:[%s3008_s0 + $0xf4] ss:$36 sps:$4 sm:$0xff]  }
  0x34   :  { %1188 = vmatmul.mubr.bf16.gmra.mxu1 %v2275_v51  ;;  %1098 = vmatprep.mubr.bf16.mxu0 %v2280_v56  ;;  %v2371_v51 = vld [vmem:[%s3007_s1 + $0x210] sm:$0xff]   ;;  %v2360_v56 = vld [vmem:[%s3008_s0 + $0x13c] ss:$36 sps:$4 sm:$0xff]  }
  0x35   :  { %1195 = vmatprep.mubr.bf16.mxu1 %v2282_v57  ;;  %2035 = vmatpush3.bf16.msra.mxu0 %v2298_v6  ;;  %v2385_v57 = vld [vmem:[%s3007_s1 + $0x200] sm:$0xff]   ;;  %v2381_v5 = vld [vmem:[%s3008_s0 + $0x214] ss:$36 sps:$4 sm:$0xff]   ;;  %v2383_v6 = vld [vmem:[%s3008_s0 + $0x208] ss:$36 sps:$4 sm:$0xff]  }
  0x36   :  { %2099 = vmatpush3.bf16.msra.mxu1 %v2299_v7  ;;  %2036 = vmatprep.subr.bf16.mxu0 %v2306_v10  ;;  %v2384_v7 = vld [vmem:[%s3008_s0 + $0x210] ss:$36 sps:$4 sm:$0xff]   ;;  %v2388_v10 = vld [vmem:[%s3008_s0 + $0x68] ss:$36 sps:$4 sm:$0xff]  }
  0x37   :  { %2100 = vmatprep.subr.bf16.mxu1 %v2307_v11  ;;  %v2389_v11 = vld [vmem:[%s3008_s0 + $0x188] ss:$36 sps:$4 sm:$0xff]  }
  0x39   :  { %2037 = vmatpush3.bf16.msra.mxu0 %v2308_v13  ;;  %v2391_v13 = vld [vmem:[%s3008_s0 + $0x1d0] ss:$36 sps:$4 sm:$0xff]  }
  0x3a   :  { %2101 = vmatpush3.bf16.msra.mxu1 %v2309_v14  ;;  %2038 = vmatprep.subr.bf16.mxu0 %v2316_v18  ;;  %v2392_v14 = vld [vmem:[%s3008_s0 + $0xf8] ss:$36 sps:$4 sm:$0xff]  }
  0x3b   :  { %1099 = vmatmul.mubr.bf16.gmra.mxu0 %v2284_v58  ;;  %2102 = vmatprep.subr.bf16.mxu1 %v2317_v19  ;;  %v2362_v58 = vld [vmem:[%s3008_s0 + $0x130] ss:$36 sps:$4 sm:$0xff]  }
  0x3c   :  { %1196 = vmatmul.mubr.bf16.gmra.mxu1 %v2285_v59  ;;  %1106 = vmatprep.mubr.bf16.mxu0 %v2290_v0  ;;  %v2363_v59 = vld [vmem:[%s3008_s0 + $0x138] ss:$36 sps:$4 sm:$0xff]   ;;  %v2372_v0 = vld [vmem:[%s3008_s0 + $0x1c4] ss:$36 sps:$4 sm:$0xff]  }
  0x3d   :  { %1203 = vmatprep.mubr.bf16.mxu1 %v2292_v1  ;;  %2039 = vmatpush3.bf16.msra.mxu0 %v2318_v20  ;;  %v2374_v1 = vld [vmem:[%s3008_s0 + $0x1cc] ss:$36 sps:$4 sm:$0xff]  }
  0x3e   :  { %2103 = vmatpush3.bf16.msra.mxu1 %v2319_v21  ;;  %2040 = vmatprep.subr.bf16.mxu0 %v2326_v26 }
  0x3f   :  { %2104 = vmatprep.subr.bf16.mxu1 %v2327_v27 }
  0x41   :  { %2041 = vmatpush3.bf16.msra.mxu0 %v2328_v28 }
  0x42   :  { %2105 = vmatpush3.bf16.msra.mxu1 %v2329_v29  ;;  %2170 = vmatprep.subr.bf16.mxu0 %v2336_v32 }
  0x43   :  { %1107 = vmatmul.mubr.bf16.gmra.mxu0 %v2294_v2  ;;  %2202 = vmatprep.subr.bf16.mxu1 %v2336_v32  ;;  %v2376_v2 = vld [vmem:[%s3008_s0 + $0x1c0] ss:$36 sps:$4 sm:$0xff]  }
  0x44   :  { %1204 = vmatmul.mubr.bf16.gmra.mxu1 %v2295_v4  ;;  %1114 = vmatprep.mubr.bf16.mxu0 %v2300_v8  ;;  %v2379_v4 = vld [vmem:[%s3008_s0 + $0x20c] ss:$36 sps:$4 sm:$0xff]   ;;  %v2386_v8 = vld [vmem:[%s3008_s0 + $0x20] ss:$36 sps:$4 sm:$0xff]  }
  0x45   :  { %1211 = vmatprep.mubr.bf16.mxu1 %v2302_v9  ;;  %v2387_v9 = vld [vmem:[%s3008_s0 + $0x140] ss:$36 sps:$4 sm:$0xff]  }
  0x4b   :  { %1115 = vmatmul.mubr.bf16.gmra.mxu0 %v2304_v12  ;;  %v2390_v12 = vld [vmem:[%s3008_s0 + $0xb0] ss:$36 sps:$4 sm:$0xff]  }
  0x4c   :  { %1212 = vmatmul.mubr.bf16.gmra.mxu1 %v2305_v15  ;;  %1122 = vmatprep.mubr.bf16.mxu0 %v2310_v16  ;;  %v2393_v15 = vld [vmem:[%s3008_s0 + $0x218] ss:$36 sps:$4 sm:$0xff]  }
  0x4d   :  { %1219 = vmatprep.mubr.bf16.mxu1 %v2312_v17 }
  0x53   :  { %1123 = vmatmul.mubr.bf16.gmra.mxu0 %v2314_v22 }
  0x54   :  { %1220 = vmatmul.mubr.bf16.gmra.mxu1 %v2315_v23  ;;  %1130 = vmatprep.mubr.bf16.mxu0 %v2320_v24 }
  0x55   :  { %1227 = vmatprep.mubr.bf16.mxu1 %v2322_v25 }
  0x5b   :  { %1131 = vmatmul.mubr.bf16.gmra.mxu0 %v2324_v30 }
  0x5c   :  { %1228 = vmatmul.mubr.bf16.gmra.mxu1 %v2325_v31  ;;  %1268 = vmatprep.mubr.bf16.mxu0 %v2332_v33 }
  0x5d   :  { %1365 = vmatprep.mubr.bf16.mxu1 %v2335_v34 }
  0x63   :  { %1269 = vmatmul.mubr.bf16.vlgmr.msra.gmra.mxu0 %v2330_v35 }
  0x64   :  { %1366 = vmatmul.mubr.bf16.vlgmr.msra.gmra.mxu1 %v2333_v36  ;;  %2171 = vmatpush3.bf16.msra.mxu0 %v2336_v32 }
  0x65   :  { %2210 = vmatpush3.bf16.msra.mxu1 %v2336_v32  ;;  %1276 = vmatprep.mubr.bf16.mxu0 %v2337_v37 }
  0x66   :  { %1373 = vmatprep.mubr.bf16.mxu1 %v2339_v38  ;;  %2172 = vmatprep.subr.bf16.mxu0 %v2343_v39 }
  0x67   :  { %2203 = vmatprep.subr.bf16.mxu1 %v2343_v39 }
  0x68   :  { %2173 = vmatpush3.bf16.msra.mxu0 %v2343_v39 }
  0x69   :  { %2211 = vmatpush3.bf16.msra.mxu1 %v2343_v39  ;;  %2174 = vmatprep.subr.bf16.mxu0 %v2350_v40 }
  0x6a   :  { %2204 = vmatprep.subr.bf16.mxu1 %v2350_v40 }
  0x6b   :  { %1277 = vmatmul.mubr.bf16.gmra.mxu0 %v2341_v41 }
  0x6c   :  { %1374 = vmatmul.mubr.bf16.gmra.mxu1 %v2342_v42  ;;  %1284 = vmatprep.mubr.bf16.mxu0 %v2344_v43 }
  0x6d   :  { %1381 = vmatprep.mubr.bf16.mxu1 %v2346_v44  ;;  %2175 = vmatpush3.bf16.msra.mxu0 %v2350_v40 }
  0x6e   :  { %2212 = vmatpush3.bf16.msra.mxu1 %v2350_v40  ;;  %2176 = vmatprep.subr.bf16.mxu0 %v2357_v45 }
  0x6f   :  { %2205 = vmatprep.subr.bf16.mxu1 %v2357_v45 }
  0x71   :  { %2177 = vmatpush3.bf16.msra.mxu0 %v2357_v45 }
  0x72   :  { %2213 = vmatpush3.bf16.msra.mxu1 %v2357_v45  ;;  %2178 = vmatprep.subr.bf16.mxu0 %v2364_v46 }
  0x73   :  { %1285 = vmatmul.mubr.bf16.gmra.mxu0 %v2348_v47  ;;  %2206 = vmatprep.subr.bf16.mxu1 %v2364_v46 }
  0x74   :  { %1382 = vmatmul.mubr.bf16.gmra.mxu1 %v2349_v48  ;;  %1292 = vmatprep.mubr.bf16.mxu0 %v2351_v49 }
  0x75   :  { %1389 = vmatprep.mubr.bf16.mxu1 %v2353_v50  ;;  %2179 = vmatpush3.bf16.msra.mxu0 %v2364_v46 }
  0x76   :  { %2214 = vmatpush3.bf16.msra.mxu1 %v2364_v46  ;;  %2180 = vmatprep.subr.bf16.mxu0 %v2371_v51 }
  0x77   :  { %2207 = vmatprep.subr.bf16.mxu1 %v2371_v51 }
  0x79   :  { %2181 = vmatpush3.bf16.msra.mxu0 %v2371_v51 }
  0x7a   :  { %2215 = vmatpush3.bf16.msra.mxu1 %v2371_v51  ;;  %2182 = vmatprep.subr.bf16.mxu0 %v2378_v53 }
  0x7b   :  { %1293 = vmatmul.mubr.bf16.gmra.mxu0 %v2355_v52  ;;  %2208 = vmatprep.subr.bf16.mxu1 %v2378_v53 }
  0x7c   :  { %1390 = vmatmul.mubr.bf16.gmra.mxu1 %v2356_v54  ;;  %1300 = vmatprep.mubr.bf16.mxu0 %v2358_v55 }
  0x7d   :  { %1397 = vmatprep.mubr.bf16.mxu1 %v2360_v56  ;;  %2183 = vmatpush3.bf16.msra.mxu0 %v2378_v53 }
  0x7e   :  { %2216 = vmatpush3.bf16.msra.mxu1 %v2378_v53  ;;  %2184 = vmatprep.subr.bf16.mxu0 %v2385_v57 }
  0x7f   :  { %2209 = vmatprep.subr.bf16.mxu1 %v2385_v57 }
  0x81   :  { %2185 = vmatpush3.bf16.msra.mxu0 %v2385_v57 }
  0x82   :  { %2217 = vmatpush3.bf16.msra.mxu1 %v2385_v57 }
  0x83   :  { %1301 = vmatmul.mubr.bf16.gmra.mxu0 %v2362_v58 }
  0x84   :  { %1398 = vmatmul.mubr.bf16.gmra.mxu1 %v2363_v59  ;;  %1308 = vmatprep.mubr.bf16.mxu0 %v2365_v60 }
  0x85   :  { %1405 = vmatprep.mubr.bf16.mxu1 %v2367_v61 }
  0x8b   :  { %1309 = vmatmul.mubr.bf16.gmra.mxu0 %v2369_v62 }
  0x8c   :  { %1406 = vmatmul.mubr.bf16.gmra.mxu1 %v2370_v63  ;;  %1316 = vmatprep.mubr.bf16.mxu0 %v2372_v0 }
  0x8d   :  { %1413 = vmatprep.mubr.bf16.mxu1 %v2374_v1 }
  0x93   :  { %1317 = vmatmul.mubr.bf16.gmra.mxu0 %v2376_v2 }
  0x94   :  { %1414 = vmatmul.mubr.bf16.gmra.mxu1 %v2377_v3  ;;  %1324 = vmatprep.mubr.bf16.mxu0 %v2379_v4 }
  0x95   :  { %1421 = vmatprep.mubr.bf16.mxu1 %v2381_v5 }
  0x9b   :  { %1325 = vmatmul.mubr.bf16.gmra.mxu0 %v2383_v6 }
  0x9c   :  { %1422 = vmatmul.mubr.bf16.gmra.mxu1 %v2384_v7  ;;  %2186 = vmatprep.mubr.bf16.mxu0 %v2386_v8 }
  0x9d   :  { %2194 = vmatprep.mubr.bf16.mxu1 %v2387_v9 }
  0xa3   :  { %2187 = vmatmul.mubr.bf16.vlgmr.msra.gmra.mxu0 %v2388_v10 }
  0xa4   :  { %2195 = vmatmul.mubr.bf16.vlgmr.msra.gmra.mxu1 %v2389_v11  ;;  %2190 = vmatprep.mubr.bf16.mxu0 %v2390_v12 }
  0xa5   :  { %2198 = vmatprep.mubr.bf16.mxu1 %v2391_v13 }
  0xab   :  { %2191 = vmatmul.mubr.bf16.gmra.mxu0 %v2392_v14 }
  0xac   :  { %2199 = vmatmul.mubr.bf16.gmra.mxu1 %v2393_v15 }
  0xe3   :  { %v1914_v16 = vpop.f32.mrf.mxu0 }
  0xe4   :  { %v1978_v17 = vpop.f32.mrf.mxu1 }
  0xe5   :  { %v1915_v18 = vpop.f32.mrf.mxu0 }
  0xe6   :  { %v1916_v19 = vadd.f32 %v1915_v18, %v1914_v16  ;;  %v1979_v20 = vpop.f32.mrf.mxu1 }
  0xe7   :  { %v1980_v21 = vadd.f32 %v1979_v20, %v1978_v17  ;;  %v1917_v22 = vpop.f32.mrf.mxu0 }
  0xe8   :  { %v1981_v23 = vpop.f32.mrf.mxu1 }
  0xe9   :  { %v2851_v24 = vadd.f32 %v1980_v21, %v1916_v19  ;;  %v1918_v25 = vpop.f32.mrf.mxu0 }
  0xea   :  { %v1919_v26 = vadd.f32 %v1918_v25, %v1917_v22  ;;  %v1982_v27 = vpop.f32.mrf.mxu1 }
  0xeb   :  { %v1983_v28 = vadd.f32 %v1982_v27, %v1981_v23  ;;  %v1920_v29 = vpop.f32.mrf.mxu0 }
  0xec   :  { %v1984_v30 = vpop.f32.mrf.mxu1 }
  0xed   :  { %v2853_v31 = vadd.f32 %v1983_v28, %v1919_v26  ;;  %v1921_v32 = vpop.f32.mrf.mxu0 }
  0xee   :  { %v1922_v33 = vadd.f32 %v1921_v32, %v1920_v29  ;;  %v1985_v34 = vpop.f32.mrf.mxu1 }
  0xef   :  { %v1986_v35 = vadd.f32 %v1985_v34, %v1984_v30  ;;  %v1923_v36 = vpop.f32.mrf.mxu0 }
  0xf0   :  { %v1987_v37 = vpop.f32.mrf.mxu1 }
  0xf1   :  { %v2855_v38 = vadd.f32 %v1986_v35, %v1922_v33  ;;  %v1924_v39 = vpop.f32.mrf.mxu0 }
  0xf2   :  { %v1925_v40 = vadd.f32 %v1924_v39, %v1923_v36  ;;  %v1988_v41 = vpop.f32.mrf.mxu1 }
  0xf3   :  { %v1989_v42 = vadd.f32 %v1988_v41, %v1987_v37  ;;  %v1926_v43 = vpop.f32.mrf.mxu0 }
  0xf4   :  { %v1990_v44 = vpop.f32.mrf.mxu1 }
  0xf5   :  { %v2857_v45 = vadd.f32 %v1989_v42, %v1925_v40  ;;  %v1927_v46 = vpop.f32.mrf.mxu0 }
  0xf6   :  { %v1928_v47 = vadd.f32 %v1927_v46, %v1926_v43  ;;  %v1991_v48 = vpop.f32.mrf.mxu1 }
  0xf7   :  { %v1992_v49 = vadd.f32 %v1991_v48, %v1990_v44  ;;  %v1929_v50 = vpop.f32.mrf.mxu0 }
  0xf8   :  { %v1993_v51 = vpop.f32.mrf.mxu1 }
  0xf9   :  { %v2859_v52 = vadd.f32 %v1992_v49, %v1928_v47  ;;  %v1930_v53 = vpop.f32.mrf.mxu0 }
  0xfa   :  { %v1931_v54 = vadd.f32 %v1930_v53, %v1929_v50  ;;  %v1994_v55 = vpop.f32.mrf.mxu1 }
  0xfb   :  { %v1995_v56 = vadd.f32 %v1994_v55, %v1993_v51  ;;  %v1932_v57 = vpop.f32.mrf.mxu0 }
  0xfc   :  { %v1996_v58 = vpop.f32.mrf.mxu1 }
  0xfd   :  { %v2861_v59 = vadd.f32 %v1995_v56, %v1931_v54  ;;  %v1933_v60 = vpop.f32.mrf.mxu0 }
  0xfe   :  { %v1934_v61 = vadd.f32 %v1933_v60, %v1932_v57  ;;  %v1997_v62 = vpop.f32.mrf.mxu1 }
  0xff   :  { %v1998_v63 = vadd.f32 %v1997_v62, %v1996_v58  ;;  %v1935_v0 = vpop.f32.mrf.mxu0 }
 0x100   :  { %v1999_v1 = vpop.f32.mrf.mxu1 }
 0x101   :  { %v2863_v2 = vadd.f32 %v1998_v63, %v1934_v61  ;;  %v1936_v3 = vpop.f32.mrf.mxu0 }
 0x102   :  { %v1937_v4 = vadd.f32 %v1936_v3, %v1935_v0  ;;  %v2000_v5 = vpop.f32.mrf.mxu1 }
 0x103   :  { %v2001_v6 = vadd.f32 %v2000_v5, %v1999_v1  ;;  %v1938_v7 = vpop.f32.mrf.mxu0 }
 0x104   :  { %v2002_v8 = vpop.f32.mrf.mxu1 }
 0x105   :  { %v2865_v9 = vadd.f32 %v2001_v6, %v1937_v4  ;;  %v1939_v10 = vpop.f32.mrf.mxu0 }
 0x106   :  { %v1940_v11 = vadd.f32 %v1939_v10, %v1938_v7  ;;  %v2003_v12 = vpop.f32.mrf.mxu1 }
 0x107   :  { %v2004_v13 = vadd.f32 %v2003_v12, %v2002_v8  ;;  %v1941_v14 = vpop.f32.mrf.mxu0 }
 0x108   :  { %v2005_v15 = vpop.f32.mrf.mxu1 }
 0x109   :  { %v2867_v16 = vadd.f32 %v2004_v13, %v1940_v11  ;;  %v1942_v17 = vpop.f32.mrf.mxu0 }
 0x10a   :  { %v1943_v18 = vadd.f32 %v1942_v17, %v1941_v14  ;;  %v2006_v19 = vpop.f32.mrf.mxu1 }
 0x10b   :  { %v2007_v20 = vadd.f32 %v2006_v19, %v2005_v15  ;;  %v1944_v21 = vpop.f32.mrf.mxu0 }
 0x10c   :  { %v2008_v22 = vpop.f32.mrf.mxu1 }
 0x10d   :  { %v2869_v23 = vadd.f32 %v2007_v20, %v1943_v18  ;;  %v1945_v25 = vpop.f32.mrf.mxu0 }
 0x10e   :  { %v1946_v26 = vadd.f32 %v1945_v25, %v1944_v21  ;;  %v2009_v27 = vpop.f32.mrf.mxu1 }
 0x10f   :  { %3012 = vst [vmem:[#allocation2_spill] sm:$0xff] %v2869_v23  ;;  %v2010_v28 = vadd.f32 %v2009_v27, %v2008_v22  ;;  %v1947_v29 = vpop.f32.mrf.mxu0 }
 0x110   :  { %v2011_v30 = vpop.f32.mrf.mxu1 }
 0x111   :  { %v2871_v32 = vadd.f32 %v2010_v28, %v1946_v26  ;;  %v1948_v33 = vpop.f32.mrf.mxu0 }
 0x112   :  { %v1949_v34 = vadd.f32 %v1948_v33, %v1947_v29  ;;  %v2012_v35 = vpop.f32.mrf.mxu1 }
 0x113   :  { %v2013_v36 = vadd.f32 %v2012_v35, %v2011_v30  ;;  %v1950_v37 = vpop.f32.mrf.mxu0 }
 0x114   :  { %v2014_v39 = vpop.f32.mrf.mxu1 }
 0x115   :  { %v2873_v40 = vadd.f32 %v2013_v36, %v1949_v34  ;;  %v1951_v41 = vpop.f32.mrf.mxu0 }
 0x116   :  { %v1952_v42 = vadd.f32 %v1951_v41, %v1950_v37  ;;  %v2015_v43 = vpop.f32.mrf.mxu1 }
 0x117   :  { %3013 = vst [vmem:[#allocation3_spill] sm:$0xff] %v2873_v40  ;;  %v2016_v44 = vadd.f32 %v2015_v43, %v2014_v39  ;;  %v1953_v46 = vpop.f32.mrf.mxu0 }
 0x118   :  { %v2017_v47 = vpop.f32.mrf.mxu1 }
 0x119   :  { %v2875_v48 = vadd.f32 %v2016_v44, %v1952_v42  ;;  %v1954_v49 = vpop.f32.mrf.mxu0 }
 0x11a   :  { %v1955_v50 = vadd.f32 %v1954_v49, %v1953_v46  ;;  %v2018_v51 = vpop.f32.mrf.mxu1 }
 0x11b   :  { %3014 = vst [vmem:[#allocation4_spill] sm:$0xff] %v2875_v48  ;;  %v2019_v53 = vadd.f32 %v2018_v51, %v2017_v47  ;;  %v1956_v54 = vpop.f32.mrf.mxu0 }
 0x11c   :  { %v2020_v55 = vpop.f32.mrf.mxu1 }
 0x11d   :  { %v2877_v56 = vadd.f32 %v2019_v53, %v1955_v50  ;;  %v1957_v57 = vpop.f32.mrf.mxu0 }
 0x11e   :  { %v1958_v58 = vadd.f32 %v1957_v57, %v1956_v54  ;;  %v2021_v60 = vpop.f32.mrf.mxu1 }
 0x11f   :  { %3015 = vst [vmem:[#allocation5_spill] sm:$0xff] %v2877_v56  ;;  %v2022_v61 = vadd.f32 %v2021_v60, %v2020_v55  ;;  %v1959_v62 = vpop.f32.mrf.mxu0 }
 0x120   :  { %v2023_v63 = vpop.f32.mrf.mxu1 }
 0x121   :  { %v2879_v0 = vadd.f32 %v2022_v61, %v1958_v58  ;;  %v1960_v1 = vpop.f32.mrf.mxu0 }
 0x122   :  { %v1961_v3 = vadd.f32 %v1960_v1, %v1959_v62  ;;  %v2024_v4 = vpop.f32.mrf.mxu1 }
 0x123   :  { %3016 = vst [vmem:[#allocation6_spill] sm:$0xff] %v2879_v0  ;;  %v2025_v5 = vadd.f32 %v2024_v4, %v2023_v63  ;;  %v2042_v6 = vpop.f32.mrf.mxu0 }
 0x124   :  { %v2106_v7 = vpop.f32.mrf.mxu1 }
 0x125   :  { %v2881_v8 = vadd.f32 %v2025_v5, %v1961_v3  ;;  %v2043_v10 = vpop.f32.mrf.mxu0 }
 0x126   :  { %v2044_v11 = vadd.f32 %v2043_v10, %v2042_v6  ;;  %v2107_v12 = vpop.f32.mrf.mxu1 }
 0x127   :  { %3017 = vst [vmem:[#allocation7_spill] sm:$0xff] %v2881_v8  ;;  %v2045_v13 = vpop.f32.mrf.mxu0  ;;  %v2108_v15 = vadd.f32 %v2107_v12, %v2106_v7 }
 0x128   :  { %v1271_v14 = vadd.f32 %v2044_v11, %v2851_v24  ;;  %v2109_v17 = vpop.f32.mrf.mxu1 }
 0x129   :  { %v2046_v18 = vpop.f32.mrf.mxu0 }
 0x12a   :  { %v2110_v19 = vpop.f32.mrf.mxu1  ;;  %v2884_v20 = vadd.f32 %v2108_v15, %v1271_v14  ;;  %v2047_v15 = vadd.f32 %v2046_v18, %v2045_v13 }
 0x12b   :  { %v2048_v21 = vpop.f32.mrf.mxu0 }
 0x12c   :  { %3018 = vst [vmem:[#allocation8_spill] sm:$0xff] %v2884_v20  ;;  %v2112_v22 = vpop.f32.mrf.mxu1 }
 0x12d   :  { %v2049_v25 = vpop.f32.mrf.mxu0 }
 0x12e   :  { %v2113_v26 = vpop.f32.mrf.mxu1  ;;  %v2050_v8 = vadd.f32 %v2049_v25, %v2048_v21 }
 0x12f   :  { %v2051_v27 = vpop.f32.mrf.mxu0 }
 0x130   :  { %v2115_v28 = vpop.f32.mrf.mxu1  ;;  %v1279_v23 = vadd.f32 %v2050_v8, %v2855_v38 }
 0x131   :  { %v2052_v29 = vpop.f32.mrf.mxu0 }
 0x132   :  { %v2116_v30 = vpop.f32.mrf.mxu1  ;;  %v2053_v20 = vadd.f32 %v2052_v29, %v2051_v27 }
 0x133   :  { %v2054_v33 = vpop.f32.mrf.mxu0 }
 0x134   :  { %v2118_v34 = vpop.f32.mrf.mxu1  ;;  %v1282_v13 = vadd.f32 %v2053_v20, %v2857_v45 }
 0x135   :  { %v2055_v35 = vpop.f32.mrf.mxu0 }
 0x136   :  { %v2119_v36 = vpop.f32.mrf.mxu1 }
 0x137   :  { %v2057_v37 = vpop.f32.mrf.mxu0 }
 0x138   :  { %v2121_v24 = vpop.f32.mrf.mxu1 }
 0x139   :  { %v2058_v39 = vpop.f32.mrf.mxu0 }
 0x13a   :  { %v2122_v41 = vpop.f32.mrf.mxu1  ;;  %v2059_v48 = vadd.f32 %v2058_v39, %v2057_v37  ;;  %v2117_v37 = vadd.f32 %v2116_v30, %v2115_v28 }
 0x13b   :  { %v2060_v42 = vpop.f32.mrf.mxu0  ;;  %v2123_v38 = vadd.f32 %v2122_v41, %v2121_v24 }
 0x13c   :  { %v2124_v43 = vpop.f32.mrf.mxu1  ;;  %v1290_v27 = vadd.f32 %v2059_v48, %v2861_v59 }
 0x13d   :  { %v2061_v44 = vpop.f32.mrf.mxu0 }
 0x13e   :  { %v2125_v46 = vpop.f32.mrf.mxu1  ;;  %v2916_v30 = vadd.f32 %v2123_v38, %v1290_v27 }
 0x13f   :  { %v2063_v47 = vpop.f32.mrf.mxu0  ;;  %v2126_v8 = vadd.f32 %v2125_v46, %v2124_v43  ;;  %v3027_v43 = vld [vmem:[#allocation3_spill] sm:$0xff] }
 0x140   :  { %v2886_v49 = vpop.f32.mrf.mxu1 }
 0x141   :  { %3019 = vst [vmem:[#allocation9_spill] sm:$0xff] %v2886_v49  ;;  %v2064_v50 = vpop.f32.mrf.mxu0  ;;  %v2111_v49 = vadd.f32 %v2110_v19, %v2109_v17 }
 0x142   :  { %v2888_v51 = vpop.f32.mrf.mxu1 }
 0x143   :  { %3020 = vst [vmem:[#allocation10_spill] sm:$0xff] %v2888_v51  ;;  %v2066_v53 = vpop.f32.mrf.mxu0  ;;  %v1274_v51 = vadd.f32 %v2047_v15, %v2853_v31 }
 0x144   :  { %v2890_v54 = vpop.f32.mrf.mxu1 }
 0x145   :  { %3021 = vst [vmem:[#allocation11_spill] sm:$0xff] %v2890_v54  ;;  %v2067_v55 = vpop.f32.mrf.mxu0  ;;  %v1371_v59 = vadd.f32 %v2111_v49, %v1274_v51 }
 0x146   :  { %v2892_v57 = vpop.f32.mrf.mxu1  ;;  %v2068_v31 = vadd.f32 %v2067_v55, %v2066_v53  ;;  %v3032_v55 = vld [vmem:[#allocation4_spill] sm:$0xff] }
 0x147   :  { %3022 = vst [vmem:[#allocation12_spill] sm:$0xff] %v2892_v57  ;;  %v2069_v58 = vpop.f32.mrf.mxu0 }
 0x148   :  { %v2894_v60 = vpop.f32.mrf.mxu1 }
 0x149   :  { %3023 = vst [vmem:[#allocation13_spill] sm:$0xff] %v2894_v60  ;;  %v2070_v61 = vpop.f32.mrf.mxu0  ;;  %v2056_v60 = vadd.f32 %v2055_v35, %v2054_v33  ;;  %v2065_v33 = vadd.f32 %v2064_v50, %v2063_v47 }
 0x14a   :  { %v2896_v62 = vpop.f32.mrf.mxu1  ;;  %v2071_v17 = vadd.f32 %v2070_v61, %v2069_v58  ;;  %v3029_v50 = vld [vmem:[#allocation10_spill] sm:$0xff] }
 0x14b   :  { %3024 = vst [vmem:[#allocation14_spill] sm:$0xff] %v2896_v62  ;;  %v2072_v63 = vpop.f32.mrf.mxu0  ;;  %v2062_v62 = vadd.f32 %v2061_v44, %v2060_v42  ;;  %v1287_v25 = vadd.f32 %v2056_v60, %v2859_v52  ;;  %v2120_v42 = vadd.f32 %v2119_v36, %v2118_v34  ;;  %v1379_v44 = vadd.f32 %v2117_v37, %v1282_v13  ;;  %v3026_v36 = vld [vmem:[#allocation2_spill] sm:$0xff] }
 0x14c   :  { %v2136_v1 = vpop.f32.mrf.mxu1  ;;  %v1303_v34 = vadd.f32 %v2068_v31, %v2867_v16  ;;  %v1306_v24 = vadd.f32 %v2071_v17, %v3026_v36  ;;  %v3030_v51 = vld [vmem:[#allocation11_spill] sm:$0xff]  ;;  %v2941_v31 = vld [vmem:[%s3010_s3] ss:$0 sm:$0xff] }
 0x14d   :  { %v2073_v3 = vpop.f32.mrf.mxu0  ;;  %v1295_v29 = vadd.f32 %v2062_v62, %v2863_v2  ;;  %v1298_v2 = vadd.f32 %v2065_v33, %v2865_v9  ;;  %v2914_v28 = vadd.f32 %v2120_v42, %v1287_v25 }
 0x14e   :  { %v2137_v4 = vpop.f32.mrf.mxu1  ;;  %v2074_v18 = vadd.f32 %v2073_v3, %v2072_v63  ;;  %v3031_v9 = vld [vmem:[#allocation12_spill] sm:$0xff] }
 0x14f   :  { %v2075_v5 = vpop.f32.mrf.mxu0  ;;  %v2912_v47 = vadd.f32 %v2126_v8, %v1295_v29  ;;  %v2138_v41 = vadd.f32 %v2137_v4, %v2136_v1  ;;  %v2132_v53 = vadd.f32 %v3031_v9, %v3030_v51  ;;  %v2931_v1 = vld [vmem:[%s3009_s2] ss:$0 sm:$0xff] }
 0x150   :  { %v2139_v6 = vpop.f32.mrf.mxu1  ;;  %v1311_v20 = vadd.f32 %v2074_v18, %v2871_v32  ;;  %v3033_v62 = vld [vmem:[#allocation13_spill] sm:$0xff] }
 0x151   :  { %v2076_v7 = vpop.f32.mrf.mxu0  ;;  %v1400_v27 = vadd.f32 %v2132_v53, %v1303_v34 }
 0x152   :  { %v2140_v10 = vpop.f32.mrf.mxu1  ;;  %v2077_v19 = vadd.f32 %v2076_v7, %v2075_v5  ;;  %v3034_v63 = vld [vmem:[#allocation14_spill] sm:$0xff]  ;;  %v1408_v4 = vadd.f32 %v2138_v41, %v1311_v20  ;;  %v3039_v20 = vld [vmem:[#allocation5_spill] sm:$0xff] }
 0x153   :  { %v2078_v11 = vpop.f32.mrf.mxu0  ;;  %v2135_v3 = vadd.f32 %v3034_v63, %v3033_v62  ;;  %v2141_v16 = vadd.f32 %v2140_v10, %v2139_v6  ;;  %v3036_v10 = vld [vmem:[#allocation6_spill] sm:$0xff] }
 0x154   :  { %v2898_v12 = vpop.f32.mrf.mxu1  ;;  %v1314_v32 = vadd.f32 %v2077_v19, %v3027_v43 }
 0x155   :  { %3025 = vst [vmem:[#allocation15_spill] sm:$0xff] %v2898_v12  ;;  %v2079_v14 = vpop.f32.mrf.mxu0  ;;  %v2114_v12 = vadd.f32 %v2113_v26, %v2112_v22  ;;  %v1403_v6 = vadd.f32 %v2135_v3, %v1306_v24 }
 0x156   :  { %v2143_v56 = vpop.f32.mrf.mxu1  ;;  %v2080_v22 = vadd.f32 %v2079_v14, %v2078_v11  ;;  %v1411_v29 = vadd.f32 %v2141_v16, %v1314_v32 }
 0x157   :  { %v2081_v0 = vpop.f32.mrf.mxu0  ;;  %v1376_v52 = vadd.f32 %v2114_v12, %v1279_v23  ;;  %v3028_v23 = vld [vmem:[#allocation9_spill] sm:$0xff] }
 0x158   :  { %v2900_v57 = vpop.f32.mrf.mxu1  ;;  %v2129_v49 = vadd.f32 %v3029_v50, %v3028_v23  ;;  %v1319_v58 = vadd.f32 %v2080_v22, %v3032_v55 }
 0x159   :  { %v2082_v54 = vpop.f32.mrf.mxu0 }
 0x15a   :  { %v2903_v40 = vpop.f32.mrf.mxu1  ;;  %v2083_v14 = vadd.f32 %v2082_v54, %v2081_v0  ;;  %v2934_v18 = vadd.f32 %v2129_v49, %v1298_v2 }
 0x15b   :  { %v2084_v21 = vpop.f32.mrf.mxu0  ;;  %v2147_v19 = vadd.f32 %v2903_v40, %v2900_v57 }
 0x15c   :  { %v2148_v35 = vpop.f32.mrf.mxu1  ;;  %v3035_v11 = vld [vmem:[#allocation15_spill] sm:$0xff] }
 0x15d   :  { %v2085_v39 = vpop.f32.mrf.mxu0  ;;  %v2144_v12 = vadd.f32 %v2143_v56, %v3035_v11  ;;  %v3037_v56 = vld [vmem:[#allocation8_spill] sm:$0xff] }
 0x15e   :  { %v2149_v45 = vpop.f32.mrf.mxu1  ;;  %v2086_v60 = vadd.f32 %v2085_v39, %v2084_v21  ;;  %v3038_v39 = vld [vmem:[#allocation7_spill] sm:$0xff] }
 0x15f   :  { %v2087_v26 = vpop.f32.mrf.mxu0  ;;  %v1416_v17 = vadd.f32 %v2144_v12, %v1319_v58 }
 0x160   :  { %v2151_v48 = vpop.f32.mrf.mxu1  ;;  %v1327_v33 = vadd.f32 %v2086_v60, %v3036_v10 }
 0x161   :  { %v2088_v46 = vpop.f32.mrf.mxu0 }
 0x162   :  { %v2152_v61 = vpop.f32.mrf.mxu1  ;;  %v2089_v5 = vadd.f32 %v2088_v46, %v2087_v26  ;;  %v1322_v26 = vadd.f32 %v2083_v14, %v3039_v20 }
 0x163   :  { %v2188_v7 = vpop.f32.mrf.mxu0  ;;  %v2153_v24 = vadd.f32 %v2152_v61, %v2151_v48 }
 0x164   :  { %v1473_v15 = vadd.f32 %v2188_v7, %v1376_v52  ;;  %v2196_v13 = vpop.f32.mrf.mxu1  ;;  %v1330_v42 = vadd.f32 %v2089_v5, %v3038_v39  ;;  %v2150_v52 = vadd.f32 %v2149_v45, %v2148_v35  ;;  %v1419_v39 = vadd.f32 %v2147_v19, %v1322_v26 }
 0x165   :  { %v1505_v21 = vadd.f32 %v2196_v13, %v1408_v4  ;;  %v1464_v25 = vpop.f32.mrf.mxu0 }
 0x166   :  { %v1536_v37 = vmul.f32 %v2931_v1, %v1473_v15  ;;  %v1465_v0 = vadd.f32 %v1464_v25, %v3037_v56  ;;  %v1496_v54 = vpop.f32.mrf.mxu1  ;;  %v1424_v49 = vadd.f32 %v2150_v52, %v1327_v33  ;;  %v1427_v48 = vadd.f32 %v2153_v24, %v1330_v42 }
 0x167   :  { %v1544_v38 = vmul.f32 %v2931_v1, %v1505_v21  ;;  %v1497_v8 = vadd.f32 %v1496_v54, %v1400_v27  ;;  %v2189_v22 = vpop.f32.mrf.mxu0 }
 0x168   :  { %v1534_v2 = vmul.f32 %v2931_v1, %v1465_v0  ;;  %v1476_v34 = vadd.f32 %v2189_v22, %v1379_v44  ;;  %v2197_v36 = vpop.f32.mrf.mxu1  ;;  %v1559_v41 = vadd.f32 %v2941_v31, %v1536_v37 }
 0x169   :  { %v1542_v43 = vmul.f32 %v2931_v1, %v1497_v8  ;;  %v1508_v32 = vadd.f32 %v2197_v36, %v1411_v29  ;;  %v1467_v40 = vpop.f32.mrf.mxu0  ;;  %v1567_v57 = vadd.f32 %v2941_v31, %v1544_v38 }
 0x16a   :  { %v1537_v46 = vmul.f32 %v2931_v1, %v1476_v34  ;;  %v1468_v23 = vadd.f32 %v1467_v40, %v1371_v59  ;;  %v1499_v50 = vpop.f32.mrf.mxu1  ;;  %v1557_v35 = vadd.f32 %v2941_v31, %v1534_v2  ;;  %v1575_v61 = vmax.f32 %v1559_v41, 0.0 }
 0x16b   :  { %v1545_v45 = vmul.f32 %v2931_v1, %v1508_v32  ;;  %v1500_v44 = vadd.f32 %v1499_v50, %v1403_v6  ;;  %v2192_v51 = vpop.f32.mrf.mxu0  ;;  %v1565_v9 = vadd.f32 %v2941_v31, %v1542_v43  ;;  %v1583_v16 = vmax.f32 %v1567_v57, 0.0 }
 0x16c   :  { %v1560_v53 = vadd.f32 %v2941_v31, %v1537_v46  ;;  %v1535_v55 = vmul.f32 %v2931_v1, %v1468_v23  ;;  %v1489_v58 = vadd.f32 %v2192_v51, %v2912_v47  ;;  %v2200_v60 = vpop.f32.mrf.mxu1  ;;  %v1573_v12 = vmax.f32 %v1557_v35, 0.0 }
 0x16d   :  { %v1568_v59 = vadd.f32 %v2941_v31, %v1545_v45  ;;  %v1543_v62 = vmul.f32 %v2931_v1, %v1500_v44  ;;  %v1521_v63 = vadd.f32 %v2200_v60, %v1424_v49  ;;  %v1480_v3 = vpop.f32.mrf.mxu0  ;;  %v1581_v21 = vmax.f32 %v1565_v9, 0.0 }
 0x16e   :  { %v1576_v5 = vmax.f32 %v1560_v53, 0.0  ;;  %v1558_v7 = vadd.f32 %v2941_v31, %v1535_v55  ;;  %v1481_v4 = vadd.f32 %v1480_v3, %v2914_v28  ;;  %v1512_v11 = vpop.f32.mrf.mxu1  ;;  %v1540_v29 = vmul.f32 %v2931_v1, %v1489_v58 }
 0x16f   :  { %v1584_v14 = vmax.f32 %v1568_v59, 0.0  ;;  %v1566_v15 = vadd.f32 %v2941_v31, %v1543_v62  ;;  %v1513_v47 = vadd.f32 %v1512_v11, %v1416_v17  ;;  %v2193_v13 = vpop.f32.mrf.mxu0  ;;  %v1548_v37 = vmul.f32 %v2931_v1, %v1521_v63 }
 0x170   :  { %v1859_v25 = vpack.c.bf16 %v1576_v5, %v1575_v61  ;;  %v1574_v27 = vmax.f32 %v1558_v7, 0.0  ;;  %v2201_v6 = vpop.f32.mrf.mxu1  ;;  %v1538_v56 = vmul.f32 %v2931_v1, %v1481_v4  ;;  %v1492_v17 = vadd.f32 %v2193_v13, %v2934_v18 }
 0x171   :  { %v1879_v10 = vpack.c.bf16 %v1584_v14, %v1583_v16  ;;  %v1582_v33 = vmax.f32 %v1566_v15, 0.0  ;;  %v1483_v28 = vpop.f32.mrf.mxu0  ;;  %v1546_v54 = vmul.f32 %v2931_v1, %v1513_v47  ;;  %v1524_v8 = vadd.f32 %v2201_v6, %v1427_v48 }
 0x172   :  { %1891 = vst [vmem:[%s3011_s4 + $0x8] sm:$0xff] %v1859_v25   ;;  %v1854_v0 = vpack.c.bf16 %v1574_v27, %v1573_v12  ;;  %v1515_v42 = vpop.f32.mrf.mxu1  ;;  %v1563_v22 = vadd.f32 %v2941_v31, %v1540_v29  ;;  %v1541_v20 = vmul.f32 %v2931_v1, %v1492_v17  ;;  %v1484_v52 = vadd.f32 %v1483_v28, %v2916_v30 }
 0x173   :  { %1895 = vst [vmem:[%s3011_s4 + $0x28] sm:$0xff] %v1879_v10   ;;  %v1874_v38 = vpack.c.bf16 %v1582_v33, %v1581_v21  ;;  %v1516_v2 = vadd.f32 %v1515_v42, %v1419_v39  ;;  %v1571_v18 = vadd.f32 %v2941_v31, %v1548_v37  ;;  %v1561_v19 = vadd.f32 %v2941_v31, %v1538_v56 }
 0x174   :  { %1855 = vst [vmem:[%s3011_s4] sm:$0xff] %v1854_v0   ;;  %v1549_v26 = vmul.f32 %v2931_v1, %v1524_v8  ;;  %v1569_v34 = vadd.f32 %v2941_v31, %v1546_v54  ;;  %v1564_v36 = vadd.f32 %v2941_v31, %v1541_v20  ;;  %v1539_v24 = vmul.f32 %v2931_v1, %v1484_v52 }
 0x175   :  { %1894 = vst [vmem:[%s3011_s4 + $0x20] sm:$0xff] %v1874_v38   ;;  %v1547_v41 = vmul.f32 %v2931_v1, %v1516_v2  ;;  %v1579_v43 = vmax.f32 %v1563_v22, 0.0  ;;  %v1587_v46 = vmax.f32 %v1571_v18, 0.0  ;;  %v1577_v23 = vmax.f32 %v1561_v19, 0.0 }
 0x176   :  { %v1572_v30 = vadd.f32 %v2941_v31, %v1549_v26  ;;  %v1580_v32 = vmax.f32 %v1564_v36, 0.0  ;;  %v1562_v40 = vadd.f32 %v2941_v31, %v1539_v24  ;;  %v1585_v49 = vmax.f32 %v1569_v34, 0.0 }
 0x177   :  { %v1570_v57 = vadd.f32 %v2941_v31, %v1547_v41 }
 0x178   :  { %v1588_v50 = vmax.f32 %v1572_v30, 0.0  ;;  %v1869_v35 = vpack.c.bf16 %v1580_v32, %v1579_v43  ;;  %v1578_v45 = vmax.f32 %v1562_v40, 0.0 }
 0x179   :  { %v1586_v44 = vmax.f32 %v1570_v57, 0.0 }
 0x17a   :  { %v1889_v51 = vpack.c.bf16 %v1588_v50, %v1587_v46  ;;  %1893 = vst [vmem:[%s3011_s4 + $0x18] sm:$0xff] %v1869_v35   ;;  %v1864_v1 = vpack.c.bf16 %v1578_v45, %v1577_v23 }
 0x17b   :  { %v1884_v48 = vpack.c.bf16 %v1586_v44, %v1585_v49 }
 0x17c   :  { %1897 = vst [vmem:[%s3011_s4 + $0x38] sm:$0xff] %v1889_v51   ;;  %1892 = vst [vmem:[%s3011_s4 + $0x10] sm:$0xff] %v1864_v1  }
 0x17d   :  { %1896 = vst [vmem:[%s3011_s4 + $0x30] sm:$0xff] %v1884_v48  }

// kernel: simplenet7_forward.10
= control target key start
LH: loop header
LB: loop body
LE: loop exit
PB: predicated region body
PF: predicated region fallthrough
CT: control target
= control target key end

     0   :  { %s3702_s1 = inlined_call_operand.vmem [shape: bf16[1152,256], index: 1, kind: input, shape index: {}]   ;;  %s3703_s0 = inlined_call_operand.vmem [shape: bf16[128,1152], index: 0, kind: input, shape index: {}]   ;;  %s3704_s2 = inlined_call_operand.vmem [shape: f32[1,256], index: 2, kind: input, shape index: {}]   ;;  %s3705_s3 = inlined_call_operand.vmem [shape: f32[1,256], index: 3, kind: input, shape index: {}]   ;;  %s3706_s4 = inlined_call_operand.vmem [shape: bf16[128,256], index: 4, kind: output, shape index: {}]  }
   0x1   :  { %v2396_v0 = vld [vmem:[%s3702_s1 + $0x74] ss:$8 sps:$4 sm:$0xff]   ;;  %v2400_v2 = vld [vmem:[%s3702_s1 + $0x70] ss:$8 sps:$4 sm:$0xff]   ;;  %v2402_v4 = vld [vmem:[%s3702_s1 + $0x64] ss:$8 sps:$4 sm:$0xff]  }
   0x2   :  { %v2398_v1 = vld [vmem:[%s3702_s1 + $0x174] ss:$8 sps:$4 sm:$0xff]   ;;  %1330 = vmatprep.subr.bf16.mxu0 %v2396_v0  ;;  %v2401_v3 = vld [vmem:[%s3702_s1 + $0x170] ss:$8 sps:$4 sm:$0xff]   ;;  %v2404_v5 = vld [vmem:[%s3702_s1 + $0x164] ss:$8 sps:$4 sm:$0xff]  }
   0x3   :  { %1443 = vmatprep.subr.bf16.mxu1 %v2398_v1  ;;  %1331 = vmatpush1.bf16.msra.mxu0 %v2400_v2  ;;  %v2406_v6 = vld [vmem:[%s3702_s1 + $0x60] ss:$8 sps:$4 sm:$0xff]   ;;  %v2408_v8 = vld [vmem:[%s3702_s1 + $0x54] ss:$8 sps:$4 sm:$0xff]   ;;  %v2412_v10 = vld [vmem:[%s3702_s1 + $0x50] ss:$8 sps:$4 sm:$0xff]  }
   0x4   :  { %1444 = vmatpush1.bf16.msra.mxu1 %v2401_v3  ;;  %1332 = vmatprep.subr.bf16.mxu0 %v2402_v4  ;;  %v2407_v7 = vld [vmem:[%s3702_s1 + $0x160] ss:$8 sps:$4 sm:$0xff]   ;;  %v2410_v9 = vld [vmem:[%s3702_s1 + $0x154] ss:$8 sps:$4 sm:$0xff]   ;;  %v2413_v11 = vld [vmem:[%s3702_s1 + $0x150] ss:$8 sps:$4 sm:$0xff]  }
   0x5   :  { %1445 = vmatprep.subr.bf16.mxu1 %v2404_v5  ;;  %v2414_v12 = vld [vmem:[%s3702_s1 + $0x44] ss:$8 sps:$4 sm:$0xff]   ;;  %v2418_v14 = vld [vmem:[%s3702_s1 + $0x40] ss:$8 sps:$4 sm:$0xff]   ;;  %v2420_v16 = vld [vmem:[%s3702_s1 + $0x34] ss:$8 sps:$4 sm:$0xff]  }
   0x6   :  { %v2416_v13 = vld [vmem:[%s3702_s1 + $0x144] ss:$8 sps:$4 sm:$0xff]   ;;  %v2419_v15 = vld [vmem:[%s3702_s1 + $0x140] ss:$8 sps:$4 sm:$0xff]   ;;  %v2422_v17 = vld [vmem:[%s3702_s1 + $0x134] ss:$8 sps:$4 sm:$0xff]  }
   0x7   :  { %1333 = vmatpush1.bf16.msra.mxu0 %v2406_v6  ;;  %v2424_v18 = vld [vmem:[%s3702_s1 + $0x30] ss:$8 sps:$4 sm:$0xff]   ;;  %v2426_v20 = vld [vmem:[%s3702_s1 + $0x24] ss:$8 sps:$4 sm:$0xff]   ;;  %v2430_v22 = vld [vmem:[%s3702_s1 + $0x20] ss:$8 sps:$4 sm:$0xff]  }
   0x8   :  { %1446 = vmatpush1.bf16.msra.mxu1 %v2407_v7  ;;  %1334 = vmatprep.subr.bf16.mxu0 %v2408_v8  ;;  %v2425_v19 = vld [vmem:[%s3702_s1 + $0x130] ss:$8 sps:$4 sm:$0xff]   ;;  %v2428_v21 = vld [vmem:[%s3702_s1 + $0x124] ss:$8 sps:$4 sm:$0xff]   ;;  %v2431_v23 = vld [vmem:[%s3702_s1 + $0x120] ss:$8 sps:$4 sm:$0xff]  }
   0x9   :  { %1447 = vmatprep.subr.bf16.mxu1 %v2410_v9  ;;  %v2432_v24 = vld [vmem:[%s3702_s1 + $0x14] ss:$8 sps:$4 sm:$0xff]   ;;  %v2436_v26 = vld [vmem:[%s3702_s1 + $0x10] ss:$8 sps:$4 sm:$0xff]   ;;  %v2438_v28 = vld [vmem:[%s3702_s1 + $0x4] ss:$8 sps:$4 sm:$0xff]  }
   0xa   :  { %v2434_v25 = vld [vmem:[%s3702_s1 + $0x114] ss:$8 sps:$4 sm:$0xff]   ;;  %v2437_v27 = vld [vmem:[%s3702_s1 + $0x110] ss:$8 sps:$4 sm:$0xff]   ;;  %v2440_v29 = vld [vmem:[%s3702_s1 + $0x104] ss:$8 sps:$4 sm:$0xff]  }
   0xb   :  { %1335 = vmatpush1.bf16.msra.mxu0 %v2412_v10  ;;  %v2442_v30 = vld [vmem:[%s3702_s1] ss:$8 sps:$4 sm:$0xff]   ;;  %v2444_v32 = vld [vmem:[%s3702_s1 + $0xf4] ss:$8 sps:$4 sm:$0xff]   ;;  %v2448_v34 = vld [vmem:[%s3702_s1 + $0xf0] ss:$8 sps:$4 sm:$0xff]  }
   0xc   :  { %1448 = vmatpush1.bf16.msra.mxu1 %v2413_v11  ;;  %1336 = vmatprep.subr.bf16.mxu0 %v2414_v12  ;;  %v2443_v31 = vld [vmem:[%s3702_s1 + $0x100] ss:$8 sps:$4 sm:$0xff]   ;;  %v2446_v33 = vld [vmem:[%s3702_s1 + $0x1f4] ss:$8 sps:$4 sm:$0xff]   ;;  %v2449_v35 = vld [vmem:[%s3702_s1 + $0x1f0] ss:$8 sps:$4 sm:$0xff]  }
   0xd   :  { %1449 = vmatprep.subr.bf16.mxu1 %v2416_v13  ;;  %v2450_v36 = vld [vmem:[%s3702_s1 + $0xe4] ss:$8 sps:$4 sm:$0xff]   ;;  %v2454_v38 = vld [vmem:[%s3702_s1 + $0xe0] ss:$8 sps:$4 sm:$0xff]   ;;  %v2456_v40 = vld [vmem:[%s3702_s1 + $0xd4] ss:$8 sps:$4 sm:$0xff]  }
   0xe   :  { %v2452_v37 = vld [vmem:[%s3702_s1 + $0x1e4] ss:$8 sps:$4 sm:$0xff]   ;;  %v2455_v39 = vld [vmem:[%s3702_s1 + $0x1e0] ss:$8 sps:$4 sm:$0xff]   ;;  %v2458_v41 = vld [vmem:[%s3702_s1 + $0x1d4] ss:$8 sps:$4 sm:$0xff]  }
   0xf   :  { %1337 = vmatpush1.bf16.msra.mxu0 %v2418_v14  ;;  %v2460_v42 = vld [vmem:[%s3702_s1 + $0xd0] ss:$8 sps:$4 sm:$0xff]   ;;  %v2462_v44 = vld [vmem:[%s3702_s1 + $0xc4] ss:$8 sps:$4 sm:$0xff]   ;;  %v2466_v46 = vld [vmem:[%s3702_s1 + $0xc0] ss:$8 sps:$4 sm:$0xff]  }
  0x10   :  { %1450 = vmatpush1.bf16.msra.mxu1 %v2419_v15  ;;  %1338 = vmatprep.subr.bf16.mxu0 %v2420_v16  ;;  %v2461_v43 = vld [vmem:[%s3702_s1 + $0x1d0] ss:$8 sps:$4 sm:$0xff]   ;;  %v2464_v45 = vld [vmem:[%s3702_s1 + $0x1c4] ss:$8 sps:$4 sm:$0xff]   ;;  %v2467_v47 = vld [vmem:[%s3702_s1 + $0x1c0] ss:$8 sps:$4 sm:$0xff]  }
  0x11   :  { %1451 = vmatprep.subr.bf16.mxu1 %v2422_v17  ;;  %v2468_v48 = vld [vmem:[%s3702_s1 + $0xb4] ss:$8 sps:$4 sm:$0xff]   ;;  %v2494_v49 = vld [vmem:[%s3703_s0 + $0x4] ss:$36 sps:$4 sm:$0xff]   ;;  %v2497_v51 = vld [vmem:[%s3703_s0 + $0xc] ss:$36 sps:$4 sm:$0xff]  }
  0x12   :  { %v2470_v50 = vld [vmem:[%s3702_s1 + $0x1b4] ss:$8 sps:$4 sm:$0xff]   ;;  %1362 = vmatprep.mubr.bf16.mxu0 %v2494_v49  ;;  %v2472_v52 = vld [vmem:[%s3702_s1 + $0xb0] ss:$8 sps:$4 sm:$0xff]   ;;  %1475 = vmatprep.mubr.bf16.mxu1 %v2497_v51  ;;  %v2474_v54 = vld [vmem:[%s3702_s1 + $0xa4] ss:$8 sps:$4 sm:$0xff]  }
  0x13   :  { %1339 = vmatpush1.bf16.msra.mxu0 %v2424_v18  ;;  %v2473_v53 = vld [vmem:[%s3702_s1 + $0x1b0] ss:$8 sps:$4 sm:$0xff]   ;;  %v2476_v55 = vld [vmem:[%s3702_s1 + $0x1a4] ss:$8 sps:$4 sm:$0xff]   ;;  %v2478_v56 = vld [vmem:[%s3702_s1 + $0xa0] ss:$8 sps:$4 sm:$0xff]  }
  0x14   :  { %1452 = vmatpush1.bf16.msra.mxu1 %v2425_v19  ;;  %1340 = vmatprep.subr.bf16.mxu0 %v2426_v20  ;;  %v2479_v57 = vld [vmem:[%s3702_s1 + $0x1a0] ss:$8 sps:$4 sm:$0xff]   ;;  %v2480_v58 = vld [vmem:[%s3702_s1 + $0x94] ss:$8 sps:$4 sm:$0xff]   ;;  %v2484_v60 = vld [vmem:[%s3702_s1 + $0x90] ss:$8 sps:$4 sm:$0xff]  }
  0x15   :  { %1453 = vmatprep.subr.bf16.mxu1 %v2428_v21  ;;  %v2482_v59 = vld [vmem:[%s3702_s1 + $0x194] ss:$8 sps:$4 sm:$0xff]   ;;  %v2485_v61 = vld [vmem:[%s3702_s1 + $0x190] ss:$8 sps:$4 sm:$0xff]   ;;  %v2486_v62 = vld [vmem:[%s3702_s1 + $0x84] ss:$8 sps:$4 sm:$0xff]  }
  0x16   :  { %v2488_v63 = vld [vmem:[%s3702_s1 + $0x184] ss:$8 sps:$4 sm:$0xff]   ;;  %v2490_v0 = vld [vmem:[%s3702_s1 + $0x80] ss:$8 sps:$4 sm:$0xff]   ;;  %v2500_v2 = vld [vmem:[%s3702_s1 + $0x274] ss:$8 sps:$4 sm:$0xff]  }
  0x17   :  { %1341 = vmatpush1.bf16.msra.mxu0 %v2430_v22  ;;  %v2491_v1 = vld [vmem:[%s3702_s1 + $0x180] ss:$8 sps:$4 sm:$0xff]   ;;  %v2503_v3 = vld [vmem:[%s3702_s1 + $0x374] ss:$8 sps:$4 sm:$0xff]   ;;  %v2498_v6 = vld [vmem:[%s3702_s1 + $0x270] ss:$8 sps:$4 sm:$0xff]  }
  0x18   :  { %1454 = vmatpush1.bf16.msra.mxu1 %v2431_v23  ;;  %1342 = vmatprep.subr.bf16.mxu0 %v2432_v24  ;;  %v2492_v4 = vld [vmem:[%s3703_s0] ss:$36 sps:$4 sm:$0xff]   ;;  %v2495_v5 = vld [vmem:[%s3703_s0 + $0x8] ss:$36 sps:$4 sm:$0xff]   ;;  %v2501_v7 = vld [vmem:[%s3702_s1 + $0x370] ss:$8 sps:$4 sm:$0xff]  }
  0x19   :  { %1455 = vmatprep.subr.bf16.mxu1 %v2434_v25  ;;  %v2506_v8 = vld [vmem:[%s3702_s1 + $0x264] ss:$8 sps:$4 sm:$0xff]   ;;  %v2512_v11 = vld [vmem:[%s3703_s0 + $0x54] ss:$36 sps:$4 sm:$0xff]   ;;  %v2504_v12 = vld [vmem:[%s3702_s1 + $0x260] ss:$8 sps:$4 sm:$0xff]  }
  0x1a   :  { %v2509_v9 = vld [vmem:[%s3702_s1 + $0x364] ss:$8 sps:$4 sm:$0xff]   ;;  %v2507_v13 = vld [vmem:[%s3702_s1 + $0x360] ss:$8 sps:$4 sm:$0xff]   ;;  %v2518_v14 = vld [vmem:[%s3702_s1 + $0x254] ss:$8 sps:$4 sm:$0xff]  }
  0x1b   :  { %1343 = vmatpush1.bf16.msra.mxu0 %v2436_v26  ;;  %v2510_v10 = vld [vmem:[%s3703_s0 + $0x4c] ss:$36 sps:$4 sm:$0xff]   ;;  %v2521_v15 = vld [vmem:[%s3702_s1 + $0x354] ss:$8 sps:$4 sm:$0xff]   ;;  %v2522_v24 = vld [vmem:[%s3702_s1 + $0x240] ss:$8 sps:$4 sm:$0xff]  }
  0x1c   :  { %1456 = vmatpush1.bf16.msra.mxu1 %v2437_v27  ;;  %1344 = vmatprep.subr.bf16.mxu0 %v2438_v28  ;;  %v2514_v16 = vld [vmem:[%s3703_s0 + $0x48] ss:$36 sps:$4 sm:$0xff]   ;;  %v2515_v17 = vld [vmem:[%s3703_s0 + $0x50] ss:$36 sps:$4 sm:$0xff]   ;;  %v2530_v23 = vld [vmem:[%s3703_s0 + $0x9c] ss:$36 sps:$4 sm:$0xff]  }
  0x1d   :  { %1457 = vmatprep.subr.bf16.mxu1 %v2440_v29  ;;  %v2516_v18 = vld [vmem:[%s3702_s1 + $0x250] ss:$8 sps:$4 sm:$0xff]   ;;  %v2524_v20 = vld [vmem:[%s3702_s1 + $0x244] ss:$8 sps:$4 sm:$0xff]   ;;  %v2525_v25 = vld [vmem:[%s3702_s1 + $0x340] ss:$8 sps:$4 sm:$0xff]  }
  0x1e   :  { %v2519_v19 = vld [vmem:[%s3702_s1 + $0x350] ss:$8 sps:$4 sm:$0xff]   ;;  %v2527_v21 = vld [vmem:[%s3702_s1 + $0x344] ss:$8 sps:$4 sm:$0xff]   ;;  %v2536_v26 = vld [vmem:[%s3702_s1 + $0x234] ss:$8 sps:$4 sm:$0xff]  }
  0x1f   :  { %1345 = vmatpush1.bf16.msra.mxu0 %v2442_v30  ;;  %v2528_v22 = vld [vmem:[%s3703_s0 + $0x94] ss:$36 sps:$4 sm:$0xff]   ;;  %v2561_v49 = vld [vmem:[%s3702_s1 + $0x300] ss:$8 sps:$4 sm:$0xff]  }
  0x20   :  { %1458 = vmatpush1.bf16.msra.mxu1 %v2443_v31  ;;  %1346 = vmatprep.subr.bf16.mxu0 %v2444_v32  ;;  %v2539_v27 = vld [vmem:[%s3702_s1 + $0x334] ss:$8 sps:$4 sm:$0xff]   ;;  %v2534_v30 = vld [vmem:[%s3702_s1 + $0x230] ss:$8 sps:$4 sm:$0xff]   ;;  %v2542_v32 = vld [vmem:[%s3702_s1 + $0x224] ss:$8 sps:$4 sm:$0xff]  }
  0x21   :  { %1459 = vmatprep.subr.bf16.mxu1 %v2446_v33  ;;  %v2532_v28 = vld [vmem:[%s3703_s0 + $0x90] ss:$36 sps:$4 sm:$0xff]   ;;  %v2533_v29 = vld [vmem:[%s3703_s0 + $0x98] ss:$36 sps:$4 sm:$0xff]   ;;  %v2545_v33 = vld [vmem:[%s3702_s1 + $0x324] ss:$8 sps:$4 sm:$0xff]  }
  0x22   :  { %v2537_v31 = vld [vmem:[%s3702_s1 + $0x330] ss:$8 sps:$4 sm:$0xff]   ;;  %v2575_v51 = vld [vmem:[%s3702_s1 + $0x3f4] ss:$8 sps:$4 sm:$0xff]  }
  0x23   :  { %1347 = vmatpush2.bf16.msra.mxu0 %v2448_v34  ;;  %v2546_v34 = vld [vmem:[%s3703_s0 + $0xdc] ss:$36 sps:$4 sm:$0xff]  }
  0x24   :  { %1460 = vmatpush2.bf16.msra.mxu1 %v2449_v35  ;;  %1348 = vmatprep.subr.bf16.mxu0 %v2450_v36  ;;  %v2548_v35 = vld [vmem:[%s3703_s0 + $0xe4] ss:$36 sps:$4 sm:$0xff]  }
  0x25   :  { %1461 = vmatprep.subr.bf16.mxu1 %v2452_v37  ;;  %v2540_v36 = vld [vmem:[%s3702_s1 + $0x220] ss:$8 sps:$4 sm:$0xff]  }
  0x26   :  { %v2543_v37 = vld [vmem:[%s3702_s1 + $0x320] ss:$8 sps:$4 sm:$0xff]  }
  0x27   :  { %1349 = vmatpush2.bf16.msra.mxu0 %v2454_v38  ;;  %v2554_v38 = vld [vmem:[%s3702_s1 + $0x214] ss:$8 sps:$4 sm:$0xff]  }
  0x28   :  { %1462 = vmatpush2.bf16.msra.mxu1 %v2455_v39  ;;  %1350 = vmatprep.subr.bf16.mxu0 %v2456_v40  ;;  %v2557_v39 = vld [vmem:[%s3702_s1 + $0x314] ss:$8 sps:$4 sm:$0xff]  }
  0x29   :  { %1463 = vmatprep.subr.bf16.mxu1 %v2458_v41  ;;  %v2550_v40 = vld [vmem:[%s3703_s0 + $0xd8] ss:$36 sps:$4 sm:$0xff]   ;;  %v2551_v41 = vld [vmem:[%s3703_s0 + $0xe0] ss:$36 sps:$4 sm:$0xff]  }
  0x2b   :  { %1351 = vmatpush2.bf16.msra.mxu0 %v2460_v42  ;;  %v2552_v42 = vld [vmem:[%s3702_s1 + $0x210] ss:$8 sps:$4 sm:$0xff]  }
  0x2c   :  { %1464 = vmatpush2.bf16.msra.mxu1 %v2461_v43  ;;  %1352 = vmatprep.subr.bf16.mxu0 %v2462_v44  ;;  %v2555_v43 = vld [vmem:[%s3702_s1 + $0x310] ss:$8 sps:$4 sm:$0xff]   ;;  %v2560_v44 = vld [vmem:[%s3702_s1 + $0x204] ss:$8 sps:$4 sm:$0xff]  }
  0x2d   :  { %1465 = vmatprep.subr.bf16.mxu1 %v2464_v45  ;;  %v2563_v45 = vld [vmem:[%s3702_s1 + $0x304] ss:$8 sps:$4 sm:$0xff]  }
  0x2f   :  { %1353 = vmatpush2.bf16.msra.mxu0 %v2466_v46  ;;  %v2564_v46 = vld [vmem:[%s3703_s0 + $0x124] ss:$36 sps:$4 sm:$0xff]  }
  0x30   :  { %1466 = vmatpush2.bf16.msra.mxu1 %v2467_v47  ;;  %1354 = vmatprep.subr.bf16.mxu0 %v2468_v48  ;;  %v2566_v47 = vld [vmem:[%s3703_s0 + $0x12c] ss:$36 sps:$4 sm:$0xff]   ;;  %v2558_v48 = vld [vmem:[%s3702_s1 + $0x200] ss:$8 sps:$4 sm:$0xff]  }
  0x31   :  { %1467 = vmatprep.subr.bf16.mxu1 %v2470_v50  ;;  %v2572_v50 = vld [vmem:[%s3702_s1 + $0x2f4] ss:$8 sps:$4 sm:$0xff]  }
  0x33   :  { %1355 = vmatpush2.bf16.msra.mxu0 %v2472_v52  ;;  %v2568_v52 = vld [vmem:[%s3703_s0 + $0x120] ss:$36 sps:$4 sm:$0xff]  }
  0x34   :  { %1468 = vmatpush2.bf16.msra.mxu1 %v2473_v53  ;;  %1356 = vmatprep.subr.bf16.mxu0 %v2474_v54  ;;  %v2569_v53 = vld [vmem:[%s3703_s0 + $0x128] ss:$36 sps:$4 sm:$0xff]   ;;  %v2570_v54 = vld [vmem:[%s3702_s1 + $0x2f0] ss:$8 sps:$4 sm:$0xff]  }
  0x35   :  { %1469 = vmatprep.subr.bf16.mxu1 %v2476_v55  ;;  %v2573_v55 = vld [vmem:[%s3702_s1 + $0x3f0] ss:$8 sps:$4 sm:$0xff]  }
  0x37   :  { %1357 = vmatpush2.bf16.msra.mxu0 %v2478_v56  ;;  %v2578_v56 = vld [vmem:[%s3702_s1 + $0x2e4] ss:$8 sps:$4 sm:$0xff]  }
  0x38   :  { %1470 = vmatpush2.bf16.msra.mxu1 %v2479_v57  ;;  %1358 = vmatprep.subr.bf16.mxu0 %v2480_v58  ;;  %v2581_v57 = vld [vmem:[%s3702_s1 + $0x3e4] ss:$8 sps:$4 sm:$0xff]  }
  0x39   :  { %1471 = vmatprep.subr.bf16.mxu1 %v2482_v59  ;;  %v2582_v58 = vld [vmem:[%s3703_s0 + $0x16c] ss:$36 sps:$4 sm:$0xff]   ;;  %v2584_v59 = vld [vmem:[%s3703_s0 + $0x174] ss:$36 sps:$4 sm:$0xff]  }
  0x3b   :  { %1359 = vmatpush2.bf16.msra.mxu0 %v2484_v60  ;;  %v2576_v60 = vld [vmem:[%s3702_s1 + $0x2e0] ss:$8 sps:$4 sm:$0xff]  }
  0x3c   :  { %1472 = vmatpush2.bf16.msra.mxu1 %v2485_v61  ;;  %1360 = vmatprep.subr.bf16.mxu0 %v2486_v62  ;;  %v2579_v61 = vld [vmem:[%s3702_s1 + $0x3e0] ss:$8 sps:$4 sm:$0xff]   ;;  %v2590_v62 = vld [vmem:[%s3702_s1 + $0x2d4] ss:$8 sps:$4 sm:$0xff]  }
  0x3d   :  { %1473 = vmatprep.subr.bf16.mxu1 %v2488_v63  ;;  %v2593_v63 = vld [vmem:[%s3702_s1 + $0x3d4] ss:$8 sps:$4 sm:$0xff]  }
  0x3f   :  { %1361 = vmatpush2.bf16.msra.mxu0 %v2490_v0  ;;  %v2586_v0 = vld [vmem:[%s3703_s0 + $0x168] ss:$36 sps:$4 sm:$0xff]  }
  0x40   :  { %1474 = vmatpush2.bf16.msra.mxu1 %v2491_v1  ;;  %1556 = vmatprep.subr.bf16.mxu0 %v2500_v2  ;;  %v2587_v1 = vld [vmem:[%s3703_s0 + $0x170] ss:$36 sps:$4 sm:$0xff]  }
  0x41   :  { %1669 = vmatprep.subr.bf16.mxu1 %v2503_v3  ;;  %v2588_v2 = vld [vmem:[%s3702_s1 + $0x2d0] ss:$8 sps:$4 sm:$0xff]  }
  0x42   :  { %1363 = vmatmul.mubr.bf16.vlgmr.msra.gmra.mxu0 %v2492_v4  ;;  %v2591_v3 = vld [vmem:[%s3702_s1 + $0x3d0] ss:$8 sps:$4 sm:$0xff]   ;;  %v2596_v4 = vld [vmem:[%s3702_s1 + $0x2c4] ss:$8 sps:$4 sm:$0xff]  }
  0x43   :  { %1476 = vmatmul.mubr.bf16.vlgmr.msra.gmra.mxu1 %v2495_v5  ;;  %1557 = vmatpush1.bf16.msra.mxu0 %v2498_v6  ;;  %v2599_v5 = vld [vmem:[%s3702_s1 + $0x3c4] ss:$8 sps:$4 sm:$0xff]   ;;  %v2600_v6 = vld [vmem:[%s3703_s0 + $0x1b4] ss:$36 sps:$4 sm:$0xff]  }
  0x44   :  { %1670 = vmatpush1.bf16.msra.mxu1 %v2501_v7  ;;  %1558 = vmatprep.subr.bf16.mxu0 %v2506_v8  ;;  %v2602_v7 = vld [vmem:[%s3703_s0 + $0x1bc] ss:$36 sps:$4 sm:$0xff]  }
  0x45   :  { %1671 = vmatprep.subr.bf16.mxu1 %v2509_v9  ;;  %1372 = vmatprep.mubr.bf16.mxu0 %v2510_v10  ;;  %v2594_v8 = vld [vmem:[%s3702_s1 + $0x2c0] ss:$8 sps:$4 sm:$0xff]   ;;  %v2608_v10 = vld [vmem:[%s3702_s1 + $0x2b4] ss:$8 sps:$4 sm:$0xff]  }
  0x46   :  { %1485 = vmatprep.mubr.bf16.mxu1 %v2512_v11  ;;  %v2597_v9 = vld [vmem:[%s3702_s1 + $0x3c0] ss:$8 sps:$4 sm:$0xff]   ;;  %v2611_v11 = vld [vmem:[%s3702_s1 + $0x3b4] ss:$8 sps:$4 sm:$0xff]  }
  0x47   :  { %1559 = vmatpush1.bf16.msra.mxu0 %v2504_v12  ;;  %v2604_v12 = vld [vmem:[%s3703_s0 + $0x1b0] ss:$36 sps:$4 sm:$0xff]  }
  0x48   :  { %1672 = vmatpush1.bf16.msra.mxu1 %v2507_v13  ;;  %1560 = vmatprep.subr.bf16.mxu0 %v2518_v14  ;;  %v2605_v13 = vld [vmem:[%s3703_s0 + $0x1b8] ss:$36 sps:$4 sm:$0xff]  }
  0x49   :  { %1673 = vmatprep.subr.bf16.mxu1 %v2521_v15  ;;  %v2606_v14 = vld [vmem:[%s3702_s1 + $0x2b0] ss:$8 sps:$4 sm:$0xff]  }
  0x4a   :  { %1373 = vmatmul.mubr.bf16.gmra.mxu0 %v2514_v16  ;;  %v2609_v15 = vld [vmem:[%s3702_s1 + $0x3b0] ss:$8 sps:$4 sm:$0xff]   ;;  %v2614_v16 = vld [vmem:[%s3702_s1 + $0x2a4] ss:$8 sps:$4 sm:$0xff]  }
  0x4b   :  { %1486 = vmatmul.mubr.bf16.gmra.mxu1 %v2515_v17  ;;  %1561 = vmatpush1.bf16.msra.mxu0 %v2516_v18  ;;  %v2617_v17 = vld [vmem:[%s3702_s1 + $0x3a4] ss:$8 sps:$4 sm:$0xff]   ;;  %v2618_v18 = vld [vmem:[%s3703_s0 + $0x1fc] ss:$36 sps:$4 sm:$0xff]  }
  0x4c   :  { %1674 = vmatpush1.bf16.msra.mxu1 %v2519_v19  ;;  %1562 = vmatprep.subr.bf16.mxu0 %v2524_v20  ;;  %v2620_v19 = vld [vmem:[%s3703_s0 + $0x204] ss:$36 sps:$4 sm:$0xff]  }
  0x4d   :  { %1675 = vmatprep.subr.bf16.mxu1 %v2527_v21  ;;  %1382 = vmatprep.mubr.bf16.mxu0 %v2528_v22  ;;  %v2612_v20 = vld [vmem:[%s3702_s1 + $0x2a0] ss:$8 sps:$4 sm:$0xff]   ;;  %v2626_v22 = vld [vmem:[%s3702_s1 + $0x294] ss:$8 sps:$4 sm:$0xff]  }
  0x4e   :  { %1495 = vmatprep.mubr.bf16.mxu1 %v2530_v23  ;;  %v2615_v21 = vld [vmem:[%s3702_s1 + $0x3a0] ss:$8 sps:$4 sm:$0xff]   ;;  %v2629_v23 = vld [vmem:[%s3702_s1 + $0x394] ss:$8 sps:$4 sm:$0xff]  }
  0x4f   :  { %1563 = vmatpush1.bf16.msra.mxu0 %v2522_v24  ;;  %v2622_v24 = vld [vmem:[%s3703_s0 + $0x1f8] ss:$36 sps:$4 sm:$0xff]  }
  0x50   :  { %1676 = vmatpush1.bf16.msra.mxu1 %v2525_v25  ;;  %1564 = vmatprep.subr.bf16.mxu0 %v2536_v26  ;;  %v2623_v25 = vld [vmem:[%s3703_s0 + $0x200] ss:$36 sps:$4 sm:$0xff]   ;;  %v2624_v26 = vld [vmem:[%s3702_s1 + $0x290] ss:$8 sps:$4 sm:$0xff]  }
  0x51   :  { %1677 = vmatprep.subr.bf16.mxu1 %v2539_v27  ;;  %v2627_v27 = vld [vmem:[%s3702_s1 + $0x390] ss:$8 sps:$4 sm:$0xff]  }
  0x52   :  { %1383 = vmatmul.mubr.bf16.gmra.mxu0 %v2532_v28  ;;  %v2632_v28 = vld [vmem:[%s3702_s1 + $0x284] ss:$8 sps:$4 sm:$0xff]  }
  0x53   :  { %1496 = vmatmul.mubr.bf16.gmra.mxu1 %v2533_v29  ;;  %1565 = vmatpush1.bf16.msra.mxu0 %v2534_v30  ;;  %v2635_v29 = vld [vmem:[%s3702_s1 + $0x384] ss:$8 sps:$4 sm:$0xff]   ;;  %v2638_v30 = vld [vmem:[%s3703_s0 + $0x14] ss:$36 sps:$4 sm:$0xff]  }
  0x54   :  { %1678 = vmatpush1.bf16.msra.mxu1 %v2537_v31  ;;  %1566 = vmatprep.subr.bf16.mxu0 %v2542_v32  ;;  %v2641_v31 = vld [vmem:[%s3703_s0 + $0x1c] ss:$36 sps:$4 sm:$0xff]  }
  0x55   :  { %1679 = vmatprep.subr.bf16.mxu1 %v2545_v33  ;;  %1392 = vmatprep.mubr.bf16.mxu0 %v2546_v34  ;;  %v2630_v32 = vld [vmem:[%s3702_s1 + $0x280] ss:$8 sps:$4 sm:$0xff]   ;;  %v2644_v34 = vld [vmem:[%s3702_s1 + $0x474] ss:$8 sps:$4 sm:$0xff]  }
  0x56   :  { %1505 = vmatprep.mubr.bf16.mxu1 %v2548_v35  ;;  %v2633_v33 = vld [vmem:[%s3702_s1 + $0x380] ss:$8 sps:$4 sm:$0xff]   ;;  %v2636_v35 = vld [vmem:[%s3703_s0 + $0x10] ss:$36 sps:$4 sm:$0xff]  }
  0x57   :  { %1567 = vmatpush1.bf16.msra.mxu0 %v2540_v36  ;;  %v2639_v36 = vld [vmem:[%s3703_s0 + $0x18] ss:$36 sps:$4 sm:$0xff]  }
  0x58   :  { %1680 = vmatpush1.bf16.msra.mxu1 %v2543_v37  ;;  %1568 = vmatprep.subr.bf16.mxu0 %v2554_v38  ;;  %v2642_v37 = vld [vmem:[%s3702_s1 + $0x470] ss:$8 sps:$4 sm:$0xff]   ;;  %v2645_v38 = vld [vmem:[%s3703_s0 + $0x5c] ss:$36 sps:$4 sm:$0xff]  }
  0x59   :  { %1681 = vmatprep.subr.bf16.mxu1 %v2557_v39  ;;  %v2647_v39 = vld [vmem:[%s3703_s0 + $0x64] ss:$36 sps:$4 sm:$0xff]  }
  0x5a   :  { %1393 = vmatmul.mubr.bf16.gmra.mxu0 %v2550_v40  ;;  %v2653_v40 = vld [vmem:[%s3702_s1 + $0x464] ss:$8 sps:$4 sm:$0xff]  }
  0x5b   :  { %1506 = vmatmul.mubr.bf16.gmra.mxu1 %v2551_v41  ;;  %1569 = vmatpush1.bf16.msra.mxu0 %v2552_v42  ;;  %v2651_v41 = vld [vmem:[%s3702_s1 + $0x460] ss:$8 sps:$4 sm:$0xff]   ;;  %v2662_v42 = vld [vmem:[%s3702_s1 + $0x454] ss:$8 sps:$4 sm:$0xff]  }
  0x5c   :  { %1682 = vmatpush1.bf16.msra.mxu1 %v2555_v43  ;;  %1570 = vmatprep.subr.bf16.mxu0 %v2560_v44  ;;  %v2649_v43 = vld [vmem:[%s3703_s0 + $0x58] ss:$36 sps:$4 sm:$0xff]   ;;  %v2650_v44 = vld [vmem:[%s3703_s0 + $0x60] ss:$36 sps:$4 sm:$0xff]  }
  0x5d   :  { %1683 = vmatprep.subr.bf16.mxu1 %v2563_v45  ;;  %1402 = vmatprep.mubr.bf16.mxu0 %v2564_v46  ;;  %v2654_v45 = vld [vmem:[%s3703_s0 + $0xa4] ss:$36 sps:$4 sm:$0xff]   ;;  %v2656_v46 = vld [vmem:[%s3703_s0 + $0xac] ss:$36 sps:$4 sm:$0xff]  }
  0x5e   :  { %1515 = vmatprep.mubr.bf16.mxu1 %v2566_v47  ;;  %v2660_v47 = vld [vmem:[%s3702_s1 + $0x450] ss:$8 sps:$4 sm:$0xff]  }
  0x5f   :  { %1571 = vmatpush1.bf16.msra.mxu0 %v2558_v48  ;;  %v2671_v48 = vld [vmem:[%s3702_s1 + $0x444] ss:$8 sps:$4 sm:$0xff]  }
  0x60   :  { %1684 = vmatpush1.bf16.msra.mxu1 %v2561_v49  ;;  %1572 = vmatprep.subr.bf16.mxu0 %v2572_v50  ;;  %v2658_v49 = vld [vmem:[%s3703_s0 + $0xa0] ss:$36 sps:$4 sm:$0xff]   ;;  %v2659_v50 = vld [vmem:[%s3703_s0 + $0xa8] ss:$36 sps:$4 sm:$0xff]  }
  0x61   :  { %1685 = vmatprep.subr.bf16.mxu1 %v2575_v51  ;;  %v2669_v51 = vld [vmem:[%s3702_s1 + $0x440] ss:$8 sps:$4 sm:$0xff]  }
  0x62   :  { %1403 = vmatmul.mubr.bf16.gmra.mxu0 %v2568_v52  ;;  %v2680_v52 = vld [vmem:[%s3702_s1 + $0x434] ss:$8 sps:$4 sm:$0xff]  }
  0x63   :  { %1516 = vmatmul.mubr.bf16.gmra.mxu1 %v2569_v53  ;;  %1573 = vmatpush2.bf16.msra.mxu0 %v2570_v54  ;;  %v2663_v53 = vld [vmem:[%s3703_s0 + $0xec] ss:$36 sps:$4 sm:$0xff]   ;;  %v2665_v54 = vld [vmem:[%s3703_s0 + $0xf4] ss:$36 sps:$4 sm:$0xff]  }
  0x64   :  { %1686 = vmatpush2.bf16.msra.mxu1 %v2573_v55  ;;  %1574 = vmatprep.subr.bf16.mxu0 %v2578_v56  ;;  %v2678_v55 = vld [vmem:[%s3702_s1 + $0x430] ss:$8 sps:$4 sm:$0xff]   ;;  %v2689_v56 = vld [vmem:[%s3702_s1 + $0x424] ss:$8 sps:$4 sm:$0xff]  }
  0x65   :  { %1687 = vmatprep.subr.bf16.mxu1 %v2581_v57  ;;  %1412 = vmatprep.mubr.bf16.mxu0 %v2582_v58  ;;  %v2687_v57 = vld [vmem:[%s3702_s1 + $0x420] ss:$8 sps:$4 sm:$0xff]   ;;  %v2698_v58 = vld [vmem:[%s3702_s1 + $0x414] ss:$8 sps:$4 sm:$0xff]  }
  0x66   :  { %1525 = vmatprep.mubr.bf16.mxu1 %v2584_v59  ;;  %v2667_v59 = vld [vmem:[%s3703_s0 + $0xe8] ss:$36 sps:$4 sm:$0xff]  }
  0x67   :  { %1575 = vmatpush2.bf16.msra.mxu0 %v2576_v60  ;;  %v2668_v60 = vld [vmem:[%s3703_s0 + $0xf0] ss:$36 sps:$4 sm:$0xff]  }
  0x68   :  { %1688 = vmatpush2.bf16.msra.mxu1 %v2579_v61  ;;  %1576 = vmatprep.subr.bf16.mxu0 %v2590_v62  ;;  %v2672_v61 = vld [vmem:[%s3703_s0 + $0x134] ss:$36 sps:$4 sm:$0xff]   ;;  %v2674_v62 = vld [vmem:[%s3703_s0 + $0x13c] ss:$36 sps:$4 sm:$0xff]  }
  0x69   :  { %1689 = vmatprep.subr.bf16.mxu1 %v2593_v63  ;;  %v2696_v63 = vld [vmem:[%s3702_s1 + $0x410] ss:$8 sps:$4 sm:$0xff]  }
  0x6a   :  { %1413 = vmatmul.mubr.bf16.gmra.mxu0 %v2586_v0  ;;  %v2707_v0 = vld [vmem:[%s3702_s1 + $0x404] ss:$8 sps:$4 sm:$0xff]  }
  0x6b   :  { %1526 = vmatmul.mubr.bf16.gmra.mxu1 %v2587_v1  ;;  %1577 = vmatpush2.bf16.msra.mxu0 %v2588_v2  ;;  %v2705_v1 = vld [vmem:[%s3702_s1 + $0x400] ss:$8 sps:$4 sm:$0xff]   ;;  %v2676_v2 = vld [vmem:[%s3703_s0 + $0x130] ss:$36 sps:$4 sm:$0xff]  }
  0x6c   :  { %1690 = vmatpush2.bf16.msra.mxu1 %v2591_v3  ;;  %1578 = vmatprep.subr.bf16.mxu0 %v2596_v4  ;;  %v2677_v3 = vld [vmem:[%s3703_s0 + $0x138] ss:$36 sps:$4 sm:$0xff]  }
  0x6d   :  { %1691 = vmatprep.subr.bf16.mxu1 %v2599_v5  ;;  %1422 = vmatprep.mubr.bf16.mxu0 %v2600_v6  ;;  %v2681_v4 = vld [vmem:[%s3703_s0 + $0x17c] ss:$36 sps:$4 sm:$0xff]   ;;  %v2683_v5 = vld [vmem:[%s3703_s0 + $0x184] ss:$36 sps:$4 sm:$0xff]  }
  0x6e   :  { %1535 = vmatprep.mubr.bf16.mxu1 %v2602_v7  ;;  %v2685_v6 = vld [vmem:[%s3703_s0 + $0x178] ss:$36 sps:$4 sm:$0xff]   ;;  %v2686_v7 = vld [vmem:[%s3703_s0 + $0x180] ss:$36 sps:$4 sm:$0xff]  }
  0x6f   :  { %1579 = vmatpush2.bf16.msra.mxu0 %v2594_v8  ;;  %v2690_v8 = vld [vmem:[%s3703_s0 + $0x1c4] ss:$36 sps:$4 sm:$0xff]  }
  0x70   :  { %1692 = vmatpush2.bf16.msra.mxu1 %v2597_v9  ;;  %1580 = vmatprep.subr.bf16.mxu0 %v2608_v10  ;;  %v2692_v9 = vld [vmem:[%s3703_s0 + $0x1cc] ss:$36 sps:$4 sm:$0xff]   ;;  %v2694_v10 = vld [vmem:[%s3703_s0 + $0x1c0] ss:$36 sps:$4 sm:$0xff]  }
  0x71   :  { %1693 = vmatprep.subr.bf16.mxu1 %v2611_v11  ;;  %v2695_v11 = vld [vmem:[%s3703_s0 + $0x1c8] ss:$36 sps:$4 sm:$0xff]  }
  0x72   :  { %1423 = vmatmul.mubr.bf16.gmra.mxu0 %v2604_v12  ;;  %v2699_v12 = vld [vmem:[%s3703_s0 + $0x20c] ss:$36 sps:$4 sm:$0xff]  }
  0x73   :  { %1536 = vmatmul.mubr.bf16.gmra.mxu1 %v2605_v13  ;;  %1581 = vmatpush2.bf16.msra.mxu0 %v2606_v14  ;;  %v2701_v13 = vld [vmem:[%s3703_s0 + $0x214] ss:$36 sps:$4 sm:$0xff]   ;;  %v2703_v14 = vld [vmem:[%s3703_s0 + $0x208] ss:$36 sps:$4 sm:$0xff]  }
  0x74   :  { %1694 = vmatpush2.bf16.msra.mxu1 %v2609_v15  ;;  %1582 = vmatprep.subr.bf16.mxu0 %v2614_v16  ;;  %v2704_v15 = vld [vmem:[%s3703_s0 + $0x210] ss:$36 sps:$4 sm:$0xff]   ;;  %v2716_v16 = vmov 0  }
  0x75   :  { %1695 = vmatprep.subr.bf16.mxu1 %v2617_v17  ;;  %1432 = vmatprep.mubr.bf16.mxu0 %v2618_v18  ;;  %v2708_v17 = vld [vmem:[%s3703_s0 + $0x20] ss:$36 sps:$4 sm:$0xff]  }
  0x76   :  { %1545 = vmatprep.mubr.bf16.mxu1 %v2620_v19  ;;  %v2709_v18 = vld [vmem:[%s3703_s0 + $0x140] ss:$36 sps:$4 sm:$0xff]   ;;  %v2710_v19 = vld [vmem:[%s3703_s0 + $0x68] ss:$36 sps:$4 sm:$0xff]  }
  0x77   :  { %1583 = vmatpush2.bf16.msra.mxu0 %v2612_v20  ;;  %v2711_v20 = vld [vmem:[%s3703_s0 + $0x188] ss:$36 sps:$4 sm:$0xff]  }
  0x78   :  { %1696 = vmatpush2.bf16.msra.mxu1 %v2615_v21  ;;  %1584 = vmatprep.subr.bf16.mxu0 %v2626_v22  ;;  %v2712_v21 = vld [vmem:[%s3703_s0 + $0xb0] ss:$36 sps:$4 sm:$0xff]  }
  0x79   :  { %1697 = vmatprep.subr.bf16.mxu1 %v2629_v23  ;;  %v2713_v22 = vld [vmem:[%s3703_s0 + $0x1d0] ss:$36 sps:$4 sm:$0xff]   ;;  %v2714_v23 = vld [vmem:[%s3703_s0 + $0xf8] ss:$36 sps:$4 sm:$0xff]  }
  0x7a   :  { %1433 = vmatmul.mubr.bf16.gmra.mxu0 %v2622_v24  ;;  %v2715_v24 = vld [vmem:[%s3703_s0 + $0x218] ss:$36 sps:$4 sm:$0xff]  }
  0x7b   :  { %1546 = vmatmul.mubr.bf16.gmra.mxu1 %v2623_v25  ;;  %1585 = vmatpush2.bf16.msra.mxu0 %v2624_v26 }
  0x7c   :  { %1698 = vmatpush2.bf16.msra.mxu1 %v2627_v27  ;;  %1586 = vmatprep.subr.bf16.mxu0 %v2632_v28 }
  0x7d   :  { %1699 = vmatprep.subr.bf16.mxu1 %v2635_v29  ;;  %1588 = vmatprep.mubr.bf16.mxu0 %v2638_v30 }
  0x7e   :  { %1701 = vmatprep.mubr.bf16.mxu1 %v2641_v31 }
  0x7f   :  { %1587 = vmatpush2.bf16.msra.mxu0 %v2630_v32 }
  0x80   :  { %1700 = vmatpush2.bf16.msra.mxu1 %v2633_v33  ;;  %1782 = vmatprep.subr.bf16.mxu0 %v2644_v34 }
  0x81   :  { %2379 = vmatprep.subr.bf16.mxu1 %v2644_v34 }
  0x82   :  { %1589 = vmatmul.mubr.bf16.vlgmr.msra.gmra.mxu0 %v2636_v35 }
  0x83   :  { %1702 = vmatmul.mubr.bf16.vlgmr.msra.gmra.mxu1 %v2639_v36  ;;  %1783 = vmatpush1.bf16.msra.mxu0 %v2642_v37 }
  0x84   :  { %2387 = vmatpush1.bf16.msra.mxu1 %v2642_v37  ;;  %1598 = vmatprep.mubr.bf16.mxu0 %v2645_v38 }
  0x85   :  { %1711 = vmatprep.mubr.bf16.mxu1 %v2647_v39  ;;  %1784 = vmatprep.subr.bf16.mxu0 %v2653_v40 }
  0x86   :  { %2380 = vmatprep.subr.bf16.mxu1 %v2653_v40 }
  0x87   :  { %1785 = vmatpush1.bf16.msra.mxu0 %v2651_v41 }
  0x88   :  { %2388 = vmatpush1.bf16.msra.mxu1 %v2651_v41  ;;  %1786 = vmatprep.subr.bf16.mxu0 %v2662_v42 }
  0x89   :  { %2381 = vmatprep.subr.bf16.mxu1 %v2662_v42 }
  0x8a   :  { %1599 = vmatmul.mubr.bf16.gmra.mxu0 %v2649_v43 }
  0x8b   :  { %1712 = vmatmul.mubr.bf16.gmra.mxu1 %v2650_v44  ;;  %1608 = vmatprep.mubr.bf16.mxu0 %v2654_v45 }
  0x8c   :  { %1721 = vmatprep.mubr.bf16.mxu1 %v2656_v46  ;;  %1787 = vmatpush1.bf16.msra.mxu0 %v2660_v47 }
  0x8d   :  { %2389 = vmatpush1.bf16.msra.mxu1 %v2660_v47  ;;  %1788 = vmatprep.subr.bf16.mxu0 %v2671_v48 }
  0x8e   :  { %2382 = vmatprep.subr.bf16.mxu1 %v2671_v48 }
  0x90   :  { %1789 = vmatpush1.bf16.msra.mxu0 %v2669_v51 }
  0x91   :  { %2390 = vmatpush1.bf16.msra.mxu1 %v2669_v51  ;;  %1790 = vmatprep.subr.bf16.mxu0 %v2680_v52 }
  0x92   :  { %2383 = vmatprep.subr.bf16.mxu1 %v2680_v52  ;;  %1609 = vmatmul.mubr.bf16.gmra.mxu0 %v2658_v49 }
  0x93   :  { %1722 = vmatmul.mubr.bf16.gmra.mxu1 %v2659_v50  ;;  %1618 = vmatprep.mubr.bf16.mxu0 %v2663_v53 }
  0x94   :  { %1731 = vmatprep.mubr.bf16.mxu1 %v2665_v54  ;;  %1791 = vmatpush1.bf16.msra.mxu0 %v2678_v55 }
  0x95   :  { %2391 = vmatpush1.bf16.msra.mxu1 %v2678_v55  ;;  %1792 = vmatprep.subr.bf16.mxu0 %v2689_v56 }
  0x96   :  { %2384 = vmatprep.subr.bf16.mxu1 %v2689_v56 }
  0x98   :  { %1793 = vmatpush1.bf16.msra.mxu0 %v2687_v57 }
  0x99   :  { %2392 = vmatpush1.bf16.msra.mxu1 %v2687_v57  ;;  %1794 = vmatprep.subr.bf16.mxu0 %v2698_v58 }
  0x9a   :  { %2385 = vmatprep.subr.bf16.mxu1 %v2698_v58  ;;  %1619 = vmatmul.mubr.bf16.gmra.mxu0 %v2667_v59 }
  0x9b   :  { %1732 = vmatmul.mubr.bf16.gmra.mxu1 %v2668_v60  ;;  %1628 = vmatprep.mubr.bf16.mxu0 %v2672_v61 }
  0x9c   :  { %1741 = vmatprep.mubr.bf16.mxu1 %v2674_v62  ;;  %1795 = vmatpush1.bf16.msra.mxu0 %v2696_v63 }
  0x9d   :  { %2393 = vmatpush1.bf16.msra.mxu1 %v2696_v63  ;;  %1796 = vmatprep.subr.bf16.mxu0 %v2707_v0 }
  0x9e   :  { %2386 = vmatprep.subr.bf16.mxu1 %v2707_v0 }
  0xa0   :  { %1797 = vmatpush1.bf16.msra.mxu0 %v2705_v1 }
  0xa1   :  { %2394 = vmatpush1.bf16.msra.mxu1 %v2705_v1 }
  0xa2   :  { %1629 = vmatmul.mubr.bf16.gmra.mxu0 %v2676_v2 }
  0xa3   :  { %1742 = vmatmul.mubr.bf16.gmra.mxu1 %v2677_v3  ;;  %1638 = vmatprep.mubr.bf16.mxu0 %v2681_v4 }
  0xa4   :  { %1751 = vmatprep.mubr.bf16.mxu1 %v2683_v5 }
  0xaa   :  { %1639 = vmatmul.mubr.bf16.gmra.mxu0 %v2685_v6 }
  0xab   :  { %1752 = vmatmul.mubr.bf16.gmra.mxu1 %v2686_v7  ;;  %1648 = vmatprep.mubr.bf16.mxu0 %v2690_v8 }
  0xac   :  { %1761 = vmatprep.mubr.bf16.mxu1 %v2692_v9 }
  0xb2   :  { %1649 = vmatmul.mubr.bf16.gmra.mxu0 %v2694_v10 }
  0xb3   :  { %1762 = vmatmul.mubr.bf16.gmra.mxu1 %v2695_v11  ;;  %1658 = vmatprep.mubr.bf16.mxu0 %v2699_v12 }
  0xb4   :  { %1771 = vmatprep.mubr.bf16.mxu1 %v2701_v13 }
  0xba   :  { %1659 = vmatmul.mubr.bf16.gmra.mxu0 %v2703_v14 }
  0xbb   :  { %1772 = vmatmul.mubr.bf16.gmra.mxu1 %v2704_v15  ;;  %1814 = vmatprep.mubr.bf16.mxu0 %v2716_v16 }
  0xbc   :  { %1854 = vmatprep.mubr.bf16.mxu1 %v2716_v16 }
  0xc2   :  { %1815 = vmatmul.mubr.bf16.vlgmr.msra.gmra.mxu0 %v2708_v17 }
  0xc3   :  { %1855 = vmatmul.mubr.bf16.vlgmr.msra.gmra.mxu1 %v2709_v18  ;;  %1824 = vmatprep.mubr.bf16.mxu0 %v2716_v16 }
  0xc4   :  { %1864 = vmatprep.mubr.bf16.mxu1 %v2716_v16 }
  0xca   :  { %1825 = vmatmul.mubr.bf16.gmra.mxu0 %v2710_v19 }
  0xcb   :  { %1865 = vmatmul.mubr.bf16.gmra.mxu1 %v2711_v20  ;;  %1834 = vmatprep.mubr.bf16.mxu0 %v2716_v16 }
  0xcc   :  { %1874 = vmatprep.mubr.bf16.mxu1 %v2716_v16 }
  0xd2   :  { %1835 = vmatmul.mubr.bf16.gmra.mxu0 %v2712_v21 }
  0xd3   :  { %1875 = vmatmul.mubr.bf16.gmra.mxu1 %v2713_v22  ;;  %1844 = vmatprep.mubr.bf16.mxu0 %v2716_v16 }
  0xd4   :  { %1884 = vmatprep.mubr.bf16.mxu1 %v2716_v16 }
  0xda   :  { %1845 = vmatmul.mubr.bf16.gmra.mxu0 %v2714_v23 }
  0xdb   :  { %1885 = vmatmul.mubr.bf16.gmra.mxu1 %v2715_v24 }
 0x102   :  { %v1364_v25 = vpop.f32.mrf.mxu0 }
 0x103   :  { %v1477_v26 = vpop.f32.mrf.mxu1 }
 0x104   :  { %v3390_v27 = vadd.f32 %v1477_v26, %v1364_v25  ;;  %v1366_v28 = vpop.f32.mrf.mxu0 }
 0x105   :  { %v1479_v29 = vpop.f32.mrf.mxu1 }
 0x106   :  { %v3392_v30 = vadd.f32 %v1479_v29, %v1366_v28  ;;  %v1368_v31 = vpop.f32.mrf.mxu0 }
 0x107   :  { %v1481_v32 = vpop.f32.mrf.mxu1 }
 0x108   :  { %v3394_v33 = vadd.f32 %v1481_v32, %v1368_v31  ;;  %v1370_v34 = vpop.f32.mrf.mxu0 }
 0x109   :  { %v1483_v35 = vpop.f32.mrf.mxu1 }
 0x10a   :  { %v3396_v36 = vadd.f32 %v1483_v35, %v1370_v34  ;;  %v1374_v37 = vpop.f32.mrf.mxu0 }
 0x10b   :  { %v1487_v38 = vpop.f32.mrf.mxu1 }
 0x10c   :  { %v3398_v39 = vadd.f32 %v1487_v38, %v1374_v37  ;;  %v1376_v40 = vpop.f32.mrf.mxu0 }
 0x10d   :  { %v1489_v41 = vpop.f32.mrf.mxu1 }
 0x10e   :  { %v3400_v42 = vadd.f32 %v1489_v41, %v1376_v40  ;;  %v1378_v43 = vpop.f32.mrf.mxu0 }
 0x10f   :  { %v1491_v44 = vpop.f32.mrf.mxu1 }
 0x110   :  { %v3402_v45 = vadd.f32 %v1491_v44, %v1378_v43  ;;  %v1380_v46 = vpop.f32.mrf.mxu0 }
 0x111   :  { %v1493_v47 = vpop.f32.mrf.mxu1 }
 0x112   :  { %v3404_v48 = vadd.f32 %v1493_v47, %v1380_v46  ;;  %v1384_v49 = vpop.f32.mrf.mxu0 }
 0x113   :  { %v1497_v50 = vpop.f32.mrf.mxu1 }
 0x114   :  { %v3406_v51 = vadd.f32 %v1497_v50, %v1384_v49  ;;  %v1386_v52 = vpop.f32.mrf.mxu0 }
 0x115   :  { %v1499_v53 = vpop.f32.mrf.mxu1 }
 0x116   :  { %v3408_v54 = vadd.f32 %v1499_v53, %v1386_v52  ;;  %v1388_v55 = vpop.f32.mrf.mxu0 }
 0x117   :  { %v1501_v56 = vpop.f32.mrf.mxu1 }
 0x118   :  { %v3410_v57 = vadd.f32 %v1501_v56, %v1388_v55  ;;  %v1390_v58 = vpop.f32.mrf.mxu0 }
 0x119   :  { %v1503_v59 = vpop.f32.mrf.mxu1 }
 0x11a   :  { %v3412_v60 = vadd.f32 %v1503_v59, %v1390_v58  ;;  %v1394_v61 = vpop.f32.mrf.mxu0 }
 0x11b   :  { %v1507_v62 = vpop.f32.mrf.mxu1 }
 0x11c   :  { %v3414_v63 = vadd.f32 %v1507_v62, %v1394_v61  ;;  %v1396_v0 = vpop.f32.mrf.mxu0 }
 0x11d   :  { %v1509_v1 = vpop.f32.mrf.mxu1 }
 0x11e   :  { %v3416_v2 = vadd.f32 %v1509_v1, %v1396_v0  ;;  %v1398_v3 = vpop.f32.mrf.mxu0 }
 0x11f   :  { %v1511_v4 = vpop.f32.mrf.mxu1 }
 0x120   :  { %v3418_v5 = vadd.f32 %v1511_v4, %v1398_v3  ;;  %v1400_v6 = vpop.f32.mrf.mxu0 }
 0x121   :  { %v1513_v7 = vpop.f32.mrf.mxu1 }
 0x122   :  { %v3420_v8 = vadd.f32 %v1513_v7, %v1400_v6  ;;  %v1404_v9 = vpop.f32.mrf.mxu0 }
 0x123   :  { %v1517_v10 = vpop.f32.mrf.mxu1 }
 0x124   :  { %v3422_v11 = vadd.f32 %v1517_v10, %v1404_v9  ;;  %v1406_v12 = vpop.f32.mrf.mxu0 }
 0x125   :  { %v1519_v13 = vpop.f32.mrf.mxu1 }
 0x126   :  { %v3424_v14 = vadd.f32 %v1519_v13, %v1406_v12  ;;  %v1408_v15 = vpop.f32.mrf.mxu0 }
 0x127   :  { %v1521_v16 = vpop.f32.mrf.mxu1 }
 0x128   :  { %v3426_v17 = vadd.f32 %v1521_v16, %v1408_v15  ;;  %v1410_v18 = vpop.f32.mrf.mxu0 }
 0x129   :  { %v1523_v19 = vpop.f32.mrf.mxu1 }
 0x12a   :  { %v3428_v20 = vadd.f32 %v1523_v19, %v1410_v18  ;;  %v1414_v21 = vpop.f32.mrf.mxu0 }
 0x12b   :  { %v1527_v22 = vpop.f32.mrf.mxu1 }
 0x12c   :  { %v3430_v23 = vadd.f32 %v1527_v22, %v1414_v21  ;;  %v1416_v24 = vpop.f32.mrf.mxu0 }
 0x12d   :  { %v1529_v25 = vpop.f32.mrf.mxu1 }
 0x12e   :  { %v3432_v26 = vadd.f32 %v1529_v25, %v1416_v24  ;;  %v1418_v28 = vpop.f32.mrf.mxu0 }
 0x12f   :  { %v1531_v29 = vpop.f32.mrf.mxu1 }
 0x130   :  { %v3434_v31 = vadd.f32 %v1531_v29, %v1418_v28  ;;  %v1420_v32 = vpop.f32.mrf.mxu0 }
 0x131   :  { %v1533_v34 = vpop.f32.mrf.mxu1 }
 0x132   :  { %v3436_v35 = vadd.f32 %v1533_v34, %v1420_v32  ;;  %v1424_v37 = vpop.f32.mrf.mxu0 }
 0x133   :  { %v1537_v38 = vpop.f32.mrf.mxu1 }
 0x134   :  { %v3438_v40 = vadd.f32 %v1537_v38, %v1424_v37  ;;  %v1426_v41 = vpop.f32.mrf.mxu0 }
 0x135   :  { %v1539_v43 = vpop.f32.mrf.mxu1 }
 0x136   :  { %v3440_v44 = vadd.f32 %v1539_v43, %v1426_v41  ;;  %v1428_v46 = vpop.f32.mrf.mxu0 }
 0x137   :  { %v1541_v47 = vpop.f32.mrf.mxu1 }
 0x138   :  { %v3442_v49 = vadd.f32 %v1541_v47, %v1428_v46  ;;  %v1430_v50 = vpop.f32.mrf.mxu0 }
 0x139   :  { %v1543_v52 = vpop.f32.mrf.mxu1 }
 0x13a   :  { %v3444_v53 = vadd.f32 %v1543_v52, %v1430_v50  ;;  %v1434_v55 = vpop.f32.mrf.mxu0 }
 0x13b   :  { %v1547_v56 = vpop.f32.mrf.mxu1 }
 0x13c   :  { %v3446_v58 = vadd.f32 %v1547_v56, %v1434_v55  ;;  %v1436_v59 = vpop.f32.mrf.mxu0 }
 0x13d   :  { %v1549_v61 = vpop.f32.mrf.mxu1 }
 0x13e   :  { %v3448_v62 = vadd.f32 %v1549_v61, %v1436_v59  ;;  %v1438_v0 = vpop.f32.mrf.mxu0 }
 0x13f   :  { %v1551_v1 = vpop.f32.mrf.mxu1 }
 0x140   :  { %v3450_v3 = vadd.f32 %v1551_v1, %v1438_v0  ;;  %v1440_v4 = vpop.f32.mrf.mxu0 }
 0x141   :  { %v1553_v6 = vpop.f32.mrf.mxu1 }
 0x142   :  { %v3452_v7 = vadd.f32 %v1553_v6, %v1440_v4  ;;  %v1590_v9 = vpop.f32.mrf.mxu0 }
 0x143   :  { %v1703_v10 = vpop.f32.mrf.mxu1  ;;  %v1591_v12 = vadd.f32 %v1590_v9, %v3390_v27 }
 0x144   :  { %v3455_v13 = vpop.f32.mrf.mxu0 }
 0x145   :  { %v3457_v15 = vpop.f32.mrf.mxu1  ;;  %v3459_v16 = vadd.f32 %v1703_v10, %v1591_v12 }
 0x146   :  { %v1594_v18 = vpop.f32.mrf.mxu0 }
 0x147   :  { %v1707_v19 = vpop.f32.mrf.mxu1  ;;  %v1595_v21 = vadd.f32 %v1594_v18, %v3394_v33 }
 0x148   :  { %v3462_v22 = vpop.f32.mrf.mxu0 }
 0x149   :  { %v3464_v24 = vpop.f32.mrf.mxu1  ;;  %v3466_v25 = vadd.f32 %v1707_v19, %v1595_v21 }
 0x14a   :  { %v1600_v28 = vpop.f32.mrf.mxu0 }
 0x14b   :  { %3707 = vst [vmem:[#allocation2_spill] sm:$0xff] %v3466_v25  ;;  %v1713_v29 = vpop.f32.mrf.mxu1  ;;  %v1601_v27 = vadd.f32 %v1600_v28, %v3398_v39 }
 0x14c   :  { %v1602_v32 = vpop.f32.mrf.mxu0 }
 0x14d   :  { %v1715_v34 = vpop.f32.mrf.mxu1  ;;  %v3469_v37 = vadd.f32 %v1713_v29, %v1601_v27  ;;  %v1603_v38 = vadd.f32 %v1602_v32, %v3400_v42 }
 0x14e   :  { %v1604_v41 = vpop.f32.mrf.mxu0 }
 0x14f   :  { %3708 = vst [vmem:[#allocation3_spill] sm:$0xff] %v3469_v37  ;;  %v1717_v43 = vpop.f32.mrf.mxu1  ;;  %v3472_v46 = vadd.f32 %v1715_v34, %v1603_v38  ;;  %v1605_v33 = vadd.f32 %v1604_v41, %v3402_v45 }
 0x150   :  { %v1606_v47 = vpop.f32.mrf.mxu0 }
 0x151   :  { %3709 = vst [vmem:[#allocation4_spill] sm:$0xff] %v3472_v46  ;;  %v1719_v50 = vpop.f32.mrf.mxu1  ;;  %v3475_v52 = vadd.f32 %v1717_v43, %v1605_v33  ;;  %v1607_v55 = vadd.f32 %v1606_v47, %v3404_v48 }
 0x152   :  { %v1610_v56 = vpop.f32.mrf.mxu0 }
 0x153   :  { %3710 = vst [vmem:[#allocation5_spill] sm:$0xff] %v3475_v52  ;;  %v1723_v39 = vpop.f32.mrf.mxu1  ;;  %v3478_v59 = vadd.f32 %v1719_v50, %v1607_v55  ;;  %v1611_v61 = vadd.f32 %v1610_v56, %v3406_v51 }
 0x154   :  { %v1612_v0 = vpop.f32.mrf.mxu0 }
 0x155   :  { %3711 = vst [vmem:[#allocation6_spill] sm:$0xff] %v3478_v59  ;;  %v1725_v42 = vpop.f32.mrf.mxu1  ;;  %v3481_v1 = vadd.f32 %v1723_v39, %v1611_v61  ;;  %v1613_v4 = vadd.f32 %v1612_v0, %v3408_v54 }
 0x156   :  { %v1614_v6 = vpop.f32.mrf.mxu0 }
 0x157   :  { %3712 = vst [vmem:[#allocation7_spill] sm:$0xff] %v3481_v1  ;;  %v1727_v45 = vpop.f32.mrf.mxu1  ;;  %v3484_v9 = vadd.f32 %v1725_v42, %v1613_v4  ;;  %v1615_v10 = vadd.f32 %v1614_v6, %v3410_v57 }
 0x158   :  { %v1616_v12 = vpop.f32.mrf.mxu0 }
 0x159   :  { %3713 = vst [vmem:[#allocation8_spill] sm:$0xff] %v3484_v9  ;;  %v1729_v48 = vpop.f32.mrf.mxu1  ;;  %v3487_v18 = vadd.f32 %v1727_v45, %v1615_v10  ;;  %v1617_v19 = vadd.f32 %v1616_v12, %v3412_v60 }
 0x15a   :  { %v1620_v21 = vpop.f32.mrf.mxu0 }
 0x15b   :  { %3714 = vst [vmem:[#allocation9_spill] sm:$0xff] %v3487_v18  ;;  %v1733_v51 = vpop.f32.mrf.mxu1  ;;  %v3490_v28 = vadd.f32 %v1729_v48, %v1617_v19  ;;  %v1621_v29 = vadd.f32 %v1620_v21, %v3414_v63 }
 0x15c   :  { %v1622_v27 = vpop.f32.mrf.mxu0 }
 0x15d   :  { %3715 = vst [vmem:[#allocation10_spill] sm:$0xff] %v3490_v28  ;;  %v1735_v54 = vpop.f32.mrf.mxu1  ;;  %v3493_v32 = vadd.f32 %v1733_v51, %v1621_v29  ;;  %v1623_v34 = vadd.f32 %v1622_v27, %v3416_v2  ;;  %v1897_v29 = vlaneseq  ;;  %v1895_v28 = vld [vmem:[%s3704_s2] sm:$0x3] }
 0x15e   :  { %v1624_v38 = vpop.f32.mrf.mxu0 }
 0x15f   :  { %3716 = vst [vmem:[#allocation11_spill] sm:$0xff] %v3493_v32  ;;  %v1737_v57 = vpop.f32.mrf.mxu1  ;;  %v3496_v41 = vadd.f32 %v1735_v54, %v1623_v34  ;;  %v1625_v43 = vadd.f32 %v1624_v38, %v3418_v5  ;;  %v1597_v32 = vadd.f32 %v3462_v22, %v3396_v36 }
 0x160   :  { %v1626_v33 = vpop.f32.mrf.mxu0 }
 0x161   :  { %3717 = vst [vmem:[#allocation12_spill] sm:$0xff] %v3496_v41  ;;  %v1739_v60 = vpop.f32.mrf.mxu1  ;;  %v3499_v47 = vadd.f32 %v1737_v57, %v1625_v43  ;;  %v1627_v50 = vadd.f32 %v1626_v33, %v3420_v8  ;;  %v1898_v57 = vshrl.u32 %v1897_v29, 7  ;;  %v1593_v41 = vadd.f32 %v3455_v13, %v3392_v30  ;;  %v1939_v29 = vld [vmem:[%s3705_s3] sm:$0x3] }
 0x162   :  { %v1630_v55 = vpop.f32.mrf.mxu0 }
 0x163   :  { %3718 = vst [vmem:[#allocation13_spill] sm:$0xff] %v3499_v47  ;;  %v1743_v63 = vpop.f32.mrf.mxu1  ;;  %v3502_v56 = vadd.f32 %v1739_v60, %v1627_v50  ;;  %v1903_v47 = vsub.s32 1, %v1898_v57  ;;  %v1631_v18 = vadd.f32 %v1630_v55, %v3422_v11  ;;  %v1706_v11 = vadd.f32 %v3457_v15, %v1593_v41 }
 0x164   :  { %v1632_v39 = vpop.f32.mrf.mxu0 }
 0x165   :  { %3719 = vst [vmem:[#allocation14_spill] sm:$0xff] %v3502_v56  ;;  %v1745_v61 = vpop.f32.mrf.mxu1  ;;  %v1899_v56 = vsub.s32 0, %v1898_v57  ;;  %v1633_v57 = vadd.f32 %v1632_v39, %v3424_v14  ;;  %v3523_v37 = vrot.slane %v1895_v28, %v1903_v47  ;;  %v3525_v25 = vrot.slane %v1939_v29, %v1903_v47 }
 0x166   :  { %v1634_v0 = vpop.f32.mrf.mxu0  ;;  %v1710_v14 = vadd.f32 %v3464_v24, %v1597_v32  ;;  %v1744_v55 = vadd.f32 %v1743_v63, %v1631_v18 }
 0x167   :  { %v1747_v2 = vpop.f32.mrf.mxu1  ;;  %v1635_v59 = vadd.f32 %v1634_v0, %v3426_v17  ;;  %v3519_v52 = vrot.slane %v1895_v28, %v1899_v56  ;;  %v3521_v46 = vrot.slane %v1939_v29, %v1899_v56  ;;  %v1746_v47 = vadd.f32 %v1745_v61, %v1633_v57 }
 0x168   :  { %v1636_v42 = vpop.f32.mrf.mxu0 }
 0x169   :  { %v1749_v4 = vpop.f32.mrf.mxu1  ;;  %v1637_v30 = vadd.f32 %v1636_v42, %v3428_v20  ;;  %v1748_v42 = vadd.f32 %v1747_v2, %v1635_v59 }
 0x16a   :  { %v1640_v6 = vpop.f32.mrf.mxu0 }
 0x16b   :  { %v1753_v45 = vpop.f32.mrf.mxu1  ;;  %v1641_v36 = vadd.f32 %v1640_v6, %v3430_v23  ;;  %v1750_v6 = vadd.f32 %v1749_v4, %v1637_v30 }
 0x16c   :  { %v1642_v10 = vpop.f32.mrf.mxu0 }
 0x16d   :  { %v1755_v5 = vpop.f32.mrf.mxu1  ;;  %v1643_v17 = vadd.f32 %v1642_v10, %v3432_v26  ;;  %v1754_v15 = vadd.f32 %v1753_v45, %v1641_v36 }
 0x16e   :  { %v1644_v12 = vpop.f32.mrf.mxu0 }
 0x16f   :  { %v1757_v48 = vpop.f32.mrf.mxu1  ;;  %v1645_v20 = vadd.f32 %v1644_v12, %v3434_v31 }
 0x170   :  { %v1646_v19 = vpop.f32.mrf.mxu0 }
 0x171   :  { %v1759_v21 = vpop.f32.mrf.mxu1  ;;  %v1647_v23 = vadd.f32 %v1646_v19, %v3436_v35 }
 0x172   :  { %v1650_v51 = vpop.f32.mrf.mxu0 }
 0x173   :  { %v1763_v8 = vpop.f32.mrf.mxu1  ;;  %v1651_v39 = vadd.f32 %v1650_v51, %v3438_v40  ;;  %v3540_v40 = vadd.f32 %v1755_v5, %v1643_v17  ;;  %v3545_v59 = vadd.f32 %v1759_v21, %v1647_v23 }
 0x174   :  { %v1652_v27 = vpop.f32.mrf.mxu0 }
 0x175   :  { %v1765_v54 = vpop.f32.mrf.mxu1  ;;  %v1653_v56 = vadd.f32 %v1652_v27, %v3440_v44  ;;  %v3542_v44 = vadd.f32 %v1757_v48, %v1645_v20  ;;  %v3547_v61 = vadd.f32 %v1763_v8, %v1651_v39 }
 0x176   :  { %v1654_v34 = vpop.f32.mrf.mxu0 }
 0x177   :  { %v1767_v38 = vpop.f32.mrf.mxu1  ;;  %v1655_v24 = vadd.f32 %v1654_v34, %v3442_v49  ;;  %v3549_v49 = vadd.f32 %v1765_v54, %v1653_v56  ;;  %v3720_v34 = vld [vmem:[#allocation2_spill] sm:$0xff] }
 0x178   :  { %v1656_v43 = vpop.f32.mrf.mxu0 }
 0x179   :  { %v1769_v33 = vpop.f32.mrf.mxu1  ;;  %v1657_v26 = vadd.f32 %v1656_v43, %v3444_v53  ;;  %v3554_v10 = vadd.f32 %v1767_v38, %v1655_v24 }
 0x17a   :  { %v1660_v60 = vpop.f32.mrf.mxu0 }
 0x17b   :  { %v1773_v50 = vpop.f32.mrf.mxu1  ;;  %v1661_v31 = vadd.f32 %v1660_v60, %v3446_v58 }
 0x17c   :  { %v1662_v9 = vpop.f32.mrf.mxu0 }
 0x17d   :  { %v1775_v1 = vpop.f32.mrf.mxu1  ;;  %v1663_v18 = vadd.f32 %v1662_v9, %v3448_v62  ;;  %v3558_v5 = vadd.f32 %v1773_v50, %v1661_v31 }
 0x17e   :  { %v1664_v13 = vpop.f32.mrf.mxu0 }
 0x17f   :  { %v1777_v22 = vpop.f32.mrf.mxu1  ;;  %v1665_v53 = vadd.f32 %v1664_v13, %v3450_v3  ;;  %v3560_v12 = vadd.f32 %v1775_v1, %v1663_v18 }
 0x180   :  { %v1666_v0 = vpop.f32.mrf.mxu0 }
 0x181   :  { %v3534_v28 = vpop.f32.mrf.mxu1  ;;  %v3566_v27 = vadd.f32 %v1777_v22, %v1665_v53  ;;  %v3569_v54 = vadd.f32 %v1666_v0, %v3452_v7 }
 0x182   :  { %v1816_v35 = vpop.f32.mrf.mxu0 }
 0x183   :  { %v1856_v32 = vpop.f32.mrf.mxu1  ;;  %v1817_v41 = vadd.f32 %v1816_v35, %v3459_v16  ;;  %v3556_v16 = vadd.f32 %v1769_v33, %v1657_v26 }
 0x184   :  { %v1857_v63 = vadd.f32 %v1856_v32, %v1744_v55  ;;  %v1818_v58 = vpop.f32.mrf.mxu0  ;;  %v3721_v55 = vld [vmem:[#allocation3_spill] sm:$0xff] }
 0x185   :  { %v1858_v2 = vpop.f32.mrf.mxu1  ;;  %v1907_v62 = vmul.f32 %v3519_v52, %v1817_v41  ;;  %v1819_v4 = vadd.f32 %v1818_v58, %v1706_v11 }
 0x186   :  { %v1923_v9 = vmul.f32 %v3519_v52, %v1857_v63  ;;  %v1859_v45 = vadd.f32 %v1858_v2, %v1746_v47  ;;  %v1820_v48 = vpop.f32.mrf.mxu0 }
 0x187   :  { %v1860_v19 = vpop.f32.mrf.mxu1  ;;  %v1951_v3 = vadd.f32 %v3521_v46, %v1907_v62  ;;  %v1908_v51 = vmul.f32 %v3523_v37, %v1819_v4  ;;  %v1821_v38 = vadd.f32 %v1820_v48, %v3720_v34  ;;  %v3722_v62 = vld [vmem:[#allocation4_spill] sm:$0xff] }
 0x188   :  { %v1967_v21 = vadd.f32 %v3521_v46, %v1923_v9  ;;  %v1924_v8 = vmul.f32 %v3523_v37, %v1859_v45  ;;  %v1861_v43 = vadd.f32 %v1860_v19, %v1748_v42  ;;  %v1822_v1 = vpop.f32.mrf.mxu0  ;;  %v3723_v19 = vld [vmem:[#allocation5_spill] sm:$0xff] }
 0x189   :  { %v1862_v33 = vpop.f32.mrf.mxu1  ;;  %v1983_v60 = vmax.f32 %v1951_v3, 0.0  ;;  %v1952_v29 = vadd.f32 %v3525_v25, %v1908_v51  ;;  %v1909_v30 = vmul.f32 %v3519_v52, %v1821_v38  ;;  %v1823_v13 = vadd.f32 %v1822_v1, %v1710_v14 }
 0x18a   :  { %v1999_v50 = vmax.f32 %v1967_v21, 0.0  ;;  %v1968_v57 = vadd.f32 %v3525_v25, %v1924_v8  ;;  %v1925_v36 = vmul.f32 %v3519_v52, %v1861_v43  ;;  %v1863_v22 = vadd.f32 %v1862_v33, %v1750_v6  ;;  %v1826_v11 = vpop.f32.mrf.mxu0 }
 0x18b   :  { %v1866_v7 = vpop.f32.mrf.mxu1  ;;  %v1984_v17 = vmax.f32 %v1952_v29, 0.0  ;;  %v1827_v23 = vadd.f32 %v1826_v11, %v3721_v55  ;;  %v1953_v56 = vadd.f32 %v3521_v46, %v1909_v30  ;;  %v1910_v47 = vmul.f32 %v3523_v37, %v1823_v13 }
 0x18c   :  { %v2000_v20 = vmax.f32 %v1968_v57, 0.0  ;;  %v1867_v39 = vadd.f32 %v1866_v7, %v1754_v15  ;;  %v1969_v0 = vadd.f32 %v3521_v46, %v1925_v36  ;;  %v1926_v42 = vmul.f32 %v3523_v37, %v1863_v22  ;;  %v1828_v24 = vpop.f32.mrf.mxu0  ;;  %v3724_v36 = vld [vmem:[#allocation6_spill] sm:$0xff] }
 0x18d   :  { %v1868_v26 = vpop.f32.mrf.mxu1  ;;  %v2363_v31 = vpack.c.bf16 %v1984_v17, %v1983_v60  ;;  %v1911_v6 = vmul.f32 %v3519_v52, %v1827_v23  ;;  %v1985_v35 = vmax.f32 %v1953_v56, 0.0  ;;  %v1954_v15 = vadd.f32 %v3525_v25, %v1910_v47  ;;  %v3725_v17 = vld [vmem:[#allocation7_spill] sm:$0xff] }
 0x18e   :  { %v2371_v14 = vpack.c.bf16 %v2000_v20, %v1999_v50  ;;  %v1927_v18 = vmul.f32 %v3519_v52, %v1867_v39  ;;  %v2001_v32 = vmax.f32 %v1969_v0, 0.0  ;;  %v1970_v41 = vadd.f32 %v3525_v25, %v1926_v42  ;;  %v1830_v63 = vpop.f32.mrf.mxu0 }
 0x18f   :  { %v1870_v53 = vpop.f32.mrf.mxu1  ;;  %2111 = vst [vmem:[%s3706_s4] sm:$0xff] %v2363_v31  ;;  %v1955_v58 = vadd.f32 %v3521_v46, %v1911_v6  ;;  %v1829_v9 = vadd.f32 %v1828_v24, %v3722_v62  ;;  %v1869_v4 = vadd.f32 %v1868_v26, %v3540_v40  ;;  %v1986_v45 = vmax.f32 %v1954_v15, 0.0 }
 0x190   :  { %2119 = vst [vmem:[%s3706_s4 + $0x40] sm:$0xff] %v2371_v14  ;;  %v1971_v2 = vadd.f32 %v3521_v46, %v1927_v18  ;;  %v2002_v48 = vmax.f32 %v1970_v41, 0.0  ;;  %v1831_v3 = vadd.f32 %v1830_v63, %v3723_v19  ;;  %v1871_v21 = vadd.f32 %v1870_v53, %v3542_v44  ;;  %v1832_v51 = vpop.f32.mrf.mxu0  ;;  %v3726_v63 = vld [vmem:[#allocation8_spill] sm:$0xff] }
 0x191   :  { %v1872_v8 = vpop.f32.mrf.mxu1  ;;  %v1987_v34 = vmax.f32 %v1955_v58, 0.0  ;;  %v1912_v43 = vmul.f32 %v3523_v37, %v1829_v9  ;;  %v1928_v1 = vmul.f32 %v3523_v37, %v1869_v4  ;;  %v2364_v33 = vpack.c.bf16 %v1986_v45, %v1985_v35  ;;  %v3727_v45 = vld [vmem:[#allocation9_spill] sm:$0xff] }
 0x192   :  { %v2003_v38 = vmax.f32 %v1971_v2, 0.0  ;;  %v2372_v60 = vpack.c.bf16 %v2002_v48, %v2001_v32  ;;  %v1913_v50 = vmul.f32 %v3519_v52, %v1831_v3  ;;  %v1929_v40 = vmul.f32 %v3519_v52, %v1871_v21  ;;  %v1836_v29 = vpop.f32.mrf.mxu0 }
 0x193   :  { %v1876_v57 = vpop.f32.mrf.mxu1  ;;  %v1956_v30 = vadd.f32 %v3525_v25, %v1912_v43  ;;  %v1972_v44 = vadd.f32 %v3525_v25, %v1928_v1  ;;  %v1833_v13 = vadd.f32 %v1832_v51, %v3724_v36  ;;  %v1873_v22 = vadd.f32 %v1872_v8, %v3545_v59  ;;  %2112 = vst [vmem:[%s3706_s4 + $0x8] sm:$0xff] %v2364_v33 }
 0x194   :  { %2120 = vst [vmem:[%s3706_s4 + $0x48] sm:$0xff] %v2372_v60  ;;  %v1957_v11 = vadd.f32 %v3521_v46, %v1913_v50  ;;  %v1973_v7 = vadd.f32 %v3521_v46, %v1929_v40  ;;  %v1837_v20 = vadd.f32 %v1836_v29, %v3725_v17  ;;  %v1877_v55 = vadd.f32 %v1876_v57, %v3547_v61  ;;  %v1838_v23 = vpop.f32.mrf.mxu0  ;;  %v3728_v40 = vld [vmem:[#allocation10_spill] sm:$0xff] }
 0x195   :  { %v1878_v39 = vpop.f32.mrf.mxu1  ;;  %v1988_v56 = vmax.f32 %v1956_v30, 0.0  ;;  %v2004_v59 = vmax.f32 %v1972_v44, 0.0  ;;  %v1914_v0 = vmul.f32 %v3523_v37, %v1833_v13  ;;  %v1930_v47 = vmul.f32 %v3523_v37, %v1873_v22  ;;  %v3729_v13 = vld [vmem:[#allocation11_spill] sm:$0xff] }
 0x196   :  { %v1989_v42 = vmax.f32 %v1957_v11, 0.0  ;;  %v2005_v24 = vmax.f32 %v1973_v7, 0.0  ;;  %v1915_v26 = vmul.f32 %v3519_v52, %v1837_v20  ;;  %v1931_v31 = vmul.f32 %v3519_v52, %v1877_v55  ;;  %v1840_v14 = vpop.f32.mrf.mxu0 }
 0x197   :  { %v1880_v6 = vpop.f32.mrf.mxu1  ;;  %v2365_v18 = vpack.c.bf16 %v1988_v56, %v1987_v34  ;;  %v2373_v35 = vpack.c.bf16 %v2004_v59, %v2003_v38  ;;  %v1958_v61 = vadd.f32 %v3525_v25, %v1914_v0  ;;  %v1974_v32 = vadd.f32 %v3525_v25, %v1930_v47 }
 0x198   :  { %v1959_v15 = vadd.f32 %v3521_v46, %v1915_v26  ;;  %v1975_v41 = vadd.f32 %v3521_v46, %v1931_v31  ;;  %v1839_v53 = vadd.f32 %v1838_v23, %v3726_v63  ;;  %v1879_v58 = vadd.f32 %v1878_v39, %v3549_v49  ;;  %v1842_v2 = vpop.f32.mrf.mxu0 }
 0x199   :  { %v1882_v62 = vpop.f32.mrf.mxu1  ;;  %2113 = vst [vmem:[%s3706_s4 + $0x10] sm:$0xff] %v2365_v18  ;;  %2121 = vst [vmem:[%s3706_s4 + $0x50] sm:$0xff] %v2373_v35  ;;  %v1990_v9 = vmax.f32 %v1958_v61, 0.0  ;;  %v2006_v4 = vmax.f32 %v1974_v32, 0.0  ;;  %v1841_v48 = vadd.f32 %v1840_v14, %v3727_v45  ;;  %v1881_v19 = vadd.f32 %v1880_v6, %v3554_v10  ;;  %v3730_v14 = vld [vmem:[#allocation12_spill] sm:$0xff]  ;;  %v3731_v32 = vld [vmem:[#allocation13_spill] sm:$0xff] }
 0x19a   :  { %v1991_v3 = vmax.f32 %v1959_v15, 0.0  ;;  %v2007_v21 = vmax.f32 %v1975_v41, 0.0  ;;  %v1916_v49 = vmul.f32 %v3523_v37, %v1839_v53  ;;  %v1932_v51 = vmul.f32 %v3523_v37, %v1879_v58  ;;  %v1846_v8 = vpop.f32.mrf.mxu0 }
 0x19b   :  { %v1886_v34 = vpop.f32.mrf.mxu1  ;;  %v2366_v38 = vpack.c.bf16 %v1990_v9, %v1989_v42  ;;  %v2374_v43 = vpack.c.bf16 %v2006_v4, %v2005_v24  ;;  %v1917_v1 = vmul.f32 %v3519_v52, %v1841_v48  ;;  %v1933_v33 = vmul.f32 %v3519_v52, %v1881_v19 }
 0x19c   :  { %v1960_v60 = vadd.f32 %v3525_v25, %v1916_v49  ;;  %v1976_v50 = vadd.f32 %v3525_v25, %v1932_v51  ;;  %v1843_v10 = vadd.f32 %v1842_v2, %v3728_v40  ;;  %v1883_v29 = vadd.f32 %v1882_v62, %v3556_v16  ;;  %v1848_v57 = vpop.f32.mrf.mxu0 }
 0x19d   :  { %v1888_v30 = vpop.f32.mrf.mxu1  ;;  %2114 = vst [vmem:[%s3706_s4 + $0x18] sm:$0xff] %v2366_v38  ;;  %2122 = vst [vmem:[%s3706_s4 + $0x58] sm:$0xff] %v2374_v43  ;;  %v1961_v44 = vadd.f32 %v3521_v46, %v1917_v1  ;;  %v1977_v36 = vadd.f32 %v3521_v46, %v1933_v33  ;;  %v1847_v22 = vadd.f32 %v1846_v8, %v3729_v13 }
 0x19e   :  { %v1887_v11 = vadd.f32 %v1886_v34, %v3558_v5  ;;  %v1992_v7 = vmax.f32 %v1960_v60, 0.0  ;;  %v2008_v16 = vmax.f32 %v1976_v50, 0.0  ;;  %v1918_v17 = vmul.f32 %v3523_v37, %v1843_v10  ;;  %v1850_v55 = vpop.f32.mrf.mxu0 }
 0x19f   :  { %v1934_v20 = vmul.f32 %v3523_v37, %v1883_v29  ;;  %v1890_v23 = vpop.f32.mrf.mxu1  ;;  %v1993_v39 = vmax.f32 %v1961_v44, 0.0  ;;  %v2009_v56 = vmax.f32 %v1977_v36, 0.0  ;;  %v1919_v59 = vmul.f32 %v3519_v52, %v1847_v22 }
 0x1a0   :  { %v1935_v0 = vmul.f32 %v3519_v52, %v1887_v11  ;;  %v2367_v47 = vpack.c.bf16 %v1992_v7, %v1991_v3  ;;  %v2375_v42 = vpack.c.bf16 %v2008_v16, %v2007_v21  ;;  %v1962_v24 = vadd.f32 %v3525_v25, %v1918_v17  ;;  %v1852_v63 = vpop.f32.mrf.mxu0 }
 0x1a1   :  { %v1978_v5 = vadd.f32 %v3525_v25, %v1934_v20  ;;  %v1963_v26 = vadd.f32 %v3521_v46, %v1919_v59  ;;  %v1849_v6 = vadd.f32 %v1848_v57, %v3730_v14  ;;  %v1889_v18 = vadd.f32 %v1888_v30, %v3560_v12  ;;  %v1892_v53 = vpop.f32.mrf.mxu1 }
 0x1a2   :  { %v1979_v31 = vadd.f32 %v3521_v46, %v1935_v0  ;;  %2115 = vst [vmem:[%s3706_s4 + $0x20] sm:$0xff] %v2367_v47  ;;  %2123 = vst [vmem:[%s3706_s4 + $0x60] sm:$0xff] %v2375_v42  ;;  %v1994_v35 = vmax.f32 %v1962_v24, 0.0  ;;  %v1851_v15 = vadd.f32 %v1850_v55, %v3731_v32  ;;  %v1891_v41 = vadd.f32 %v1890_v23, %v3566_v27  ;;  %v3732_v27 = vld [vmem:[#allocation14_spill] sm:$0xff] }
 0x1a3   :  { %v2010_v61 = vmax.f32 %v1978_v5, 0.0  ;;  %v1780_v58 = vadd.f32 %v3534_v28, %v3569_v54  ;;  %v1920_v12 = vmul.f32 %v3523_v37, %v1849_v6  ;;  %v1936_v2 = vmul.f32 %v3523_v37, %v1889_v18 }
 0x1a4   :  { %v2368_v62 = vpack.c.bf16 %v1994_v35, %v1993_v39  ;;  %v1921_v4 = vmul.f32 %v3519_v52, %v1851_v15  ;;  %v1937_v45 = vmul.f32 %v3519_v52, %v1891_v41  ;;  %v1853_v3 = vadd.f32 %v1852_v63, %v3732_v27 }
 0x1a5   :  { %v2376_v9 = vpack.c.bf16 %v2010_v61, %v2009_v56  ;;  %v1964_v48 = vadd.f32 %v3525_v25, %v1920_v12  ;;  %v1980_v19 = vadd.f32 %v3525_v25, %v1936_v2  ;;  %v1893_v21 = vadd.f32 %v1892_v53, %v1780_v58 }
 0x1a6   :  { %2116 = vst [vmem:[%s3706_s4 + $0x28] sm:$0xff] %v2368_v62  ;;  %v1995_v28 = vmax.f32 %v1963_v26, 0.0  ;;  %v2011_v54 = vmax.f32 %v1979_v31, 0.0  ;;  %v1965_v49 = vadd.f32 %v3521_v46, %v1921_v4  ;;  %v1981_v52 = vadd.f32 %v3521_v46, %v1937_v45 }
 0x1a7   :  { %2124 = vst [vmem:[%s3706_s4 + $0x68] sm:$0xff] %v2376_v9  ;;  %v1996_v51 = vmax.f32 %v1964_v48, 0.0  ;;  %v2012_v8 = vmax.f32 %v1980_v19, 0.0  ;;  %v1922_v34 = vmul.f32 %v3523_v37, %v1853_v3  ;;  %v1938_v38 = vmul.f32 %v3523_v37, %v1893_v21 }
 0x1a8   :  { %v1997_v46 = vmax.f32 %v1965_v49, 0.0  ;;  %v2013_v50 = vmax.f32 %v1981_v52, 0.0 }
 0x1a9   :  { %v2369_v43 = vpack.c.bf16 %v1996_v51, %v1995_v28  ;;  %v2377_v1 = vpack.c.bf16 %v2012_v8, %v2011_v54  ;;  %v1966_v33 = vadd.f32 %v3525_v25, %v1922_v34  ;;  %v1982_v60 = vadd.f32 %v3525_v25, %v1938_v38 }
 0x1ab   :  { %2117 = vst [vmem:[%s3706_s4 + $0x30] sm:$0xff] %v2369_v43  ;;  %2125 = vst [vmem:[%s3706_s4 + $0x70] sm:$0xff] %v2377_v1  ;;  %v1998_v40 = vmax.f32 %v1966_v33, 0.0  ;;  %v2014_v10 = vmax.f32 %v1982_v60, 0.0 }
 0x1ad   :  { %v2370_v29 = vpack.c.bf16 %v1998_v40, %v1997_v46  ;;  %v2378_v37 = vpack.c.bf16 %v2014_v10, %v2013_v50 }
 0x1af   :  { %2118 = vst [vmem:[%s3706_s4 + $0x38] sm:$0xff] %v2370_v29  ;;  %2126 = vst [vmem:[%s3706_s4 + $0x78] sm:$0xff] %v2378_v37 }

// kernel: simplenet7_forward.11
= control target key start
LH: loop header
LB: loop body
LE: loop exit
PB: predicated region body
PF: predicated region fallthrough
CT: control target
= control target key end

     0   :  { %s4713_s0 = inlined_call_operand.vmem [shape: bf16[32,2304], index: 0, kind: input, shape index: {}]   ;;  %s4714_s1 = inlined_call_operand.vmem [shape: bf16[2304,256], index: 1, kind: input, shape index: {}]   ;;  %s4715_s2 = inlined_call_operand.vmem [shape: f32[1,256], index: 2, kind: input, shape index: {}]   ;;  %s4716_s3 = inlined_call_operand.vmem [shape: f32[1,256], index: 3, kind: input, shape index: {}]   ;;  %s4717_s4 = inlined_call_operand.vmem [shape: f32[256,128], index: 4, kind: input, shape index: {}]   ;;  %s4718_s5 = inlined_call_operand.vmem [shape: f32[1,128], index: 5, kind: input, shape index: {}]   ;;  %s4719_s6 = inlined_call_operand.hbm [shape: f32[2,128], index: 6, kind: output, shape index: {}]  }
   0x1   :  { %v3020_v0 = vld [vmem:[%s4714_s1 + $0x74] ss:$8 sps:$4 sm:$0xff]   ;;  %v3024_v2 = vld [vmem:[%s4714_s1 + $0x70] ss:$8 sps:$4 sm:$0xff]   ;;  %v3026_v4 = vld [vmem:[%s4714_s1 + $0x64] ss:$8 sps:$4 sm:$0xff]  }
   0x2   :  { %v3022_v1 = vld [vmem:[%s4714_s1 + $0x174] ss:$8 sps:$4 sm:$0xff]   ;;  %1968 = vmatprep.subr.bf16.mxu0 %v3020_v0  ;;  %v3025_v3 = vld [vmem:[%s4714_s1 + $0x170] ss:$8 sps:$4 sm:$0xff]   ;;  %v3028_v5 = vld [vmem:[%s4714_s1 + $0x164] ss:$8 sps:$4 sm:$0xff]  }
   0x3   :  { %2021 = vmatprep.subr.bf16.mxu1 %v3022_v1  ;;  %1969 = vmatpush1.bf16.msra.mxu0 %v3024_v2  ;;  %v3030_v6 = vld [vmem:[%s4714_s1 + $0x60] ss:$8 sps:$4 sm:$0xff]   ;;  %v3032_v8 = vld [vmem:[%s4714_s1 + $0x54] ss:$8 sps:$4 sm:$0xff]   ;;  %v3036_v10 = vld [vmem:[%s4714_s1 + $0x50] ss:$8 sps:$4 sm:$0xff]  }
   0x4   :  { %2022 = vmatpush1.bf16.msra.mxu1 %v3025_v3  ;;  %1970 = vmatprep.subr.bf16.mxu0 %v3026_v4  ;;  %v3031_v7 = vld [vmem:[%s4714_s1 + $0x160] ss:$8 sps:$4 sm:$0xff]   ;;  %v3034_v9 = vld [vmem:[%s4714_s1 + $0x154] ss:$8 sps:$4 sm:$0xff]   ;;  %v3037_v11 = vld [vmem:[%s4714_s1 + $0x150] ss:$8 sps:$4 sm:$0xff]  }
   0x5   :  { %2023 = vmatprep.subr.bf16.mxu1 %v3028_v5  ;;  %v3038_v12 = vld [vmem:[%s4714_s1 + $0x44] ss:$8 sps:$4 sm:$0xff]   ;;  %v3042_v14 = vld [vmem:[%s4714_s1 + $0x40] ss:$8 sps:$4 sm:$0xff]   ;;  %v3044_v16 = vld [vmem:[%s4714_s1 + $0x34] ss:$8 sps:$4 sm:$0xff]  }
   0x6   :  { %v3040_v13 = vld [vmem:[%s4714_s1 + $0x144] ss:$8 sps:$4 sm:$0xff]   ;;  %v3043_v15 = vld [vmem:[%s4714_s1 + $0x140] ss:$8 sps:$4 sm:$0xff]   ;;  %v3046_v17 = vld [vmem:[%s4714_s1 + $0x134] ss:$8 sps:$4 sm:$0xff]  }
   0x7   :  { %1971 = vmatpush1.bf16.msra.mxu0 %v3030_v6  ;;  %v3048_v18 = vld [vmem:[%s4714_s1 + $0x30] ss:$8 sps:$4 sm:$0xff]   ;;  %v3050_v20 = vld [vmem:[%s4714_s1 + $0x24] ss:$8 sps:$4 sm:$0xff]   ;;  %v3054_v22 = vld [vmem:[%s4714_s1 + $0x20] ss:$8 sps:$4 sm:$0xff]  }
   0x8   :  { %2024 = vmatpush1.bf16.msra.mxu1 %v3031_v7  ;;  %1972 = vmatprep.subr.bf16.mxu0 %v3032_v8  ;;  %v3049_v19 = vld [vmem:[%s4714_s1 + $0x130] ss:$8 sps:$4 sm:$0xff]   ;;  %v3052_v21 = vld [vmem:[%s4714_s1 + $0x124] ss:$8 sps:$4 sm:$0xff]   ;;  %v3055_v23 = vld [vmem:[%s4714_s1 + $0x120] ss:$8 sps:$4 sm:$0xff]  }
   0x9   :  { %2025 = vmatprep.subr.bf16.mxu1 %v3034_v9  ;;  %v3056_v24 = vld [vmem:[%s4714_s1 + $0x14] ss:$8 sps:$4 sm:$0xff]   ;;  %v3060_v26 = vld [vmem:[%s4714_s1 + $0x10] ss:$8 sps:$4 sm:$0xff]   ;;  %v3062_v28 = vld [vmem:[%s4714_s1 + $0x4] ss:$8 sps:$4 sm:$0xff]  }
   0xa   :  { %v3058_v25 = vld [vmem:[%s4714_s1 + $0x114] ss:$8 sps:$4 sm:$0xff]   ;;  %v3061_v27 = vld [vmem:[%s4714_s1 + $0x110] ss:$8 sps:$4 sm:$0xff]   ;;  %v3064_v29 = vld [vmem:[%s4714_s1 + $0x104] ss:$8 sps:$4 sm:$0xff]  }
   0xb   :  { %1973 = vmatpush1.bf16.msra.mxu0 %v3036_v10  ;;  %v3066_v30 = vld [vmem:[%s4714_s1] ss:$8 sps:$4 sm:$0xff]   ;;  %v3068_v32 = vld [vmem:[%s4714_s1 + $0xf4] ss:$8 sps:$4 sm:$0xff]   ;;  %v3072_v34 = vld [vmem:[%s4714_s1 + $0xf0] ss:$8 sps:$4 sm:$0xff]  }
   0xc   :  { %2026 = vmatpush1.bf16.msra.mxu1 %v3037_v11  ;;  %1974 = vmatprep.subr.bf16.mxu0 %v3038_v12  ;;  %v3067_v31 = vld [vmem:[%s4714_s1 + $0x100] ss:$8 sps:$4 sm:$0xff]   ;;  %v3070_v33 = vld [vmem:[%s4714_s1 + $0x1f4] ss:$8 sps:$4 sm:$0xff]   ;;  %v3073_v35 = vld [vmem:[%s4714_s1 + $0x1f0] ss:$8 sps:$4 sm:$0xff]  }
   0xd   :  { %2027 = vmatprep.subr.bf16.mxu1 %v3040_v13  ;;  %v3074_v36 = vld [vmem:[%s4714_s1 + $0xe4] ss:$8 sps:$4 sm:$0xff]   ;;  %v3078_v38 = vld [vmem:[%s4714_s1 + $0xe0] ss:$8 sps:$4 sm:$0xff]   ;;  %v3080_v40 = vld [vmem:[%s4714_s1 + $0xd4] ss:$8 sps:$4 sm:$0xff]  }
   0xe   :  { %v3076_v37 = vld [vmem:[%s4714_s1 + $0x1e4] ss:$8 sps:$4 sm:$0xff]   ;;  %v3079_v39 = vld [vmem:[%s4714_s1 + $0x1e0] ss:$8 sps:$4 sm:$0xff]   ;;  %v3082_v41 = vld [vmem:[%s4714_s1 + $0x1d4] ss:$8 sps:$4 sm:$0xff]  }
   0xf   :  { %1975 = vmatpush1.bf16.msra.mxu0 %v3042_v14  ;;  %v3084_v42 = vld [vmem:[%s4714_s1 + $0xd0] ss:$8 sps:$4 sm:$0xff]   ;;  %v3086_v44 = vld [vmem:[%s4714_s1 + $0xc4] ss:$8 sps:$4 sm:$0xff]   ;;  %v3090_v46 = vld [vmem:[%s4714_s1 + $0xc0] ss:$8 sps:$4 sm:$0xff]  }
  0x10   :  { %2028 = vmatpush1.bf16.msra.mxu1 %v3043_v15  ;;  %1976 = vmatprep.subr.bf16.mxu0 %v3044_v16  ;;  %v3085_v43 = vld [vmem:[%s4714_s1 + $0x1d0] ss:$8 sps:$4 sm:$0xff]   ;;  %v3088_v45 = vld [vmem:[%s4714_s1 + $0x1c4] ss:$8 sps:$4 sm:$0xff]   ;;  %v3091_v47 = vld [vmem:[%s4714_s1 + $0x1c0] ss:$8 sps:$4 sm:$0xff]  }
  0x11   :  { %2029 = vmatprep.subr.bf16.mxu1 %v3046_v17  ;;  %v3092_v48 = vld [vmem:[%s4714_s1 + $0xb4] ss:$8 sps:$4 sm:$0xff]   ;;  %v3118_v49 = vld [vmem:[%s4713_s0 + $0x4] ss:$72 sps:$4 sm:$0xff]   ;;  %v3096_v52 = vld [vmem:[%s4714_s1 + $0xb0] ss:$8 sps:$4 sm:$0xff]  }
  0x12   :  { %v3094_v50 = vld [vmem:[%s4714_s1 + $0x1b4] ss:$8 sps:$4 sm:$0xff]   ;;  %2000 = vmatprep.mubr.bf16.mxu0 %v3118_v49  ;;  %v3097_v53 = vld [vmem:[%s4714_s1 + $0x1b0] ss:$8 sps:$4 sm:$0xff]   ;;  %v3098_v54 = vld [vmem:[%s4714_s1 + $0xa4] ss:$8 sps:$4 sm:$0xff]  }
  0x13   :  { %1977 = vmatpush1.bf16.msra.mxu0 %v3048_v18  ;;  %v3121_v51 = vld [vmem:[%s4713_s0 + $0xc] ss:$72 sps:$4 sm:$0xff]   ;;  %v3102_v56 = vld [vmem:[%s4714_s1 + $0xa0] ss:$8 sps:$4 sm:$0xff]   ;;  %v3108_v60 = vld [vmem:[%s4714_s1 + $0x90] ss:$8 sps:$4 sm:$0xff]  }
  0x14   :  { %2030 = vmatpush1.bf16.msra.mxu1 %v3049_v19  ;;  %1978 = vmatprep.subr.bf16.mxu0 %v3050_v20  ;;  %v3100_v55 = vld [vmem:[%s4714_s1 + $0x1a4] ss:$8 sps:$4 sm:$0xff]   ;;  %v3103_v57 = vld [vmem:[%s4714_s1 + $0x1a0] ss:$8 sps:$4 sm:$0xff]   ;;  %v3104_v58 = vld [vmem:[%s4714_s1 + $0x94] ss:$8 sps:$4 sm:$0xff]  }
  0x15   :  { %2031 = vmatprep.subr.bf16.mxu1 %v3052_v21  ;;  %2053 = vmatprep.mubr.bf16.mxu1 %v3121_v51  ;;  %v3106_v59 = vld [vmem:[%s4714_s1 + $0x194] ss:$8 sps:$4 sm:$0xff]   ;;  %v3109_v61 = vld [vmem:[%s4714_s1 + $0x190] ss:$8 sps:$4 sm:$0xff]   ;;  %v3110_v62 = vld [vmem:[%s4714_s1 + $0x84] ss:$8 sps:$4 sm:$0xff]  }
  0x16   :  { %v3112_v63 = vld [vmem:[%s4714_s1 + $0x184] ss:$8 sps:$4 sm:$0xff]   ;;  %v3114_v0 = vld [vmem:[%s4714_s1 + $0x80] ss:$8 sps:$4 sm:$0xff]   ;;  %v3124_v2 = vld [vmem:[%s4714_s1 + $0x274] ss:$8 sps:$4 sm:$0xff]  }
  0x17   :  { %1979 = vmatpush1.bf16.msra.mxu0 %v3054_v22  ;;  %v3115_v1 = vld [vmem:[%s4714_s1 + $0x180] ss:$8 sps:$4 sm:$0xff]   ;;  %v3127_v3 = vld [vmem:[%s4714_s1 + $0x374] ss:$8 sps:$4 sm:$0xff]   ;;  %v3122_v6 = vld [vmem:[%s4714_s1 + $0x270] ss:$8 sps:$4 sm:$0xff]  }
  0x18   :  { %2032 = vmatpush1.bf16.msra.mxu1 %v3055_v23  ;;  %1980 = vmatprep.subr.bf16.mxu0 %v3056_v24  ;;  %v3116_v4 = vld [vmem:[%s4713_s0] ss:$72 sps:$4 sm:$0xff]   ;;  %v3125_v7 = vld [vmem:[%s4714_s1 + $0x370] ss:$8 sps:$4 sm:$0xff]   ;;  %v3130_v8 = vld [vmem:[%s4714_s1 + $0x264] ss:$8 sps:$4 sm:$0xff]  }
  0x19   :  { %2033 = vmatprep.subr.bf16.mxu1 %v3058_v25  ;;  %v3119_v5 = vld [vmem:[%s4713_s0 + $0x8] ss:$72 sps:$4 sm:$0xff]   ;;  %v3133_v9 = vld [vmem:[%s4714_s1 + $0x364] ss:$8 sps:$4 sm:$0xff]   ;;  %v3136_v12 = vld [vmem:[%s4714_s1 + $0x254] ss:$8 sps:$4 sm:$0xff]  }
  0x1a   :  { %v3128_v10 = vld [vmem:[%s4714_s1 + $0x260] ss:$8 sps:$4 sm:$0xff]   ;;  %v3139_v13 = vld [vmem:[%s4714_s1 + $0x354] ss:$8 sps:$4 sm:$0xff]   ;;  %v3134_v14 = vld [vmem:[%s4714_s1 + $0x250] ss:$8 sps:$4 sm:$0xff]  }
  0x1b   :  { %1981 = vmatpush1.bf16.msra.mxu0 %v3060_v26  ;;  %v3131_v11 = vld [vmem:[%s4714_s1 + $0x360] ss:$8 sps:$4 sm:$0xff]   ;;  %v3137_v15 = vld [vmem:[%s4714_s1 + $0x350] ss:$8 sps:$4 sm:$0xff]   ;;  %v3142_v16 = vld [vmem:[%s4714_s1 + $0x244] ss:$8 sps:$4 sm:$0xff]  }
  0x1c   :  { %2034 = vmatpush1.bf16.msra.mxu1 %v3061_v27  ;;  %1982 = vmatprep.subr.bf16.mxu0 %v3062_v28  ;;  %v3145_v17 = vld [vmem:[%s4714_s1 + $0x344] ss:$8 sps:$4 sm:$0xff]   ;;  %v3140_v18 = vld [vmem:[%s4714_s1 + $0x240] ss:$8 sps:$4 sm:$0xff]   ;;  %v3148_v20 = vld [vmem:[%s4714_s1 + $0x234] ss:$8 sps:$4 sm:$0xff]  }
  0x1d   :  { %2035 = vmatprep.subr.bf16.mxu1 %v3064_v29  ;;  %v3143_v19 = vld [vmem:[%s4714_s1 + $0x340] ss:$8 sps:$4 sm:$0xff]   ;;  %v3151_v21 = vld [vmem:[%s4714_s1 + $0x334] ss:$8 sps:$4 sm:$0xff]   ;;  %v3146_v22 = vld [vmem:[%s4714_s1 + $0x230] ss:$8 sps:$4 sm:$0xff]  }
  0x1e   :  { %v3149_v23 = vld [vmem:[%s4714_s1 + $0x330] ss:$8 sps:$4 sm:$0xff]   ;;  %v3197_v24 = vld [vmem:[%s4713_s0 + $0x94] ss:$72 sps:$4 sm:$0xff]   ;;  %v3154_v26 = vld [vmem:[%s4714_s1 + $0x224] ss:$8 sps:$4 sm:$0xff]  }
  0x1f   :  { %1983 = vmatpush1.bf16.msra.mxu0 %v3066_v30  ;;  %v3199_v25 = vld [vmem:[%s4713_s0 + $0x9c] ss:$72 sps:$4 sm:$0xff]   ;;  %v3204_v28 = vld [vmem:[%s4713_s0 + $0x90] ss:$72 sps:$4 sm:$0xff]   ;;  %v3152_v30 = vld [vmem:[%s4714_s1 + $0x220] ss:$8 sps:$4 sm:$0xff]  }
  0x20   :  { %2036 = vmatpush1.bf16.msra.mxu1 %v3067_v31  ;;  %1984 = vmatprep.subr.bf16.mxu0 %v3068_v32  ;;  %v3157_v27 = vld [vmem:[%s4714_s1 + $0x324] ss:$8 sps:$4 sm:$0xff]   ;;  %v3205_v29 = vld [vmem:[%s4713_s0 + $0x98] ss:$72 sps:$4 sm:$0xff]   ;;  %v3160_v32 = vld [vmem:[%s4714_s1 + $0x214] ss:$8 sps:$4 sm:$0xff]  }
  0x21   :  { %2037 = vmatprep.subr.bf16.mxu1 %v3070_v33  ;;  %v3155_v31 = vld [vmem:[%s4714_s1 + $0x320] ss:$8 sps:$4 sm:$0xff]   ;;  %v3163_v33 = vld [vmem:[%s4714_s1 + $0x314] ss:$8 sps:$4 sm:$0xff]  }
  0x22   :  { %v3179_v49 = vld [vmem:[%s4714_s1 + $0x3e0] ss:$8 sps:$4 sm:$0xff]   ;;  %v3187_v51 = vld [vmem:[%s4714_s1 + $0x3d4] ss:$8 sps:$4 sm:$0xff]  }
  0x23   :  { %1985 = vmatpush2.bf16.msra.mxu0 %v3072_v34  ;;  %v3158_v34 = vld [vmem:[%s4714_s1 + $0x210] ss:$8 sps:$4 sm:$0xff]  }
  0x24   :  { %2038 = vmatpush2.bf16.msra.mxu1 %v3073_v35  ;;  %1986 = vmatprep.subr.bf16.mxu0 %v3074_v36  ;;  %v3161_v35 = vld [vmem:[%s4714_s1 + $0x310] ss:$8 sps:$4 sm:$0xff]   ;;  %v3166_v36 = vld [vmem:[%s4714_s1 + $0x204] ss:$8 sps:$4 sm:$0xff]  }
  0x25   :  { %2039 = vmatprep.subr.bf16.mxu1 %v3076_v37  ;;  %v3169_v37 = vld [vmem:[%s4714_s1 + $0x304] ss:$8 sps:$4 sm:$0xff]  }
  0x27   :  { %1987 = vmatpush2.bf16.msra.mxu0 %v3078_v38  ;;  %v3164_v38 = vld [vmem:[%s4714_s1 + $0x200] ss:$8 sps:$4 sm:$0xff]  }
  0x28   :  { %2040 = vmatpush2.bf16.msra.mxu1 %v3079_v39  ;;  %1988 = vmatprep.subr.bf16.mxu0 %v3080_v40  ;;  %v3167_v39 = vld [vmem:[%s4714_s1 + $0x300] ss:$8 sps:$4 sm:$0xff]   ;;  %v3226_v40 = vld [vmem:[%s4713_s0 + $0x14] ss:$72 sps:$4 sm:$0xff]  }
  0x29   :  { %2041 = vmatprep.subr.bf16.mxu1 %v3082_v41  ;;  %v3172_v41 = vld [vmem:[%s4714_s1 + $0x2f4] ss:$8 sps:$4 sm:$0xff]  }
  0x2b   :  { %1989 = vmatpush2.bf16.msra.mxu0 %v3084_v42  ;;  %v3175_v42 = vld [vmem:[%s4714_s1 + $0x3f4] ss:$8 sps:$4 sm:$0xff]  }
  0x2c   :  { %2042 = vmatpush2.bf16.msra.mxu1 %v3085_v43  ;;  %1990 = vmatprep.subr.bf16.mxu0 %v3086_v44  ;;  %v3232_v43 = vld [vmem:[%s4713_s0 + $0x1c] ss:$72 sps:$4 sm:$0xff]   ;;  %v3170_v44 = vld [vmem:[%s4714_s1 + $0x2f0] ss:$8 sps:$4 sm:$0xff]  }
  0x2d   :  { %2043 = vmatprep.subr.bf16.mxu1 %v3088_v45  ;;  %v3173_v45 = vld [vmem:[%s4714_s1 + $0x3f0] ss:$8 sps:$4 sm:$0xff]  }
  0x2f   :  { %1991 = vmatpush2.bf16.msra.mxu0 %v3090_v46  ;;  %v3178_v46 = vld [vmem:[%s4714_s1 + $0x2e4] ss:$8 sps:$4 sm:$0xff]  }
  0x30   :  { %2044 = vmatpush2.bf16.msra.mxu1 %v3091_v47  ;;  %1992 = vmatprep.subr.bf16.mxu0 %v3092_v48  ;;  %v3181_v47 = vld [vmem:[%s4714_s1 + $0x3e4] ss:$8 sps:$4 sm:$0xff]   ;;  %v3176_v48 = vld [vmem:[%s4714_s1 + $0x2e0] ss:$8 sps:$4 sm:$0xff]  }
  0x31   :  { %2045 = vmatprep.subr.bf16.mxu1 %v3094_v50  ;;  %v3184_v50 = vld [vmem:[%s4714_s1 + $0x2d4] ss:$8 sps:$4 sm:$0xff]  }
  0x33   :  { %1993 = vmatpush2.bf16.msra.mxu0 %v3096_v52  ;;  %v3182_v52 = vld [vmem:[%s4714_s1 + $0x2d0] ss:$8 sps:$4 sm:$0xff]  }
  0x34   :  { %2046 = vmatpush2.bf16.msra.mxu1 %v3097_v53  ;;  %1994 = vmatprep.subr.bf16.mxu0 %v3098_v54  ;;  %v3185_v53 = vld [vmem:[%s4714_s1 + $0x3d0] ss:$8 sps:$4 sm:$0xff]   ;;  %v3190_v54 = vld [vmem:[%s4714_s1 + $0x2c4] ss:$8 sps:$4 sm:$0xff]  }
  0x35   :  { %2047 = vmatprep.subr.bf16.mxu1 %v3100_v55  ;;  %v3193_v55 = vld [vmem:[%s4714_s1 + $0x3c4] ss:$8 sps:$4 sm:$0xff]  }
  0x37   :  { %1995 = vmatpush2.bf16.msra.mxu0 %v3102_v56  ;;  %v3188_v56 = vld [vmem:[%s4714_s1 + $0x2c0] ss:$8 sps:$4 sm:$0xff]  }
  0x38   :  { %2048 = vmatpush2.bf16.msra.mxu1 %v3103_v57  ;;  %1996 = vmatprep.subr.bf16.mxu0 %v3104_v58  ;;  %v3191_v57 = vld [vmem:[%s4714_s1 + $0x3c0] ss:$8 sps:$4 sm:$0xff]   ;;  %v3196_v58 = vld [vmem:[%s4714_s1 + $0x2b4] ss:$8 sps:$4 sm:$0xff]  }
  0x39   :  { %2049 = vmatprep.subr.bf16.mxu1 %v3106_v59  ;;  %v3203_v59 = vld [vmem:[%s4714_s1 + $0x3b4] ss:$8 sps:$4 sm:$0xff]  }
  0x3b   :  { %1997 = vmatpush2.bf16.msra.mxu0 %v3108_v60  ;;  %v3194_v60 = vld [vmem:[%s4714_s1 + $0x2b0] ss:$8 sps:$4 sm:$0xff]  }
  0x3c   :  { %2050 = vmatpush2.bf16.msra.mxu1 %v3109_v61  ;;  %1998 = vmatprep.subr.bf16.mxu0 %v3110_v62  ;;  %v3201_v61 = vld [vmem:[%s4714_s1 + $0x3b0] ss:$8 sps:$4 sm:$0xff]   ;;  %v3208_v62 = vld [vmem:[%s4714_s1 + $0x2a4] ss:$8 sps:$4 sm:$0xff]  }
  0x3d   :  { %2051 = vmatprep.subr.bf16.mxu1 %v3112_v63  ;;  %v3211_v63 = vld [vmem:[%s4714_s1 + $0x3a4] ss:$8 sps:$4 sm:$0xff]  }
  0x3f   :  { %1999 = vmatpush2.bf16.msra.mxu0 %v3114_v0  ;;  %v3206_v0 = vld [vmem:[%s4714_s1 + $0x2a0] ss:$8 sps:$4 sm:$0xff]  }
  0x40   :  { %2052 = vmatpush2.bf16.msra.mxu1 %v3115_v1  ;;  %2074 = vmatprep.subr.bf16.mxu0 %v3124_v2  ;;  %v3209_v1 = vld [vmem:[%s4714_s1 + $0x3a0] ss:$8 sps:$4 sm:$0xff]   ;;  %v3214_v2 = vld [vmem:[%s4714_s1 + $0x294] ss:$8 sps:$4 sm:$0xff]  }
  0x41   :  { %2127 = vmatprep.subr.bf16.mxu1 %v3127_v3  ;;  %v3217_v3 = vld [vmem:[%s4714_s1 + $0x394] ss:$8 sps:$4 sm:$0xff]  }
  0x42   :  { %2001 = vmatmul.mubr.bf16.vlgmr.msra.gmra.mxu0 %v3116_v4  ;;  %v3212_v4 = vld [vmem:[%s4714_s1 + $0x290] ss:$8 sps:$4 sm:$0xff]  }
  0x43   :  { %2054 = vmatmul.mubr.bf16.vlgmr.msra.gmra.mxu1 %v3119_v5  ;;  %2075 = vmatpush1.bf16.msra.mxu0 %v3122_v6  ;;  %v3215_v5 = vld [vmem:[%s4714_s1 + $0x390] ss:$8 sps:$4 sm:$0xff]   ;;  %v3220_v6 = vld [vmem:[%s4714_s1 + $0x284] ss:$8 sps:$4 sm:$0xff]  }
  0x44   :  { %2128 = vmatpush1.bf16.msra.mxu1 %v3125_v7  ;;  %2076 = vmatprep.subr.bf16.mxu0 %v3130_v8  ;;  %v3223_v7 = vld [vmem:[%s4714_s1 + $0x384] ss:$8 sps:$4 sm:$0xff]   ;;  %v3218_v8 = vld [vmem:[%s4714_s1 + $0x280] ss:$8 sps:$4 sm:$0xff]  }
  0x45   :  { %2129 = vmatprep.subr.bf16.mxu1 %v3133_v9  ;;  %2010 = vmatprep.mubr.bf16.mxu0 %v3197_v24  ;;  %v3221_v9 = vld [vmem:[%s4714_s1 + $0x380] ss:$8 sps:$4 sm:$0xff]  }
  0x46   :  { %2063 = vmatprep.mubr.bf16.mxu1 %v3199_v25  ;;  %v3244_v24 = vld [vmem:[%s4713_s0 + $0xa0] ss:$72 sps:$4 sm:$0xff]   ;;  %v3245_v25 = vld [vmem:[%s4714_s1 + $0x450] ss:$8 sps:$4 sm:$0xff]  }
  0x47   :  { %2077 = vmatpush1.bf16.msra.mxu0 %v3128_v10  ;;  %v3229_v10 = vld [vmem:[%s4714_s1 + $0x474] ss:$8 sps:$4 sm:$0xff]  }
  0x48   :  { %2130 = vmatpush1.bf16.msra.mxu1 %v3131_v11  ;;  %2078 = vmatprep.subr.bf16.mxu0 %v3136_v12  ;;  %v3235_v11 = vld [vmem:[%s4714_s1 + $0x574] ss:$8 sps:$4 sm:$0xff]   ;;  %v3224_v12 = vld [vmem:[%s4713_s0 + $0x10] ss:$72 sps:$4 sm:$0xff]  }
  0x49   :  { %2131 = vmatprep.subr.bf16.mxu1 %v3139_v13  ;;  %v3227_v13 = vld [vmem:[%s4714_s1 + $0x470] ss:$8 sps:$4 sm:$0xff]  }
  0x4a   :  { %2011 = vmatmul.mubr.bf16.gmra.mxu0 %v3204_v28  ;;  %v3256_v28 = vld [vmem:[%s4714_s1 + $0x444] ss:$8 sps:$4 sm:$0xff]  }
  0x4b   :  { %2079 = vmatpush1.bf16.msra.mxu0 %v3134_v14  ;;  %2064 = vmatmul.mubr.bf16.gmra.mxu1 %v3205_v29  ;;  %v3230_v14 = vld [vmem:[%s4713_s0 + $0x18] ss:$72 sps:$4 sm:$0xff]   ;;  %v3259_v29 = vld [vmem:[%s4714_s1 + $0x544] ss:$8 sps:$4 sm:$0xff]  }
  0x4c   :  { %2132 = vmatpush1.bf16.msra.mxu1 %v3137_v15  ;;  %2080 = vmatprep.subr.bf16.mxu0 %v3142_v16  ;;  %v3233_v15 = vld [vmem:[%s4714_s1 + $0x570] ss:$8 sps:$4 sm:$0xff]   ;;  %v3238_v16 = vld [vmem:[%s4714_s1 + $0x464] ss:$8 sps:$4 sm:$0xff]  }
  0x4d   :  { %2133 = vmatprep.subr.bf16.mxu1 %v3145_v17  ;;  %2106 = vmatprep.mubr.bf16.mxu0 %v3226_v40  ;;  %v3241_v17 = vld [vmem:[%s4714_s1 + $0x564] ss:$8 sps:$4 sm:$0xff]   ;;  %v3266_v40 = vld [vmem:[%s4714_s1 + $0x420] ss:$8 sps:$4 sm:$0xff]  }
  0x4e   :  { %2159 = vmatprep.mubr.bf16.mxu1 %v3232_v43  ;;  %v3277_v43 = vld [vmem:[%s4714_s1 + $0x514] ss:$8 sps:$4 sm:$0xff]  }
  0x4f   :  { %2081 = vmatpush1.bf16.msra.mxu0 %v3140_v18  ;;  %v3242_v18 = vld [vmem:[%s4713_s0 + $0xa4] ss:$72 sps:$4 sm:$0xff]  }
  0x50   :  { %2134 = vmatpush1.bf16.msra.mxu1 %v3143_v19  ;;  %2082 = vmatprep.subr.bf16.mxu0 %v3148_v20  ;;  %v3248_v19 = vld [vmem:[%s4713_s0 + $0xac] ss:$72 sps:$4 sm:$0xff]   ;;  %v3236_v20 = vld [vmem:[%s4714_s1 + $0x460] ss:$8 sps:$4 sm:$0xff]  }
  0x51   :  { %2135 = vmatprep.subr.bf16.mxu1 %v3151_v21  ;;  %v3239_v21 = vld [vmem:[%s4714_s1 + $0x560] ss:$8 sps:$4 sm:$0xff]  }
  0x53   :  { %2083 = vmatpush1.bf16.msra.mxu0 %v3146_v22  ;;  %v3247_v22 = vld [vmem:[%s4714_s1 + $0x454] ss:$8 sps:$4 sm:$0xff]  }
  0x54   :  { %2136 = vmatpush1.bf16.msra.mxu1 %v3149_v23  ;;  %2084 = vmatprep.subr.bf16.mxu0 %v3154_v26  ;;  %v3253_v23 = vld [vmem:[%s4714_s1 + $0x554] ss:$8 sps:$4 sm:$0xff]   ;;  %v3250_v26 = vld [vmem:[%s4713_s0 + $0xa8] ss:$72 sps:$4 sm:$0xff]  }
  0x55   :  { %2137 = vmatprep.subr.bf16.mxu1 %v3157_v27  ;;  %v3251_v27 = vld [vmem:[%s4714_s1 + $0x550] ss:$8 sps:$4 sm:$0xff]  }
  0x57   :  { %2085 = vmatpush1.bf16.msra.mxu0 %v3152_v30  ;;  %v3254_v30 = vld [vmem:[%s4714_s1 + $0x440] ss:$8 sps:$4 sm:$0xff]  }
  0x58   :  { %2138 = vmatpush1.bf16.msra.mxu1 %v3155_v31  ;;  %2086 = vmatprep.subr.bf16.mxu0 %v3160_v32  ;;  %v3257_v31 = vld [vmem:[%s4714_s1 + $0x540] ss:$8 sps:$4 sm:$0xff]   ;;  %v3334_v32 = vld [vmem:[%s4713_s0 + $0x24] ss:$72 sps:$4 sm:$0xff]  }
  0x59   :  { %2139 = vmatprep.subr.bf16.mxu1 %v3163_v33  ;;  %v3262_v33 = vld [vmem:[%s4714_s1 + $0x434] ss:$8 sps:$4 sm:$0xff]  }
  0x5b   :  { %2087 = vmatpush1.bf16.msra.mxu0 %v3158_v34  ;;  %v3265_v34 = vld [vmem:[%s4714_s1 + $0x534] ss:$8 sps:$4 sm:$0xff]  }
  0x5c   :  { %2140 = vmatpush1.bf16.msra.mxu1 %v3161_v35  ;;  %2088 = vmatprep.subr.bf16.mxu0 %v3166_v36  ;;  %v3340_v35 = vld [vmem:[%s4713_s0 + $0x2c] ss:$72 sps:$4 sm:$0xff]   ;;  %v3260_v36 = vld [vmem:[%s4714_s1 + $0x430] ss:$8 sps:$4 sm:$0xff]  }
  0x5d   :  { %2141 = vmatprep.subr.bf16.mxu1 %v3169_v37  ;;  %v3263_v37 = vld [vmem:[%s4714_s1 + $0x530] ss:$8 sps:$4 sm:$0xff]  }
  0x5f   :  { %2089 = vmatpush1.bf16.msra.mxu0 %v3164_v38  ;;  %v3268_v38 = vld [vmem:[%s4714_s1 + $0x424] ss:$8 sps:$4 sm:$0xff]  }
  0x60   :  { %2142 = vmatpush1.bf16.msra.mxu1 %v3167_v39  ;;  %2090 = vmatprep.subr.bf16.mxu0 %v3172_v41  ;;  %v3271_v39 = vld [vmem:[%s4714_s1 + $0x524] ss:$8 sps:$4 sm:$0xff]   ;;  %v3269_v41 = vld [vmem:[%s4714_s1 + $0x520] ss:$8 sps:$4 sm:$0xff]  }
  0x61   :  { %2143 = vmatprep.subr.bf16.mxu1 %v3175_v42  ;;  %v3274_v42 = vld [vmem:[%s4714_s1 + $0x414] ss:$8 sps:$4 sm:$0xff]  }
  0x63   :  { %2091 = vmatpush2.bf16.msra.mxu0 %v3170_v44  ;;  %v3272_v44 = vld [vmem:[%s4714_s1 + $0x410] ss:$8 sps:$4 sm:$0xff]  }
  0x64   :  { %2144 = vmatpush2.bf16.msra.mxu1 %v3173_v45  ;;  %2092 = vmatprep.subr.bf16.mxu0 %v3178_v46  ;;  %v3275_v45 = vld [vmem:[%s4714_s1 + $0x510] ss:$8 sps:$4 sm:$0xff]   ;;  %v3280_v46 = vld [vmem:[%s4714_s1 + $0x404] ss:$8 sps:$4 sm:$0xff]  }
  0x65   :  { %2145 = vmatprep.subr.bf16.mxu1 %v3181_v47  ;;  %v3283_v47 = vld [vmem:[%s4714_s1 + $0x504] ss:$8 sps:$4 sm:$0xff]  }
  0x67   :  { %2093 = vmatpush2.bf16.msra.mxu0 %v3176_v48  ;;  %v3278_v48 = vld [vmem:[%s4714_s1 + $0x400] ss:$8 sps:$4 sm:$0xff]  }
  0x68   :  { %2146 = vmatpush2.bf16.msra.mxu1 %v3179_v49  ;;  %2094 = vmatprep.subr.bf16.mxu0 %v3184_v50  ;;  %v3281_v49 = vld [vmem:[%s4714_s1 + $0x500] ss:$8 sps:$4 sm:$0xff]   ;;  %v3286_v50 = vld [vmem:[%s4714_s1 + $0x4f4] ss:$8 sps:$4 sm:$0xff]  }
  0x69   :  { %2147 = vmatprep.subr.bf16.mxu1 %v3187_v51  ;;  %v3289_v51 = vld [vmem:[%s4714_s1 + $0x5f4] ss:$8 sps:$4 sm:$0xff]  }
  0x6b   :  { %2095 = vmatpush2.bf16.msra.mxu0 %v3182_v52  ;;  %v3284_v52 = vld [vmem:[%s4714_s1 + $0x4f0] ss:$8 sps:$4 sm:$0xff]  }
  0x6c   :  { %2148 = vmatpush2.bf16.msra.mxu1 %v3185_v53  ;;  %2096 = vmatprep.subr.bf16.mxu0 %v3190_v54  ;;  %v3287_v53 = vld [vmem:[%s4714_s1 + $0x5f0] ss:$8 sps:$4 sm:$0xff]   ;;  %v3292_v54 = vld [vmem:[%s4714_s1 + $0x4e4] ss:$8 sps:$4 sm:$0xff]  }
  0x6d   :  { %2149 = vmatprep.subr.bf16.mxu1 %v3193_v55  ;;  %v3295_v55 = vld [vmem:[%s4714_s1 + $0x5e4] ss:$8 sps:$4 sm:$0xff]  }
  0x6f   :  { %2097 = vmatpush2.bf16.msra.mxu0 %v3188_v56  ;;  %v3290_v56 = vld [vmem:[%s4714_s1 + $0x4e0] ss:$8 sps:$4 sm:$0xff]  }
  0x70   :  { %2150 = vmatpush2.bf16.msra.mxu1 %v3191_v57  ;;  %2098 = vmatprep.subr.bf16.mxu0 %v3196_v58  ;;  %v3293_v57 = vld [vmem:[%s4714_s1 + $0x5e0] ss:$8 sps:$4 sm:$0xff]   ;;  %v3298_v58 = vld [vmem:[%s4714_s1 + $0x4d4] ss:$8 sps:$4 sm:$0xff]  }
  0x71   :  { %2151 = vmatprep.subr.bf16.mxu1 %v3203_v59  ;;  %v3301_v59 = vld [vmem:[%s4714_s1 + $0x5d4] ss:$8 sps:$4 sm:$0xff]  }
  0x73   :  { %2099 = vmatpush2.bf16.msra.mxu0 %v3194_v60  ;;  %v3296_v60 = vld [vmem:[%s4714_s1 + $0x4d0] ss:$8 sps:$4 sm:$0xff]  }
  0x74   :  { %2152 = vmatpush2.bf16.msra.mxu1 %v3201_v61  ;;  %2100 = vmatprep.subr.bf16.mxu0 %v3208_v62  ;;  %v3299_v61 = vld [vmem:[%s4714_s1 + $0x5d0] ss:$8 sps:$4 sm:$0xff]   ;;  %v3304_v62 = vld [vmem:[%s4714_s1 + $0x4c4] ss:$8 sps:$4 sm:$0xff]  }
  0x75   :  { %2153 = vmatprep.subr.bf16.mxu1 %v3211_v63  ;;  %v3307_v63 = vld [vmem:[%s4714_s1 + $0x5c4] ss:$8 sps:$4 sm:$0xff]  }
  0x77   :  { %2101 = vmatpush2.bf16.msra.mxu0 %v3206_v0  ;;  %v3302_v0 = vld [vmem:[%s4714_s1 + $0x4c0] ss:$8 sps:$4 sm:$0xff]  }
  0x78   :  { %2154 = vmatpush2.bf16.msra.mxu1 %v3209_v1  ;;  %2102 = vmatprep.subr.bf16.mxu0 %v3214_v2  ;;  %v3305_v1 = vld [vmem:[%s4714_s1 + $0x5c0] ss:$8 sps:$4 sm:$0xff]   ;;  %v3310_v2 = vld [vmem:[%s4714_s1 + $0x4b4] ss:$8 sps:$4 sm:$0xff]  }
  0x79   :  { %2155 = vmatprep.subr.bf16.mxu1 %v3217_v3  ;;  %v3313_v3 = vld [vmem:[%s4714_s1 + $0x5b4] ss:$8 sps:$4 sm:$0xff]  }
  0x7b   :  { %2103 = vmatpush2.bf16.msra.mxu0 %v3212_v4  ;;  %v3308_v4 = vld [vmem:[%s4714_s1 + $0x4b0] ss:$8 sps:$4 sm:$0xff]  }
  0x7c   :  { %2156 = vmatpush2.bf16.msra.mxu1 %v3215_v5  ;;  %2104 = vmatprep.subr.bf16.mxu0 %v3220_v6  ;;  %v3311_v5 = vld [vmem:[%s4714_s1 + $0x5b0] ss:$8 sps:$4 sm:$0xff]   ;;  %v3316_v6 = vld [vmem:[%s4714_s1 + $0x4a4] ss:$8 sps:$4 sm:$0xff]  }
  0x7d   :  { %2157 = vmatprep.subr.bf16.mxu1 %v3223_v7  ;;  %v3319_v7 = vld [vmem:[%s4714_s1 + $0x5a4] ss:$8 sps:$4 sm:$0xff]  }
  0x7f   :  { %2105 = vmatpush2.bf16.msra.mxu0 %v3218_v8  ;;  %v3314_v8 = vld [vmem:[%s4714_s1 + $0x4a0] ss:$8 sps:$4 sm:$0xff]  }
  0x80   :  { %2158 = vmatpush2.bf16.msra.mxu1 %v3221_v9  ;;  %2180 = vmatprep.subr.bf16.mxu0 %v3229_v10  ;;  %v3317_v9 = vld [vmem:[%s4714_s1 + $0x5a0] ss:$8 sps:$4 sm:$0xff]   ;;  %v3322_v10 = vld [vmem:[%s4714_s1 + $0x494] ss:$8 sps:$4 sm:$0xff]  }
  0x81   :  { %2233 = vmatprep.subr.bf16.mxu1 %v3235_v11  ;;  %v3325_v11 = vld [vmem:[%s4714_s1 + $0x594] ss:$8 sps:$4 sm:$0xff]  }
  0x82   :  { %2107 = vmatmul.mubr.bf16.vlgmr.msra.gmra.mxu0 %v3224_v12  ;;  %v3320_v12 = vld [vmem:[%s4714_s1 + $0x490] ss:$8 sps:$4 sm:$0xff]  }
  0x83   :  { %2160 = vmatmul.mubr.bf16.vlgmr.msra.gmra.mxu1 %v3230_v14  ;;  %2181 = vmatpush1.bf16.msra.mxu0 %v3227_v13  ;;  %v3323_v13 = vld [vmem:[%s4714_s1 + $0x590] ss:$8 sps:$4 sm:$0xff]   ;;  %v3328_v14 = vld [vmem:[%s4714_s1 + $0x484] ss:$8 sps:$4 sm:$0xff]  }
  0x84   :  { %2234 = vmatpush1.bf16.msra.mxu1 %v3233_v15  ;;  %2182 = vmatprep.subr.bf16.mxu0 %v3238_v16  ;;  %v3331_v15 = vld [vmem:[%s4714_s1 + $0x584] ss:$8 sps:$4 sm:$0xff]   ;;  %v3326_v16 = vld [vmem:[%s4714_s1 + $0x480] ss:$8 sps:$4 sm:$0xff]  }
  0x85   :  { %2235 = vmatprep.subr.bf16.mxu1 %v3241_v17  ;;  %2116 = vmatprep.mubr.bf16.mxu0 %v3242_v18  ;;  %v3329_v17 = vld [vmem:[%s4714_s1 + $0x580] ss:$8 sps:$4 sm:$0xff]   ;;  %v3337_v18 = vld [vmem:[%s4714_s1 + $0x674] ss:$8 sps:$4 sm:$0xff]  }
  0x86   :  { %2169 = vmatprep.mubr.bf16.mxu1 %v3248_v19  ;;  %v3343_v19 = vld [vmem:[%s4714_s1 + $0x774] ss:$8 sps:$4 sm:$0xff]  }
  0x87   :  { %2183 = vmatpush1.bf16.msra.mxu0 %v3236_v20  ;;  %v3332_v20 = vld [vmem:[%s4713_s0 + $0x20] ss:$72 sps:$4 sm:$0xff]  }
  0x88   :  { %2236 = vmatpush1.bf16.msra.mxu1 %v3239_v21  ;;  %2184 = vmatprep.subr.bf16.mxu0 %v3247_v22  ;;  %v3335_v21 = vld [vmem:[%s4714_s1 + $0x670] ss:$8 sps:$4 sm:$0xff]  }
  0x89   :  { %2237 = vmatprep.subr.bf16.mxu1 %v3253_v23  ;;  %v3338_v22 = vld [vmem:[%s4713_s0 + $0x28] ss:$72 sps:$4 sm:$0xff]  }
  0x8a   :  { %2117 = vmatmul.mubr.bf16.gmra.mxu0 %v3244_v24  ;;  %v3341_v23 = vld [vmem:[%s4714_s1 + $0x770] ss:$8 sps:$4 sm:$0xff]   ;;  %v3346_v24 = vld [vmem:[%s4714_s1 + $0x664] ss:$8 sps:$4 sm:$0xff]  }
  0x8b   :  { %2170 = vmatmul.mubr.bf16.gmra.mxu1 %v3250_v26  ;;  %2185 = vmatpush1.bf16.msra.mxu0 %v3245_v25  ;;  %v3349_v25 = vld [vmem:[%s4714_s1 + $0x764] ss:$8 sps:$4 sm:$0xff]   ;;  %v3350_v26 = vld [vmem:[%s4713_s0 + $0xb4] ss:$72 sps:$4 sm:$0xff]  }
  0x8c   :  { %2238 = vmatpush1.bf16.msra.mxu1 %v3251_v27  ;;  %2186 = vmatprep.subr.bf16.mxu0 %v3256_v28  ;;  %v3356_v27 = vld [vmem:[%s4713_s0 + $0xbc] ss:$72 sps:$4 sm:$0xff]   ;;  %v3344_v28 = vld [vmem:[%s4714_s1 + $0x660] ss:$8 sps:$4 sm:$0xff]  }
  0x8d   :  { %2239 = vmatprep.subr.bf16.mxu1 %v3259_v29  ;;  %2212 = vmatprep.mubr.bf16.mxu0 %v3334_v32  ;;  %v3347_v29 = vld [vmem:[%s4714_s1 + $0x760] ss:$8 sps:$4 sm:$0xff]   ;;  %v3352_v32 = vld [vmem:[%s4713_s0 + $0xb0] ss:$72 sps:$4 sm:$0xff]  }
  0x8e   :  { %2265 = vmatprep.mubr.bf16.mxu1 %v3340_v35  ;;  %v3359_v35 = vld [vmem:[%s4714_s1 + $0x750] ss:$8 sps:$4 sm:$0xff]  }
  0x8f   :  { %2187 = vmatpush1.bf16.msra.mxu0 %v3254_v30  ;;  %v3355_v30 = vld [vmem:[%s4714_s1 + $0x654] ss:$8 sps:$4 sm:$0xff]  }
  0x90   :  { %2240 = vmatpush1.bf16.msra.mxu1 %v3257_v31  ;;  %2188 = vmatprep.subr.bf16.mxu0 %v3262_v33  ;;  %v3361_v31 = vld [vmem:[%s4714_s1 + $0x754] ss:$8 sps:$4 sm:$0xff]   ;;  %v3353_v33 = vld [vmem:[%s4714_s1 + $0x650] ss:$8 sps:$4 sm:$0xff]  }
  0x91   :  { %2241 = vmatprep.subr.bf16.mxu1 %v3265_v34  ;;  %v3358_v34 = vld [vmem:[%s4713_s0 + $0xb8] ss:$72 sps:$4 sm:$0xff]  }
  0x93   :  { %2189 = vmatpush1.bf16.msra.mxu0 %v3260_v36  ;;  %v3364_v36 = vld [vmem:[%s4714_s1 + $0x644] ss:$8 sps:$4 sm:$0xff]  }
  0x94   :  { %2242 = vmatpush1.bf16.msra.mxu1 %v3263_v37  ;;  %2190 = vmatprep.subr.bf16.mxu0 %v3268_v38  ;;  %v3367_v37 = vld [vmem:[%s4714_s1 + $0x744] ss:$8 sps:$4 sm:$0xff]   ;;  %v3442_v38 = vld [vmem:[%s4713_s0 + $0x34] ss:$72 sps:$4 sm:$0xff]  }
  0x95   :  { %2243 = vmatprep.subr.bf16.mxu1 %v3271_v39  ;;  %v3448_v39 = vld [vmem:[%s4713_s0 + $0x3c] ss:$72 sps:$4 sm:$0xff]  }
  0x97   :  { %2191 = vmatpush1.bf16.msra.mxu0 %v3266_v40  ;;  %v3362_v40 = vld [vmem:[%s4714_s1 + $0x640] ss:$8 sps:$4 sm:$0xff]  }
  0x98   :  { %2244 = vmatpush1.bf16.msra.mxu1 %v3269_v41  ;;  %2192 = vmatprep.subr.bf16.mxu0 %v3274_v42  ;;  %v3365_v41 = vld [vmem:[%s4714_s1 + $0x740] ss:$8 sps:$4 sm:$0xff]   ;;  %v3370_v42 = vld [vmem:[%s4714_s1 + $0x634] ss:$8 sps:$4 sm:$0xff]  }
  0x99   :  { %2245 = vmatprep.subr.bf16.mxu1 %v3277_v43  ;;  %v3373_v43 = vld [vmem:[%s4714_s1 + $0x734] ss:$8 sps:$4 sm:$0xff]  }
  0x9b   :  { %2193 = vmatpush1.bf16.msra.mxu0 %v3272_v44  ;;  %v3368_v44 = vld [vmem:[%s4714_s1 + $0x630] ss:$8 sps:$4 sm:$0xff]  }
  0x9c   :  { %2246 = vmatpush1.bf16.msra.mxu1 %v3275_v45  ;;  %2194 = vmatprep.subr.bf16.mxu0 %v3280_v46  ;;  %v3371_v45 = vld [vmem:[%s4714_s1 + $0x730] ss:$8 sps:$4 sm:$0xff]   ;;  %v3376_v46 = vld [vmem:[%s4714_s1 + $0x624] ss:$8 sps:$4 sm:$0xff]  }
  0x9d   :  { %2247 = vmatprep.subr.bf16.mxu1 %v3283_v47  ;;  %v3379_v47 = vld [vmem:[%s4714_s1 + $0x724] ss:$8 sps:$4 sm:$0xff]  }
  0x9f   :  { %2195 = vmatpush1.bf16.msra.mxu0 %v3278_v48  ;;  %v3374_v48 = vld [vmem:[%s4714_s1 + $0x620] ss:$8 sps:$4 sm:$0xff]  }
  0xa0   :  { %2248 = vmatpush1.bf16.msra.mxu1 %v3281_v49  ;;  %2196 = vmatprep.subr.bf16.mxu0 %v3286_v50  ;;  %v3377_v49 = vld [vmem:[%s4714_s1 + $0x720] ss:$8 sps:$4 sm:$0xff]   ;;  %v3382_v50 = vld [vmem:[%s4714_s1 + $0x614] ss:$8 sps:$4 sm:$0xff]  }
  0xa1   :  { %2249 = vmatprep.subr.bf16.mxu1 %v3289_v51  ;;  %v3385_v51 = vld [vmem:[%s4714_s1 + $0x714] ss:$8 sps:$4 sm:$0xff]  }
  0xa3   :  { %2197 = vmatpush2.bf16.msra.mxu0 %v3284_v52  ;;  %v3380_v52 = vld [vmem:[%s4714_s1 + $0x610] ss:$8 sps:$4 sm:$0xff]  }
  0xa4   :  { %2250 = vmatpush2.bf16.msra.mxu1 %v3287_v53  ;;  %2198 = vmatprep.subr.bf16.mxu0 %v3292_v54  ;;  %v3383_v53 = vld [vmem:[%s4714_s1 + $0x710] ss:$8 sps:$4 sm:$0xff]  }
  0xa5   :  { %2251 = vmatprep.subr.bf16.mxu1 %v3295_v55 }
  0xa7   :  { %2199 = vmatpush2.bf16.msra.mxu0 %v3290_v56 }
  0xa8   :  { %2252 = vmatpush2.bf16.msra.mxu1 %v3293_v57  ;;  %2200 = vmatprep.subr.bf16.mxu0 %v3298_v58 }
  0xa9   :  { %2253 = vmatprep.subr.bf16.mxu1 %v3301_v59 }
  0xab   :  { %2201 = vmatpush2.bf16.msra.mxu0 %v3296_v60 }
  0xac   :  { %2254 = vmatpush2.bf16.msra.mxu1 %v3299_v61  ;;  %2202 = vmatprep.subr.bf16.mxu0 %v3304_v62 }
  0xad   :  { %2255 = vmatprep.subr.bf16.mxu1 %v3307_v63 }
  0xaf   :  { %2203 = vmatpush2.bf16.msra.mxu0 %v3302_v0 }
  0xb0   :  { %2256 = vmatpush2.bf16.msra.mxu1 %v3305_v1  ;;  %2204 = vmatprep.subr.bf16.mxu0 %v3310_v2 }
  0xb1   :  { %2257 = vmatprep.subr.bf16.mxu1 %v3313_v3 }
  0xb3   :  { %2205 = vmatpush2.bf16.msra.mxu0 %v3308_v4 }
  0xb4   :  { %2258 = vmatpush2.bf16.msra.mxu1 %v3311_v5  ;;  %2206 = vmatprep.subr.bf16.mxu0 %v3316_v6 }
  0xb5   :  { %2259 = vmatprep.subr.bf16.mxu1 %v3319_v7 }
  0xb7   :  { %2207 = vmatpush2.bf16.msra.mxu0 %v3314_v8 }
  0xb8   :  { %2260 = vmatpush2.bf16.msra.mxu1 %v3317_v9  ;;  %2208 = vmatprep.subr.bf16.mxu0 %v3322_v10 }
  0xb9   :  { %2261 = vmatprep.subr.bf16.mxu1 %v3325_v11 }
  0xbb   :  { %2209 = vmatpush2.bf16.msra.mxu0 %v3320_v12 }
  0xbc   :  { %2262 = vmatpush2.bf16.msra.mxu1 %v3323_v13  ;;  %2210 = vmatprep.subr.bf16.mxu0 %v3328_v14 }
  0xbd   :  { %2263 = vmatprep.subr.bf16.mxu1 %v3331_v15 }
  0xbf   :  { %2211 = vmatpush2.bf16.msra.mxu0 %v3326_v16 }
  0xc0   :  { %2264 = vmatpush2.bf16.msra.mxu1 %v3329_v17  ;;  %2286 = vmatprep.subr.bf16.mxu0 %v3337_v18 }
  0xc1   :  { %2339 = vmatprep.subr.bf16.mxu1 %v3343_v19 }
  0xc2   :  { %2213 = vmatmul.mubr.bf16.vlgmr.msra.gmra.mxu0 %v3332_v20 }
  0xc3   :  { %2266 = vmatmul.mubr.bf16.vlgmr.msra.gmra.mxu1 %v3338_v22  ;;  %2287 = vmatpush1.bf16.msra.mxu0 %v3335_v21 }
  0xc4   :  { %2340 = vmatpush1.bf16.msra.mxu1 %v3341_v23  ;;  %2288 = vmatprep.subr.bf16.mxu0 %v3346_v24 }
  0xc5   :  { %2341 = vmatprep.subr.bf16.mxu1 %v3349_v25  ;;  %2222 = vmatprep.mubr.bf16.mxu0 %v3350_v26 }
  0xc6   :  { %2275 = vmatprep.mubr.bf16.mxu1 %v3356_v27 }
  0xc7   :  { %2289 = vmatpush1.bf16.msra.mxu0 %v3344_v28 }
  0xc8   :  { %2342 = vmatpush1.bf16.msra.mxu1 %v3347_v29  ;;  %2290 = vmatprep.subr.bf16.mxu0 %v3355_v30 }
  0xc9   :  { %2343 = vmatprep.subr.bf16.mxu1 %v3361_v31 }
  0xca   :  { %2223 = vmatmul.mubr.bf16.gmra.mxu0 %v3352_v32 }
  0xcb   :  { %2276 = vmatmul.mubr.bf16.gmra.mxu1 %v3358_v34  ;;  %2291 = vmatpush1.bf16.msra.mxu0 %v3353_v33 }
  0xcc   :  { %2344 = vmatpush1.bf16.msra.mxu1 %v3359_v35  ;;  %2292 = vmatprep.subr.bf16.mxu0 %v3364_v36 }
  0xcd   :  { %2345 = vmatprep.subr.bf16.mxu1 %v3367_v37  ;;  %2318 = vmatprep.mubr.bf16.mxu0 %v3442_v38 }
  0xce   :  { %2371 = vmatprep.mubr.bf16.mxu1 %v3448_v39 }
  0xcf   :  { %2293 = vmatpush1.bf16.msra.mxu0 %v3362_v40 }
  0xd0   :  { %2346 = vmatpush1.bf16.msra.mxu1 %v3365_v41  ;;  %2294 = vmatprep.subr.bf16.mxu0 %v3370_v42 }
  0xd1   :  { %2347 = vmatprep.subr.bf16.mxu1 %v3373_v43 }
  0xd3   :  { %2295 = vmatpush1.bf16.msra.mxu0 %v3368_v44 }
  0xd4   :  { %2348 = vmatpush1.bf16.msra.mxu1 %v3371_v45  ;;  %2296 = vmatprep.subr.bf16.mxu0 %v3376_v46 }
  0xd5   :  { %2349 = vmatprep.subr.bf16.mxu1 %v3379_v47 }
  0xd7   :  { %2297 = vmatpush1.bf16.msra.mxu0 %v3374_v48 }
  0xd8   :  { %2350 = vmatpush1.bf16.msra.mxu1 %v3377_v49 }
  0xd9   :  { %11 = vsyncpa [#allocation3], 0  ;;  %2298 = vmatprep.subr.bf16.mxu0 %v3382_v50  ;;  %2351 = vmatprep.subr.bf16.mxu1 %v3385_v51  ;;  %v3388_v54 = vld [vmem:[%s4714_s1 + $0x604] ss:$8 sps:$4 sm:$0xff]   ;;  %v3386_v56 = vld [vmem:[%s4714_s1 + $0x600] ss:$8 sps:$4 sm:$0xff]  }
  0xda   :  { %v3391_v55 = vld [vmem:[%s4714_s1 + $0x704] ss:$8 sps:$4 sm:$0xff]   ;;  %v3389_v57 = vld [vmem:[%s4714_s1 + $0x700] ss:$8 sps:$4 sm:$0xff]   ;;  %v3394_v58 = vld [vmem:[%s4714_s1 + $0x6f4] ss:$8 sps:$4 sm:$0xff]  }
  0xdb   :  { %2299 = vmatpush1.bf16.msra.mxu0 %v3380_v52  ;;  %v3397_v59 = vld [vmem:[%s4714_s1 + $0x7f4] ss:$8 sps:$4 sm:$0xff]   ;;  %v3392_v60 = vld [vmem:[%s4714_s1 + $0x6f0] ss:$8 sps:$4 sm:$0xff]   ;;  %v3400_v62 = vld [vmem:[%s4714_s1 + $0x6e4] ss:$8 sps:$4 sm:$0xff]  }
  0xdc   :  { %2352 = vmatpush1.bf16.msra.mxu1 %v3383_v53  ;;  %2300 = vmatprep.subr.bf16.mxu0 %v3388_v54  ;;  %v3395_v61 = vld [vmem:[%s4714_s1 + $0x7f0] ss:$8 sps:$4 sm:$0xff]   ;;  %v3403_v63 = vld [vmem:[%s4714_s1 + $0x7e4] ss:$8 sps:$4 sm:$0xff]   ;;  %v3398_v0 = vld [vmem:[%s4714_s1 + $0x6e0] ss:$8 sps:$4 sm:$0xff]  }
  0xdd   :  { %2353 = vmatprep.subr.bf16.mxu1 %v3391_v55  ;;  %v3401_v1 = vld [vmem:[%s4714_s1 + $0x7e0] ss:$8 sps:$4 sm:$0xff]   ;;  %v3406_v2 = vld [vmem:[%s4714_s1 + $0x6d4] ss:$8 sps:$4 sm:$0xff]   ;;  %v3404_v4 = vld [vmem:[%s4714_s1 + $0x6d0] ss:$8 sps:$4 sm:$0xff]  }
  0xde   :  { %v3409_v3 = vld [vmem:[%s4714_s1 + $0x7d4] ss:$8 sps:$4 sm:$0xff]   ;;  %v3407_v5 = vld [vmem:[%s4714_s1 + $0x7d0] ss:$8 sps:$4 sm:$0xff]   ;;  %v3412_v6 = vld [vmem:[%s4714_s1 + $0x6c4] ss:$8 sps:$4 sm:$0xff]  }
  0xdf   :  { %2301 = vmatpush1.bf16.msra.mxu0 %v3386_v56  ;;  %v3415_v7 = vld [vmem:[%s4714_s1 + $0x7c4] ss:$8 sps:$4 sm:$0xff]   ;;  %v3410_v8 = vld [vmem:[%s4714_s1 + $0x6c0] ss:$8 sps:$4 sm:$0xff]   ;;  %v3418_v10 = vld [vmem:[%s4714_s1 + $0x6b4] ss:$8 sps:$4 sm:$0xff]  }
  0xe0   :  { %2354 = vmatpush1.bf16.msra.mxu1 %v3389_v57  ;;  %2302 = vmatprep.subr.bf16.mxu0 %v3394_v58  ;;  %v3413_v9 = vld [vmem:[%s4714_s1 + $0x7c0] ss:$8 sps:$4 sm:$0xff]   ;;  %v3421_v11 = vld [vmem:[%s4714_s1 + $0x7b4] ss:$8 sps:$4 sm:$0xff]   ;;  %v3416_v12 = vld [vmem:[%s4714_s1 + $0x6b0] ss:$8 sps:$4 sm:$0xff]  }
  0xe1   :  { %2355 = vmatprep.subr.bf16.mxu1 %v3397_v59  ;;  %v3419_v13 = vld [vmem:[%s4714_s1 + $0x7b0] ss:$8 sps:$4 sm:$0xff]   ;;  %v3424_v14 = vld [vmem:[%s4714_s1 + $0x6a4] ss:$8 sps:$4 sm:$0xff]   ;;  %v3422_v16 = vld [vmem:[%s4714_s1 + $0x6a0] ss:$8 sps:$4 sm:$0xff]  }
  0xe2   :  { %v3427_v15 = vld [vmem:[%s4714_s1 + $0x7a4] ss:$8 sps:$4 sm:$0xff]   ;;  %v3425_v17 = vld [vmem:[%s4714_s1 + $0x7a0] ss:$8 sps:$4 sm:$0xff]   ;;  %v3430_v18 = vld [vmem:[%s4714_s1 + $0x694] ss:$8 sps:$4 sm:$0xff]  }
  0xe3   :  { %2303 = vmatpush2.bf16.msra.mxu0 %v3392_v60  ;;  %v3433_v19 = vld [vmem:[%s4714_s1 + $0x794] ss:$8 sps:$4 sm:$0xff]   ;;  %v3428_v20 = vld [vmem:[%s4714_s1 + $0x690] ss:$8 sps:$4 sm:$0xff]   ;;  %v3436_v22 = vld [vmem:[%s4714_s1 + $0x684] ss:$8 sps:$4 sm:$0xff]  }
  0xe4   :  { %2356 = vmatpush2.bf16.msra.mxu1 %v3395_v61  ;;  %2304 = vmatprep.subr.bf16.mxu0 %v3400_v62  ;;  %v3431_v21 = vld [vmem:[%s4714_s1 + $0x790] ss:$8 sps:$4 sm:$0xff]   ;;  %v3439_v23 = vld [vmem:[%s4714_s1 + $0x784] ss:$8 sps:$4 sm:$0xff]   ;;  %v3434_v24 = vld [vmem:[%s4714_s1 + $0x680] ss:$8 sps:$4 sm:$0xff]  }
  0xe5   :  { %2357 = vmatprep.subr.bf16.mxu1 %v3403_v63  ;;  %v3437_v25 = vld [vmem:[%s4714_s1 + $0x780] ss:$8 sps:$4 sm:$0xff]   ;;  %v3445_v26 = vld [vmem:[%s4714_s1 + $0x874] ss:$8 sps:$4 sm:$0xff]   ;;  %v3440_v27 = vld [vmem:[%s4713_s0 + $0x30] ss:$72 sps:$4 sm:$0xff]  }
  0xe6   :  { %v3446_v28 = vld [vmem:[%s4713_s0 + $0x38] ss:$72 sps:$4 sm:$0xff]   ;;  %v3452_v30 = vld [vmem:[%s4713_s0 + $0xc4] ss:$72 sps:$4 sm:$0xff]   ;;  %v3457_v34 = vld [vmem:[%s4714_s1 + $0x854] ss:$8 sps:$4 sm:$0xff]  }
  0xe7   :  { %2305 = vmatpush2.bf16.msra.mxu0 %v3398_v0  ;;  %v3443_v29 = vld [vmem:[%s4714_s1 + $0x870] ss:$8 sps:$4 sm:$0xff]   ;;  %v3451_v31 = vld [vmem:[%s4714_s1 + $0x864] ss:$8 sps:$4 sm:$0xff]   ;;  %v3449_v33 = vld [vmem:[%s4714_s1 + $0x860] ss:$8 sps:$4 sm:$0xff]  }
  0xe8   :  { %2358 = vmatpush2.bf16.msra.mxu1 %v3401_v1  ;;  %2306 = vmatprep.subr.bf16.mxu0 %v3406_v2  ;;  %v3458_v32 = vld [vmem:[%s4713_s0 + $0xcc] ss:$72 sps:$4 sm:$0xff]   ;;  %v3454_v35 = vld [vmem:[%s4713_s0 + $0xc0] ss:$72 sps:$4 sm:$0xff]   ;;  %v3455_v37 = vld [vmem:[%s4714_s1 + $0x850] ss:$8 sps:$4 sm:$0xff]  }
  0xe9   :  { %2359 = vmatprep.subr.bf16.mxu1 %v3409_v3  ;;  %v3460_v36 = vld [vmem:[%s4713_s0 + $0xc8] ss:$72 sps:$4 sm:$0xff]   ;;  %v3502_v38 = vld [vmem:[%s4713_s0 + $0x44] ss:$72 sps:$4 sm:$0xff]   ;;  %v3466_v41 = vld [vmem:[%s4714_s1 + $0x834] ss:$8 sps:$4 sm:$0xff]  }
  0xea   :  { %v3463_v39 = vld [vmem:[%s4714_s1 + $0x844] ss:$8 sps:$4 sm:$0xff]   ;;  %v3461_v40 = vld [vmem:[%s4714_s1 + $0x840] ss:$8 sps:$4 sm:$0xff]   ;;  %v3464_v42 = vld [vmem:[%s4714_s1 + $0x830] ss:$8 sps:$4 sm:$0xff]  }
  0xeb   :  { %2307 = vmatpush2.bf16.msra.mxu0 %v3404_v4  ;;  %v3469_v43 = vld [vmem:[%s4714_s1 + $0x824] ss:$8 sps:$4 sm:$0xff]   ;;  %v3467_v44 = vld [vmem:[%s4714_s1 + $0x820] ss:$8 sps:$4 sm:$0xff]   ;;  %v3472_v45 = vld [vmem:[%s4714_s1 + $0x814] ss:$8 sps:$4 sm:$0xff]  }
  0xec   :  { %2360 = vmatpush2.bf16.msra.mxu1 %v3407_v5  ;;  %2308 = vmatprep.subr.bf16.mxu0 %v3412_v6  ;;  %v3470_v46 = vld [vmem:[%s4714_s1 + $0x810] ss:$8 sps:$4 sm:$0xff]   ;;  %v3475_v47 = vld [vmem:[%s4714_s1 + $0x804] ss:$8 sps:$4 sm:$0xff]   ;;  %v3473_v48 = vld [vmem:[%s4714_s1 + $0x800] ss:$8 sps:$4 sm:$0xff]  }
  0xed   :  { %2361 = vmatprep.subr.bf16.mxu1 %v3415_v7  ;;  %v3478_v49 = vld [vmem:[%s4714_s1 + $0x8f4] ss:$8 sps:$4 sm:$0xff]   ;;  %v3476_v50 = vld [vmem:[%s4714_s1 + $0x8f0] ss:$8 sps:$4 sm:$0xff]   ;;  %v3481_v51 = vld [vmem:[%s4714_s1 + $0x8e4] ss:$8 sps:$4 sm:$0xff]  }
  0xee   :  { %v3479_v52 = vld [vmem:[%s4714_s1 + $0x8e0] ss:$8 sps:$4 sm:$0xff]   ;;  %v3484_v53 = vld [vmem:[%s4714_s1 + $0x8d4] ss:$8 sps:$4 sm:$0xff]   ;;  %v3482_v54 = vld [vmem:[%s4714_s1 + $0x8d0] ss:$8 sps:$4 sm:$0xff]  }
  0xef   :  { %2309 = vmatpush2.bf16.msra.mxu0 %v3410_v8  ;;  %v3487_v55 = vld [vmem:[%s4714_s1 + $0x8c4] ss:$8 sps:$4 sm:$0xff]   ;;  %v3485_v56 = vld [vmem:[%s4714_s1 + $0x8c0] ss:$8 sps:$4 sm:$0xff]   ;;  %v3490_v57 = vld [vmem:[%s4714_s1 + $0x8b4] ss:$8 sps:$4 sm:$0xff]  }
  0xf0   :  { %2362 = vmatpush2.bf16.msra.mxu1 %v3413_v9  ;;  %2310 = vmatprep.subr.bf16.mxu0 %v3418_v10  ;;  %v3488_v58 = vld [vmem:[%s4714_s1 + $0x8b0] ss:$8 sps:$4 sm:$0xff]   ;;  %v3493_v59 = vld [vmem:[%s4714_s1 + $0x8a4] ss:$8 sps:$4 sm:$0xff]   ;;  %v3491_v60 = vld [vmem:[%s4714_s1 + $0x8a0] ss:$8 sps:$4 sm:$0xff]  }
  0xf1   :  { %2363 = vmatprep.subr.bf16.mxu1 %v3421_v11  ;;  %v3496_v61 = vld [vmem:[%s4714_s1 + $0x894] ss:$8 sps:$4 sm:$0xff]   ;;  %v3494_v62 = vld [vmem:[%s4714_s1 + $0x890] ss:$8 sps:$4 sm:$0xff]   ;;  %v3499_v63 = vld [vmem:[%s4714_s1 + $0x884] ss:$8 sps:$4 sm:$0xff]  }
  0xf2   :  { %v3497_v0 = vld [vmem:[%s4714_s1 + $0x880] ss:$8 sps:$4 sm:$0xff]   ;;  %v3503_v2 = vld [vmem:[%s4713_s0 + $0xd4] ss:$72 sps:$4 sm:$0xff]   ;;  %v3505_v3 = vld [vmem:[%s4713_s0 + $0xd0] ss:$72 sps:$4 sm:$0xff]  }
  0xf3   :  { %2311 = vmatpush2.bf16.msra.mxu0 %v3416_v12  ;;  %v3500_v1 = vld [vmem:[%s4713_s0 + $0x40] ss:$72 sps:$4 sm:$0xff]   ;;  %v2557_v4 = vld [vmem:[%s4717_s4 + $0xf8] sm:$0xff]  ;;  %v2556_v7 = vld [vmem:[%s4717_s4 + $0xf0] sm:$0xff]  ;;  %vm2569_vm0 = vcmask 1041409   ;;  %s3528_s10 = smov [#allocation2]  }
  0xf4   :  { %2364 = vmatpush2.bf16.msra.mxu1 %v3419_v13  ;;  %2312 = vmatprep.subr.bf16.mxu0 %v3424_v14  ;;  %v2541_v5 = vld [vmem:[%s4717_s4 + $0x78] sm:$0xff]  ;;  %v2540_v8 = vld [vmem:[%s4717_s4 + $0x70] sm:$0xff]  ;;  %v2555_v9 = vld [vmem:[%s4717_s4 + $0xe8] sm:$0xff]  ;;  %s2651_s11 = sshll.u32 %s3528_s10, 4  ;;  %s2652_s11 = int_to_ptr.vmem [resolvable:$true] %s2651_s11 }
  0xf5   :  { %2365 = vmatprep.subr.bf16.mxu1 %v3427_v15  ;;  %v2539_v11 = vld [vmem:[%s4717_s4 + $0x68] sm:$0xff]  ;;  %v2554_v12 = vld [vmem:[%s4717_s4 + $0xe0] sm:$0xff]  ;;  %v2553_v14 = vld [vmem:[%s4717_s4 + $0xd8] sm:$0xff]  ;;  %s3506_s12 = scalar_lea.vmem %s2652_s11, 32  ;;  %p3511_p1 = scmp.lt.s32.totalorder %s2652_s11, %s2652_s11 }
  0xf6   :  { %v2538_v13 = vld [vmem:[%s4717_s4 + $0x60] sm:$0xff]  ;;  %p3507_p0 = scmp.ne.s32.totalorder %s2652_s11, %s3506_s12  ;;  %p3512_p2 = scmp.lt.s32.totalorder %s3506_s12, %s3506_s12 }
  0xf7   :  { %2313 = vmatpush2.bf16.msra.mxu0 %v3422_v16  ;;  %v2537_v16 = vld [vmem:[%s4717_s4 + $0x58] sm:$0xff] }
  0xf8   :  { %2366 = vmatpush2.bf16.msra.mxu1 %v3425_v17  ;;  %2314 = vmatprep.subr.bf16.mxu0 %v3430_v18  ;;  %v2552_v17 = vld [vmem:[%s4717_s4 + $0xd0] sm:$0xff]  ;;  %p3513_p3 = por %p3512_p2, %p3511_p1 }
  0xf9   :  { %2367 = vmatprep.subr.bf16.mxu1 %v3433_v19  ;;  %v2536_v18 = vld [vmem:[%s4717_s4 + $0x50] sm:$0xff]  ;;  %v2551_v19 = vld [vmem:[%s4717_s4 + $0xc8] sm:$0xff] }
  0xfa   :  { %p3514_p4 = pnand %p3513_p3, %p3507_p0 }
  0xfb   :  { %2315 = vmatpush2.bf16.msra.mxu0 %v3428_v20 }
  0xfc   :  { %2368 = vmatpush2.bf16.msra.mxu1 %v3431_v21  ;;  %2316 = vmatprep.subr.bf16.mxu0 %v3436_v22  ;;  %v2535_v21 = vld [vmem:[%s4717_s4 + $0x48] sm:$0xff] }
  0xfd   :  { %2369 = vmatprep.subr.bf16.mxu1 %v3439_v23  ;;  %v2550_v23 = vld [vmem:[%s4717_s4 + $0xc0] sm:$0xff] }
  0xff   :  { %2317 = vmatpush2.bf16.msra.mxu0 %v3434_v24 }
 0x100   :  { %2370 = vmatpush2.bf16.msra.mxu1 %v3437_v25  ;;  %2392 = vmatprep.subr.bf16.mxu0 %v3445_v26  ;;  %v2534_v25 = vld [vmem:[%s4717_s4 + $0x40] sm:$0xff]  ;;  %v2549_v26 = vld [vmem:[%s4717_s4 + $0xb8] sm:$0xff] }
 0x101   :  { %2984 = vmatprep.subr.mxu1 %v2557_v4 }
 0x102   :  { %2319 = vmatmul.mubr.bf16.vlgmr.msra.gmra.mxu0 %v3440_v27  ;;  %v4542_v6 = vpop.f32.mrf.mxu0  ;;  %v2533_v27 = vld [vmem:[%s4717_s4 + $0x38] sm:$0xff] }
 0x103   :  { %2372 = vmatmul.mubr.bf16.vlgmr.msra.gmra.mxu1 %v3446_v28  ;;  %2393 = vmatpush1.bf16.msra.mxu0 %v3443_v29  ;;  %v4586_v22 = vpop.f32.mrf.mxu1  ;;  %v2548_v29 = vld [vmem:[%s4717_s4 + $0xb0] sm:$0xff] }
 0x104   :  { %2328 = vmatprep.mubr.bf16.mxu0 %v3452_v30  ;;  %2394 = vmatprep.subr.bf16.mxu0 %v3451_v31  ;;  %v4553_v10 = vpop.f32.mrf.mxu0  ;;  %v2532_v31 = vld [vmem:[%s4717_s4 + $0x30] sm:$0xff] }
 0x105   :  { %2381 = vmatprep.mubr.bf16.mxu1 %v3458_v32  ;;  %2985 = vmatpush3.msra.mxu1 %v2541_v5  ;;  %v4602_v28 = vpop.f32.mrf.mxu1  ;;  %v2547_v32 = vld [vmem:[%s4717_s4 + $0xa8] sm:$0xff] }
 0x106   :  { %2986 = vmatprep.subr.mxu1 %v2556_v7  ;;  %v4567_v15 = vpop.f32.mrf.mxu0 }
 0x107   :  { %2395 = vmatpush1.bf16.msra.mxu0 %v3449_v33  ;;  %2987 = vmatpush3.msra.mxu1 %v2540_v8  ;;  %v2531_v33 = vld [vmem:[%s4717_s4 + $0x28] sm:$0xff] }
 0x108   :  { %2396 = vmatprep.subr.bf16.mxu0 %v3457_v34  ;;  %2988 = vmatprep.subr.mxu1 %v2555_v9  ;;  %v4581_v20 = vpop.f32.mrf.mxu0  ;;  %v2546_v34 = vld [vmem:[%s4717_s4 + $0xa0] sm:$0xff] }
 0x109   :  { %2989 = vmatpush3.msra.mxu1 %v2539_v11 }
 0x10a   :  { %2329 = vmatmul.mubr.bf16.gmra.mxu0 %v3454_v35  ;;  %2990 = vmatprep.subr.mxu1 %v2554_v12  ;;  %v4591_v24 = vpop.f32.mrf.mxu0  ;;  %v2530_v35 = vld [vmem:[%s4717_s4 + $0x20] sm:$0xff] }
 0x10b   :  { %2382 = vmatmul.mubr.bf16.gmra.mxu1 %v3460_v36  ;;  %2397 = vmatpush1.bf16.msra.mxu0 %v3455_v37  ;;  %v4624_v36 = vpop.f32.mrf.mxu1  ;;  %v2545_v37 = vld [vmem:[%s4717_s4 + $0x98] sm:$0xff] }
 0x10c   :  { %2424 = vmatprep.mubr.bf16.mxu0 %v3502_v38  ;;  %2398 = vmatprep.subr.bf16.mxu0 %v3463_v39  ;;  %v4607_v30 = vpop.f32.mrf.mxu0  ;;  %v2529_v39 = vld [vmem:[%s4717_s4 + $0x18] sm:$0xff] }
 0x10d   :  { %2991 = vmatpush3.msra.mxu1 %v2538_v13 }
 0x10e   :  { %2992 = vmatprep.subr.mxu1 %v2553_v14  ;;  %v4629_v38 = vpop.f32.mrf.mxu0 }
 0x10f   :  { %2399 = vmatpush1.bf16.msra.mxu0 %v3461_v40  ;;  %2993 = vmatpush3.msra.mxu1 %v2537_v16  ;;  %v2544_v40 = vld [vmem:[%s4717_s4 + $0x90] sm:$0xff] }
 0x110   :  { %2400 = vmatprep.subr.bf16.mxu0 %v3466_v41  ;;  %2994 = vmatprep.subr.mxu1 %v2552_v17  ;;  %v2528_v41 = vld [vmem:[%s4717_s4 + $0x10] sm:$0xff] }
 0x111   :  { %2995 = vmatpush3.msra.mxu1 %v2536_v18 }
 0x112   :  { %2996 = vmatprep.subr.mxu1 %v2551_v19 }
 0x113   :  { %2401 = vmatpush1.bf16.msra.mxu0 %v3464_v42  ;;  %2997 = vmatpush3.msra.mxu1 %v2535_v21  ;;  %v2061_v42 = vpop.f32.mrf.mxu1 }
 0x114   :  { %2402 = vmatprep.subr.bf16.mxu0 %v3469_v43  ;;  %2998 = vmatprep.subr.mxu1 %v2550_v23  ;;  %v2543_v43 = vld [vmem:[%s4717_s4 + $0x88] sm:$0xff] }
 0x115   :  { %2999 = vmatpush3.msra.mxu1 %v2534_v25 }
 0x116   :  { %3000 = vmatprep.subr.mxu1 %v2549_v26 }
 0x117   :  { %2403 = vmatpush1.bf16.msra.mxu0 %v3467_v44  ;;  %3001 = vmatpush3.msra.mxu1 %v2533_v27  ;;  %v4643_v44 = vpop.f32.mrf.mxu0 }
 0x118   :  { %2404 = vmatprep.subr.bf16.mxu0 %v3472_v45  ;;  %3002 = vmatprep.subr.mxu1 %v2548_v29  ;;  %v2527_v45 = vld [vmem:[%s4717_s4 + $0x8] sm:$0xff]  ;;  %v2056_v29 = vadd.f32 %v4586_v22, %v4542_v6 }
 0x119   :  { %3003 = vmatpush3.msra.mxu1 %v2532_v31 }
 0x11a   :  { %3004 = vmatprep.subr.mxu1 %v2547_v32 }
 0x11b   :  { %2405 = vmatpush1.bf16.msra.mxu0 %v3470_v46  ;;  %3005 = vmatpush3.msra.mxu1 %v2531_v33  ;;  %v2065_v46 = vpop.f32.mrf.mxu1  ;;  %v2058_v33 = vadd.f32 %v4602_v28, %v4553_v10 }
 0x11c   :  { %2406 = vmatprep.subr.bf16.mxu0 %v3475_v47  ;;  %3006 = vmatprep.subr.mxu1 %v2546_v34  ;;  %v2542_v47 = vld [vmem:[%s4717_s4 + $0x80] sm:$0xff]  ;;  %v2066_v6 = vadd.f32 %v2065_v46, %v4591_v24 }
 0x11d   :  { %3007 = vmatpush3.msra.mxu1 %v2530_v35 }
 0x11e   :  { %3008 = vmatprep.subr.mxu1 %v2545_v37  ;;  %v2060_v37 = vadd.f32 %v4624_v36, %v4567_v15 }
 0x11f   :  { %2407 = vmatpush1.bf16.msra.mxu0 %v3473_v48  ;;  %3009 = vmatpush3.msra.mxu1 %v2529_v39 }
 0x120   :  { %2408 = vmatprep.subr.bf16.mxu0 %v3478_v49  ;;  %3010 = vmatprep.subr.mxu1 %v2544_v40  ;;  %v2526_v49 = vld [vmem:[%s4717_s4] sm:$0xff] }
 0x121   :  { %3011 = vmatpush3.msra.mxu1 %v2528_v41  ;;  %v2062_v41 = vadd.f32 %v2061_v42, %v4581_v20 }
 0x122   :  { %3012 = vmatprep.subr.mxu1 %v2543_v43 }
 0x123   :  { %2409 = vmatpush2.bf16.msra.mxu0 %v3476_v50  ;;  %3013 = vmatpush3.msra.mxu1 %v2527_v45  ;;  %v2067_v50 = vpop.f32.mrf.mxu1 }
 0x124   :  { %2410 = vmatprep.subr.bf16.mxu0 %v3481_v51  ;;  %3014 = vmatprep.subr.mxu1 %v2542_v47  ;;  %v2068_v10 = vadd.f32 %v2067_v50, %v4607_v30 }
 0x125   :  { %3015 = vmatpush3.msra.mxu1 %v2526_v49  ;;  %v2447_v49 = vlaneseq }
 0x127   :  { %2411 = vmatpush2.bf16.msra.mxu0 %v3479_v52  ;;  %v4654_v52 = vpop.f32.mrf.mxu1  ;;  %v2448_v36 = vshrl.u32 %v2447_v49, 7 }
 0x128   :  { %2412 = vmatprep.subr.bf16.mxu0 %v3484_v53 }
 0x129   :  { %v2449_v30 = vsub.s32 0, %v2448_v36 }
 0x12b   :  { %2413 = vmatpush2.bf16.msra.mxu0 %v3482_v54  ;;  %v4656_v54 = vpop.f32.mrf.mxu1 }
 0x12c   :  { %2414 = vmatprep.subr.bf16.mxu0 %v3487_v55  ;;  %v2072_v50 = vadd.f32 %v4656_v54, %v4643_v44  ;;  %v2465_v54 = vld [vmem:[%s4716_s3] sm:$0x3] }
 0x12f   :  { %2415 = vmatpush2.bf16.msra.mxu0 %v3485_v56 }
 0x130   :  { %2416 = vmatprep.subr.bf16.mxu0 %v3490_v57 }
 0x133   :  { %2417 = vmatpush2.bf16.msra.mxu0 %v3488_v58 }
 0x134   :  { %2418 = vmatprep.subr.bf16.mxu0 %v3493_v59 }
 0x137   :  { %2419 = vmatpush2.bf16.msra.mxu0 %v3491_v60 }
 0x138   :  { %2420 = vmatprep.subr.bf16.mxu0 %v3496_v61 }
 0x13b   :  { %2421 = vmatpush2.bf16.msra.mxu0 %v3494_v62 }
 0x13c   :  { %2422 = vmatprep.subr.bf16.mxu0 %v3499_v63 }
 0x13f   :  { %2423 = vmatpush2.bf16.msra.mxu0 %v3497_v0 }
 0x142   :  { %2425 = vmatmul.mubr.bf16.vlgmr.msra.gmra.mxu0 %v3500_v1  ;;  %v2108_v48 = vpop.f32.mrf.mxu0 }
 0x143   :  { %2434 = vmatprep.mubr.bf16.mxu0 %v3503_v2  ;;  %v2161_v56 = vpop.f32.mrf.mxu1  ;;  %v2109_v34 = vadd.f32 %v2108_v48, %v2056_v29 }
 0x144   :  { %v2110_v51 = vpop.f32.mrf.mxu0 }
 0x145   :  { %v2163_v58 = vpop.f32.mrf.mxu1  ;;  %v2111_v39 = vadd.f32 %v2110_v51, %v2058_v33  ;;  %v2162_v43 = vadd.f32 %v2161_v56, %v2109_v34 }
 0x146   :  { %v2112_v53 = vpop.f32.mrf.mxu0 }
 0x147   :  { %v2165_v60 = vpop.f32.mrf.mxu1  ;;  %v2113_v45 = vadd.f32 %v2112_v53, %v2060_v37  ;;  %v2164_v22 = vadd.f32 %v2163_v58, %v2111_v39  ;;  %v2070_v53 = vadd.f32 %v4654_v52, %v4629_v38 }
 0x148   :  { %v2114_v55 = vpop.f32.mrf.mxu0 }
 0x149   :  { %v2167_v62 = vpop.f32.mrf.mxu1  ;;  %v2166_v29 = vadd.f32 %v2165_v60, %v2113_v45 }
 0x14a   :  { %2435 = vmatmul.mubr.bf16.gmra.mxu0 %v3505_v3  ;;  %v2118_v57 = vpop.f32.mrf.mxu0 }
 0x14b   :  { %v2171_v0 = vpop.f32.mrf.mxu1  ;;  %v2119_v28 = vadd.f32 %v2118_v57, %v2066_v6 }
 0x14c   :  { %v2120_v59 = vpop.f32.mrf.mxu0 }
 0x14d   :  { %v2173_v2 = vpop.f32.mrf.mxu1  ;;  %v2121_v51 = vadd.f32 %v2120_v59, %v2068_v10  ;;  %v2172_v56 = vadd.f32 %v2171_v0, %v2119_v28  ;;  %v2445_v59 = vld [vmem:[%s4715_s2] sm:$0x3] }
 0x14e   :  { %v4658_v61 = vpop.f32.mrf.mxu0  ;;  %v2450_v44 = vrot.slane %v2445_v59, %v2449_v30 }
 0x14f   :  { %v4662_v4 = vpop.f32.mrf.mxu1  ;;  %v2123_v57 = vadd.f32 %v4658_v61, %v2070_v53  ;;  %v2174_v60 = vadd.f32 %v2173_v2, %v2121_v51 }
 0x150   :  { %v4660_v63 = vpop.f32.mrf.mxu0 }
 0x151   :  { %v4664_v7 = vpop.f32.mrf.mxu1  ;;  %v2125_v0 = vadd.f32 %v4660_v63, %v2072_v50  ;;  %v2176_v61 = vadd.f32 %v4662_v4, %v2123_v57 }
 0x182   :  { %v2214_v1 = vpop.f32.mrf.mxu0 }
 0x183   :  { %v2267_v9 = vpop.f32.mrf.mxu1 }
 0x184   :  { %v2216_v3 = vpop.f32.mrf.mxu0 }
 0x185   :  { %v2269_v12 = vpop.f32.mrf.mxu1 }
 0x186   :  { %v2218_v5 = vpop.f32.mrf.mxu0 }
 0x187   :  { %v2271_v14 = vpop.f32.mrf.mxu1  ;;  %v2219_v42 = vadd.f32 %v2218_v5, %v2166_v29 }
 0x188   :  { %v2220_v8 = vpop.f32.mrf.mxu0 }
 0x189   :  { %v2273_v17 = vpop.f32.mrf.mxu1 }
 0x18a   :  { %v2224_v11 = vpop.f32.mrf.mxu0 }
 0x18b   :  { %v4670_v19 = vpop.f32.mrf.mxu1  ;;  %v2225_v38 = vadd.f32 %v2224_v11, %v2172_v56 }
 0x18c   :  { %v2226_v13 = vpop.f32.mrf.mxu0 }
 0x18d   :  { %v4672_v23 = vpop.f32.mrf.mxu1  ;;  %v2227_v5 = vadd.f32 %v2226_v13, %v2174_v60  ;;  %v2278_v11 = vadd.f32 %v4670_v19, %v2225_v38  ;;  %v2178_v13 = vadd.f32 %v4664_v7, %v2125_v0 }
 0x18e   :  { %v4666_v16 = vpop.f32.mrf.mxu0 }
 0x18f   :  { %v4674_v26 = vpop.f32.mrf.mxu1 }
 0x190   :  { %v4668_v18 = vpop.f32.mrf.mxu0  ;;  %4721 = vst [vmem:[#allocation6_spill] sm:$0xff] %v4674_v26  ;;  %v2215_v26 = vadd.f32 %v2214_v1, %v2162_v43 }
 0x191   :  { %4720 = vst [vmem:[#allocation5_spill] sm:$0xff] %v4668_v18  ;;  %v4678_v31 = vpop.f32.mrf.mxu1  ;;  %v2217_v18 = vadd.f32 %v2216_v3, %v2164_v22  ;;  %v2272_v3 = vadd.f32 %v2271_v14, %v2219_v42 }
 0x192   :  { %4722 = vst [vmem:[#allocation7_spill] sm:$0xff] %v4678_v31  ;;  %v2115_v31 = vadd.f32 %v2114_v55, %v2062_v41  ;;  %v2268_v20 = vadd.f32 %v2267_v9, %v2215_v26 }
 0x193   :  { %v2270_v46 = vadd.f32 %v2269_v12, %v2217_v18 }
 0x194   :  { %v2168_v33 = vadd.f32 %v2167_v62, %v2115_v31  ;;  %v2453_v62 = vsub.s32 1, %v2448_v36  ;;  %v2470_v31 = vrot.slane %v2465_v54, %v2449_v30 }
 0x196   :  { %v2221_v55 = vadd.f32 %v2220_v8, %v2168_v33  ;;  %v2454_v26 = vrot.slane %v2445_v59, %v2453_v62  ;;  %v2474_v6 = vrot.slane %v2465_v54, %v2453_v62 }
 0x197   :  { %v4724_v7 = vld [vmem:[#allocation6_spill] sm:$0xff] }
 0x198   :  { %v2274_v9 = vadd.f32 %v2273_v17, %v2221_v55  ;;  %v2229_v17 = vadd.f32 %v4666_v16, %v2176_v61  ;;  %v4723_v43 = vld [vmem:[#allocation5_spill] sm:$0xff] }
 0x199   :  { %v2231_v45 = vadd.f32 %v4723_v43, %v2178_v13 }
 0x19a   :  { %v2282_v10 = vadd.f32 %v4724_v7, %v2229_v17 }
 0x1c2   :  { %v2320_v21 = vpop.f32.mrf.mxu0 }
 0x1c3   :  { %v2373_v35 = vpop.f32.mrf.mxu1  ;;  %v2321_v58 = vadd.f32 %v2320_v21, %v2268_v20 }
 0x1c4   :  { %v2322_v25 = vpop.f32.mrf.mxu0 }
 0x1c5   :  { %v2375_v47 = vpop.f32.mrf.mxu1  ;;  %v2323_v52 = vadd.f32 %v2322_v25, %v2270_v46  ;;  %v2374_v12 = vadd.f32 %v2373_v35, %v2321_v58 }
 0x1c6   :  { %v2324_v27 = vpop.f32.mrf.mxu0 }
 0x1c7   :  { %v2377_v15 = vpop.f32.mrf.mxu1  ;;  %v2325_v18 = vadd.f32 %v2324_v27, %v2272_v3  ;;  %v2376_v14 = vadd.f32 %v2375_v47, %v2323_v52  ;;  %v2280_v27 = vadd.f32 %v4672_v23, %v2227_v5 }
 0x1c8   :  { %v2326_v32 = vpop.f32.mrf.mxu0 }
 0x1c9   :  { %v2379_v1 = vpop.f32.mrf.mxu1  ;;  %v2327_v25 = vadd.f32 %v2326_v32, %v2274_v9  ;;  %v2378_v35 = vadd.f32 %v2377_v15, %v2325_v18 }
 0x1ca   :  { %v2330_v40 = vpop.f32.mrf.mxu0 }
 0x1cb   :  { %v2383_v21 = vpop.f32.mrf.mxu1  ;;  %v2331_v37 = vadd.f32 %v2330_v40, %v2278_v11  ;;  %v2380_v47 = vadd.f32 %v2379_v1, %v2327_v25  ;;  %v4725_v40 = vld [vmem:[#allocation7_spill] sm:$0xff] }
 0x1cc   :  { %v2332_v48 = vpop.f32.mrf.mxu0  ;;  %v2284_v51 = vadd.f32 %v4725_v40, %v2231_v45 }
 0x1cd   :  { %v2385_v39 = vpop.f32.mrf.mxu1  ;;  %v2333_v49 = vadd.f32 %v2332_v48, %v2280_v27  ;;  %v2384_v28 = vadd.f32 %v2383_v21, %v2331_v37 }
 0x1ce   :  { %v2334_v24 = vpop.f32.mrf.mxu0 }
 0x1cf   :  { %v2387_v23 = vpop.f32.mrf.mxu1  ;;  %v2335_v33 = vadd.f32 %v2334_v24, %v2282_v10  ;;  %v2386_v20 = vadd.f32 %v2385_v39, %v2333_v49 }
 0x1d0   :  { %v2336_v8 = vpop.f32.mrf.mxu0 }
 0x1d1   :  { %v2337_v55 = vadd.f32 %v2336_v8, %v2284_v51  ;;  %v2389_v1 = vpop.f32.mrf.mxu1  ;;  %v2388_v59 = vadd.f32 %v2387_v23, %v2335_v33 }
 0x1d3   :  { %v2390_v24 = vadd.f32 %v2389_v1, %v2337_v55 }
 0x202   :  { %v2426_v2 = vpop.f32.mrf.mxu0 }
 0x203   :  { %v2427_v63 = vadd.f32 %v2426_v2, %v2374_v12 }
 0x204   :  { %v2428_v34 = vpop.f32.mrf.mxu0 }
 0x205   :  { %v2457_v41 = vmul.f32 %v2450_v44, %v2427_v63  ;;  %v2429_v4 = vadd.f32 %v2428_v34, %v2376_v14 }
 0x206   :  { %v2430_v19 = vpop.f32.mrf.mxu0 }
 0x207   :  { %v2458_v32 = vmul.f32 %v2454_v26, %v2429_v4  ;;  %v2431_v22 = vadd.f32 %v2430_v19, %v2378_v35  ;;  %v2477_v29 = vadd.f32 %v2470_v31, %v2457_v41 }
 0x208   :  { %v2432_v16 = vpop.f32.mrf.mxu0 }
 0x209   :  { %v2459_v36 = vmul.f32 %v2450_v44, %v2431_v22  ;;  %v2433_v15 = vadd.f32 %v2432_v16, %v2380_v47  ;;  %v2478_v53 = vadd.f32 %v2474_v6, %v2458_v32  ;;  %v2485_v30 = vmax.f32 %v2477_v29, 0.0 }
 0x20a   :  { %v2436_v42 = vpop.f32.mrf.mxu0 }
 0x20b   :  { %v2479_v48 = vadd.f32 %v2470_v31, %v2459_v36  ;;  %v2460_v56 = vmul.f32 %v2454_v26, %v2433_v15  ;;  %v2437_v46 = vadd.f32 %v2436_v42, %v2384_v28  ;;  %v2486_v38 = vmax.f32 %v2478_v53, 0.0 }
 0x20c   :  { %v2438_v58 = vpop.f32.mrf.mxu0 }
 0x20d   :  { %v2487_v50 = vmax.f32 %v2479_v48, 0.0  ;;  %v2480_v57 = vadd.f32 %v2474_v6, %v2460_v56  ;;  %v2439_v60 = vadd.f32 %v2438_v58, %v2386_v20  ;;  %v2461_v62 = vmul.f32 %v2450_v44, %v2437_v46  ;;  %v2983_v46 = vld [vmem:[%s4718_s5] ss:$0 sm:$0xff] }
 0x20e   :  { %v2440_v3 = vpop.f32.mrf.mxu0 }
 0x20f   :  { %v2493_v52 = vadd.f32 %v2487_v50, %v2485_v30  ;;  %v2488_v0 = vmax.f32 %v2480_v57, 0.0  ;;  %v2462_v5 = vmul.f32 %v2454_v26, %v2439_v60  ;;  %v2441_v9 = vadd.f32 %v2440_v3, %v2388_v59 }
 0x210   :  { %v2442_v12 = vpop.f32.mrf.mxu0  ;;  %v2481_v54 = vadd.f32 %v2470_v31, %v2461_v62 }
 0x211   :  { %v2494_v18 = vrot.slane %v2493_v52, 4  ;;  %v2500_v21 = vadd.f32 %v2488_v0, %v2486_v38  ;;  %v2463_v8 = vmul.f32 %v2450_v44, %v2441_v9  ;;  %v2443_v61 = vadd.f32 %v2442_v12, %v2390_v24 }
 0x212   :  { %v2482_v11 = vadd.f32 %v2474_v6, %v2462_v5  ;;  %v2489_v17 = vmax.f32 %v2481_v54, 0.0 }
 0x213   :  { %v2501_v2 = vrot.slane %v2500_v21, 4  ;;  %v2483_v14 = vadd.f32 %v2470_v31, %v2463_v8  ;;  %v2464_v25 = vmul.f32 %v2454_v26, %v2443_v61  ;;  %v2495_v63 = vadd.f32 %v2494_v18, %v2493_v52 }
 0x214   :  { %v2490_v35 = vmax.f32 %v2482_v11, 0.0 }
 0x215   :  { %v2502_v13 = vadd.f32 %v2501_v2, %v2500_v21  ;;  %v2491_v27 = vmax.f32 %v2483_v14, 0.0  ;;  %v2484_v34 = vadd.f32 %v2474_v6, %v2464_v25  ;;  %v2496_v4 = vrot.slane %v2495_v63, 2 }
 0x217   :  { %v2507_v37 = vadd.f32 %v2491_v27, %v2489_v17  ;;  %v2492_v39 = vmax.f32 %v2484_v34, 0.0  ;;  %v2503_v41 = vrot.slane %v2502_v13, 2  ;;  %v2497_v47 = vadd.f32 %v2496_v4, %v2495_v63 }
 0x219   :  { %v2508_v43 = vrot.slane %v2507_v37, 4  ;;  %v2514_v45 = vadd.f32 %v2492_v39, %v2490_v35  ;;  %v2504_v44 = vadd.f32 %v2503_v41, %v2502_v13  ;;  %v2498_v10 = vrot.slane %v2497_v47, 1 }
 0x21b   :  { %v2509_v49 = vadd.f32 %v2508_v43, %v2507_v37  ;;  %v2515_v19 = vrot.slane %v2514_v45, 4  ;;  %v2505_v26 = vrot.slane %v2504_v44, 1  ;;  %v2499_v36 = vadd.f32 %v2498_v10, %v2497_v47 }
 0x21d   :  { %v2510_v32 = vrot.slane %v2509_v49, 2  ;;  %v2516_v22 = vadd.f32 %v2515_v19, %v2514_v45  ;;  %v2506_v6 = vadd.f32 %v2505_v26, %v2504_v44  ;;  %v2522_v20 = vmul.f32 0.0625, %v2499_v36 }
 0x21f   :  { %v2511_v31 = vadd.f32 %v2510_v32, %v2509_v49  ;;  %v2517_v7 = vrot.slane %v2516_v22, 2  ;;  %v2523_v51 = vmul.f32 0.0625, %v2506_v6 }
 0x221   :  { %v2518_v16 = vadd.f32 %v2517_v7, %v2516_v22  ;;  %v2512_v28 = vrot.slane %v2511_v31, 1 }
 0x223   :  { %v2519_v23 = vrot.slane %v2518_v16, 1  ;;  %v2513_v29 = vadd.f32 %v2512_v28, %v2511_v31 }
 0x225   :  { %v2520_v15 = vadd.f32 %v2519_v23, %v2518_v16  ;;  %v2524_v40 = vmul.f32 0.0625, %v2513_v29 }
 0x227   :  { %v2525_v33 = vmul.f32 0.0625, %v2520_v15  ;;  %v2570_v53 = vsel %vm2569_vm0, %v2524_v40, %v2522_v20 }
 0x229   :  { %v2571_v42 = vsel %vm2569_vm0, %v2525_v33, %v2523_v51 }
 0x22a   :  { %2638 = vmatprep.mubr.f32.mxu1 %v2571_v42 }
 0x22b   :  { %2639 = vmatmul.mubr.f32.vlgmr.msra.gmra.mxu1 %v2570_v53 }
 0x2eb   :  { %v3016_v48 = vpop.f32.mrf.mxu1 }
 0x2ed   :  { %v3017_v56 = vpop.f32.mrf.mxu1 }
 0x2ee   :  { %v3018_v55 = vadd.f32 %v3017_v56, %v3016_v48 }
 0x2f0   :  { %v2641_v58 = vadd.f32 %v3018_v55, %v2983_v46 }
 0x2f2   :  { %2644 = vst [vmem:[#allocation2] sm:$0x3] %v2641_v58 }
 0x2f3   :  { %3517 = shalt.err (!%p3514_p4)
}
 0x2f4   :  { %2654 = dma.vmem_to_hbm [thread:$0]  %s2652_s11, 32, %s4719_s6, [#allocation3]  }
 0x2f5   :  { %3526 = dma.done.wait [#allocation3], 32  }
 0x2f6   :  { %3527 = vsyncadd [#allocation3], 4294967264 }
 0x2f7   :  { %2658 = vsyncpa [#allocation3], 1 }

</bundles_post_ra>
